<compile_context>
chip_gen: v7x
topology: tpu7x:2x2x1
jax: 0.10.0
libtpu: 0.0.40
codegen_flags: <defaults>
</compile_context>

<pallas_src>
import functools

import jax
import jax.numpy as jnp
from jax.experimental import pallas as pl
from jax.experimental.pallas import tpu as pltpu

# ---------------- configuration (small, structure-preserving) ---------------
B = 2
C_IN = 3
IMG = 96                          # AlexNet stride/pool stack needs >= ~63
CH = (16, 32, 64, 64, 64)         # scaled-down AlexNet (64, 192, 384, 256, 256)
EMB = 32                          # args['audio_model']['embedding_dim'] (scaled)

_VMEM_SPEC = pl.BlockSpec(memory_space=pltpu.MemorySpace.VMEM)


# --------------------- kernel 1: conv-as-GEMM (+bias, +ReLU) ----------------
def _gemm_bias_kernel(x_ref, w_ref, b_ref, o_ref, *, relu):
    y = jnp.dot(x_ref[...], w_ref[...], preferred_element_type=jnp.float32)
    y = y + b_ref[...]
    if relu:
        y = jnp.maximum(y, 0.0)
    o_ref[...] = y


def _im2col(x, k, stride, pad):
    # x: (B, H, W, C) NHWC -> rows: (B*Ho*Wo, k*k*C), row layout (kh, kw, c)
    bsz, H, W, C = x.shape
    xp = jnp.pad(x, ((0, 0), (pad, pad), (pad, pad), (0, 0)))
    Ho = (H + 2 * pad - k) // stride + 1
    Wo = (W + 2 * pad - k) // stride + 1
    i_idx = (jnp.arange(Ho) * stride)[:, None] + jnp.arange(k)[None, :]   # (Ho,k)
    j_idx = (jnp.arange(Wo) * stride)[:, None] + jnp.arange(k)[None, :]   # (Wo,k)
    patches = xp[:, i_idx[:, None, :, None], j_idx[None, :, None, :], :]  # (B,Ho,Wo,k,k,C)
    rows = patches.reshape(bsz * Ho * Wo, k * k * C)
    return rows, Ho, Wo


def conv2d(x, w, b, *, stride, pad, relu):
    # x: (B,H,W,Cin) NHWC ; w: PyTorch layout (Cout,Cin,k,k) ; b: (Cout,)
    bsz = x.shape[0]
    cout, cin, k, _ = w.shape
    rows, Ho, Wo = _im2col(x, k, stride, pad)
    wmat = jnp.transpose(w, (2, 3, 1, 0)).reshape(k * k * cin, cout)

    # zero-pad contraction dim to a multiple of 128 (lane-aligned MXU feed;
    # removes any reliance on tile-padding contents).
    kk = k * k * cin
    kp = ((kk + 127) // 128) * 128
    if kp != kk:
        rows = jnp.pad(rows, ((0, 0), (0, kp - kk)))
        wmat = jnp.pad(wmat, ((0, kp - kk), (0, 0)))

    n = rows.shape[0]
    out = pl.pallas_call(
        functools.partial(_gemm_bias_kernel, relu=relu),
        out_shape=jax.ShapeDtypeStruct((n, cout), jnp.float32),
        in_specs=[_VMEM_SPEC, _VMEM_SPEC, _VMEM_SPEC],
        out_specs=_VMEM_SPEC,
    )(rows, wmat, b.reshape(1, cout))
    return out.reshape(bsz, Ho, Wo, cout)


# --------------------------- kernel 2: max-pool 3x3/2 ------------------------
def _window_max_kernel(p_ref, o_ref):
    o_ref[...] = jnp.max(p_ref[...], axis=0)


def maxpool3x2(x):
    # x: (B, H, W, C) -> (B, Ho, Wo, C), kernel 3, stride 2, no padding
    bsz, H, W, C = x.shape
    k, s = 3, 2
    Ho = (H - k) // s + 1
    Wo = (W - k) // s + 1
    i_idx = (jnp.arange(Ho) * s)[:, None] + jnp.arange(k)[None, :]
    j_idx = (jnp.arange(Wo) * s)[:, None] + jnp.arange(k)[None, :]
    patches = x[:, i_idx[:, None, :, None], j_idx[None, :, None, :], :]   # (B,Ho,Wo,3,3,C)
    patches = patches.reshape(bsz * Ho * Wo, k * k, C)
    patches = jnp.transpose(patches, (1, 0, 2))                           # (9, Npix, C)
    n = bsz * Ho * Wo
    out = pl.pallas_call(
        _window_max_kernel,
        out_shape=jax.ShapeDtypeStruct((n, C), jnp.float32),
        in_specs=[_VMEM_SPEC],
        out_specs=_VMEM_SPEC,
    )(patches)
    return out.reshape(bsz, Ho, Wo, C)


# ----------------------------------- model ----------------------------------
def init_params(key):
    # TODO(synk): pretrained AlexNet weights (torch.utils.model_zoo) cannot be
    # loaded in a self-contained script; layers are randomly initialized with
    # identical structure instead.
    keys = jax.random.split(key, 12)
    it = iter(keys)

    def conv_p(cin, cout, k, scale=0.1):
        w = scale * jax.random.normal(next(it), (cout, cin, k, k), dtype=jnp.float32)
        b = scale * jax.random.normal(next(it), (cout,), dtype=jnp.float32)
        return w, b

    p = {}
    p["w1"], p["b1"] = conv_p(C_IN, CH[0], 11)   # Conv2d(3, 64, 11, 4, 2)
    p["w2"], p["b2"] = conv_p(CH[0], CH[1], 5)   # Conv2d(64, 192, 5, 1, 2)
    p["w3"], p["b3"] = conv_p(CH[1], CH[2], 3)   # Conv2d(192, 384, 3, 1, 1)
    p["w4"], p["b4"] = conv_p(CH[2], CH[3], 3)   # Conv2d(384, 256, 3, 1, 1)
    p["w5"], p["b5"] = conv_p(CH[3], CH[4], 3)   # Conv2d(256, 256, 3, 1, 1)
    p["w6"], p["b6"] = conv_p(CH[4], EMB, 3)     # appended Conv2d(256, emb, 3, 1, 1)
    return p


def forward(x_nchw, p):
    # x_nchw: (B, 3, H, W) -- same NCHW layout as the PyTorch module input
    x = jnp.transpose(x_nchw, (0, 2, 3, 1))                      # NHWC (lane-dense C)
    x = conv2d(x, p["w1"], p["b1"], stride=4, pad=2, relu=True)  # conv1 + ReLU
    x = maxpool3x2(x)                                            # MaxPool2d(3, 2)
    x = conv2d(x, p["w2"], p["b2"], stride=1, pad=2, relu=True)  # conv2 + ReLU
    x = maxpool3x2(x)
    x = conv2d(x, p["w3"], p["b3"], stride=1, pad=1, relu=True)  # conv3 + ReLU
    x = conv2d(x, p["w4"], p["b4"], stride=1, pad=1, relu=True)  # conv4 + ReLU
    x = conv2d(x, p["w5"], p["b5"], stride=1, pad=1, relu=True)  # conv5 + ReLU
    x = maxpool3x2(x)
    x = conv2d(x, p["w6"], p["b6"], stride=1, pad=1, relu=False) # embedding conv (no ReLU)
    # x: (B, Ho, Wo, EMB) -> PyTorch x.view(B, C, H*W)
    x = jnp.transpose(x, (0, 3, 1, 2))
    bsz, c, ho, wo = x.shape
    return x.reshape(bsz, c, ho * wo)


if __name__ == "__main__":
    key = jax.random.PRNGKey(0)
    pkey, xkey = jax.random.split(key)
    params = init_params(pkey)
    x = jax.random.normal(xkey, (B, C_IN, IMG, IMG), dtype=jnp.float32)

    out = jax.jit(forward)(x, params)
    jax.block_until_ready(out)

    # spatial trace for IMG=96: 96 ->23 ->11 ->11 ->5 ->5 ->5 ->5 ->2 ->2
    assert out.shape == (B, EMB, 2 * 2), out.shape
    assert bool(jnp.all(jnp.isfinite(out)))
    print("KERNEL_OK")
</pallas_src>

<mosaic_0001>
module attributes {stable_mosaic.version = 11 : i64} {
  func.func @_gemm_bias_kernel(%arg0: memref<1058x384xf32, #tpu.memory_space<vmem>>, %arg1: memref<384x16xf32, #tpu.memory_space<vmem>>, %arg2: memref<1x16xf32, #tpu.memory_space<vmem>>, %arg3: memref<1058x16xf32, #tpu.memory_space<vmem>>) attributes {dimension_semantics = [], scalar_prefetch = 0 : i64, scratch_operands = 0 : i64, tpu.core_type = #tpu.core_type<tc>} {
    %c0 = arith.constant 0 : index
    %c0_0 = arith.constant 0 : index
    %0 = vector.load %arg0[%c0, %c0_0] : memref<1058x384xf32, #tpu.memory_space<vmem>>, vector<1058x384xf32>
    %c0_1 = arith.constant 0 : index
    %c0_2 = arith.constant 0 : index
    %1 = vector.load %arg1[%c0_1, %c0_2] : memref<384x16xf32, #tpu.memory_space<vmem>>, vector<384x16xf32>
    %cst = arith.constant dense<0.000000e+00> : vector<1058x16xf32>
    %2 = tpu.matmul %0, %1, %cst {dimension_numbers = #tpu.dot_dimension_numbers<[1], [0], [0], [1], [0, 0, 1, 1], [], []>} : vector<1058x384xf32>, vector<384x16xf32>, vector<1058x16xf32> -> vector<1058x16xf32>
    %c0_3 = arith.constant 0 : index
    %c0_4 = arith.constant 0 : index
    %3 = vector.load %arg2[%c0_3, %c0_4] : memref<1x16xf32, #tpu.memory_space<vmem>>, vector<1x16xf32>
    %4 = vector.broadcast %3 : vector<1x16xf32> to vector<1058x16xf32>
    %5 = arith.addf %2, %4 : vector<1058x16xf32>
    %cst_5 = arith.constant 0.000000e+00 : f32
    %6 = vector.broadcast %cst_5 : f32 to vector<1058x16xf32>
    %7 = arith.maximumf %5, %6 : vector<1058x16xf32>
    %c0_6 = arith.constant 0 : index
    %c0_7 = arith.constant 0 : index
    %8 = vector.load %arg3[%c0_6, %c0_7] : memref<1058x16xf32, #tpu.memory_space<vmem>>, vector<1058x16xf32>
    tpu.vector_store %arg3[%c0_6, %c0_7], %7 {strides = array<i32>} : memref<1058x16xf32, #tpu.memory_space<vmem>>, vector<1058x16xf32>,
    return
  }
}

module attributes {stable_mosaic.version = 11 : i64} {
  func.func @_window_max_kernel(%arg0: memref<9x242x16xf32, #tpu.memory_space<vmem>>, %arg1: memref<242x16xf32, #tpu.memory_space<vmem>>) attributes {dimension_semantics = [], scalar_prefetch = 0 : i64, scratch_operands = 0 : i64, tpu.core_type = #tpu.core_type<tc>} {
    %c0 = arith.constant 0 : index
    %c0_0 = arith.constant 0 : index
    %c0_1 = arith.constant 0 : index
    %0 = vector.load %arg0[%c0, %c0_0, %c0_1] : memref<9x242x16xf32, #tpu.memory_space<vmem>>, vector<9x242x16xf32>
    %cst = arith.constant dense<0xFF800000> : vector<242x16xf32>
    %1 = vector.multi_reduction <maximumf>, %0, %cst [0] : vector<9x242x16xf32> to vector<242x16xf32>
    %c0_2 = arith.constant 0 : index
    %c0_3 = arith.constant 0 : index
    %2 = vector.load %arg1[%c0_2, %c0_3] : memref<242x16xf32, #tpu.memory_space<vmem>>, vector<242x16xf32>
    tpu.vector_store %arg1[%c0_2, %c0_3], %1 {strides = array<i32>} : memref<242x16xf32, #tpu.memory_space<vmem>>, vector<242x16xf32>,
    return
  }
}

module attributes {stable_mosaic.version = 11 : i64} {
  func.func @_gemm_bias_kernel(%arg0: memref<242x512xf32, #tpu.memory_space<vmem>>, %arg1: memref<512x32xf32, #tpu.memory_space<vmem>>, %arg2: memref<1x32xf32, #tpu.memory_space<vmem>>, %arg3: memref<242x32xf32, #tpu.memory_space<vmem>>) attributes {dimension_semantics = [], scalar_prefetch = 0 : i64, scratch_operands = 0 : i64, tpu.core_type = #tpu.core_type<tc>} {
    %c0 = arith.constant 0 : index
    %c0_0 = arith.constant 0 : index
    %0 = vector.load %arg0[%c0, %c0_0] : memref<242x512xf32, #tpu.memory_space<vmem>>, vector<242x512xf32>
    %c0_1 = arith.constant 0 : index
    %c0_2 = arith.constant 0 : index
    %1 = vector.load %arg1[%c0_1, %c0_2] : memref<512x32xf32, #tpu.memory_space<vmem>>, vector<512x32xf32>
    %cst = arith.constant dense<0.000000e+00> : vector<242x32xf32>
    %2 = tpu.matmul %0, %1, %cst {dimension_numbers = #tpu.dot_dimension_numbers<[1], [0], [0], [1], [0, 0, 1, 1], [], []>} : vector<242x512xf32>, vector<512x32xf32>, vector<242x32xf32> -> vector<242x32xf32>
    %c0_3 = arith.constant 0 : index
    %c0_4 = arith.constant 0 : index
    %3 = vector.load %arg2[%c0_3, %c0_4] : memref<1x32xf32, #tpu.memory_space<vmem>>, vector<1x32xf32>
    %4 = vector.broadcast %3 : vector<1x32xf32> to vector<242x32xf32>
    %5 = arith.addf %2, %4 : vector<242x32xf32>
    %cst_5 = arith.constant 0.000000e+00 : f32
    %6 = vector.broadcast %cst_5 : f32 to vector<242x32xf32>
    %7 = arith.maximumf %5, %6 : vector<242x32xf32>
    %c0_6 = arith.constant 0 : index
    %c0_7 = arith.constant 0 : index
    %8 = vector.load %arg3[%c0_6, %c0_7] : memref<242x32xf32, #tpu.memory_space<vmem>>, vector<242x32xf32>
    tpu.vector_store %arg3[%c0_6, %c0_7], %7 {strides = array<i32>} : memref<242x32xf32, #tpu.memory_space<vmem>>, vector<242x32xf32>,
    return
  }
}

module attributes {stable_mosaic.version = 11 : i64} {
  func.func @_window_max_kernel(%arg0: memref<9x50x32xf32, #tpu.memory_space<vmem>>, %arg1: memref<50x32xf32, #tpu.memory_space<vmem>>) attributes {dimension_semantics = [], scalar_prefetch = 0 : i64, scratch_operands = 0 : i64, tpu.core_type = #tpu.core_type<tc>} {
    %c0 = arith.constant 0 : index
    %c0_0 = arith.constant 0 : index
    %c0_1 = arith.constant 0 : index
    %0 = vector.load %arg0[%c0, %c0_0, %c0_1] : memref<9x50x32xf32, #tpu.memory_space<vmem>>, vector<9x50x32xf32>
    %cst = arith.constant dense<0xFF800000> : vector<50x32xf32>
    %1 = vector.multi_reduction <maximumf>, %0, %cst [0] : vector<9x50x32xf32> to vector<50x32xf32>
    %c0_2 = arith.constant 0 : index
    %c0_3 = arith.constant 0 : index
    %2 = vector.load %arg1[%c0_2, %c0_3] : memref<50x32xf32, #tpu.memory_space<vmem>>, vector<50x32xf32>
    tpu.vector_store %arg1[%c0_2, %c0_3], %1 {strides = array<i32>} : memref<50x32xf32, #tpu.memory_space<vmem>>, vector<50x32xf32>,
    return
  }
}

module attributes {stable_mosaic.version = 11 : i64} {
  func.func @_gemm_bias_kernel(%arg0: memref<50x384xf32, #tpu.memory_space<vmem>>, %arg1: memref<384x64xf32, #tpu.memory_space<vmem>>, %arg2: memref<1x64xf32, #tpu.memory_space<vmem>>, %arg3: memref<50x64xf32, #tpu.memory_space<vmem>>) attributes {dimension_semantics = [], scalar_prefetch = 0 : i64, scratch_operands = 0 : i64, tpu.core_type = #tpu.core_type<tc>} {
    %c0 = arith.constant 0 : index
    %c0_0 = arith.constant 0 : index
    %0 = vector.load %arg0[%c0, %c0_0] : memref<50x384xf32, #tpu.memory_space<vmem>>, vector<50x384xf32>
    %c0_1 = arith.constant 0 : index
    %c0_2 = arith.constant 0 : index
    %1 = vector.load %arg1[%c0_1, %c0_2] : memref<384x64xf32, #tpu.memory_space<vmem>>, vector<384x64xf32>
    %cst = arith.constant dense<0.000000e+00> : vector<50x64xf32>
    %2 = tpu.matmul %0, %1, %cst {dimension_numbers = #tpu.dot_dimension_numbers<[1], [0], [0], [1], [0, 0, 1, 1], [], []>} : vector<50x384xf32>, vector<384x64xf32>, vector<50x64xf32> -> vector<50x64xf32>
    %c0_3 = arith.constant 0 : index
    %c0_4 = arith.constant 0 : index
    %3 = vector.load %arg2[%c0_3, %c0_4] : memref<1x64xf32, #tpu.memory_space<vmem>>, vector<1x64xf32>
    %4 = vector.broadcast %3 : vector<1x64xf32> to vector<50x64xf32>
    %5 = arith.addf %2, %4 : vector<50x64xf32>
    %cst_5 = arith.constant 0.000000e+00 : f32
    %6 = vector.broadcast %cst_5 : f32 to vector<50x64xf32>
    %7 = arith.maximumf %5, %6 : vector<50x64xf32>
    %c0_6 = arith.constant 0 : index
    %c0_7 = arith.constant 0 : index
    %8 = vector.load %arg3[%c0_6, %c0_7] : memref<50x64xf32, #tpu.memory_space<vmem>>, vector<50x64xf32>
    tpu.vector_store %arg3[%c0_6, %c0_7], %7 {strides = array<i32>} : memref<50x64xf32, #tpu.memory_space<vmem>>, vector<50x64xf32>,
    return
  }
}

module attributes {stable_mosaic.version = 11 : i64} {
  func.func @_gemm_bias_kernel(%arg0: memref<50x640xf32, #tpu.memory_space<vmem>>, %arg1: memref<640x64xf32, #tpu.memory_space<vmem>>, %arg2: memref<1x64xf32, #tpu.memory_space<vmem>>, %arg3: memref<50x64xf32, #tpu.memory_space<vmem>>) attributes {dimension_semantics = [], scalar_prefetch = 0 : i64, scratch_operands = 0 : i64, tpu.core_type = #tpu.core_type<tc>} {
    %c0 = arith.constant 0 : index
    %c0_0 = arith.constant 0 : index
    %0 = vector.load %arg0[%c0, %c0_0] : memref<50x640xf32, #tpu.memory_space<vmem>>, vector<50x640xf32>
    %c0_1 = arith.constant 0 : index
    %c0_2 = arith.constant 0 : index
    %1 = vector.load %arg1[%c0_1, %c0_2] : memref<640x64xf32, #tpu.memory_space<vmem>>, vector<640x64xf32>
    %cst = arith.constant dense<0.000000e+00> : vector<50x64xf32>
    %2 = tpu.matmul %0, %1, %cst {dimension_numbers = #tpu.dot_dimension_numbers<[1], [0], [0], [1], [0, 0, 1, 1], [], []>} : vector<50x640xf32>, vector<640x64xf32>, vector<50x64xf32> -> vector<50x64xf32>
    %c0_3 = arith.constant 0 : index
    %c0_4 = arith.constant 0 : index
    %3 = vector.load %arg2[%c0_3, %c0_4] : memref<1x64xf32, #tpu.memory_space<vmem>>, vector<1x64xf32>
    %4 = vector.broadcast %3 : vector<1x64xf32> to vector<50x64xf32>
    %5 = arith.addf %2, %4 : vector<50x64xf32>
    %cst_5 = arith.constant 0.000000e+00 : f32
    %6 = vector.broadcast %cst_5 : f32 to vector<50x64xf32>
    %7 = arith.maximumf %5, %6 : vector<50x64xf32>
    %c0_6 = arith.constant 0 : index
    %c0_7 = arith.constant 0 : index
    %8 = vector.load %arg3[%c0_6, %c0_7] : memref<50x64xf32, #tpu.memory_space<vmem>>, vector<50x64xf32>
    tpu.vector_store %arg3[%c0_6, %c0_7], %7 {strides = array<i32>} : memref<50x64xf32, #tpu.memory_space<vmem>>, vector<50x64xf32>,
    return
  }
}

module attributes {stable_mosaic.version = 11 : i64} {
  func.func @_window_max_kernel(%arg0: memref<9x8x64xf32, #tpu.memory_space<vmem>>, %arg1: memref<8x64xf32, #tpu.memory_space<vmem>>) attributes {dimension_semantics = [], scalar_prefetch = 0 : i64, scratch_operands = 0 : i64, tpu.core_type = #tpu.core_type<tc>} {
    %c0 = arith.constant 0 : index
    %c0_0 = arith.constant 0 : index
    %c0_1 = arith.constant 0 : index
    %0 = vector.load %arg0[%c0, %c0_0, %c0_1] : memref<9x8x64xf32, #tpu.memory_space<vmem>>, vector<9x8x64xf32>
    %cst = arith.constant dense<0xFF800000> : vector<8x64xf32>
    %1 = vector.multi_reduction <maximumf>, %0, %cst [0] : vector<9x8x64xf32> to vector<8x64xf32>
    %c0_2 = arith.constant 0 : index
    %c0_3 = arith.constant 0 : index
    %2 = vector.load %arg1[%c0_2, %c0_3] : memref<8x64xf32, #tpu.memory_space<vmem>>, vector<8x64xf32>
    tpu.vector_store %arg1[%c0_2, %c0_3], %1 {strides = array<i32>} : memref<8x64xf32, #tpu.memory_space<vmem>>, vector<8x64xf32>,
    return
  }
}

module attributes {stable_mosaic.version = 11 : i64} {
  func.func @_gemm_bias_kernel(%arg0: memref<8x640xf32, #tpu.memory_space<vmem>>, %arg1: memref<640x32xf32, #tpu.memory_space<vmem>>, %arg2: memref<1x32xf32, #tpu.memory_space<vmem>>, %arg3: memref<8x32xf32, #tpu.memory_space<vmem>>) attributes {dimension_semantics = [], scalar_prefetch = 0 : i64, scratch_operands = 0 : i64, tpu.core_type = #tpu.core_type<tc>} {
    %c0 = arith.constant 0 : index
    %c0_0 = arith.constant 0 : index
    %0 = vector.load %arg0[%c0, %c0_0] : memref<8x640xf32, #tpu.memory_space<vmem>>, vector<8x640xf32>
    %c0_1 = arith.constant 0 : index
    %c0_2 = arith.constant 0 : index
    %1 = vector.load %arg1[%c0_1, %c0_2] : memref<640x32xf32, #tpu.memory_space<vmem>>, vector<640x32xf32>
    %cst = arith.constant dense<0.000000e+00> : vector<8x32xf32>
    %2 = tpu.matmul %0, %1, %cst {dimension_numbers = #tpu.dot_dimension_numbers<[1], [0], [0], [1], [0, 0, 1, 1], [], []>} : vector<8x640xf32>, vector<640x32xf32>, vector<8x32xf32> -> vector<8x32xf32>
    %c0_3 = arith.constant 0 : index
    %c0_4 = arith.constant 0 : index
    %3 = vector.load %arg2[%c0_3, %c0_4] : memref<1x32xf32, #tpu.memory_space<vmem>>, vector<1x32xf32>
    %4 = vector.broadcast %3 : vector<1x32xf32> to vector<8x32xf32>
    %5 = arith.addf %2, %4 : vector<8x32xf32>
    %c0_5 = arith.constant 0 : index
    %c0_6 = arith.constant 0 : index
    %6 = vector.load %arg3[%c0_5, %c0_6] : memref<8x32xf32, #tpu.memory_space<vmem>>, vector<8x32xf32>
    tpu.vector_store %arg3[%c0_5, %c0_6], %5 {strides = array<i32>} : memref<8x32xf32, #tpu.memory_space<vmem>>, vector<8x32xf32>,
    return
  }
}

</mosaic_0001>

<bundles_post_ra>
// kernel: forward.9
= control target key start
LH: loop header
LB: loop body
LE: loop exit
PB: predicated region body
PF: predicated region fallthrough
CT: control target
= control target key end

     0   :  { %v3125_v0 = vmov 0.0|0.0   ;;  %vm3126_vm0 = vmmov 0   ;;  %v3127_v6 = vmov 0.0   ;;  %vm2061_vm1 = vcmask 130048   ;;  %s5710_s1 = inlined_call_operand.vmem [shape: f32[384,16], index: 1, kind: input, shape index: {}]   ;;  %s5711_s0 = inlined_call_operand.vmem [shape: f32[1058,384], index: 0, kind: input, shape index: {}]   ;;  %s5712_s2 = inlined_call_operand.vmem [shape: f32[1,16], index: 2, kind: input, shape index: {}]   ;;  %s5713_s3 = inlined_call_operand.vmem [shape: f32[1058,16], index: 3, kind: output, shape index: {}]  }
   0x1   :  { %2781 = vmatprep.subr.bf16.mxu1 %v3125_v0  ;;  %v413_v1 = vld [vmem:[%s5710_s1] sm:$0xff]  ;;  %v414_v2 = vld [vmem:[%s5710_s1 + $0x8] sm:$0xff]  ;;  %v415_v3 = vld [vmem:[%s5710_s1 + $0x10] sm:$0xff]  ;;  %2829 = vmatprep.subr.bf16.mxu0 %v3125_v0  ;;  %vm2194_vm2 = vcmask 123904  }
   0x2   :  { %v2782_v4 = vpack.c.bf16 %v414_v2, %v413_v1  ;;  %v416_v5 = vld [vmem:[%s5710_s1 + $0x18] sm:$0xff]  ;;  %2382 = vmatprep.mubr.msk.f32.mxu0 %vm3126_vm0, %v3127_v6  ;;  %v417_v8 = vld [vmem:[%s5710_s1 + $0x20] sm:$0xff]  ;;  %v418_v9 = vld [vmem:[%s5710_s1 + $0x28] sm:$0xff] }
   0x3   :  { %v2785_v7 = vpack.c.bf16 %v416_v5, %v415_v3  ;;  %v445_v10 = vld [vmem:[%s5710_s1 + $0x100] sm:$0xff]  ;;  %v446_v11 = vld [vmem:[%s5710_s1 + $0x108] sm:$0xff]  ;;  %v2788_v12 = vpack.c.bf16 %v418_v9, %v417_v8  ;;  %v447_v14 = vld [vmem:[%s5710_s1 + $0x110] sm:$0xff] }
   0x4   :  { %2783 = vmatpush1.bf16.msra.mxu1 %v2782_v4  ;;  %v2830_v13 = vpack.c.bf16 %v446_v11, %v445_v10  ;;  %v448_v15 = vld [vmem:[%s5710_s1 + $0x118] sm:$0xff]  ;;  %v419_v16 = vld [vmem:[%s5710_s1 + $0x30] sm:$0xff]  ;;  %v449_v19 = vld [vmem:[%s5710_s1 + $0x120] sm:$0xff] }
   0x5   :  { %2784 = vmatprep.subr.bf16.mxu1 %v3125_v0  ;;  %v420_v17 = vld [vmem:[%s5710_s1 + $0x38] sm:$0xff]  ;;  %v2833_v18 = vpack.c.bf16 %v448_v15, %v447_v14  ;;  %v450_v20 = vld [vmem:[%s5710_s1 + $0x128] sm:$0xff]  ;;  %v421_v22 = vld [vmem:[%s5710_s1 + $0x40] sm:$0xff] }
   0x6   :  { %2831 = vmatpush3.bf16.msra.mxu0 %v2830_v13  ;;  %v2791_v21 = vpack.c.bf16 %v420_v17, %v419_v16  ;;  %v422_v23 = vld [vmem:[%s5710_s1 + $0x48] sm:$0xff]  ;;  %v2836_v24 = vpack.c.bf16 %v450_v20, %v449_v19  ;;  %v451_v25 = vld [vmem:[%s5710_s1 + $0x130] sm:$0xff]  ;;  %v452_v26 = vld [vmem:[%s5710_s1 + $0x138] sm:$0xff] }
   0x7   :  { %2832 = vmatprep.subr.bf16.mxu0 %v3125_v0  ;;  %v2794_v27 = vpack.c.bf16 %v422_v23, %v421_v22  ;;  %v423_v28 = vld [vmem:[%s5710_s1 + $0x50] sm:$0xff]  ;;  %v424_v29 = vld [vmem:[%s5710_s1 + $0x58] sm:$0xff]  ;;  %v15_v30 = vld [vmem:[%s5711_s0 + $0x8] sm:$0xff]  ;;  %v2839_v31 = vpack.c.bf16 %v452_v26, %v451_v25 }
   0x8   :  { %2786 = vmatpush1.bf16.msra.mxu1 %v2785_v7  ;;  %532 = vmatprep.mubr.f32.mxu1 %v15_v30  ;;  %v453_v32 = vld [vmem:[%s5710_s1 + $0x140] sm:$0xff]  ;;  %v454_v33 = vld [vmem:[%s5710_s1 + $0x148] sm:$0xff]  ;;  %v2797_v34 = vpack.c.bf16 %v424_v29, %v423_v28  ;;  %v455_v38 = vld [vmem:[%s5710_s1 + $0x150] sm:$0xff] }
   0x9   :  { %2787 = vmatprep.subr.bf16.mxu1 %v3125_v0  ;;  %v425_v35 = vld [vmem:[%s5710_s1 + $0x60] sm:$0xff]  ;;  %v426_v36 = vld [vmem:[%s5710_s1 + $0x68] sm:$0xff]  ;;  %v2842_v37 = vpack.c.bf16 %v454_v33, %v453_v32  ;;  %v456_v39 = vld [vmem:[%s5710_s1 + $0x158] sm:$0xff] }
   0xa   :  { %2834 = vmatpush3.bf16.msra.mxu0 %v2833_v18  ;;  %v2800_v40 = vpack.c.bf16 %v426_v36, %v425_v35  ;;  %v427_v41 = vld [vmem:[%s5710_s1 + $0x70] sm:$0xff]  ;;  %v428_v42 = vld [vmem:[%s5710_s1 + $0x78] sm:$0xff]  ;;  %v2845_v43 = vpack.c.bf16 %v456_v39, %v455_v38  ;;  %v457_v44 = vld [vmem:[%s5710_s1 + $0x160] sm:$0xff] }
   0xb   :  { %2835 = vmatprep.subr.bf16.mxu0 %v3125_v0  ;;  %v458_v45 = vld [vmem:[%s5710_s1 + $0x168] sm:$0xff]  ;;  %v2803_v46 = vpack.c.bf16 %v428_v42, %v427_v41  ;;  %v429_v47 = vld [vmem:[%s5710_s1 + $0x80] sm:$0xff]  ;;  %v459_v50 = vld [vmem:[%s5710_s1 + $0x170] sm:$0xff] }
   0xc   :  { %2789 = vmatpush1.bf16.msra.mxu1 %v2788_v12  ;;  %v430_v48 = vld [vmem:[%s5710_s1 + $0x88] sm:$0xff]  ;;  %v2848_v49 = vpack.c.bf16 %v458_v45, %v457_v44  ;;  %v460_v51 = vld [vmem:[%s5710_s1 + $0x178] sm:$0xff]  ;;  %v431_v53 = vld [vmem:[%s5710_s1 + $0x90] sm:$0xff] }
   0xd   :  { %2790 = vmatprep.subr.bf16.mxu1 %v3125_v0  ;;  %v2806_v52 = vpack.c.bf16 %v430_v48, %v429_v47  ;;  %v432_v54 = vld [vmem:[%s5710_s1 + $0x98] sm:$0xff]  ;;  %v2851_v55 = vpack.c.bf16 %v460_v51, %v459_v50  ;;  %v433_v57 = vld [vmem:[%s5710_s1 + $0xa0] sm:$0xff]  ;;  %v434_v58 = vld [vmem:[%s5710_s1 + $0xa8] sm:$0xff] }
   0xe   :  { %2837 = vmatpush3.bf16.msra.mxu0 %v2836_v24  ;;  %v2809_v56 = vpack.c.bf16 %v432_v54, %v431_v53  ;;  %v16_v59 = vld [vmem:[%s5711_s0 + $0x10] sm:$0xff]  ;;  %v2812_v60 = vpack.c.bf16 %v434_v58, %v433_v57  ;;  %v436_v62 = vld [vmem:[%s5710_s1 + $0xb8] sm:$0xff]  ;;  %v19_v63 = vld [vmem:[%s5711_s0 + $0x28] sm:$0xff] }
   0xf   :  { %2838 = vmatprep.subr.bf16.mxu0 %v3125_v0  ;;  %v435_v61 = vld [vmem:[%s5710_s1 + $0xb0] sm:$0xff]  ;;  %v437_v2 = vld [vmem:[%s5710_s1 + $0xc0] sm:$0xff]  ;;  %v438_v3 = vld [vmem:[%s5710_s1 + $0xc8] sm:$0xff] }
  0x10   :  { %2792 = vmatpush1.bf16.msra.mxu1 %v2791_v21  ;;  %v2815_v1 = vpack.c.bf16 %v436_v62, %v435_v61  ;;  %v22_v4 = vld [vmem:[%s5711_s0 + $0x40] sm:$0xff]  ;;  %v2818_v5 = vpack.c.bf16 %v438_v3, %v437_v2  ;;  %v439_v7 = vld [vmem:[%s5710_s1 + $0xd0] sm:$0xff]  ;;  %v440_v8 = vld [vmem:[%s5710_s1 + $0xd8] sm:$0xff] }
  0x11   :  { %2793 = vmatprep.subr.bf16.mxu1 %v3125_v0  ;;  %v25_v9 = vld [vmem:[%s5711_s0 + $0x58] sm:$0xff]  ;;  %v2821_v10 = vpack.c.bf16 %v440_v8, %v439_v7  ;;  %v441_v11 = vld [vmem:[%s5710_s1 + $0xe0] sm:$0xff]  ;;  %v442_v12 = vld [vmem:[%s5710_s1 + $0xe8] sm:$0xff] }
  0x12   :  { %2840 = vmatpush3.bf16.msra.mxu0 %v2839_v31  ;;  %v28_v13 = vld [vmem:[%s5711_s0 + $0x70] sm:$0xff]  ;;  %v2824_v14 = vpack.c.bf16 %v442_v12, %v441_v11  ;;  %v444_v16 = vld [vmem:[%s5710_s1 + $0xf8] sm:$0xff]  ;;  %v31_v17 = vld [vmem:[%s5711_s0 + $0x88] sm:$0xff] }
  0x13   :  { %2841 = vmatprep.subr.bf16.mxu0 %v3125_v0  ;;  %v443_v15 = vld [vmem:[%s5710_s1 + $0xf0] sm:$0xff]  ;;  %v34_v19 = vld [vmem:[%s5711_s0 + $0xa0] sm:$0xff]  ;;  %v17_v22 = vld [vmem:[%s5711_s0 + $0x18] sm:$0xff] }
  0x14   :  { %2795 = vmatpush1.bf16.msra.mxu1 %v2794_v27  ;;  %v2827_v18 = vpack.c.bf16 %v444_v16, %v443_v15  ;;  %v14_v20 = vld [vmem:[%s5711_s0] sm:$0xff]  ;;  %v21_v23 = vld [vmem:[%s5711_s0 + $0x38] sm:$0xff]  ;;  %v40_v24 = vld [vmem:[%s5711_s0 + $0xd0] sm:$0xff] }
  0x15   :  { %2796 = vmatprep.subr.bf16.mxu1 %v3125_v0  ;;  %v18_v21 = vld [vmem:[%s5711_s0 + $0x20] sm:$0xff]  ;;  %v20_v25 = vld [vmem:[%s5711_s0 + $0x30] sm:$0xff]  ;;  %v43_v27 = vld [vmem:[%s5711_s0 + $0xe8] sm:$0xff] }
  0x16   :  { %2843 = vmatpush3.bf16.msra.mxu0 %v2842_v37  ;;  %v24_v26 = vld [vmem:[%s5711_s0 + $0x50] sm:$0xff]  ;;  %v23_v28 = vld [vmem:[%s5711_s0 + $0x48] sm:$0xff]  ;;  %v46_v30 = vld [vmem:[%s5711_s0 + $0x100] sm:$0xff] }
  0x17   :  { %2844 = vmatprep.subr.bf16.mxu0 %v3125_v0  ;;  %v27_v29 = vld [vmem:[%s5711_s0 + $0x68] sm:$0xff]  ;;  %v26_v31 = vld [vmem:[%s5711_s0 + $0x60] sm:$0xff]  ;;  %v49_v33 = vld [vmem:[%s5711_s0 + $0x118] sm:$0xff] }
  0x18   :  { %2798 = vmatpush1.bf16.msra.mxu1 %v2797_v34  ;;  %v30_v32 = vld [vmem:[%s5711_s0 + $0x80] sm:$0xff]  ;;  %v29_v34 = vld [vmem:[%s5711_s0 + $0x78] sm:$0xff]  ;;  %v52_v36 = vld [vmem:[%s5711_s0 + $0x130] sm:$0xff] }
  0x19   :  { %2799 = vmatprep.subr.bf16.mxu1 %v3125_v0  ;;  %v33_v35 = vld [vmem:[%s5711_s0 + $0x98] sm:$0xff]  ;;  %v32_v37 = vld [vmem:[%s5711_s0 + $0x90] sm:$0xff]  ;;  %v55_v39 = vld [vmem:[%s5711_s0 + $0x148] sm:$0xff] }
  0x1a   :  { %2846 = vmatpush3.bf16.msra.mxu0 %v2845_v43  ;;  %v36_v38 = vld [vmem:[%s5711_s0 + $0xb0] sm:$0xff]  ;;  %v39_v41 = vld [vmem:[%s5711_s0 + $0xc8] sm:$0xff]  ;;  %v58_v42 = vld [vmem:[%s5711_s0 + $0x160] sm:$0xff] }
  0x1b   :  { %2847 = vmatprep.subr.bf16.mxu0 %v3125_v0  ;;  %v38_v43 = vld [vmem:[%s5711_s0 + $0xc0] sm:$0xff]  ;;  %v61_v45 = vld [vmem:[%s5711_s0 + $0x178] sm:$0xff]  ;;  %v64_v48 = vld [vmem:[%s5711_s0 + $0x190] sm:$0xff] }
  0x1c   :  { %2801 = vmatpush1.bf16.msra.mxu1 %v2800_v40  ;;  %v35_v40 = vld [vmem:[%s5711_s0 + $0xa8] sm:$0xff]  ;;  %v42_v44 = vld [vmem:[%s5711_s0 + $0xe0] sm:$0xff]  ;;  %v45_v47 = vld [vmem:[%s5711_s0 + $0xf8] sm:$0xff] }
  0x1d   :  { %2802 = vmatprep.subr.bf16.mxu1 %v3125_v0  ;;  %v48_v50 = vld [vmem:[%s5711_s0 + $0x110] sm:$0xff]  ;;  %v67_v51 = vld [vmem:[%s5711_s0 + $0x1a8] sm:$0xff]  ;;  %v70_v54 = vld [vmem:[%s5711_s0 + $0x1c0] sm:$0xff] }
  0x1e   :  { %2849 = vmatpush3.bf16.msra.mxu0 %v2848_v49  ;;  %v44_v49 = vld [vmem:[%s5711_s0 + $0xf0] sm:$0xff]  ;;  %v51_v53 = vld [vmem:[%s5711_s0 + $0x128] sm:$0xff]  ;;  %v73_v57 = vld [vmem:[%s5711_s0 + $0x1d8] sm:$0xff] }
  0x1f   :  { %2850 = vmatprep.subr.bf16.mxu0 %v3125_v0  ;;  %v53_v58 = vld [vmem:[%s5711_s0 + $0x138] sm:$0xff]  ;;  %v56_v61 = vld [vmem:[%s5711_s0 + $0x150] sm:$0xff]  ;;  %v63_v2 = vld [vmem:[%s5711_s0 + $0x188] sm:$0xff] }
  0x20   :  { %2804 = vmatpush1.bf16.msra.mxu1 %v2803_v46  ;;  %v41_v46 = vld [vmem:[%s5711_s0 + $0xd8] sm:$0xff]  ;;  %v60_v62 = vld [vmem:[%s5711_s0 + $0x170] sm:$0xff]  ;;  %v82_v3 = vld [vmem:[%s5711_s0 + $0x220] sm:$0xff] }
  0x21   :  { %2805 = vmatprep.subr.bf16.mxu1 %v3125_v0  ;;  %v85_v7 = vld [vmem:[%s5711_s0 + $0x238] sm:$0xff]  ;;  %v68_v11 = vld [vmem:[%s5711_s0 + $0x1b0] sm:$0xff]  ;;  %v75_v15 = vld [vmem:[%s5711_s0 + $0x1e8] sm:$0xff] }
  0x22   :  { %2852 = vmatpush3.bf16.msra.mxu0 %v2851_v55  ;;  %v50_v55 = vld [vmem:[%s5711_s0 + $0x120] sm:$0xff]  ;;  %v65_v8 = vld [vmem:[%s5711_s0 + $0x198] sm:$0xff]  ;;  %v72_v12 = vld [vmem:[%s5711_s0 + $0x1d0] sm:$0xff] }
  0x23   :  { %v94_v16 = vld [vmem:[%s5711_s0 + $0x280] sm:$0xff] }
  0x24   :  { %2807 = vmatpush1.bf16.msra.mxu1 %v2806_v52  ;;  %v47_v52 = vld [vmem:[%s5711_s0 + $0x108] sm:$0xff] }
  0x25   :  { %2808 = vmatprep.subr.bf16.mxu1 %v3125_v0  ;;  %2383 = vmatmul.mubr.f32.vlgmr.msra.gmra.mrb[0].mxu0 %v16_v59  ;;  %v57_v59 = vld [vmem:[%s5711_s0 + $0x158] sm:$0xff] }
  0x26   :  { %2385 = vmatprep.mubr.msk.f32.mxu0 %vm3126_vm0, %v3127_v6 }
  0x28   :  { %2810 = vmatpush1.bf16.msra.mxu1 %v2809_v56  ;;  %v54_v56 = vld [vmem:[%s5711_s0 + $0x140] sm:$0xff] }
  0x29   :  { %2811 = vmatprep.subr.bf16.mxu1 %v3125_v0  ;;  %2386 = vmatmul.mubr.f32.gmra.mrb[2].mxu0 %v19_v63  ;;  %v79_v63 = vld [vmem:[%s5711_s0 + $0x208] sm:$0xff] }
  0x2a   :  { %2388 = vmatprep.mubr.msk.f32.mxu0 %vm3126_vm0, %v3127_v6 }
  0x2c   :  { %2813 = vmatpush1.bf16.msra.mxu1 %v2812_v60  ;;  %v76_v60 = vld [vmem:[%s5711_s0 + $0x1f0] sm:$0xff] }
  0x2d   :  { %2814 = vmatprep.subr.bf16.mxu1 %v3125_v0  ;;  %2389 = vmatmul.mubr.f32.gmra.mrb[4].mxu0 %v22_v4  ;;  %v62_v4 = vld [vmem:[%s5711_s0 + $0x180] sm:$0xff] }
  0x2e   :  { %2391 = vmatprep.mubr.msk.f32.mxu0 %vm3126_vm0, %v3127_v6 }
  0x30   :  { %2816 = vmatpush1.bf16.msra.mxu1 %v2815_v1  ;;  %v59_v1 = vld [vmem:[%s5711_s0 + $0x168] sm:$0xff] }
  0x31   :  { %2817 = vmatprep.subr.bf16.mxu1 %v3125_v0  ;;  %2392 = vmatmul.mubr.f32.gmra.mrb[6].mxu0 %v25_v9  ;;  %v69_v9 = vld [vmem:[%s5711_s0 + $0x1b8] sm:$0xff] }
  0x32   :  { %2394 = vmatprep.mubr.msk.f32.mxu0 %vm3126_vm0, %v3127_v6 }
  0x34   :  { %2819 = vmatpush1.bf16.msra.mxu1 %v2818_v5  ;;  %v66_v5 = vld [vmem:[%s5711_s0 + $0x1a0] sm:$0xff] }
  0x35   :  { %2820 = vmatprep.subr.bf16.mxu1 %v3125_v0  ;;  %2395 = vmatmul.mubr.f32.gmra.mrb[8].mxu0 %v28_v13  ;;  %v91_v13 = vld [vmem:[%s5711_s0 + $0x268] sm:$0xff] }
  0x36   :  { %2397 = vmatprep.mubr.msk.f32.mxu0 %vm3126_vm0, %v3127_v6 }
  0x38   :  { %2822 = vmatpush1.bf16.msra.mxu1 %v2821_v10  ;;  %v88_v10 = vld [vmem:[%s5711_s0 + $0x250] sm:$0xff] }
  0x39   :  { %2823 = vmatprep.subr.bf16.mxu1 %v3125_v0  ;;  %2398 = vmatmul.mubr.f32.gmra.mrb[10].mxu0 %v31_v17  ;;  %v74_v17 = vld [vmem:[%s5711_s0 + $0x1e0] sm:$0xff] }
  0x3a   :  { %2400 = vmatprep.mubr.msk.f32.mxu0 %vm3126_vm0, %v3127_v6 }
  0x3c   :  { %2825 = vmatpush1.bf16.msra.mxu1 %v2824_v14  ;;  %v71_v14 = vld [vmem:[%s5711_s0 + $0x1c8] sm:$0xff] }
  0x3d   :  { %2826 = vmatprep.subr.bf16.mxu1 %v3125_v0  ;;  %2401 = vmatmul.mubr.f32.gmra.mrb[12].mxu0 %v34_v19  ;;  %v37_v0 = vld [vmem:[%s5711_s0 + $0xb8] sm:$0xff] }
  0x3e   :  { %2403 = vmatprep.mubr.msk.f32.mxu0 %vm3126_vm0, %v3127_v6  ;;  %v97_v19 = vld [vmem:[%s5711_s0 + $0x298] sm:$0xff] }
  0x40   :  { %2828 = vmatpush1.bf16.msra.mxu1 %v2827_v18  ;;  %v78_v18 = vld [vmem:[%s5711_s0 + $0x200] sm:$0xff] }
  0x41   :  { %2404 = vmatmul.mubr.f32.gmra.mrb[14].mxu0 %v37_v0  ;;  %v100_v0 = vld [vmem:[%s5711_s0 + $0x2b0] sm:$0xff] }
  0x42   :  { %2406 = vmatprep.mubr.msk.f32.mxu0 %vm3126_vm0, %v3127_v6 }
  0x43   :  { %533 = vmatmul.mubr.f32.vlgmr.msra.gmra.mrb[0].mxu1 %v14_v20  ;;  %v77_v20 = vld [vmem:[%s5711_s0 + $0x1f8] sm:$0xff] }
  0x44   :  { %537 = vmatprep.mubr.f32.mxu1 %v18_v21  ;;  %v81_v21 = vld [vmem:[%s5711_s0 + $0x218] sm:$0xff] }
  0x45   :  { %2407 = vmatmul.mubr.f32.gmra.mrb[16].mxu0 %v40_v24  ;;  %v103_v24 = vld [vmem:[%s5711_s0 + $0x2c8] sm:$0xff] }
  0x46   :  { %2409 = vmatprep.mubr.msk.f32.mxu0 %vm3126_vm0, %v3127_v6 }
  0x47   :  { %538 = vmatmul.mubr.f32.gmra.mrb[2].mxu1 %v17_v22  ;;  %v80_v22 = vld [vmem:[%s5711_s0 + $0x210] sm:$0xff] }
  0x48   :  { %542 = vmatprep.mubr.f32.mxu1 %v21_v23  ;;  %v84_v23 = vld [vmem:[%s5711_s0 + $0x230] sm:$0xff] }
  0x49   :  { %2410 = vmatmul.mubr.f32.gmra.mrb[18].mxu0 %v43_v27  ;;  %v106_v27 = vld [vmem:[%s5711_s0 + $0x2e0] sm:$0xff] }
  0x4a   :  { %2412 = vmatprep.mubr.msk.f32.mxu0 %vm3126_vm0, %v3127_v6 }
  0x4b   :  { %543 = vmatmul.mubr.f32.gmra.mrb[4].mxu1 %v20_v25  ;;  %v83_v25 = vld [vmem:[%s5711_s0 + $0x228] sm:$0xff] }
  0x4c   :  { %547 = vmatprep.mubr.f32.mxu1 %v24_v26  ;;  %v87_v26 = vld [vmem:[%s5711_s0 + $0x248] sm:$0xff] }
  0x4d   :  { %2413 = vmatmul.mubr.f32.gmra.mrb[20].mxu0 %v46_v30  ;;  %v109_v30 = vld [vmem:[%s5711_s0 + $0x2f8] sm:$0xff] }
  0x4e   :  { %2415 = vmatprep.mubr.msk.f32.mxu0 %vm3126_vm0, %v3127_v6 }
  0x4f   :  { %548 = vmatmul.mubr.f32.gmra.mrb[6].mxu1 %v23_v28  ;;  %v86_v28 = vld [vmem:[%s5711_s0 + $0x240] sm:$0xff] }
  0x50   :  { %552 = vmatprep.mubr.f32.mxu1 %v27_v29  ;;  %v90_v29 = vld [vmem:[%s5711_s0 + $0x260] sm:$0xff] }
  0x51   :  { %2416 = vmatmul.mubr.f32.gmra.mrb[22].mxu0 %v49_v33  ;;  %v112_v33 = vld [vmem:[%s5711_s0 + $0x310] sm:$0xff] }
  0x52   :  { %2418 = vmatprep.mubr.msk.f32.mxu0 %vm3126_vm0, %v3127_v6 }
  0x53   :  { %553 = vmatmul.mubr.f32.gmra.mrb[8].mxu1 %v26_v31  ;;  %v89_v31 = vld [vmem:[%s5711_s0 + $0x258] sm:$0xff] }
  0x54   :  { %557 = vmatprep.mubr.f32.mxu1 %v30_v32  ;;  %v93_v32 = vld [vmem:[%s5711_s0 + $0x278] sm:$0xff] }
  0x55   :  { %2419 = vmatmul.mubr.f32.gmra.mrb[24].mxu0 %v52_v36  ;;  %v115_v36 = vld [vmem:[%s5711_s0 + $0x328] sm:$0xff] }
  0x56   :  { %2421 = vmatprep.mubr.msk.f32.mxu0 %vm3126_vm0, %v3127_v6 }
  0x57   :  { %558 = vmatmul.mubr.f32.gmra.mrb[10].mxu1 %v29_v34  ;;  %v92_v34 = vld [vmem:[%s5711_s0 + $0x270] sm:$0xff] }
  0x58   :  { %562 = vmatprep.mubr.f32.mxu1 %v33_v35  ;;  %v96_v35 = vld [vmem:[%s5711_s0 + $0x290] sm:$0xff] }
  0x59   :  { %2422 = vmatmul.mubr.f32.gmra.mrb[26].mxu0 %v55_v39  ;;  %v118_v39 = vld [vmem:[%s5711_s0 + $0x340] sm:$0xff] }
  0x5a   :  { %2424 = vmatprep.mubr.msk.f32.mxu0 %vm3126_vm0, %v3127_v6 }
  0x5b   :  { %563 = vmatmul.mubr.f32.gmra.mrb[12].mxu1 %v32_v37  ;;  %v95_v37 = vld [vmem:[%s5711_s0 + $0x288] sm:$0xff] }
  0x5c   :  { %567 = vmatprep.mubr.f32.mxu1 %v36_v38  ;;  %v99_v38 = vld [vmem:[%s5711_s0 + $0x2a8] sm:$0xff] }
  0x5d   :  { %2425 = vmatmul.mubr.f32.gmra.mrb[28].mxu0 %v58_v42  ;;  %v121_v42 = vld [vmem:[%s5711_s0 + $0x358] sm:$0xff] }
  0x5e   :  { %2427 = vmatprep.mubr.msk.f32.mxu0 %vm3126_vm0, %v3127_v6 }
  0x5f   :  { %568 = vmatmul.mubr.f32.gmra.mrb[14].mxu1 %v35_v40  ;;  %v98_v40 = vld [vmem:[%s5711_s0 + $0x2a0] sm:$0xff] }
  0x60   :  { %572 = vmatprep.mubr.f32.mxu1 %v39_v41  ;;  %v102_v41 = vld [vmem:[%s5711_s0 + $0x2c0] sm:$0xff] }
  0x61   :  { %2428 = vmatmul.mubr.f32.gmra.mrb[30].mxu0 %v61_v45  ;;  %v124_v45 = vld [vmem:[%s5711_s0 + $0x370] sm:$0xff] }
  0x62   :  { %2430 = vmatprep.mubr.msk.f32.mxu0 %vm3126_vm0, %v3127_v6 }
  0x63   :  { %573 = vmatmul.mubr.f32.gmra.mrb[16].mxu1 %v38_v43  ;;  %v101_v43 = vld [vmem:[%s5711_s0 + $0x2b8] sm:$0xff] }
  0x64   :  { %577 = vmatprep.mubr.f32.mxu1 %v42_v44  ;;  %v105_v44 = vld [vmem:[%s5711_s0 + $0x2d8] sm:$0xff] }
  0x65   :  { %2431 = vmatmul.mubr.f32.gmra.mrb[32].mxu0 %v64_v48  ;;  %v127_v48 = vld [vmem:[%s5711_s0 + $0x388] sm:$0xff] }
  0x66   :  { %2433 = vmatprep.mubr.msk.f32.mxu0 %vm3126_vm0, %v3127_v6 }
  0x67   :  { %578 = vmatmul.mubr.f32.gmra.mrb[18].mxu1 %v41_v46  ;;  %v104_v46 = vld [vmem:[%s5711_s0 + $0x2d0] sm:$0xff] }
  0x68   :  { %582 = vmatprep.mubr.f32.mxu1 %v45_v47  ;;  %v108_v47 = vld [vmem:[%s5711_s0 + $0x2f0] sm:$0xff] }
  0x69   :  { %2434 = vmatmul.mubr.f32.gmra.mrb[34].mxu0 %v67_v51  ;;  %v130_v51 = vld [vmem:[%s5711_s0 + $0x3a0] sm:$0xff] }
  0x6a   :  { %2436 = vmatprep.mubr.msk.f32.mxu0 %vm3126_vm0, %v3127_v6 }
  0x6b   :  { %583 = vmatmul.mubr.f32.gmra.mrb[20].mxu1 %v44_v49  ;;  %v107_v49 = vld [vmem:[%s5711_s0 + $0x2e8] sm:$0xff] }
  0x6c   :  { %587 = vmatprep.mubr.f32.mxu1 %v48_v50  ;;  %v111_v50 = vld [vmem:[%s5711_s0 + $0x308] sm:$0xff] }
  0x6d   :  { %2437 = vmatmul.mubr.f32.gmra.mrb[36].mxu0 %v70_v54  ;;  %v133_v54 = vld [vmem:[%s5711_s0 + $0x3b8] sm:$0xff] }
  0x6e   :  { %2439 = vmatprep.mubr.msk.f32.mxu0 %vm3126_vm0, %v3127_v6 }
  0x6f   :  { %588 = vmatmul.mubr.f32.gmra.mrb[22].mxu1 %v47_v52  ;;  %v110_v52 = vld [vmem:[%s5711_s0 + $0x300] sm:$0xff] }
  0x70   :  { %592 = vmatprep.mubr.f32.mxu1 %v51_v53  ;;  %v114_v53 = vld [vmem:[%s5711_s0 + $0x320] sm:$0xff] }
  0x71   :  { %2440 = vmatmul.mubr.f32.gmra.mrb[38].mxu0 %v73_v57  ;;  %v136_v57 = vld [vmem:[%s5711_s0 + $0x3d0] sm:$0xff] }
  0x72   :  { %2442 = vmatprep.mubr.msk.f32.mxu0 %vm3126_vm0, %v3127_v6 }
  0x73   :  { %593 = vmatmul.mubr.f32.gmra.mrb[24].mxu1 %v50_v55  ;;  %v113_v55 = vld [vmem:[%s5711_s0 + $0x318] sm:$0xff] }
  0x74   :  { %597 = vmatprep.mubr.f32.mxu1 %v54_v56  ;;  %v117_v56 = vld [vmem:[%s5711_s0 + $0x338] sm:$0xff] }
  0x75   :  { %2443 = vmatmul.mubr.f32.gmra.mrb[40].mxu0 %v76_v60  ;;  %v139_v60 = vld [vmem:[%s5711_s0 + $0x3e8] sm:$0xff] }
  0x76   :  { %2445 = vmatprep.mubr.msk.f32.mxu0 %vm3126_vm0, %v3127_v6 }
  0x77   :  { %598 = vmatmul.mubr.f32.gmra.mrb[26].mxu1 %v53_v58  ;;  %v116_v58 = vld [vmem:[%s5711_s0 + $0x330] sm:$0xff] }
  0x78   :  { %602 = vmatprep.mubr.f32.mxu1 %v57_v59  ;;  %v120_v59 = vld [vmem:[%s5711_s0 + $0x350] sm:$0xff] }
  0x79   :  { %2446 = vmatmul.mubr.f32.gmra.mrb[42].mxu0 %v79_v63  ;;  %v142_v63 = vld [vmem:[%s5711_s0 + $0x400] sm:$0xff] }
  0x7a   :  { %2448 = vmatprep.mubr.msk.f32.mxu0 %vm3126_vm0, %v3127_v6 }
  0x7b   :  { %603 = vmatmul.mubr.f32.gmra.mrb[28].mxu1 %v56_v61  ;;  %v119_v61 = vld [vmem:[%s5711_s0 + $0x348] sm:$0xff] }
  0x7c   :  { %607 = vmatprep.mubr.f32.mxu1 %v60_v62  ;;  %v123_v62 = vld [vmem:[%s5711_s0 + $0x368] sm:$0xff] }
  0x7d   :  { %2449 = vmatmul.mubr.f32.gmra.mrb[44].mxu0 %v82_v3  ;;  %v145_v3 = vld [vmem:[%s5711_s0 + $0x418] sm:$0xff] }
  0x7e   :  { %2451 = vmatprep.mubr.msk.f32.mxu0 %vm3126_vm0, %v3127_v6 }
  0x7f   :  { %608 = vmatmul.mubr.f32.gmra.mrb[30].mxu1 %v59_v1  ;;  %v122_v1 = vld [vmem:[%s5711_s0 + $0x360] sm:$0xff] }
  0x80   :  { %612 = vmatprep.mubr.f32.mxu1 %v63_v2  ;;  %v126_v2 = vld [vmem:[%s5711_s0 + $0x380] sm:$0xff] }
  0x81   :  { %2452 = vmatmul.mubr.f32.gmra.mrb[46].mxu0 %v85_v7  ;;  %v148_v7 = vld [vmem:[%s5711_s0 + $0x430] sm:$0xff] }
  0x82   :  { %2454 = vmatprep.mubr.msk.f32.mxu0 %vm3126_vm0, %v3127_v6 }
  0x83   :  { %613 = vmatmul.mubr.f32.gmra.mrb[32].mxu1 %v62_v4  ;;  %v125_v4 = vld [vmem:[%s5711_s0 + $0x378] sm:$0xff] }
  0x84   :  { %617 = vmatprep.mubr.f32.mxu1 %v66_v5  ;;  %v129_v5 = vld [vmem:[%s5711_s0 + $0x398] sm:$0xff] }
  0x85   :  { %2455 = vmatmul.mubr.f32.gmra.mrb[48].mxu0 %v88_v10  ;;  %v151_v10 = vld [vmem:[%s5711_s0 + $0x448] sm:$0xff] }
  0x86   :  { %2457 = vmatprep.mubr.msk.f32.mxu0 %vm3126_vm0, %v3127_v6 }
  0x87   :  { %618 = vmatmul.mubr.f32.gmra.mrb[34].mxu1 %v65_v8  ;;  %v128_v8 = vld [vmem:[%s5711_s0 + $0x390] sm:$0xff] }
  0x88   :  { %622 = vmatprep.mubr.f32.mxu1 %v69_v9  ;;  %v132_v9 = vld [vmem:[%s5711_s0 + $0x3b0] sm:$0xff] }
  0x89   :  { %2458 = vmatmul.mubr.f32.gmra.mrb[50].mxu0 %v91_v13  ;;  %v154_v13 = vld [vmem:[%s5711_s0 + $0x460] sm:$0xff] }
  0x8a   :  { %2460 = vmatprep.mubr.msk.f32.mxu0 %vm3126_vm0, %v3127_v6 }
  0x8b   :  { %623 = vmatmul.mubr.f32.gmra.mrb[36].mxu1 %v68_v11  ;;  %v131_v11 = vld [vmem:[%s5711_s0 + $0x3a8] sm:$0xff] }
  0x8c   :  { %627 = vmatprep.mubr.f32.mxu1 %v72_v12  ;;  %v135_v12 = vld [vmem:[%s5711_s0 + $0x3c8] sm:$0xff] }
  0x8d   :  { %2461 = vmatmul.mubr.f32.gmra.mrb[52].mxu0 %v94_v16  ;;  %v157_v16 = vld [vmem:[%s5711_s0 + $0x478] sm:$0xff] }
  0x8e   :  { %2463 = vmatprep.mubr.msk.f32.mxu0 %vm3126_vm0, %v3127_v6 }
  0x8f   :  { %628 = vmatmul.mubr.f32.gmra.mrb[38].mxu1 %v71_v14  ;;  %v134_v14 = vld [vmem:[%s5711_s0 + $0x3c0] sm:$0xff] }
  0x90   :  { %632 = vmatprep.mubr.f32.mxu1 %v75_v15  ;;  %v138_v15 = vld [vmem:[%s5711_s0 + $0x3e0] sm:$0xff] }
  0x91   :  { %2464 = vmatmul.mubr.f32.gmra.mrb[54].mxu0 %v97_v19  ;;  %v160_v19 = vld [vmem:[%s5711_s0 + $0x490] sm:$0xff] }
  0x92   :  { %2466 = vmatprep.mubr.msk.f32.mxu0 %vm3126_vm0, %v3127_v6 }
  0x93   :  { %633 = vmatmul.mubr.f32.gmra.mrb[40].mxu1 %v74_v17  ;;  %v137_v17 = vld [vmem:[%s5711_s0 + $0x3d8] sm:$0xff] }
  0x94   :  { %637 = vmatprep.mubr.f32.mxu1 %v78_v18  ;;  %v141_v18 = vld [vmem:[%s5711_s0 + $0x3f8] sm:$0xff] }
  0x95   :  { %2467 = vmatmul.mubr.f32.gmra.mrb[56].mxu0 %v100_v0  ;;  %v163_v0 = vld [vmem:[%s5711_s0 + $0x4a8] sm:$0xff] }
  0x96   :  { %2469 = vmatprep.mubr.msk.f32.mxu0 %vm3126_vm0, %v3127_v6 }
  0x97   :  { %638 = vmatmul.mubr.f32.gmra.mrb[42].mxu1 %v77_v20  ;;  %v140_v20 = vld [vmem:[%s5711_s0 + $0x3f0] sm:$0xff] }
  0x98   :  { %642 = vmatprep.mubr.f32.mxu1 %v81_v21  ;;  %v144_v21 = vld [vmem:[%s5711_s0 + $0x410] sm:$0xff] }
  0x99   :  { %2470 = vmatmul.mubr.f32.gmra.mrb[58].mxu0 %v103_v24  ;;  %v166_v24 = vld [vmem:[%s5711_s0 + $0x4c0] sm:$0xff] }
  0x9a   :  { %2472 = vmatprep.mubr.msk.f32.mxu0 %vm3126_vm0, %v3127_v6 }
  0x9b   :  { %643 = vmatmul.mubr.f32.gmra.mrb[44].mxu1 %v80_v22  ;;  %v143_v22 = vld [vmem:[%s5711_s0 + $0x408] sm:$0xff] }
  0x9c   :  { %647 = vmatprep.mubr.f32.mxu1 %v84_v23  ;;  %v147_v23 = vld [vmem:[%s5711_s0 + $0x428] sm:$0xff] }
  0x9d   :  { %2473 = vmatmul.mubr.f32.gmra.mrb[60].mxu0 %v106_v27  ;;  %v169_v27 = vld [vmem:[%s5711_s0 + $0x4d8] sm:$0xff] }
  0x9e   :  { %2475 = vmatprep.mubr.msk.f32.mxu0 %vm3126_vm0, %v3127_v6 }
  0x9f   :  { %648 = vmatmul.mubr.f32.gmra.mrb[46].mxu1 %v83_v25  ;;  %v146_v25 = vld [vmem:[%s5711_s0 + $0x420] sm:$0xff] }
  0xa0   :  { %652 = vmatprep.mubr.f32.mxu1 %v87_v26  ;;  %v150_v26 = vld [vmem:[%s5711_s0 + $0x440] sm:$0xff] }
  0xa1   :  { %2476 = vmatmul.mubr.f32.gmra.mrb[62].mxu0 %v109_v30  ;;  %v172_v30 = vld [vmem:[%s5711_s0 + $0x4f0] sm:$0xff] }
  0xa2   :  { %2478 = vmatprep.mubr.msk.f32.mxu0 %vm3126_vm0, %v3127_v6 }
  0xa3   :  { %653 = vmatmul.mubr.f32.gmra.mrb[48].mxu1 %v86_v28  ;;  %v149_v28 = vld [vmem:[%s5711_s0 + $0x438] sm:$0xff] }
  0xa4   :  { %657 = vmatprep.mubr.f32.mxu1 %v90_v29  ;;  %v153_v29 = vld [vmem:[%s5711_s0 + $0x458] sm:$0xff] }
  0xa5   :  { %2479 = vmatmul.mubr.f32.gmra.mrb[64].mxu0 %v112_v33  ;;  %v175_v33 = vld [vmem:[%s5711_s0 + $0x508] sm:$0xff] }
  0xa6   :  { %2481 = vmatprep.mubr.msk.f32.mxu0 %vm3126_vm0, %v3127_v6 }
  0xa7   :  { %658 = vmatmul.mubr.f32.gmra.mrb[50].mxu1 %v89_v31  ;;  %v152_v31 = vld [vmem:[%s5711_s0 + $0x450] sm:$0xff] }
  0xa8   :  { %662 = vmatprep.mubr.f32.mxu1 %v93_v32  ;;  %v156_v32 = vld [vmem:[%s5711_s0 + $0x470] sm:$0xff] }
  0xa9   :  { %2482 = vmatmul.mubr.f32.gmra.mrb[66].mxu0 %v115_v36  ;;  %v159_v36 = vld [vmem:[%s5711_s0 + $0x488] sm:$0xff] }
  0xaa   :  { %2484 = vmatprep.mubr.msk.f32.mxu0 %vm3126_vm0, %v3127_v6 }
  0xab   :  { %663 = vmatmul.mubr.f32.gmra.mrb[52].mxu1 %v92_v34  ;;  %v155_v34 = vld [vmem:[%s5711_s0 + $0x468] sm:$0xff] }
  0xac   :  { %667 = vmatprep.mubr.f32.mxu1 %v96_v35 }
  0xad   :  { %2485 = vmatmul.mubr.f32.gmra.mrb[68].mxu0 %v118_v39  ;;  %v158_v39 = vld [vmem:[%s5711_s0 + $0x480] sm:$0xff] }
  0xae   :  { %2487 = vmatprep.mubr.msk.f32.mxu0 %vm3126_vm0, %v3127_v6 }
  0xaf   :  { %668 = vmatmul.mubr.f32.gmra.mrb[54].mxu1 %v95_v37 }
  0xb0   :  { %672 = vmatprep.mubr.f32.mxu1 %v99_v38  ;;  %v178_v38 = vld [vmem:[%s5711_s0 + $0x520] sm:$0xff] }
  0xb1   :  { %2488 = vmatmul.mubr.f32.gmra.mrb[70].mxu0 %v121_v42 }
  0xb2   :  { %2490 = vmatprep.mubr.msk.f32.mxu0 %vm3126_vm0, %v3127_v6 }
  0xb3   :  { %673 = vmatmul.mubr.f32.gmra.mrb[56].mxu1 %v98_v40 }
  0xb4   :  { %677 = vmatprep.mubr.f32.mxu1 %v102_v41  ;;  %v162_v41 = vld [vmem:[%s5711_s0 + $0x4a0] sm:$0xff] }
  0xb5   :  { %2491 = vmatmul.mubr.f32.gmra.mrb[72].mxu0 %v124_v45 }
  0xb6   :  { %2493 = vmatprep.mubr.msk.f32.mxu0 %vm3126_vm0, %v3127_v6 }
  0xb7   :  { %678 = vmatmul.mubr.f32.gmra.mrb[58].mxu1 %v101_v43  ;;  %v181_v43 = vld [vmem:[%s5711_s0 + $0x538] sm:$0xff] }
  0xb8   :  { %682 = vmatprep.mubr.f32.mxu1 %v105_v44  ;;  %v161_v44 = vld [vmem:[%s5711_s0 + $0x498] sm:$0xff] }
  0xb9   :  { %2494 = vmatmul.mubr.f32.gmra.mrb[74].mxu0 %v127_v48  ;;  %v184_v48 = vld [vmem:[%s5711_s0 + $0x550] sm:$0xff] }
  0xba   :  { %2496 = vmatprep.mubr.msk.f32.mxu0 %vm3126_vm0, %v3127_v6 }
  0xbb   :  { %683 = vmatmul.mubr.f32.gmra.mrb[60].mxu1 %v104_v46  ;;  %v165_v46 = vld [vmem:[%s5711_s0 + $0x4b8] sm:$0xff] }
  0xbc   :  { %687 = vmatprep.mubr.f32.mxu1 %v108_v47 }
  0xbd   :  { %2497 = vmatmul.mubr.f32.gmra.mrb[76].mxu0 %v130_v51  ;;  %v168_v51 = vld [vmem:[%s5711_s0 + $0x4d0] sm:$0xff] }
  0xbe   :  { %2499 = vmatprep.mubr.msk.f32.mxu0 %vm3126_vm0, %v3127_v6 }
  0xbf   :  { %688 = vmatmul.mubr.f32.gmra.mrb[62].mxu1 %v107_v49  ;;  %v164_v49 = vld [vmem:[%s5711_s0 + $0x4b0] sm:$0xff] }
  0xc0   :  { %692 = vmatprep.mubr.f32.mxu1 %v111_v50 }
  0xc1   :  { %2500 = vmatmul.mubr.f32.gmra.mrb[78].mxu0 %v133_v54  ;;  %v167_v54 = vld [vmem:[%s5711_s0 + $0x4c8] sm:$0xff] }
  0xc2   :  { %2502 = vmatprep.mubr.msk.f32.mxu0 %vm3126_vm0, %v3127_v6 }
  0xc3   :  { %693 = vmatmul.mubr.f32.gmra.mrb[64].mxu1 %v110_v52 }
  0xc4   :  { %697 = vmatprep.mubr.f32.mxu1 %v114_v53  ;;  %v187_v53 = vld [vmem:[%s5711_s0 + $0x568] sm:$0xff] }
  0xc5   :  { %2503 = vmatmul.mubr.f32.gmra.mrb[80].mxu0 %v136_v57 }
  0xc6   :  { %2505 = vmatprep.mubr.msk.f32.mxu0 %vm3126_vm0, %v3127_v6 }
  0xc7   :  { %698 = vmatmul.mubr.f32.gmra.mrb[66].mxu1 %v113_v55 }
  0xc8   :  { %702 = vmatprep.mubr.f32.mxu1 %v117_v56  ;;  %v171_v56 = vld [vmem:[%s5711_s0 + $0x4e8] sm:$0xff] }
  0xc9   :  { %2506 = vmatmul.mubr.f32.gmra.mrb[82].mxu0 %v139_v60 }
  0xca   :  { %2508 = vmatprep.mubr.msk.f32.mxu0 %vm3126_vm0, %v3127_v6 }
  0xcb   :  { %703 = vmatmul.mubr.f32.gmra.mrb[68].mxu1 %v116_v58  ;;  %v190_v58 = vld [vmem:[%s5711_s0 + $0x580] sm:$0xff] }
  0xcc   :  { %707 = vmatprep.mubr.f32.mxu1 %v120_v59  ;;  %v170_v59 = vld [vmem:[%s5711_s0 + $0x4e0] sm:$0xff] }
  0xcd   :  { %2509 = vmatmul.mubr.f32.gmra.mrb[84].mxu0 %v142_v63  ;;  %v193_v63 = vld [vmem:[%s5711_s0 + $0x598] sm:$0xff] }
  0xce   :  { %2511 = vmatprep.mubr.msk.f32.mxu0 %vm3126_vm0, %v3127_v6 }
  0xcf   :  { %708 = vmatmul.mubr.f32.gmra.mrb[70].mxu1 %v119_v61  ;;  %v174_v61 = vld [vmem:[%s5711_s0 + $0x500] sm:$0xff] }
  0xd0   :  { %712 = vmatprep.mubr.f32.mxu1 %v123_v62 }
  0xd1   :  { %2512 = vmatmul.mubr.f32.gmra.mrb[86].mxu0 %v145_v3 }
  0xd2   :  { %2514 = vmatprep.mubr.msk.f32.mxu0 %vm3126_vm0, %v3127_v6 }
  0xd3   :  { %713 = vmatmul.mubr.f32.gmra.mrb[72].mxu1 %v122_v1  ;;  %v3952_v1 = vld [vmem:[%s5712_s2] ss:$0 sm:$0xff] }
  0xd4   :  { %717 = vmatprep.mubr.f32.mxu1 %v126_v2  ;;  %v173_v2 = vld [vmem:[%s5711_s0 + $0x4f8] sm:$0xff] }
  0xd5   :  { %2515 = vmatmul.mubr.f32.gmra.mrb[88].mxu0 %v148_v7 }
  0xd6   :  { %2517 = vmatprep.mubr.msk.f32.mxu0 %vm3126_vm0, %v3127_v6 }
  0xd7   :  { %718 = vmatmul.mubr.f32.gmra.mrb[74].mxu1 %v125_v4  ;;  %v177_v4 = vld [vmem:[%s5711_s0 + $0x518] sm:$0xff] }
  0xd8   :  { %722 = vmatprep.mubr.f32.mxu1 %v129_v5 }
  0xd9   :  { %2518 = vmatmul.mubr.f32.gmra.mrb[90].mxu0 %v151_v10 }
  0xda   :  { %2520 = vmatprep.mubr.msk.f32.mxu0 %vm3126_vm0, %v3127_v6 }
  0xdb   :  { %723 = vmatmul.mubr.f32.gmra.mrb[76].mxu1 %v128_v8  ;;  %v196_v8 = vld [vmem:[%s5711_s0 + $0x5b0] sm:$0xff] }
  0xdc   :  { %727 = vmatprep.mubr.f32.mxu1 %v132_v9 }
  0xdd   :  { %2521 = vmatmul.mubr.f32.gmra.mrb[92].mxu0 %v154_v13 }
  0xde   :  { %2523 = vmatprep.mubr.msk.f32.mxu0 %vm3126_vm0, %v3127_v6 }
  0xdf   :  { %728 = vmatmul.mubr.f32.gmra.mrb[78].mxu1 %v131_v11  ;;  %v176_v11 = vld [vmem:[%s5711_s0 + $0x510] sm:$0xff] }
  0xe0   :  { %732 = vmatprep.mubr.f32.mxu1 %v135_v12 }
  0xe1   :  { %2524 = vmatmul.mubr.f32.gmra.mrb[94].mxu0 %v157_v16 }
  0xe2   :  { %2526 = vmatprep.mubr.msk.f32.mxu0 %vm3126_vm0, %v3127_v6 }
  0xe3   :  { %733 = vmatmul.mubr.f32.gmra.mrb[80].mxu1 %v134_v14  ;;  %v180_v14 = vld [vmem:[%s5711_s0 + $0x530] sm:$0xff] }
  0xe4   :  { %737 = vmatprep.mubr.f32.mxu1 %v138_v15 }
  0xe5   :  { %2527 = vmatmul.mubr.f32.gmra.mrb[96].mxu0 %v160_v19 }
  0xe6   :  { %2529 = vmatprep.mubr.msk.f32.mxu0 %vm3126_vm0, %v3127_v6 }
  0xe7   :  { %738 = vmatmul.mubr.f32.gmra.mrb[82].mxu1 %v137_v17  ;;  %v199_v17 = vld [vmem:[%s5711_s0 + $0x5c8] sm:$0xff] }
  0xe8   :  { %742 = vmatprep.mubr.f32.mxu1 %v141_v18 }
  0xe9   :  { %2530 = vmatmul.mubr.f32.gmra.mrb[98].mxu0 %v163_v0 }
  0xea   :  { %2532 = vmatprep.mubr.msk.f32.mxu0 %vm3126_vm0, %v3127_v6 }
  0xeb   :  { %743 = vmatmul.mubr.f32.gmra.mrb[84].mxu1 %v140_v20 }
  0xec   :  { %747 = vmatprep.mubr.f32.mxu1 %v144_v21  ;;  %v179_v21 = vld [vmem:[%s5711_s0 + $0x528] sm:$0xff] }
  0xed   :  { %2533 = vmatmul.mubr.f32.gmra.mrb[100].mxu0 %v166_v24 }
  0xee   :  { %2535 = vmatprep.mubr.msk.f32.mxu0 %vm3126_vm0, %v3127_v6 }
  0xef   :  { %748 = vmatmul.mubr.f32.gmra.mrb[86].mxu1 %v143_v22 }
  0xf0   :  { %752 = vmatprep.mubr.f32.mxu1 %v147_v23  ;;  %v183_v23 = vld [vmem:[%s5711_s0 + $0x548] sm:$0xff] }
  0xf1   :  { %2536 = vmatmul.mubr.f32.gmra.mrb[102].mxu0 %v169_v27 }
  0xf2   :  { %2538 = vmatprep.mubr.msk.f32.mxu0 %vm3126_vm0, %v3127_v6 }
  0xf3   :  { %753 = vmatmul.mubr.f32.gmra.mrb[88].mxu1 %v146_v25 }
  0xf4   :  { %757 = vmatprep.mubr.f32.mxu1 %v150_v26  ;;  %v202_v26 = vld [vmem:[%s5711_s0 + $0x5e0] sm:$0xff] }
  0xf5   :  { %2539 = vmatmul.mubr.f32.gmra.mrb[104].mxu0 %v172_v30  ;;  %v182_v30 = vld [vmem:[%s5711_s0 + $0x540] sm:$0xff] }
  0xf6   :  { %2541 = vmatprep.mubr.msk.f32.mxu0 %vm3126_vm0, %v3127_v6 }
  0xf7   :  { %758 = vmatmul.mubr.f32.gmra.mrb[90].mxu1 %v149_v28 }
  0xf8   :  { %762 = vmatprep.mubr.f32.mxu1 %v153_v29  ;;  %v3874_v35 = vpop.f32.mrb[0].mxu0 }
  0xf9   :  { %v2384_v37 = vpop.f32.mrb[1].mxu0  ;;  %2542 = vmatmul.mubr.f32.gmra.mrb[106].mxu0 %v175_v33  ;;  %v186_v33 = vld [vmem:[%s5711_s0 + $0x560] sm:$0xff] }
  0xfa   :  { %2544 = vmatprep.mubr.msk.f32.mxu0 %vm3126_vm0, %v3127_v6 }
  0xfb   :  { %763 = vmatmul.mubr.f32.gmra.mrb[92].mxu1 %v152_v31 }
  0xfc   :  { %767 = vmatprep.mubr.f32.mxu1 %v156_v32  ;;  %v3887_v40 = vpop.f32.mrb[2].mxu0 }
  0xfd   :  { %v2387_v42 = vpop.f32.mrb[3].mxu0  ;;  %2545 = vmatmul.mubr.f32.gmra.mrb[108].mxu0 %v178_v38 }
  0xfe   :  { %2547 = vmatprep.mubr.msk.f32.mxu0 %vm3126_vm0, %v3127_v6 }
  0xff   :  { %768 = vmatmul.mubr.f32.gmra.mrb[94].mxu1 %v155_v34 }
 0x100   :  { %772 = vmatprep.mubr.f32.mxu1 %v159_v36  ;;  %v3900_v45 = vpop.f32.mrb[4].mxu0  ;;  %v205_v36 = vld [vmem:[%s5711_s0 + $0x5f8] sm:$0xff] }
 0x101   :  { %v2390_v47 = vpop.f32.mrb[5].mxu0  ;;  %2548 = vmatmul.mubr.f32.gmra.mrb[110].mxu0 %v181_v43  ;;  %v189_v43 = vld [vmem:[%s5711_s0 + $0x578] sm:$0xff] }
 0x102   :  { %2550 = vmatprep.mubr.msk.f32.mxu0 %vm3126_vm0, %v3127_v6 }
 0x103   :  { %773 = vmatmul.mubr.f32.gmra.mrb[96].mxu1 %v158_v39 }
 0x104   :  { %777 = vmatprep.mubr.f32.mxu1 %v162_v41  ;;  %v3913_v50 = vpop.f32.mrb[6].mxu0 }
 0x105   :  { %v2393_v52 = vpop.f32.mrb[7].mxu0  ;;  %2551 = vmatmul.mubr.f32.gmra.mrb[112].mxu0 %v184_v48 }
 0x106   :  { %2553 = vmatprep.mubr.msk.f32.mxu0 %vm3126_vm0, %v3127_v6 }
 0x107   :  { %778 = vmatmul.mubr.f32.gmra.mrb[98].mxu1 %v161_v44 }
 0x108   :  { %782 = vmatprep.mubr.f32.mxu1 %v165_v46  ;;  %v3926_v55 = vpop.f32.mrb[8].mxu0  ;;  %v208_v46 = vld [vmem:[%s5711_s0 + $0x610] sm:$0xff] }
 0x109   :  { %v2396_v57 = vpop.f32.mrb[9].mxu0  ;;  %2554 = vmatmul.mubr.f32.gmra.mrb[114].mxu0 %v187_v53  ;;  %v192_v53 = vld [vmem:[%s5711_s0 + $0x590] sm:$0xff] }
 0x10a   :  { %2556 = vmatprep.mubr.msk.f32.mxu0 %vm3126_vm0, %v3127_v6  ;;  %v211_v57 = vld [vmem:[%s5711_s0 + $0x628] sm:$0xff] }
 0x10b   :  { %783 = vmatmul.mubr.f32.gmra.mrb[100].mxu1 %v164_v49 }
 0x10c   :  { %787 = vmatprep.mubr.f32.mxu1 %v168_v51  ;;  %v3939_v60 = vpop.f32.mrb[10].mxu0 }
 0x10d   :  { %v2399_v62 = vpop.f32.mrb[11].mxu0  ;;  %2557 = vmatmul.mubr.f32.gmra.mrb[116].mxu0 %v190_v58 }
 0x10e   :  { %2559 = vmatprep.mubr.msk.f32.mxu0 %vm3126_vm0, %v3127_v6 }
 0x10f   :  { %788 = vmatmul.mubr.f32.gmra.mrb[102].mxu1 %v167_v54 }
 0x110   :  { %792 = vmatprep.mubr.f32.mxu1 %v171_v56  ;;  %v3957_v3 = vpop.f32.mrb[12].mxu0 }
 0x111   :  { %v2402_v5 = vpop.f32.mrb[13].mxu0  ;;  %2560 = vmatmul.mubr.f32.gmra.mrb[118].mxu0 %v193_v63 }
 0x112   :  { %2562 = vmatprep.mubr.msk.f32.mxu0 %vm3126_vm0, %v3127_v6 }
 0x113   :  { %793 = vmatmul.mubr.f32.gmra.mrb[104].mxu1 %v170_v59 }
 0x114   :  { %797 = vmatprep.mubr.f32.mxu1 %v174_v61  ;;  %v3971_v12 = vpop.f32.mrb[14].mxu0 }
 0x115   :  { %v2405_v15 = vpop.f32.mrb[15].mxu0  ;;  %2563 = vmatmul.mubr.f32.gmra.mrb[120].mxu0 %v196_v8 }
 0x116   :  { %v534_v7 = vpop.f32.mrb[0].mxu1  ;;  %2565 = vmatprep.mubr.msk.f32.mxu0 %vm3126_vm0, %v3127_v6 }
 0x117   :  { %v535_v9 = vadd.f32 %v3952_v1, %v534_v7  ;;  %v536_v10 = vpop.f32.mrb[1].mxu1  ;;  %798 = vmatmul.mubr.f32.gmra.mrb[106].mxu1 %v173_v2  ;;  %v195_v2 = vld [vmem:[%s5711_s0 + $0x5a8] sm:$0xff]  ;;  %v214_v7 = vld [vmem:[%s5711_s0 + $0x640] sm:$0xff] }
 0x118   :  { %802 = vmatprep.mubr.f32.mxu1 %v177_v4  ;;  %v3986_v0 = vpop.f32.mrb[16].mxu0 }
 0x119   :  { %v1265_v13 = vadd.f32 %v3874_v35, %v535_v9  ;;  %v2408_v24 = vpop.f32.mrb[17].mxu0  ;;  %2566 = vmatmul.mubr.f32.gmra.mrb[122].mxu0 %v199_v17  ;;  %v217_v17 = vld [vmem:[%s5711_s0 + $0x658] sm:$0xff] }
 0x11a   :  { %v539_v16 = vpop.f32.mrb[2].mxu1  ;;  %2568 = vmatprep.mubr.msk.f32.mxu0 %vm3126_vm0, %v3127_v6 }
 0x11b   :  { %v1928_v18 = vmax.f32 %v1265_v13, 0.0  ;;  %v540_v19 = vadd.f32 %v3952_v1, %v539_v16  ;;  %v541_v20 = vpop.f32.mrb[3].mxu1  ;;  %803 = vmatmul.mubr.f32.gmra.mrb[108].mxu1 %v176_v11 }
 0x11c   :  { %807 = vmatprep.mubr.f32.mxu1 %v180_v14  ;;  %v4005_v31 = vpop.f32.mrb[18].mxu0  ;;  %v198_v14 = vld [vmem:[%s5711_s0 + $0x5c0] sm:$0xff] }
 0x11d   :  { %2062 = vst.msk [vmem:[%s5713_s3] sm:$0xff] %vm2061_vm1, %v1928_v18  ;;  %v1270_v22 = vadd.f32 %v3887_v40, %v540_v19  ;;  %v2411_v34 = vpop.f32.mrb[19].mxu0  ;;  %2569 = vmatmul.mubr.f32.gmra.mrb[124].mxu0 %v202_v26  ;;  %v185_v40 = vld [vmem:[%s5711_s0 + $0x558] sm:$0xff]  ;;  %v220_v26 = vld [vmem:[%s5711_s0 + $0x670] sm:$0xff] }
 0x11e   :  { %v544_v25 = vpop.f32.mrb[4].mxu1  ;;  %2571 = vmatprep.mubr.msk.f32.mxu0 %vm3126_vm0, %v3127_v6 }
 0x11f   :  { %v1929_v27 = vmax.f32 %v1270_v22, 0.0  ;;  %v545_v28 = vadd.f32 %v3952_v1, %v544_v25  ;;  %v546_v29 = vpop.f32.mrb[5].mxu1  ;;  %808 = vmatmul.mubr.f32.gmra.mrb[110].mxu1 %v179_v21 }
 0x120   :  { %812 = vmatprep.mubr.f32.mxu1 %v183_v23  ;;  %v4024_v41 = vpop.f32.mrb[20].mxu0  ;;  %v201_v23 = vld [vmem:[%s5711_s0 + $0x5d8] sm:$0xff] }
 0x121   :  { %2063 = vst.msk [vmem:[%s5713_s3 + $0x8] sm:$0xff] %vm2061_vm1, %v1929_v27  ;;  %v1275_v32 = vadd.f32 %v3900_v45, %v545_v28  ;;  %v2414_v44 = vpop.f32.mrb[21].mxu0  ;;  %2572 = vmatmul.mubr.f32.gmra.mrb[126].mxu0 %v205_v36  ;;  %v223_v36 = vld [vmem:[%s5711_s0 + $0x688] sm:$0xff] }
 0x122   :  { %v549_v35 = vpop.f32.mrb[6].mxu1  ;;  %2574 = vmatprep.mubr.msk.f32.mxu0 %vm3126_vm0, %v3127_v6 }
 0x123   :  { %v1930_v37 = vmax.f32 %v1275_v32, 0.0  ;;  %v550_v38 = vadd.f32 %v3952_v1, %v549_v35  ;;  %v551_v39 = vpop.f32.mrb[7].mxu1  ;;  %813 = vmatmul.mubr.f32.gmra.mrb[112].mxu1 %v182_v30 }
 0x124   :  { %817 = vmatprep.mubr.f32.mxu1 %v186_v33  ;;  %v4043_v51 = vpop.f32.mrb[22].mxu0  ;;  %v204_v33 = vld [vmem:[%s5711_s0 + $0x5f0] sm:$0xff] }
 0x125   :  { %2064 = vst.msk [vmem:[%s5713_s3 + $0x10] sm:$0xff] %vm2061_vm1, %v1930_v37  ;;  %v1280_v42 = vadd.f32 %v3913_v50, %v550_v38  ;;  %v188_v50 = vld [vmem:[%s5711_s0 + $0x570] sm:$0xff]  ;;  %v2417_v54 = vpop.f32.mrb[23].mxu0  ;;  %2575 = vmatmul.mubr.f32.gmra.mrb[128].mxu0 %v208_v46  ;;  %v226_v46 = vld [vmem:[%s5711_s0 + $0x6a0] sm:$0xff] }
 0x126   :  { %v554_v45 = vpop.f32.mrb[8].mxu1  ;;  %2577 = vmatprep.mubr.msk.f32.mxu0 %vm3126_vm0, %v3127_v6 }
 0x127   :  { %v1931_v47 = vmax.f32 %v1280_v42, 0.0  ;;  %v555_v48 = vadd.f32 %v3952_v1, %v554_v45  ;;  %v556_v49 = vpop.f32.mrb[9].mxu1  ;;  %818 = vmatmul.mubr.f32.gmra.mrb[114].mxu1 %v185_v40 }
 0x128   :  { %822 = vmatprep.mubr.f32.mxu1 %v189_v43  ;;  %v4062_v62 = vpop.f32.mrb[24].mxu0  ;;  %v207_v43 = vld [vmem:[%s5711_s0 + $0x608] sm:$0xff] }
 0x129   :  { %2065 = vst.msk [vmem:[%s5713_s3 + $0x18] sm:$0xff] %vm2061_vm1, %v1931_v47  ;;  %v1285_v52 = vadd.f32 %v3926_v55, %v555_v48  ;;  %v191_v55 = vld [vmem:[%s5711_s0 + $0x588] sm:$0xff]  ;;  %v2420_v4 = vpop.f32.mrb[25].mxu0  ;;  %2578 = vmatmul.mubr.f32.gmra.mrb[130].mxu0 %v211_v57  ;;  %v229_v57 = vld [vmem:[%s5711_s0 + $0x6b8] sm:$0xff] }
 0x12a   :  { %v559_v56 = vpop.f32.mrb[10].mxu1  ;;  %2580 = vmatprep.mubr.msk.f32.mxu0 %vm3126_vm0, %v3127_v6 }
 0x12b   :  { %v1932_v58 = vmax.f32 %v1285_v52, 0.0  ;;  %v560_v59 = vadd.f32 %v3952_v1, %v559_v56  ;;  %v561_v61 = vpop.f32.mrb[11].mxu1  ;;  %823 = vmatmul.mubr.f32.gmra.mrb[116].mxu1 %v188_v50 }
 0x12c   :  { %827 = vmatprep.mubr.f32.mxu1 %v192_v53  ;;  %v4081_v11 = vpop.f32.mrb[26].mxu0  ;;  %v210_v53 = vld [vmem:[%s5711_s0 + $0x620] sm:$0xff] }
 0x12d   :  { %2066 = vst.msk [vmem:[%s5713_s3 + $0x20] sm:$0xff] %vm2061_vm1, %v1932_v58  ;;  %v1290_v63 = vadd.f32 %v3939_v60, %v560_v59  ;;  %v194_v60 = vld [vmem:[%s5711_s0 + $0x5a0] sm:$0xff]  ;;  %v2423_v15 = vpop.f32.mrb[27].mxu0  ;;  %2581 = vmatmul.mubr.f32.gmra.mrb[132].mxu0 %v214_v7  ;;  %v232_v7 = vld [vmem:[%s5711_s0 + $0x6d0] sm:$0xff] }
 0x12e   :  { %v564_v5 = vpop.f32.mrb[12].mxu1  ;;  %2583 = vmatprep.mubr.msk.f32.mxu0 %vm3126_vm0, %v3127_v6 }
 0x12f   :  { %v1933_v8 = vmax.f32 %v1290_v63, 0.0  ;;  %v565_v9 = vadd.f32 %v3952_v1, %v564_v5  ;;  %v566_v10 = vpop.f32.mrb[13].mxu1  ;;  %828 = vmatmul.mubr.f32.gmra.mrb[118].mxu1 %v191_v55 }
 0x130   :  { %832 = vmatprep.mubr.f32.mxu1 %v195_v2  ;;  %v4100_v21 = vpop.f32.mrb[28].mxu0  ;;  %v213_v2 = vld [vmem:[%s5711_s0 + $0x638] sm:$0xff] }
 0x131   :  { %2067 = vst.msk [vmem:[%s5713_s3 + $0x28] sm:$0xff] %vm2061_vm1, %v1933_v8  ;;  %v1295_v13 = vadd.f32 %v3957_v3, %v565_v9  ;;  %v197_v3 = vld [vmem:[%s5711_s0 + $0x5b8] sm:$0xff]  ;;  %v2426_v24 = vpop.f32.mrb[29].mxu0  ;;  %2584 = vmatmul.mubr.f32.gmra.mrb[134].mxu0 %v217_v17  ;;  %v235_v17 = vld [vmem:[%s5711_s0 + $0x6e8] sm:$0xff] }
 0x132   :  { %v569_v16 = vpop.f32.mrb[14].mxu1  ;;  %2586 = vmatprep.mubr.msk.f32.mxu0 %vm3126_vm0, %v3127_v6 }
 0x133   :  { %v1934_v18 = vmax.f32 %v1295_v13, 0.0  ;;  %v570_v19 = vadd.f32 %v3952_v1, %v569_v16  ;;  %v571_v20 = vpop.f32.mrb[15].mxu1  ;;  %833 = vmatmul.mubr.f32.gmra.mrb[120].mxu1 %v194_v60 }
 0x134   :  { %837 = vmatprep.mubr.f32.mxu1 %v198_v14  ;;  %v4119_v30 = vpop.f32.mrb[30].mxu0  ;;  %v216_v14 = vld [vmem:[%s5711_s0 + $0x650] sm:$0xff] }
 0x135   :  { %2068 = vst.msk [vmem:[%s5713_s3 + $0x30] sm:$0xff] %vm2061_vm1, %v1934_v18  ;;  %v1300_v22 = vadd.f32 %v3971_v12, %v570_v19  ;;  %v200_v12 = vld [vmem:[%s5711_s0 + $0x5d0] sm:$0xff]  ;;  %v2429_v34 = vpop.f32.mrb[31].mxu0  ;;  %2587 = vmatmul.mubr.f32.gmra.mrb[136].mxu0 %v220_v26  ;;  %v238_v26 = vld [vmem:[%s5711_s0 + $0x700] sm:$0xff] }
 0x136   :  { %v574_v25 = vpop.f32.mrb[16].mxu1  ;;  %2589 = vmatprep.mubr.msk.f32.mxu0 %vm3126_vm0, %v3127_v6 }
 0x137   :  { %v1935_v27 = vmax.f32 %v1300_v22, 0.0  ;;  %v575_v28 = vadd.f32 %v3952_v1, %v574_v25  ;;  %v576_v29 = vpop.f32.mrb[17].mxu1  ;;  %838 = vmatmul.mubr.f32.gmra.mrb[122].mxu1 %v197_v3 }
 0x138   :  { %842 = vmatprep.mubr.f32.mxu1 %v201_v23  ;;  %v4138_v40 = vpop.f32.mrb[32].mxu0  ;;  %v219_v23 = vld [vmem:[%s5711_s0 + $0x668] sm:$0xff] }
 0x139   :  { %2069 = vst.msk [vmem:[%s5713_s3 + $0x38] sm:$0xff] %vm2061_vm1, %v1935_v27  ;;  %v1305_v32 = vadd.f32 %v3986_v0, %v575_v28  ;;  %v203_v0 = vld [vmem:[%s5711_s0 + $0x5e8] sm:$0xff]  ;;  %v2432_v44 = vpop.f32.mrb[33].mxu0  ;;  %2590 = vmatmul.mubr.f32.gmra.mrb[138].mxu0 %v223_v36  ;;  %v241_v36 = vld [vmem:[%s5711_s0 + $0x718] sm:$0xff] }
 0x13a   :  { %v579_v35 = vpop.f32.mrb[18].mxu1  ;;  %2592 = vmatprep.mubr.msk.f32.mxu0 %vm3126_vm0, %v3127_v6 }
 0x13b   :  { %v1936_v37 = vmax.f32 %v1305_v32, 0.0  ;;  %v580_v38 = vadd.f32 %v3952_v1, %v579_v35  ;;  %v581_v39 = vpop.f32.mrb[19].mxu1  ;;  %843 = vmatmul.mubr.f32.gmra.mrb[124].mxu1 %v200_v12 }
 0x13c   :  { %847 = vmatprep.mubr.f32.mxu1 %v204_v33  ;;  %v4157_v50 = vpop.f32.mrb[34].mxu0  ;;  %v222_v33 = vld [vmem:[%s5711_s0 + $0x680] sm:$0xff] }
 0x13d   :  { %2070 = vst.msk [vmem:[%s5713_s3 + $0x40] sm:$0xff] %vm2061_vm1, %v1936_v37  ;;  %v1310_v42 = vadd.f32 %v4005_v31, %v580_v38  ;;  %v206_v31 = vld [vmem:[%s5711_s0 + $0x600] sm:$0xff]  ;;  %v2435_v54 = vpop.f32.mrb[35].mxu0  ;;  %2593 = vmatmul.mubr.f32.gmra.mrb[140].mxu0 %v226_v46  ;;  %v244_v46 = vld [vmem:[%s5711_s0 + $0x730] sm:$0xff] }
 0x13e   :  { %v584_v45 = vpop.f32.mrb[20].mxu1  ;;  %2595 = vmatprep.mubr.msk.f32.mxu0 %vm3126_vm0, %v3127_v6 }
 0x13f   :  { %v1937_v47 = vmax.f32 %v1310_v42, 0.0  ;;  %v585_v48 = vadd.f32 %v3952_v1, %v584_v45  ;;  %v586_v49 = vpop.f32.mrb[21].mxu1  ;;  %848 = vmatmul.mubr.f32.gmra.mrb[126].mxu1 %v203_v0 }
 0x140   :  { %852 = vmatprep.mubr.f32.mxu1 %v207_v43  ;;  %v4176_v55 = vpop.f32.mrb[36].mxu0  ;;  %v225_v43 = vld [vmem:[%s5711_s0 + $0x698] sm:$0xff] }
 0x141   :  { %2071 = vst.msk [vmem:[%s5713_s3 + $0x48] sm:$0xff] %vm2061_vm1, %v1937_v47  ;;  %v1315_v52 = vadd.f32 %v4024_v41, %v585_v48  ;;  %v209_v41 = vld [vmem:[%s5711_s0 + $0x618] sm:$0xff]  ;;  %v2438_v4 = vpop.f32.mrb[37].mxu0  ;;  %2596 = vmatmul.mubr.f32.gmra.mrb[142].mxu0 %v229_v57  ;;  %v247_v57 = vld [vmem:[%s5711_s0 + $0x748] sm:$0xff] }
 0x142   :  { %v589_v56 = vpop.f32.mrb[22].mxu1  ;;  %2598 = vmatprep.mubr.msk.f32.mxu0 %vm3126_vm0, %v3127_v6 }
 0x143   :  { %v1938_v58 = vmax.f32 %v1315_v52, 0.0  ;;  %v590_v59 = vadd.f32 %v3952_v1, %v589_v56  ;;  %v591_v61 = vpop.f32.mrb[23].mxu1  ;;  %853 = vmatmul.mubr.f32.gmra.mrb[128].mxu1 %v206_v31 }
 0x144   :  { %857 = vmatprep.mubr.f32.mxu1 %v210_v53  ;;  %v4195_v60 = vpop.f32.mrb[38].mxu0  ;;  %v228_v53 = vld [vmem:[%s5711_s0 + $0x6b0] sm:$0xff] }
 0x145   :  { %2072 = vst.msk [vmem:[%s5713_s3 + $0x50] sm:$0xff] %vm2061_vm1, %v1938_v58  ;;  %v1320_v63 = vadd.f32 %v4043_v51, %v590_v59  ;;  %v212_v51 = vld [vmem:[%s5711_s0 + $0x630] sm:$0xff]  ;;  %v2441_v15 = vpop.f32.mrb[39].mxu0  ;;  %2599 = vmatmul.mubr.f32.gmra.mrb[144].mxu0 %v232_v7  ;;  %v250_v7 = vld [vmem:[%s5711_s0 + $0x760] sm:$0xff] }
 0x146   :  { %v594_v5 = vpop.f32.mrb[24].mxu1  ;;  %2601 = vmatprep.mubr.msk.f32.mxu0 %vm3126_vm0, %v3127_v6 }
 0x147   :  { %v1939_v8 = vmax.f32 %v1320_v63, 0.0  ;;  %v595_v9 = vadd.f32 %v3952_v1, %v594_v5  ;;  %v596_v10 = vpop.f32.mrb[25].mxu1  ;;  %858 = vmatmul.mubr.f32.gmra.mrb[130].mxu1 %v209_v41 }
 0x148   :  { %862 = vmatprep.mubr.f32.mxu1 %v213_v2  ;;  %v4214_v3 = vpop.f32.mrb[40].mxu0  ;;  %v231_v2 = vld [vmem:[%s5711_s0 + $0x6c8] sm:$0xff] }
 0x149   :  { %2073 = vst.msk [vmem:[%s5713_s3 + $0x58] sm:$0xff] %vm2061_vm1, %v1939_v8  ;;  %v1325_v13 = vadd.f32 %v4062_v62, %v595_v9  ;;  %v215_v62 = vld [vmem:[%s5711_s0 + $0x648] sm:$0xff]  ;;  %v2444_v24 = vpop.f32.mrb[41].mxu0  ;;  %2602 = vmatmul.mubr.f32.gmra.mrb[146].mxu0 %v235_v17  ;;  %v253_v17 = vld [vmem:[%s5711_s0 + $0x778] sm:$0xff] }
 0x14a   :  { %v599_v16 = vpop.f32.mrb[26].mxu1  ;;  %2604 = vmatprep.mubr.msk.f32.mxu0 %vm3126_vm0, %v3127_v6 }
 0x14b   :  { %v1940_v18 = vmax.f32 %v1325_v13, 0.0  ;;  %v600_v19 = vadd.f32 %v3952_v1, %v599_v16  ;;  %v601_v20 = vpop.f32.mrb[27].mxu1  ;;  %863 = vmatmul.mubr.f32.gmra.mrb[132].mxu1 %v212_v51 }
 0x14c   :  { %867 = vmatprep.mubr.f32.mxu1 %v216_v14  ;;  %v4233_v12 = vpop.f32.mrb[42].mxu0  ;;  %v234_v14 = vld [vmem:[%s5711_s0 + $0x6e0] sm:$0xff] }
 0x14d   :  { %2074 = vst.msk [vmem:[%s5713_s3 + $0x60] sm:$0xff] %vm2061_vm1, %v1940_v18  ;;  %v1330_v22 = vadd.f32 %v4081_v11, %v600_v19  ;;  %v218_v11 = vld [vmem:[%s5711_s0 + $0x660] sm:$0xff]  ;;  %v2447_v34 = vpop.f32.mrb[43].mxu0  ;;  %2605 = vmatmul.mubr.f32.gmra.mrb[148].mxu0 %v238_v26  ;;  %v256_v26 = vld [vmem:[%s5711_s0 + $0x790] sm:$0xff] }
 0x14e   :  { %v604_v25 = vpop.f32.mrb[28].mxu1  ;;  %2607 = vmatprep.mubr.msk.f32.mxu0 %vm3126_vm0, %v3127_v6 }
 0x14f   :  { %v1941_v27 = vmax.f32 %v1330_v22, 0.0  ;;  %v605_v28 = vadd.f32 %v3952_v1, %v604_v25  ;;  %v606_v29 = vpop.f32.mrb[29].mxu1  ;;  %868 = vmatmul.mubr.f32.gmra.mrb[134].mxu1 %v215_v62 }
 0x150   :  { %872 = vmatprep.mubr.f32.mxu1 %v219_v23  ;;  %v4252_v0 = vpop.f32.mrb[44].mxu0  ;;  %v237_v23 = vld [vmem:[%s5711_s0 + $0x6f8] sm:$0xff] }
 0x151   :  { %2075 = vst.msk [vmem:[%s5713_s3 + $0x68] sm:$0xff] %vm2061_vm1, %v1941_v27  ;;  %v1335_v32 = vadd.f32 %v4100_v21, %v605_v28  ;;  %v221_v21 = vld [vmem:[%s5711_s0 + $0x678] sm:$0xff]  ;;  %v2450_v44 = vpop.f32.mrb[45].mxu0  ;;  %2608 = vmatmul.mubr.f32.gmra.mrb[150].mxu0 %v241_v36  ;;  %v259_v36 = vld [vmem:[%s5711_s0 + $0x7a8] sm:$0xff] }
 0x152   :  { %v609_v35 = vpop.f32.mrb[30].mxu1  ;;  %2610 = vmatprep.mubr.msk.f32.mxu0 %vm3126_vm0, %v3127_v6 }
 0x153   :  { %v1942_v37 = vmax.f32 %v1335_v32, 0.0  ;;  %v610_v38 = vadd.f32 %v3952_v1, %v609_v35  ;;  %v611_v39 = vpop.f32.mrb[31].mxu1  ;;  %873 = vmatmul.mubr.f32.gmra.mrb[136].mxu1 %v218_v11 }
 0x154   :  { %877 = vmatprep.mubr.f32.mxu1 %v222_v33  ;;  %v4271_v31 = vpop.f32.mrb[46].mxu0  ;;  %v240_v33 = vld [vmem:[%s5711_s0 + $0x710] sm:$0xff] }
 0x155   :  { %2076 = vst.msk [vmem:[%s5713_s3 + $0x70] sm:$0xff] %vm2061_vm1, %v1942_v37  ;;  %v1340_v42 = vadd.f32 %v4119_v30, %v610_v38  ;;  %v224_v30 = vld [vmem:[%s5711_s0 + $0x690] sm:$0xff]  ;;  %v2453_v54 = vpop.f32.mrb[47].mxu0  ;;  %2611 = vmatmul.mubr.f32.gmra.mrb[152].mxu0 %v244_v46  ;;  %v262_v46 = vld [vmem:[%s5711_s0 + $0x7c0] sm:$0xff] }
 0x156   :  { %v614_v45 = vpop.f32.mrb[32].mxu1  ;;  %2613 = vmatprep.mubr.msk.f32.mxu0 %vm3126_vm0, %v3127_v6 }
 0x157   :  { %v1943_v47 = vmax.f32 %v1340_v42, 0.0  ;;  %v615_v48 = vadd.f32 %v3952_v1, %v614_v45  ;;  %v616_v49 = vpop.f32.mrb[33].mxu1  ;;  %878 = vmatmul.mubr.f32.gmra.mrb[138].mxu1 %v221_v21 }
 0x158   :  { %882 = vmatprep.mubr.f32.mxu1 %v225_v43  ;;  %v4290_v41 = vpop.f32.mrb[48].mxu0  ;;  %v243_v43 = vld [vmem:[%s5711_s0 + $0x728] sm:$0xff] }
 0x159   :  { %2077 = vst.msk [vmem:[%s5713_s3 + $0x78] sm:$0xff] %vm2061_vm1, %v1943_v47  ;;  %v1345_v52 = vadd.f32 %v4138_v40, %v615_v48  ;;  %v227_v40 = vld [vmem:[%s5711_s0 + $0x6a8] sm:$0xff]  ;;  %v2456_v4 = vpop.f32.mrb[49].mxu0  ;;  %2614 = vmatmul.mubr.f32.gmra.mrb[154].mxu0 %v247_v57  ;;  %v265_v57 = vld [vmem:[%s5711_s0 + $0x7d8] sm:$0xff] }
 0x15a   :  { %v619_v56 = vpop.f32.mrb[34].mxu1  ;;  %2616 = vmatprep.mubr.msk.f32.mxu0 %vm3126_vm0, %v3127_v6 }
 0x15b   :  { %v1944_v58 = vmax.f32 %v1345_v52, 0.0  ;;  %v620_v59 = vadd.f32 %v3952_v1, %v619_v56  ;;  %v621_v61 = vpop.f32.mrb[35].mxu1  ;;  %883 = vmatmul.mubr.f32.gmra.mrb[140].mxu1 %v224_v30 }
 0x15c   :  { %887 = vmatprep.mubr.f32.mxu1 %v228_v53  ;;  %v4309_v51 = vpop.f32.mrb[50].mxu0  ;;  %v246_v53 = vld [vmem:[%s5711_s0 + $0x740] sm:$0xff] }
 0x15d   :  { %2078 = vst.msk [vmem:[%s5713_s3 + $0x80] sm:$0xff] %vm2061_vm1, %v1944_v58  ;;  %v1350_v63 = vadd.f32 %v4157_v50, %v620_v59  ;;  %v230_v50 = vld [vmem:[%s5711_s0 + $0x6c0] sm:$0xff]  ;;  %v2459_v15 = vpop.f32.mrb[51].mxu0  ;;  %2617 = vmatmul.mubr.f32.gmra.mrb[156].mxu0 %v250_v7  ;;  %v268_v7 = vld [vmem:[%s5711_s0 + $0x7f0] sm:$0xff] }
 0x15e   :  { %v624_v5 = vpop.f32.mrb[36].mxu1  ;;  %2619 = vmatprep.mubr.msk.f32.mxu0 %vm3126_vm0, %v3127_v6 }
 0x15f   :  { %v1945_v8 = vmax.f32 %v1350_v63, 0.0  ;;  %v625_v9 = vadd.f32 %v3952_v1, %v624_v5  ;;  %v626_v10 = vpop.f32.mrb[37].mxu1  ;;  %888 = vmatmul.mubr.f32.gmra.mrb[142].mxu1 %v227_v40 }
 0x160   :  { %892 = vmatprep.mubr.f32.mxu1 %v231_v2  ;;  %v4328_v62 = vpop.f32.mrb[52].mxu0  ;;  %v249_v2 = vld [vmem:[%s5711_s0 + $0x758] sm:$0xff] }
 0x161   :  { %2079 = vst.msk [vmem:[%s5713_s3 + $0x88] sm:$0xff] %vm2061_vm1, %v1945_v8  ;;  %v1355_v13 = vadd.f32 %v4176_v55, %v625_v9  ;;  %v233_v55 = vld [vmem:[%s5711_s0 + $0x6d8] sm:$0xff]  ;;  %v2462_v24 = vpop.f32.mrb[53].mxu0  ;;  %2620 = vmatmul.mubr.f32.gmra.mrb[158].mxu0 %v253_v17  ;;  %v271_v17 = vld [vmem:[%s5711_s0 + $0x808] sm:$0xff] }
 0x162   :  { %v629_v16 = vpop.f32.mrb[38].mxu1  ;;  %2622 = vmatprep.mubr.msk.f32.mxu0 %vm3126_vm0, %v3127_v6 }
 0x163   :  { %v1946_v18 = vmax.f32 %v1355_v13, 0.0  ;;  %v630_v19 = vadd.f32 %v3952_v1, %v629_v16  ;;  %v631_v20 = vpop.f32.mrb[39].mxu1  ;;  %893 = vmatmul.mubr.f32.gmra.mrb[144].mxu1 %v230_v50 }
 0x164   :  { %897 = vmatprep.mubr.f32.mxu1 %v234_v14  ;;  %v4347_v11 = vpop.f32.mrb[54].mxu0  ;;  %v252_v14 = vld [vmem:[%s5711_s0 + $0x770] sm:$0xff] }
 0x165   :  { %2080 = vst.msk [vmem:[%s5713_s3 + $0x90] sm:$0xff] %vm2061_vm1, %v1946_v18  ;;  %v1360_v22 = vadd.f32 %v4195_v60, %v630_v19  ;;  %v236_v60 = vld [vmem:[%s5711_s0 + $0x6f0] sm:$0xff]  ;;  %v2465_v34 = vpop.f32.mrb[55].mxu0  ;;  %2623 = vmatmul.mubr.f32.gmra.mrb[160].mxu0 %v256_v26  ;;  %v274_v26 = vld [vmem:[%s5711_s0 + $0x820] sm:$0xff] }
 0x166   :  { %v634_v25 = vpop.f32.mrb[40].mxu1  ;;  %2625 = vmatprep.mubr.msk.f32.mxu0 %vm3126_vm0, %v3127_v6 }
 0x167   :  { %v1947_v27 = vmax.f32 %v1360_v22, 0.0  ;;  %v635_v28 = vadd.f32 %v3952_v1, %v634_v25  ;;  %v636_v29 = vpop.f32.mrb[41].mxu1  ;;  %898 = vmatmul.mubr.f32.gmra.mrb[146].mxu1 %v233_v55 }
 0x168   :  { %902 = vmatprep.mubr.f32.mxu1 %v237_v23  ;;  %v4366_v21 = vpop.f32.mrb[56].mxu0  ;;  %v255_v23 = vld [vmem:[%s5711_s0 + $0x788] sm:$0xff] }
 0x169   :  { %2081 = vst.msk [vmem:[%s5713_s3 + $0x98] sm:$0xff] %vm2061_vm1, %v1947_v27  ;;  %v1365_v32 = vadd.f32 %v4214_v3, %v635_v28  ;;  %v239_v3 = vld [vmem:[%s5711_s0 + $0x708] sm:$0xff]  ;;  %v2468_v44 = vpop.f32.mrb[57].mxu0  ;;  %2626 = vmatmul.mubr.f32.gmra.mrb[162].mxu0 %v259_v36  ;;  %v277_v36 = vld [vmem:[%s5711_s0 + $0x838] sm:$0xff] }
 0x16a   :  { %v639_v35 = vpop.f32.mrb[42].mxu1  ;;  %2628 = vmatprep.mubr.msk.f32.mxu0 %vm3126_vm0, %v3127_v6 }
 0x16b   :  { %v1948_v37 = vmax.f32 %v1365_v32, 0.0  ;;  %v640_v38 = vadd.f32 %v3952_v1, %v639_v35  ;;  %v641_v39 = vpop.f32.mrb[43].mxu1  ;;  %903 = vmatmul.mubr.f32.gmra.mrb[148].mxu1 %v236_v60 }
 0x16c   :  { %907 = vmatprep.mubr.f32.mxu1 %v240_v33  ;;  %v4385_v30 = vpop.f32.mrb[58].mxu0  ;;  %v258_v33 = vld [vmem:[%s5711_s0 + $0x7a0] sm:$0xff] }
 0x16d   :  { %2082 = vst.msk [vmem:[%s5713_s3 + $0xa0] sm:$0xff] %vm2061_vm1, %v1948_v37  ;;  %v1370_v42 = vadd.f32 %v4233_v12, %v640_v38  ;;  %v242_v12 = vld [vmem:[%s5711_s0 + $0x720] sm:$0xff]  ;;  %v2471_v54 = vpop.f32.mrb[59].mxu0  ;;  %2629 = vmatmul.mubr.f32.gmra.mrb[164].mxu0 %v262_v46  ;;  %v280_v46 = vld [vmem:[%s5711_s0 + $0x850] sm:$0xff] }
 0x16e   :  { %v644_v45 = vpop.f32.mrb[44].mxu1  ;;  %2631 = vmatprep.mubr.msk.f32.mxu0 %vm3126_vm0, %v3127_v6 }
 0x16f   :  { %v1949_v47 = vmax.f32 %v1370_v42, 0.0  ;;  %v645_v48 = vadd.f32 %v3952_v1, %v644_v45  ;;  %v646_v49 = vpop.f32.mrb[45].mxu1  ;;  %908 = vmatmul.mubr.f32.gmra.mrb[150].mxu1 %v239_v3 }
 0x170   :  { %912 = vmatprep.mubr.f32.mxu1 %v243_v43  ;;  %v4404_v40 = vpop.f32.mrb[60].mxu0  ;;  %v261_v43 = vld [vmem:[%s5711_s0 + $0x7b8] sm:$0xff] }
 0x171   :  { %2083 = vst.msk [vmem:[%s5713_s3 + $0xa8] sm:$0xff] %vm2061_vm1, %v1949_v47  ;;  %v1375_v52 = vadd.f32 %v4252_v0, %v645_v48  ;;  %v245_v0 = vld [vmem:[%s5711_s0 + $0x738] sm:$0xff]  ;;  %v2474_v4 = vpop.f32.mrb[61].mxu0  ;;  %2632 = vmatmul.mubr.f32.gmra.mrb[166].mxu0 %v265_v57  ;;  %v283_v57 = vld [vmem:[%s5711_s0 + $0x868] sm:$0xff] }
 0x172   :  { %v649_v56 = vpop.f32.mrb[46].mxu1  ;;  %2634 = vmatprep.mubr.msk.f32.mxu0 %vm3126_vm0, %v3127_v6 }
 0x173   :  { %v1950_v58 = vmax.f32 %v1375_v52, 0.0  ;;  %v650_v59 = vadd.f32 %v3952_v1, %v649_v56  ;;  %v651_v61 = vpop.f32.mrb[47].mxu1  ;;  %913 = vmatmul.mubr.f32.gmra.mrb[152].mxu1 %v242_v12 }
 0x174   :  { %917 = vmatprep.mubr.f32.mxu1 %v246_v53  ;;  %v4423_v50 = vpop.f32.mrb[62].mxu0  ;;  %v264_v53 = vld [vmem:[%s5711_s0 + $0x7d0] sm:$0xff] }
 0x175   :  { %2084 = vst.msk [vmem:[%s5713_s3 + $0xb0] sm:$0xff] %vm2061_vm1, %v1950_v58  ;;  %v1380_v63 = vadd.f32 %v4271_v31, %v650_v59  ;;  %v248_v31 = vld [vmem:[%s5711_s0 + $0x750] sm:$0xff]  ;;  %v2477_v15 = vpop.f32.mrb[63].mxu0  ;;  %2635 = vmatmul.mubr.f32.gmra.mrb[168].mxu0 %v268_v7  ;;  %v286_v7 = vld [vmem:[%s5711_s0 + $0x880] sm:$0xff] }
 0x176   :  { %v654_v5 = vpop.f32.mrb[48].mxu1  ;;  %2637 = vmatprep.mubr.msk.f32.mxu0 %vm3126_vm0, %v3127_v6 }
 0x177   :  { %v1951_v8 = vmax.f32 %v1380_v63, 0.0  ;;  %v655_v9 = vadd.f32 %v3952_v1, %v654_v5  ;;  %v656_v10 = vpop.f32.mrb[49].mxu1  ;;  %918 = vmatmul.mubr.f32.gmra.mrb[154].mxu1 %v245_v0 }
 0x178   :  { %922 = vmatprep.mubr.f32.mxu1 %v249_v2  ;;  %v4442_v55 = vpop.f32.mrb[64].mxu0  ;;  %v267_v2 = vld [vmem:[%s5711_s0 + $0x7e8] sm:$0xff] }
 0x179   :  { %2085 = vst.msk [vmem:[%s5713_s3 + $0xb8] sm:$0xff] %vm2061_vm1, %v1951_v8  ;;  %v1385_v13 = vadd.f32 %v4290_v41, %v655_v9  ;;  %v251_v41 = vld [vmem:[%s5711_s0 + $0x768] sm:$0xff]  ;;  %v2480_v24 = vpop.f32.mrb[65].mxu0  ;;  %2638 = vmatmul.mubr.f32.gmra.mrb[170].mxu0 %v271_v17  ;;  %v289_v17 = vld [vmem:[%s5711_s0 + $0x898] sm:$0xff] }
 0x17a   :  { %v659_v16 = vpop.f32.mrb[50].mxu1  ;;  %2640 = vmatprep.mubr.msk.f32.mxu0 %vm3126_vm0, %v3127_v6 }
 0x17b   :  { %v1952_v18 = vmax.f32 %v1385_v13, 0.0  ;;  %v660_v19 = vadd.f32 %v3952_v1, %v659_v16  ;;  %v661_v20 = vpop.f32.mrb[51].mxu1  ;;  %923 = vmatmul.mubr.f32.gmra.mrb[156].mxu1 %v248_v31 }
 0x17c   :  { %927 = vmatprep.mubr.f32.mxu1 %v252_v14  ;;  %v4461_v60 = vpop.f32.mrb[66].mxu0  ;;  %v270_v14 = vld [vmem:[%s5711_s0 + $0x800] sm:$0xff] }
 0x17d   :  { %2086 = vst.msk [vmem:[%s5713_s3 + $0xc0] sm:$0xff] %vm2061_vm1, %v1952_v18  ;;  %v1390_v22 = vadd.f32 %v4309_v51, %v660_v19  ;;  %v254_v51 = vld [vmem:[%s5711_s0 + $0x780] sm:$0xff]  ;;  %v2483_v34 = vpop.f32.mrb[67].mxu0  ;;  %2641 = vmatmul.mubr.f32.gmra.mrb[172].mxu0 %v274_v26  ;;  %v292_v26 = vld [vmem:[%s5711_s0 + $0x8b0] sm:$0xff] }
 0x17e   :  { %v664_v25 = vpop.f32.mrb[52].mxu1  ;;  %2643 = vmatprep.mubr.msk.f32.mxu0 %vm3126_vm0, %v3127_v6 }
 0x17f   :  { %v1953_v27 = vmax.f32 %v1390_v22, 0.0  ;;  %v665_v28 = vadd.f32 %v3952_v1, %v664_v25  ;;  %v666_v29 = vpop.f32.mrb[53].mxu1  ;;  %928 = vmatmul.mubr.f32.gmra.mrb[158].mxu1 %v251_v41 }
 0x180   :  { %932 = vmatprep.mubr.f32.mxu1 %v255_v23  ;;  %v4480_v3 = vpop.f32.mrb[68].mxu0  ;;  %v273_v23 = vld [vmem:[%s5711_s0 + $0x818] sm:$0xff] }
 0x181   :  { %2087 = vst.msk [vmem:[%s5713_s3 + $0xc8] sm:$0xff] %vm2061_vm1, %v1953_v27  ;;  %v1395_v32 = vadd.f32 %v4328_v62, %v665_v28  ;;  %v257_v62 = vld [vmem:[%s5711_s0 + $0x798] sm:$0xff]  ;;  %v2486_v44 = vpop.f32.mrb[69].mxu0  ;;  %2644 = vmatmul.mubr.f32.gmra.mrb[174].mxu0 %v277_v36  ;;  %v295_v36 = vld [vmem:[%s5711_s0 + $0x8c8] sm:$0xff] }
 0x182   :  { %v669_v35 = vpop.f32.mrb[54].mxu1  ;;  %2646 = vmatprep.mubr.msk.f32.mxu0 %vm3126_vm0, %v3127_v6 }
 0x183   :  { %v1954_v37 = vmax.f32 %v1395_v32, 0.0  ;;  %v670_v38 = vadd.f32 %v3952_v1, %v669_v35  ;;  %v671_v39 = vpop.f32.mrb[55].mxu1  ;;  %933 = vmatmul.mubr.f32.gmra.mrb[160].mxu1 %v254_v51 }
 0x184   :  { %937 = vmatprep.mubr.f32.mxu1 %v258_v33  ;;  %v4499_v12 = vpop.f32.mrb[70].mxu0  ;;  %v276_v33 = vld [vmem:[%s5711_s0 + $0x830] sm:$0xff] }
 0x185   :  { %2088 = vst.msk [vmem:[%s5713_s3 + $0xd0] sm:$0xff] %vm2061_vm1, %v1954_v37  ;;  %v1400_v42 = vadd.f32 %v4347_v11, %v670_v38  ;;  %v260_v11 = vld [vmem:[%s5711_s0 + $0x7b0] sm:$0xff]  ;;  %v2489_v54 = vpop.f32.mrb[71].mxu0  ;;  %2647 = vmatmul.mubr.f32.gmra.mrb[176].mxu0 %v280_v46 }
 0x186   :  { %v674_v45 = vpop.f32.mrb[56].mxu1  ;;  %2649 = vmatprep.mubr.msk.f32.mxu0 %vm3126_vm0, %v3127_v6 }
 0x187   :  { %v1955_v47 = vmax.f32 %v1400_v42, 0.0  ;;  %v675_v48 = vadd.f32 %v3952_v1, %v674_v45  ;;  %v676_v49 = vpop.f32.mrb[57].mxu1  ;;  %938 = vmatmul.mubr.f32.gmra.mrb[162].mxu1 %v257_v62  ;;  %v298_v45 = vld [vmem:[%s5711_s0 + $0x8e0] sm:$0xff] }
 0x188   :  { %942 = vmatprep.mubr.f32.mxu1 %v261_v43  ;;  %v4518_v0 = vpop.f32.mrb[72].mxu0  ;;  %v278_v49 = vld [vmem:[%s5711_s0 + $0x840] sm:$0xff] }
 0x189   :  { %2089 = vst.msk [vmem:[%s5713_s3 + $0xd8] sm:$0xff] %vm2061_vm1, %v1955_v47  ;;  %v1405_v52 = vadd.f32 %v4366_v21, %v675_v48  ;;  %v263_v21 = vld [vmem:[%s5711_s0 + $0x7c8] sm:$0xff]  ;;  %v2492_v4 = vpop.f32.mrb[73].mxu0  ;;  %2650 = vmatmul.mubr.f32.gmra.mrb[178].mxu0 %v283_v57  ;;  %v4612_v47 = vld [vmem:[%s5712_s2] ss:$0 sm:$0xff]  ;;  %v301_v57 = vld [vmem:[%s5711_s0 + $0x8f8] sm:$0xff] }
 0x18a   :  { %v679_v56 = vpop.f32.mrb[58].mxu1  ;;  %2652 = vmatprep.mubr.msk.f32.mxu0 %vm3126_vm0, %v3127_v6 }
 0x18b   :  { %v1956_v58 = vmax.f32 %v1405_v52, 0.0  ;;  %v680_v59 = vadd.f32 %v3952_v1, %v679_v56  ;;  %v681_v61 = vpop.f32.mrb[59].mxu1  ;;  %943 = vmatmul.mubr.f32.gmra.mrb[164].mxu1 %v260_v11 }
 0x18c   :  { %947 = vmatprep.mubr.f32.mxu1 %v264_v53  ;;  %v4537_v31 = vpop.f32.mrb[74].mxu0  ;;  %v282_v53 = vld [vmem:[%s5711_s0 + $0x860] sm:$0xff] }
 0x18d   :  { %2090 = vst.msk [vmem:[%s5713_s3 + $0xe0] sm:$0xff] %vm2061_vm1, %v1956_v58  ;;  %v1410_v63 = vadd.f32 %v4385_v30, %v680_v59  ;;  %v266_v30 = vld [vmem:[%s5711_s0 + $0x7e0] sm:$0xff]  ;;  %v2495_v15 = vpop.f32.mrb[75].mxu0  ;;  %2653 = vmatmul.mubr.f32.gmra.mrb[180].mxu0 %v286_v7  ;;  %v304_v7 = vld [vmem:[%s5711_s0 + $0x910] sm:$0xff] }
 0x18e   :  { %v684_v5 = vpop.f32.mrb[60].mxu1  ;;  %2655 = vmatprep.mubr.msk.f32.mxu0 %vm3126_vm0, %v3127_v6 }
 0x18f   :  { %v1957_v8 = vmax.f32 %v1410_v63, 0.0  ;;  %v685_v9 = vadd.f32 %v3952_v1, %v684_v5  ;;  %v686_v10 = vpop.f32.mrb[61].mxu1  ;;  %948 = vmatmul.mubr.f32.gmra.mrb[166].mxu1 %v263_v21 }
 0x190   :  { %952 = vmatprep.mubr.f32.mxu1 %v267_v2  ;;  %v4556_v41 = vpop.f32.mrb[76].mxu0  ;;  %v285_v2 = vld [vmem:[%s5711_s0 + $0x878] sm:$0xff] }
 0x191   :  { %2091 = vst.msk [vmem:[%s5713_s3 + $0xe8] sm:$0xff] %vm2061_vm1, %v1957_v8  ;;  %v1415_v13 = vadd.f32 %v4404_v40, %v685_v9  ;;  %v269_v40 = vld [vmem:[%s5711_s0 + $0x7f8] sm:$0xff]  ;;  %v2498_v24 = vpop.f32.mrb[77].mxu0  ;;  %2656 = vmatmul.mubr.f32.gmra.mrb[182].mxu0 %v289_v17  ;;  %v307_v17 = vld [vmem:[%s5711_s0 + $0x928] sm:$0xff] }
 0x192   :  { %v689_v16 = vpop.f32.mrb[62].mxu1  ;;  %2658 = vmatprep.mubr.msk.f32.mxu0 %vm3126_vm0, %v3127_v6 }
 0x193   :  { %v1958_v18 = vmax.f32 %v1415_v13, 0.0  ;;  %v690_v19 = vadd.f32 %v3952_v1, %v689_v16  ;;  %v691_v20 = vpop.f32.mrb[63].mxu1  ;;  %953 = vmatmul.mubr.f32.gmra.mrb[168].mxu1 %v266_v30 }
 0x194   :  { %957 = vmatprep.mubr.f32.mxu1 %v270_v14  ;;  %v4575_v51 = vpop.f32.mrb[78].mxu0  ;;  %v288_v14 = vld [vmem:[%s5711_s0 + $0x890] sm:$0xff] }
 0x195   :  { %2092 = vst.msk [vmem:[%s5713_s3 + $0xf0] sm:$0xff] %vm2061_vm1, %v1958_v18  ;;  %v1420_v22 = vadd.f32 %v4423_v50, %v690_v19  ;;  %v272_v50 = vld [vmem:[%s5711_s0 + $0x810] sm:$0xff]  ;;  %v2501_v34 = vpop.f32.mrb[79].mxu0  ;;  %2659 = vmatmul.mubr.f32.gmra.mrb[184].mxu0 %v292_v26  ;;  %v310_v26 = vld [vmem:[%s5711_s0 + $0x940] sm:$0xff] }
 0x196   :  { %v694_v25 = vpop.f32.mrb[64].mxu1  ;;  %2661 = vmatprep.mubr.msk.f32.mxu0 %vm3126_vm0, %v3127_v6 }
 0x197   :  { %v1959_v27 = vmax.f32 %v1420_v22, 0.0  ;;  %v695_v28 = vadd.f32 %v3952_v1, %v694_v25  ;;  %v696_v29 = vpop.f32.mrb[65].mxu1  ;;  %958 = vmatmul.mubr.f32.gmra.mrb[170].mxu1 %v269_v40 }
 0x198   :  { %962 = vmatprep.mubr.f32.mxu1 %v273_v23  ;;  %v4594_v62 = vpop.f32.mrb[80].mxu0  ;;  %v291_v23 = vld [vmem:[%s5711_s0 + $0x8a8] sm:$0xff] }
 0x199   :  { %2093 = vst.msk [vmem:[%s5713_s3 + $0xf8] sm:$0xff] %vm2061_vm1, %v1959_v27  ;;  %v1425_v32 = vadd.f32 %v4442_v55, %v695_v28  ;;  %v275_v55 = vld [vmem:[%s5711_s0 + $0x828] sm:$0xff]  ;;  %v2504_v43 = vpop.f32.mrb[81].mxu0  ;;  %2662 = vmatmul.mubr.f32.gmra.mrb[186].mxu0 %v295_v36  ;;  %v313_v36 = vld [vmem:[%s5711_s0 + $0x958] sm:$0xff] }
 0x19a   :  { %v699_v35 = vpop.f32.mrb[66].mxu1  ;;  %2664 = vmatprep.mubr.msk.f32.mxu0 %vm3126_vm0, %v3127_v6 }
 0x19b   :  { %v1960_v37 = vmax.f32 %v1425_v32, 0.0  ;;  %v700_v38 = vadd.f32 %v3952_v1, %v699_v35  ;;  %v701_v39 = vpop.f32.mrb[67].mxu1  ;;  %963 = vmatmul.mubr.f32.gmra.mrb[172].mxu1 %v272_v50  ;;  %v279_v1 = vld [vmem:[%s5711_s0 + $0x848] sm:$0xff] }
 0x19c   :  { %967 = vmatprep.mubr.f32.mxu1 %v276_v33  ;;  %v4618_v11 = vpop.f32.mrb[82].mxu0  ;;  %v294_v33 = vld [vmem:[%s5711_s0 + $0x8c0] sm:$0xff] }
 0x19d   :  { %2094 = vst.msk [vmem:[%s5713_s3 + $0x100] sm:$0xff] %vm2061_vm1, %v1960_v37  ;;  %v1430_v42 = vadd.f32 %v4461_v60, %v700_v38  ;;  %v2507_v54 = vpop.f32.mrb[83].mxu0  ;;  %2665 = vmatmul.mubr.f32.gmra.mrb[188].mxu0 %v298_v45  ;;  %v316_v45 = vld [vmem:[%s5711_s0 + $0x970] sm:$0xff] }
 0x19e   :  { %v704_v44 = vpop.f32.mrb[68].mxu1  ;;  %2667 = vmatprep.mubr.msk.f32.mxu0 %vm3126_vm0, %v3127_v6 }
 0x19f   :  { %v1961_v46 = vmax.f32 %v1430_v42, 0.0  ;;  %v705_v60 = vadd.f32 %v4612_v47, %v704_v44  ;;  %v706_v48 = vpop.f32.mrb[69].mxu1  ;;  %968 = vmatmul.mubr.f32.gmra.mrb[174].mxu1 %v275_v55 }
 0x1a0   :  { %972 = vmatprep.mubr.f32.mxu1 %v279_v1  ;;  %v4637_v21 = vpop.f32.mrb[84].mxu0  ;;  %v297_v1 = vld [vmem:[%s5711_s0 + $0x8d8] sm:$0xff] }
 0x1a1   :  { %2095 = vst.msk [vmem:[%s5713_s3 + $0x108] sm:$0xff] %vm2061_vm1, %v1961_v46  ;;  %v1435_v52 = vadd.f32 %v4480_v3, %v705_v60  ;;  %v281_v3 = vld [vmem:[%s5711_s0 + $0x858] sm:$0xff]  ;;  %v2510_v4 = vpop.f32.mrb[85].mxu0  ;;  %2668 = vmatmul.mubr.f32.gmra.mrb[190].mxu0 %v301_v57  ;;  %v319_v57 = vld [vmem:[%s5711_s0 + $0x988] sm:$0xff] }
 0x1a2   :  { %v709_v56 = vpop.f32.mrb[70].mxu1  ;;  %2670 = vmatprep.mubr.msk.f32.mxu0 %vm3126_vm0, %v3127_v6 }
 0x1a3   :  { %v1962_v58 = vmax.f32 %v1435_v52, 0.0  ;;  %v710_v59 = vadd.f32 %v4612_v47, %v709_v56  ;;  %v711_v61 = vpop.f32.mrb[71].mxu1  ;;  %973 = vmatmul.mubr.f32.gmra.mrb[176].mxu1 %v278_v49 }
 0x1a4   :  { %977 = vmatprep.mubr.f32.mxu1 %v282_v53  ;;  %v4656_v30 = vpop.f32.mrb[86].mxu0  ;;  %v300_v53 = vld [vmem:[%s5711_s0 + $0x8f0] sm:$0xff] }
 0x1a5   :  { %2096 = vst.msk [vmem:[%s5713_s3 + $0x110] sm:$0xff] %vm2061_vm1, %v1962_v58  ;;  %v1440_v63 = vadd.f32 %v4499_v12, %v710_v59  ;;  %v284_v12 = vld [vmem:[%s5711_s0 + $0x870] sm:$0xff]  ;;  %v2513_v15 = vpop.f32.mrb[87].mxu0  ;;  %2671 = vmatmul.mubr.f32.gmra.mrb[192].mxu0 %v304_v7  ;;  %v322_v7 = vld [vmem:[%s5711_s0 + $0x9a0] sm:$0xff] }
 0x1a6   :  { %v714_v5 = vpop.f32.mrb[72].mxu1  ;;  %2673 = vmatprep.mubr.msk.f32.mxu0 %vm3126_vm0, %v3127_v6 }
 0x1a7   :  { %v1963_v8 = vmax.f32 %v1440_v63, 0.0  ;;  %v715_v9 = vadd.f32 %v4612_v47, %v714_v5  ;;  %v716_v10 = vpop.f32.mrb[73].mxu1  ;;  %978 = vmatmul.mubr.f32.gmra.mrb[178].mxu1 %v281_v3 }
 0x1a8   :  { %982 = vmatprep.mubr.f32.mxu1 %v285_v2  ;;  %v4675_v40 = vpop.f32.mrb[88].mxu0  ;;  %v303_v2 = vld [vmem:[%s5711_s0 + $0x908] sm:$0xff] }
 0x1a9   :  { %2097 = vst.msk [vmem:[%s5713_s3 + $0x118] sm:$0xff] %vm2061_vm1, %v1963_v8  ;;  %v1445_v13 = vadd.f32 %v4518_v0, %v715_v9  ;;  %v287_v0 = vld [vmem:[%s5711_s0 + $0x888] sm:$0xff]  ;;  %v2516_v24 = vpop.f32.mrb[89].mxu0  ;;  %2674 = vmatmul.mubr.f32.gmra.mrb[194].mxu0 %v307_v17  ;;  %v325_v17 = vld [vmem:[%s5711_s0 + $0x9b8] sm:$0xff] }
 0x1aa   :  { %v719_v16 = vpop.f32.mrb[74].mxu1  ;;  %2676 = vmatprep.mubr.msk.f32.mxu0 %vm3126_vm0, %v3127_v6 }
 0x1ab   :  { %v1964_v18 = vmax.f32 %v1445_v13, 0.0  ;;  %v720_v19 = vadd.f32 %v4612_v47, %v719_v16  ;;  %v721_v20 = vpop.f32.mrb[75].mxu1  ;;  %983 = vmatmul.mubr.f32.gmra.mrb[180].mxu1 %v284_v12 }
 0x1ac   :  { %987 = vmatprep.mubr.f32.mxu1 %v288_v14  ;;  %v4694_v50 = vpop.f32.mrb[90].mxu0  ;;  %v306_v14 = vld [vmem:[%s5711_s0 + $0x920] sm:$0xff] }
 0x1ad   :  { %2098 = vst.msk [vmem:[%s5713_s3 + $0x120] sm:$0xff] %vm2061_vm1, %v1964_v18  ;;  %v1450_v22 = vadd.f32 %v4537_v31, %v720_v19  ;;  %v290_v31 = vld [vmem:[%s5711_s0 + $0x8a0] sm:$0xff]  ;;  %v2519_v34 = vpop.f32.mrb[91].mxu0  ;;  %2677 = vmatmul.mubr.f32.gmra.mrb[196].mxu0 %v310_v26  ;;  %v328_v26 = vld [vmem:[%s5711_s0 + $0x9d0] sm:$0xff] }
 0x1ae   :  { %v724_v25 = vpop.f32.mrb[76].mxu1  ;;  %2679 = vmatprep.mubr.msk.f32.mxu0 %vm3126_vm0, %v3127_v6 }
 0x1af   :  { %v1965_v27 = vmax.f32 %v1450_v22, 0.0  ;;  %v725_v28 = vadd.f32 %v4612_v47, %v724_v25  ;;  %v726_v29 = vpop.f32.mrb[77].mxu1  ;;  %988 = vmatmul.mubr.f32.gmra.mrb[182].mxu1 %v287_v0 }
 0x1b0   :  { %992 = vmatprep.mubr.f32.mxu1 %v291_v23  ;;  %v4713_v55 = vpop.f32.mrb[92].mxu0  ;;  %v309_v23 = vld [vmem:[%s5711_s0 + $0x938] sm:$0xff] }
 0x1b1   :  { %2099 = vst.msk [vmem:[%s5713_s3 + $0x128] sm:$0xff] %vm2061_vm1, %v1965_v27  ;;  %v1455_v32 = vadd.f32 %v4556_v41, %v725_v28  ;;  %v293_v41 = vld [vmem:[%s5711_s0 + $0x8b8] sm:$0xff]  ;;  %v2522_v43 = vpop.f32.mrb[93].mxu0  ;;  %2680 = vmatmul.mubr.f32.gmra.mrb[198].mxu0 %v313_v36  ;;  %v331_v36 = vld [vmem:[%s5711_s0 + $0x9e8] sm:$0xff] }
 0x1b2   :  { %v729_v35 = vpop.f32.mrb[78].mxu1  ;;  %2682 = vmatprep.mubr.msk.f32.mxu0 %vm3126_vm0, %v3127_v6 }
 0x1b3   :  { %v1966_v37 = vmax.f32 %v1455_v32, 0.0  ;;  %v730_v38 = vadd.f32 %v4612_v47, %v729_v35  ;;  %v731_v39 = vpop.f32.mrb[79].mxu1  ;;  %993 = vmatmul.mubr.f32.gmra.mrb[184].mxu1 %v290_v31 }
 0x1b4   :  { %997 = vmatprep.mubr.f32.mxu1 %v294_v33  ;;  %v4732_v49 = vpop.f32.mrb[94].mxu0  ;;  %v312_v33 = vld [vmem:[%s5711_s0 + $0x950] sm:$0xff] }
 0x1b5   :  { %2100 = vst.msk [vmem:[%s5713_s3 + $0x130] sm:$0xff] %vm2061_vm1, %v1966_v37  ;;  %v1460_v42 = vadd.f32 %v4575_v51, %v730_v38  ;;  %v296_v51 = vld [vmem:[%s5711_s0 + $0x8d0] sm:$0xff]  ;;  %v2525_v54 = vpop.f32.mrb[95].mxu0  ;;  %2683 = vmatmul.mubr.f32.gmra.mrb[200].mxu0 %v316_v45  ;;  %v334_v45 = vld [vmem:[%s5711_s0 + $0xa00] sm:$0xff] }
 0x1b6   :  { %v734_v44 = vpop.f32.mrb[80].mxu1  ;;  %2685 = vmatprep.mubr.msk.f32.mxu0 %vm3126_vm0, %v3127_v6 }
 0x1b7   :  { %v1967_v46 = vmax.f32 %v1460_v42, 0.0  ;;  %v735_v60 = vadd.f32 %v4612_v47, %v734_v44  ;;  %v736_v48 = vpop.f32.mrb[81].mxu1  ;;  %998 = vmatmul.mubr.f32.gmra.mrb[186].mxu1 %v293_v41 }
 0x1b8   :  { %1002 = vmatprep.mubr.f32.mxu1 %v297_v1  ;;  %v4751_v3 = vpop.f32.mrb[96].mxu0  ;;  %v315_v1 = vld [vmem:[%s5711_s0 + $0x968] sm:$0xff] }
 0x1b9   :  { %2101 = vst.msk [vmem:[%s5713_s3 + $0x138] sm:$0xff] %vm2061_vm1, %v1967_v46  ;;  %v1465_v52 = vadd.f32 %v4594_v62, %v735_v60  ;;  %v299_v62 = vld [vmem:[%s5711_s0 + $0x8e8] sm:$0xff]  ;;  %v2528_v4 = vpop.f32.mrb[97].mxu0  ;;  %2686 = vmatmul.mubr.f32.gmra.mrb[202].mxu0 %v319_v57  ;;  %v337_v57 = vld [vmem:[%s5711_s0 + $0xa18] sm:$0xff] }
 0x1ba   :  { %v739_v56 = vpop.f32.mrb[82].mxu1  ;;  %2688 = vmatprep.mubr.msk.f32.mxu0 %vm3126_vm0, %v3127_v6 }
 0x1bb   :  { %v1968_v58 = vmax.f32 %v1465_v52, 0.0  ;;  %v740_v59 = vadd.f32 %v4612_v47, %v739_v56  ;;  %v741_v61 = vpop.f32.mrb[83].mxu1  ;;  %1003 = vmatmul.mubr.f32.gmra.mrb[188].mxu1 %v296_v51 }
 0x1bc   :  { %1007 = vmatprep.mubr.f32.mxu1 %v300_v53  ;;  %v4770_v12 = vpop.f32.mrb[98].mxu0  ;;  %v318_v53 = vld [vmem:[%s5711_s0 + $0x980] sm:$0xff] }
 0x1bd   :  { %2102 = vst.msk [vmem:[%s5713_s3 + $0x140] sm:$0xff] %vm2061_vm1, %v1968_v58  ;;  %v1470_v63 = vadd.f32 %v4618_v11, %v740_v59  ;;  %v302_v11 = vld [vmem:[%s5711_s0 + $0x900] sm:$0xff]  ;;  %v2531_v15 = vpop.f32.mrb[99].mxu0  ;;  %2689 = vmatmul.mubr.f32.gmra.mrb[204].mxu0 %v322_v7  ;;  %v340_v7 = vld [vmem:[%s5711_s0 + $0xa30] sm:$0xff] }
 0x1be   :  { %v744_v5 = vpop.f32.mrb[84].mxu1  ;;  %2691 = vmatprep.mubr.msk.f32.mxu0 %vm3126_vm0, %v3127_v6 }
 0x1bf   :  { %v1969_v8 = vmax.f32 %v1470_v63, 0.0  ;;  %v745_v9 = vadd.f32 %v4612_v47, %v744_v5  ;;  %v746_v10 = vpop.f32.mrb[85].mxu1  ;;  %1008 = vmatmul.mubr.f32.gmra.mrb[190].mxu1 %v299_v62 }
 0x1c0   :  { %1012 = vmatprep.mubr.f32.mxu1 %v303_v2  ;;  %v4789_v0 = vpop.f32.mrb[100].mxu0  ;;  %v321_v2 = vld [vmem:[%s5711_s0 + $0x998] sm:$0xff] }
 0x1c1   :  { %2103 = vst.msk [vmem:[%s5713_s3 + $0x148] sm:$0xff] %vm2061_vm1, %v1969_v8  ;;  %v1475_v13 = vadd.f32 %v4637_v21, %v745_v9  ;;  %v305_v21 = vld [vmem:[%s5711_s0 + $0x918] sm:$0xff]  ;;  %v2534_v24 = vpop.f32.mrb[101].mxu0  ;;  %2692 = vmatmul.mubr.f32.gmra.mrb[206].mxu0 %v325_v17  ;;  %v343_v17 = vld [vmem:[%s5711_s0 + $0xa48] sm:$0xff] }
 0x1c2   :  { %v749_v16 = vpop.f32.mrb[86].mxu1  ;;  %2694 = vmatprep.mubr.msk.f32.mxu0 %vm3126_vm0, %v3127_v6 }
 0x1c3   :  { %v1970_v18 = vmax.f32 %v1475_v13, 0.0  ;;  %v750_v19 = vadd.f32 %v4612_v47, %v749_v16  ;;  %v751_v20 = vpop.f32.mrb[87].mxu1  ;;  %1013 = vmatmul.mubr.f32.gmra.mrb[192].mxu1 %v302_v11 }
 0x1c4   :  { %1017 = vmatprep.mubr.f32.mxu1 %v306_v14  ;;  %v4808_v31 = vpop.f32.mrb[102].mxu0  ;;  %v324_v14 = vld [vmem:[%s5711_s0 + $0x9b0] sm:$0xff] }
 0x1c5   :  { %2104 = vst.msk [vmem:[%s5713_s3 + $0x150] sm:$0xff] %vm2061_vm1, %v1970_v18  ;;  %v1480_v22 = vadd.f32 %v4656_v30, %v750_v19  ;;  %v308_v30 = vld [vmem:[%s5711_s0 + $0x930] sm:$0xff]  ;;  %v2537_v34 = vpop.f32.mrb[103].mxu0  ;;  %2695 = vmatmul.mubr.f32.gmra.mrb[208].mxu0 %v328_v26  ;;  %v346_v26 = vld [vmem:[%s5711_s0 + $0xa60] sm:$0xff] }
 0x1c6   :  { %v754_v25 = vpop.f32.mrb[88].mxu1  ;;  %2697 = vmatprep.mubr.msk.f32.mxu0 %vm3126_vm0, %v3127_v6 }
 0x1c7   :  { %v1971_v27 = vmax.f32 %v1480_v22, 0.0  ;;  %v755_v28 = vadd.f32 %v4612_v47, %v754_v25  ;;  %v756_v29 = vpop.f32.mrb[89].mxu1  ;;  %1018 = vmatmul.mubr.f32.gmra.mrb[194].mxu1 %v305_v21 }
 0x1c8   :  { %1022 = vmatprep.mubr.f32.mxu1 %v309_v23  ;;  %v4827_v41 = vpop.f32.mrb[104].mxu0  ;;  %v327_v23 = vld [vmem:[%s5711_s0 + $0x9c8] sm:$0xff] }
 0x1c9   :  { %2105 = vst.msk [vmem:[%s5713_s3 + $0x158] sm:$0xff] %vm2061_vm1, %v1971_v27  ;;  %v1485_v32 = vadd.f32 %v4675_v40, %v755_v28  ;;  %v311_v40 = vld [vmem:[%s5711_s0 + $0x948] sm:$0xff]  ;;  %v2540_v43 = vpop.f32.mrb[105].mxu0  ;;  %2698 = vmatmul.mubr.f32.gmra.mrb[210].mxu0 %v331_v36  ;;  %v349_v36 = vld [vmem:[%s5711_s0 + $0xa78] sm:$0xff] }
 0x1ca   :  { %v759_v35 = vpop.f32.mrb[90].mxu1  ;;  %2700 = vmatprep.mubr.msk.f32.mxu0 %vm3126_vm0, %v3127_v6 }
 0x1cb   :  { %v1972_v37 = vmax.f32 %v1485_v32, 0.0  ;;  %v760_v38 = vadd.f32 %v4612_v47, %v759_v35  ;;  %v761_v39 = vpop.f32.mrb[91].mxu1  ;;  %1023 = vmatmul.mubr.f32.gmra.mrb[196].mxu1 %v308_v30 }
 0x1cc   :  { %1027 = vmatprep.mubr.f32.mxu1 %v312_v33  ;;  %v4846_v51 = vpop.f32.mrb[106].mxu0  ;;  %v330_v33 = vld [vmem:[%s5711_s0 + $0x9e0] sm:$0xff] }
 0x1cd   :  { %2106 = vst.msk [vmem:[%s5713_s3 + $0x160] sm:$0xff] %vm2061_vm1, %v1972_v37  ;;  %v1490_v42 = vadd.f32 %v4694_v50, %v760_v38  ;;  %v314_v50 = vld [vmem:[%s5711_s0 + $0x960] sm:$0xff]  ;;  %v2543_v54 = vpop.f32.mrb[107].mxu0  ;;  %2701 = vmatmul.mubr.f32.gmra.mrb[212].mxu0 %v334_v45  ;;  %v352_v45 = vld [vmem:[%s5711_s0 + $0xa90] sm:$0xff] }
 0x1ce   :  { %v764_v44 = vpop.f32.mrb[92].mxu1  ;;  %2703 = vmatprep.mubr.msk.f32.mxu0 %vm3126_vm0, %v3127_v6 }
 0x1cf   :  { %v1973_v46 = vmax.f32 %v1490_v42, 0.0  ;;  %v765_v60 = vadd.f32 %v4612_v47, %v764_v44  ;;  %v766_v48 = vpop.f32.mrb[93].mxu1  ;;  %1028 = vmatmul.mubr.f32.gmra.mrb[198].mxu1 %v311_v40 }
 0x1d0   :  { %1032 = vmatprep.mubr.f32.mxu1 %v315_v1  ;;  %v4865_v62 = vpop.f32.mrb[108].mxu0  ;;  %v333_v1 = vld [vmem:[%s5711_s0 + $0x9f8] sm:$0xff] }
 0x1d1   :  { %2107 = vst.msk [vmem:[%s5713_s3 + $0x168] sm:$0xff] %vm2061_vm1, %v1973_v46  ;;  %v1495_v52 = vadd.f32 %v4713_v55, %v765_v60  ;;  %v317_v55 = vld [vmem:[%s5711_s0 + $0x978] sm:$0xff]  ;;  %v2546_v4 = vpop.f32.mrb[109].mxu0  ;;  %2704 = vmatmul.mubr.f32.gmra.mrb[214].mxu0 %v337_v57  ;;  %v355_v57 = vld [vmem:[%s5711_s0 + $0xaa8] sm:$0xff] }
 0x1d2   :  { %v769_v56 = vpop.f32.mrb[94].mxu1  ;;  %2706 = vmatprep.mubr.msk.f32.mxu0 %vm3126_vm0, %v3127_v6 }
 0x1d3   :  { %v1974_v58 = vmax.f32 %v1495_v52, 0.0  ;;  %v770_v59 = vadd.f32 %v4612_v47, %v769_v56  ;;  %v771_v61 = vpop.f32.mrb[95].mxu1  ;;  %1033 = vmatmul.mubr.f32.gmra.mrb[200].mxu1 %v314_v50 }
 0x1d4   :  { %1037 = vmatprep.mubr.f32.mxu1 %v318_v53  ;;  %v4884_v11 = vpop.f32.mrb[110].mxu0  ;;  %v336_v53 = vld [vmem:[%s5711_s0 + $0xa10] sm:$0xff] }
 0x1d5   :  { %2108 = vst.msk [vmem:[%s5713_s3 + $0x170] sm:$0xff] %vm2061_vm1, %v1974_v58  ;;  %v1500_v63 = vadd.f32 %v4732_v49, %v770_v59  ;;  %v320_v49 = vld [vmem:[%s5711_s0 + $0x990] sm:$0xff]  ;;  %v2549_v15 = vpop.f32.mrb[111].mxu0  ;;  %2707 = vmatmul.mubr.f32.gmra.mrb[216].mxu0 %v340_v7  ;;  %v358_v7 = vld [vmem:[%s5711_s0 + $0xac0] sm:$0xff] }
 0x1d6   :  { %v774_v5 = vpop.f32.mrb[96].mxu1  ;;  %2709 = vmatprep.mubr.msk.f32.mxu0 %vm3126_vm0, %v3127_v6 }
 0x1d7   :  { %v1975_v8 = vmax.f32 %v1500_v63, 0.0  ;;  %v775_v9 = vadd.f32 %v4612_v47, %v774_v5  ;;  %v776_v10 = vpop.f32.mrb[97].mxu1  ;;  %1038 = vmatmul.mubr.f32.gmra.mrb[202].mxu1 %v317_v55 }
 0x1d8   :  { %1042 = vmatprep.mubr.f32.mxu1 %v321_v2  ;;  %v4903_v21 = vpop.f32.mrb[112].mxu0  ;;  %v339_v2 = vld [vmem:[%s5711_s0 + $0xa28] sm:$0xff] }
 0x1d9   :  { %2109 = vst.msk [vmem:[%s5713_s3 + $0x178] sm:$0xff] %vm2061_vm1, %v1975_v8  ;;  %v1505_v13 = vadd.f32 %v4751_v3, %v775_v9  ;;  %v323_v3 = vld [vmem:[%s5711_s0 + $0x9a8] sm:$0xff]  ;;  %v2552_v24 = vpop.f32.mrb[113].mxu0  ;;  %2710 = vmatmul.mubr.f32.gmra.mrb[218].mxu0 %v343_v17  ;;  %v361_v17 = vld [vmem:[%s5711_s0 + $0xad8] sm:$0xff] }
 0x1da   :  { %v779_v16 = vpop.f32.mrb[98].mxu1  ;;  %2712 = vmatprep.mubr.msk.f32.mxu0 %vm3126_vm0, %v3127_v6 }
 0x1db   :  { %v1976_v18 = vmax.f32 %v1505_v13, 0.0  ;;  %v780_v19 = vadd.f32 %v4612_v47, %v779_v16  ;;  %v781_v20 = vpop.f32.mrb[99].mxu1  ;;  %1043 = vmatmul.mubr.f32.gmra.mrb[204].mxu1 %v320_v49 }
 0x1dc   :  { %1047 = vmatprep.mubr.f32.mxu1 %v324_v14  ;;  %v4922_v30 = vpop.f32.mrb[114].mxu0  ;;  %v342_v14 = vld [vmem:[%s5711_s0 + $0xa40] sm:$0xff] }
 0x1dd   :  { %2110 = vst.msk [vmem:[%s5713_s3 + $0x180] sm:$0xff] %vm2061_vm1, %v1976_v18  ;;  %v1510_v22 = vadd.f32 %v4770_v12, %v780_v19  ;;  %v326_v12 = vld [vmem:[%s5711_s0 + $0x9c0] sm:$0xff]  ;;  %v2555_v34 = vpop.f32.mrb[115].mxu0  ;;  %2713 = vmatmul.mubr.f32.gmra.mrb[220].mxu0 %v346_v26  ;;  %v364_v26 = vld [vmem:[%s5711_s0 + $0xaf0] sm:$0xff] }
 0x1de   :  { %v784_v25 = vpop.f32.mrb[100].mxu1  ;;  %2715 = vmatprep.mubr.msk.f32.mxu0 %vm3126_vm0, %v3127_v6 }
 0x1df   :  { %v1977_v27 = vmax.f32 %v1510_v22, 0.0  ;;  %v785_v28 = vadd.f32 %v4612_v47, %v784_v25  ;;  %v786_v29 = vpop.f32.mrb[101].mxu1  ;;  %1048 = vmatmul.mubr.f32.gmra.mrb[206].mxu1 %v323_v3 }
 0x1e0   :  { %1052 = vmatprep.mubr.f32.mxu1 %v327_v23  ;;  %v4941_v40 = vpop.f32.mrb[116].mxu0  ;;  %v345_v23 = vld [vmem:[%s5711_s0 + $0xa58] sm:$0xff] }
 0x1e1   :  { %2111 = vst.msk [vmem:[%s5713_s3 + $0x188] sm:$0xff] %vm2061_vm1, %v1977_v27  ;;  %v1515_v32 = vadd.f32 %v4789_v0, %v785_v28  ;;  %v329_v0 = vld [vmem:[%s5711_s0 + $0x9d8] sm:$0xff]  ;;  %v2558_v43 = vpop.f32.mrb[117].mxu0  ;;  %2716 = vmatmul.mubr.f32.gmra.mrb[222].mxu0 %v349_v36  ;;  %v367_v36 = vld [vmem:[%s5711_s0 + $0xb08] sm:$0xff] }
 0x1e2   :  { %v789_v35 = vpop.f32.mrb[102].mxu1  ;;  %2718 = vmatprep.mubr.msk.f32.mxu0 %vm3126_vm0, %v3127_v6 }
 0x1e3   :  { %v1978_v37 = vmax.f32 %v1515_v32, 0.0  ;;  %v790_v38 = vadd.f32 %v4612_v47, %v789_v35  ;;  %v791_v39 = vpop.f32.mrb[103].mxu1  ;;  %1053 = vmatmul.mubr.f32.gmra.mrb[208].mxu1 %v326_v12 }
 0x1e4   :  { %1057 = vmatprep.mubr.f32.mxu1 %v330_v33  ;;  %v4960_v50 = vpop.f32.mrb[118].mxu0  ;;  %v348_v33 = vld [vmem:[%s5711_s0 + $0xa70] sm:$0xff] }
 0x1e5   :  { %2112 = vst.msk [vmem:[%s5713_s3 + $0x190] sm:$0xff] %vm2061_vm1, %v1978_v37  ;;  %v1520_v42 = vadd.f32 %v4808_v31, %v790_v38  ;;  %v332_v31 = vld [vmem:[%s5711_s0 + $0x9f0] sm:$0xff]  ;;  %v2561_v54 = vpop.f32.mrb[119].mxu0  ;;  %2719 = vmatmul.mubr.f32.gmra.mrb[224].mxu0 %v352_v45  ;;  %v370_v45 = vld [vmem:[%s5711_s0 + $0xb20] sm:$0xff] }
 0x1e6   :  { %v794_v44 = vpop.f32.mrb[104].mxu1  ;;  %2721 = vmatprep.mubr.msk.f32.mxu0 %vm3126_vm0, %v3127_v6 }
 0x1e7   :  { %v1979_v46 = vmax.f32 %v1520_v42, 0.0  ;;  %v795_v60 = vadd.f32 %v4612_v47, %v794_v44  ;;  %v796_v48 = vpop.f32.mrb[105].mxu1  ;;  %1058 = vmatmul.mubr.f32.gmra.mrb[210].mxu1 %v329_v0 }
 0x1e8   :  { %1062 = vmatprep.mubr.f32.mxu1 %v333_v1  ;;  %v4979_v55 = vpop.f32.mrb[120].mxu0  ;;  %v351_v1 = vld [vmem:[%s5711_s0 + $0xa88] sm:$0xff] }
 0x1e9   :  { %2113 = vst.msk [vmem:[%s5713_s3 + $0x198] sm:$0xff] %vm2061_vm1, %v1979_v46  ;;  %v1525_v52 = vadd.f32 %v4827_v41, %v795_v60  ;;  %v335_v41 = vld [vmem:[%s5711_s0 + $0xa08] sm:$0xff]  ;;  %v2564_v4 = vpop.f32.mrb[121].mxu0  ;;  %2722 = vmatmul.mubr.f32.gmra.mrb[226].mxu0 %v355_v57  ;;  %v373_v57 = vld [vmem:[%s5711_s0 + $0xb38] sm:$0xff] }
 0x1ea   :  { %v799_v56 = vpop.f32.mrb[106].mxu1  ;;  %2724 = vmatprep.mubr.msk.f32.mxu0 %vm3126_vm0, %v3127_v6 }
 0x1eb   :  { %v1980_v58 = vmax.f32 %v1525_v52, 0.0  ;;  %v800_v59 = vadd.f32 %v4612_v47, %v799_v56  ;;  %v801_v61 = vpop.f32.mrb[107].mxu1  ;;  %1063 = vmatmul.mubr.f32.gmra.mrb[212].mxu1 %v332_v31 }
 0x1ec   :  { %1067 = vmatprep.mubr.f32.mxu1 %v336_v53  ;;  %v4998_v49 = vpop.f32.mrb[122].mxu0  ;;  %v354_v53 = vld [vmem:[%s5711_s0 + $0xaa0] sm:$0xff] }
 0x1ed   :  { %2114 = vst.msk [vmem:[%s5713_s3 + $0x1a0] sm:$0xff] %vm2061_vm1, %v1980_v58  ;;  %v1530_v63 = vadd.f32 %v4846_v51, %v800_v59  ;;  %v338_v51 = vld [vmem:[%s5711_s0 + $0xa20] sm:$0xff]  ;;  %v2567_v15 = vpop.f32.mrb[123].mxu0  ;;  %2725 = vmatmul.mubr.f32.gmra.mrb[228].mxu0 %v358_v7  ;;  %v376_v7 = vld [vmem:[%s5711_s0 + $0xb50] sm:$0xff] }
 0x1ee   :  { %v804_v5 = vpop.f32.mrb[108].mxu1  ;;  %2727 = vmatprep.mubr.msk.f32.mxu0 %vm3126_vm0, %v3127_v6 }
 0x1ef   :  { %v1981_v8 = vmax.f32 %v1530_v63, 0.0  ;;  %v805_v9 = vadd.f32 %v4612_v47, %v804_v5  ;;  %v806_v10 = vpop.f32.mrb[109].mxu1  ;;  %1068 = vmatmul.mubr.f32.gmra.mrb[214].mxu1 %v335_v41 }
 0x1f0   :  { %1072 = vmatprep.mubr.f32.mxu1 %v339_v2  ;;  %v5017_v3 = vpop.f32.mrb[124].mxu0  ;;  %v357_v2 = vld [vmem:[%s5711_s0 + $0xab8] sm:$0xff] }
 0x1f1   :  { %2115 = vst.msk [vmem:[%s5713_s3 + $0x1a8] sm:$0xff] %vm2061_vm1, %v1981_v8  ;;  %v1535_v13 = vadd.f32 %v4865_v62, %v805_v9  ;;  %v341_v62 = vld [vmem:[%s5711_s0 + $0xa38] sm:$0xff]  ;;  %v2570_v24 = vpop.f32.mrb[125].mxu0  ;;  %2728 = vmatmul.mubr.f32.gmra.mrb[230].mxu0 %v361_v17  ;;  %v379_v17 = vld [vmem:[%s5711_s0 + $0xb68] sm:$0xff] }
 0x1f2   :  { %v809_v16 = vpop.f32.mrb[110].mxu1  ;;  %2730 = vmatprep.mubr.msk.f32.mxu0 %vm3126_vm0, %v3127_v6 }
 0x1f3   :  { %v1982_v18 = vmax.f32 %v1535_v13, 0.0  ;;  %v810_v19 = vadd.f32 %v4612_v47, %v809_v16  ;;  %v811_v20 = vpop.f32.mrb[111].mxu1  ;;  %1073 = vmatmul.mubr.f32.gmra.mrb[216].mxu1 %v338_v51 }
 0x1f4   :  { %1077 = vmatprep.mubr.f32.mxu1 %v342_v14  ;;  %v5036_v12 = vpop.f32.mrb[126].mxu0  ;;  %v360_v14 = vld [vmem:[%s5711_s0 + $0xad0] sm:$0xff] }
 0x1f5   :  { %2116 = vst.msk [vmem:[%s5713_s3 + $0x1b0] sm:$0xff] %vm2061_vm1, %v1982_v18  ;;  %v1540_v22 = vadd.f32 %v4884_v11, %v810_v19  ;;  %v344_v11 = vld [vmem:[%s5711_s0 + $0xa50] sm:$0xff]  ;;  %v2573_v34 = vpop.f32.mrb[127].mxu0  ;;  %2731 = vmatmul.mubr.f32.gmra.mrb[232].mxu0 %v364_v26  ;;  %v382_v26 = vld [vmem:[%s5711_s0 + $0xb80] sm:$0xff] }
 0x1f6   :  { %v814_v25 = vpop.f32.mrb[112].mxu1  ;;  %2733 = vmatprep.mubr.msk.f32.mxu0 %vm3126_vm0, %v3127_v6 }
 0x1f7   :  { %v1983_v27 = vmax.f32 %v1540_v22, 0.0  ;;  %v815_v28 = vadd.f32 %v4612_v47, %v814_v25  ;;  %v816_v29 = vpop.f32.mrb[113].mxu1  ;;  %1078 = vmatmul.mubr.f32.gmra.mrb[218].mxu1 %v341_v62 }
 0x1f8   :  { %1082 = vmatprep.mubr.f32.mxu1 %v345_v23  ;;  %v5055_v0 = vpop.f32.mrb[128].mxu0  ;;  %v363_v23 = vld [vmem:[%s5711_s0 + $0xae8] sm:$0xff] }
 0x1f9   :  { %2117 = vst.msk [vmem:[%s5713_s3 + $0x1b8] sm:$0xff] %vm2061_vm1, %v1983_v27  ;;  %v1545_v32 = vadd.f32 %v4903_v21, %v815_v28  ;;  %v347_v21 = vld [vmem:[%s5711_s0 + $0xa68] sm:$0xff]  ;;  %v2576_v43 = vpop.f32.mrb[129].mxu0  ;;  %2734 = vmatmul.mubr.f32.gmra.mrb[234].mxu0 %v367_v36  ;;  %v385_v36 = vld [vmem:[%s5711_s0 + $0xb98] sm:$0xff] }
 0x1fa   :  { %v819_v35 = vpop.f32.mrb[114].mxu1  ;;  %2736 = vmatprep.mubr.msk.f32.mxu0 %vm3126_vm0, %v3127_v6 }
 0x1fb   :  { %v1984_v37 = vmax.f32 %v1545_v32, 0.0  ;;  %v820_v38 = vadd.f32 %v4612_v47, %v819_v35  ;;  %v821_v39 = vpop.f32.mrb[115].mxu1  ;;  %1083 = vmatmul.mubr.f32.gmra.mrb[220].mxu1 %v344_v11 }
 0x1fc   :  { %1087 = vmatprep.mubr.f32.mxu1 %v348_v33  ;;  %v5074_v31 = vpop.f32.mrb[130].mxu0  ;;  %v366_v33 = vld [vmem:[%s5711_s0 + $0xb00] sm:$0xff] }
 0x1fd   :  { %2118 = vst.msk [vmem:[%s5713_s3 + $0x1c0] sm:$0xff] %vm2061_vm1, %v1984_v37  ;;  %v1550_v42 = vadd.f32 %v4922_v30, %v820_v38  ;;  %v350_v30 = vld [vmem:[%s5711_s0 + $0xa80] sm:$0xff]  ;;  %v2579_v54 = vpop.f32.mrb[131].mxu0  ;;  %2737 = vmatmul.mubr.f32.gmra.mrb[236].mxu0 %v370_v45  ;;  %v388_v45 = vld [vmem:[%s5711_s0 + $0xbb0] sm:$0xff] }
 0x1fe   :  { %v824_v44 = vpop.f32.mrb[116].mxu1  ;;  %2739 = vmatprep.mubr.msk.f32.mxu0 %vm3126_vm0, %v3127_v6 }
 0x1ff   :  { %v1985_v46 = vmax.f32 %v1550_v42, 0.0  ;;  %v825_v60 = vadd.f32 %v4612_v47, %v824_v44  ;;  %v826_v48 = vpop.f32.mrb[117].mxu1  ;;  %1088 = vmatmul.mubr.f32.gmra.mrb[222].mxu1 %v347_v21 }
 0x200   :  { %1092 = vmatprep.mubr.f32.mxu1 %v351_v1  ;;  %v5093_v41 = vpop.f32.mrb[132].mxu0  ;;  %v369_v1 = vld [vmem:[%s5711_s0 + $0xb18] sm:$0xff] }
 0x201   :  { %2119 = vst.msk [vmem:[%s5713_s3 + $0x1c8] sm:$0xff] %vm2061_vm1, %v1985_v46  ;;  %v1555_v52 = vadd.f32 %v4941_v40, %v825_v60  ;;  %v353_v40 = vld [vmem:[%s5711_s0 + $0xa98] sm:$0xff]  ;;  %v2582_v4 = vpop.f32.mrb[133].mxu0  ;;  %2740 = vmatmul.mubr.f32.gmra.mrb[238].mxu0 %v373_v57  ;;  %v391_v57 = vld [vmem:[%s5711_s0 + $0xbc8] sm:$0xff] }
 0x202   :  { %v829_v56 = vpop.f32.mrb[118].mxu1  ;;  %2742 = vmatprep.mubr.msk.f32.mxu0 %vm3126_vm0, %v3127_v6 }
 0x203   :  { %v1986_v58 = vmax.f32 %v1555_v52, 0.0  ;;  %v830_v59 = vadd.f32 %v4612_v47, %v829_v56  ;;  %v831_v61 = vpop.f32.mrb[119].mxu1  ;;  %1093 = vmatmul.mubr.f32.gmra.mrb[224].mxu1 %v350_v30 }
 0x204   :  { %1097 = vmatprep.mubr.f32.mxu1 %v354_v53  ;;  %v5112_v51 = vpop.f32.mrb[134].mxu0  ;;  %v372_v53 = vld [vmem:[%s5711_s0 + $0xb30] sm:$0xff] }
 0x205   :  { %2120 = vst.msk [vmem:[%s5713_s3 + $0x1d0] sm:$0xff] %vm2061_vm1, %v1986_v58  ;;  %v1560_v63 = vadd.f32 %v4960_v50, %v830_v59  ;;  %v356_v50 = vld [vmem:[%s5711_s0 + $0xab0] sm:$0xff]  ;;  %v2585_v15 = vpop.f32.mrb[135].mxu0  ;;  %2743 = vmatmul.mubr.f32.gmra.mrb[240].mxu0 %v376_v7  ;;  %v394_v7 = vld [vmem:[%s5711_s0 + $0xbe0] sm:$0xff] }
 0x206   :  { %v834_v5 = vpop.f32.mrb[120].mxu1  ;;  %2745 = vmatprep.mubr.msk.f32.mxu0 %vm3126_vm0, %v3127_v6 }
 0x207   :  { %v1987_v8 = vmax.f32 %v1560_v63, 0.0  ;;  %v835_v9 = vadd.f32 %v4612_v47, %v834_v5  ;;  %v836_v10 = vpop.f32.mrb[121].mxu1  ;;  %1098 = vmatmul.mubr.f32.gmra.mrb[226].mxu1 %v353_v40 }
 0x208   :  { %1102 = vmatprep.mubr.f32.mxu1 %v357_v2  ;;  %v5131_v62 = vpop.f32.mrb[136].mxu0  ;;  %v375_v2 = vld [vmem:[%s5711_s0 + $0xb48] sm:$0xff] }
 0x209   :  { %2121 = vst.msk [vmem:[%s5713_s3 + $0x1d8] sm:$0xff] %vm2061_vm1, %v1987_v8  ;;  %v1565_v13 = vadd.f32 %v4979_v55, %v835_v9  ;;  %v359_v55 = vld [vmem:[%s5711_s0 + $0xac8] sm:$0xff]  ;;  %v2588_v24 = vpop.f32.mrb[137].mxu0  ;;  %2746 = vmatmul.mubr.f32.gmra.mrb[242].mxu0 %v379_v17  ;;  %v397_v17 = vld [vmem:[%s5711_s0 + $0xbf8] sm:$0xff] }
 0x20a   :  { %v839_v16 = vpop.f32.mrb[122].mxu1  ;;  %2748 = vmatprep.mubr.msk.f32.mxu0 %vm3126_vm0, %v3127_v6 }
 0x20b   :  { %v1988_v18 = vmax.f32 %v1565_v13, 0.0  ;;  %v840_v19 = vadd.f32 %v4612_v47, %v839_v16  ;;  %v841_v20 = vpop.f32.mrb[123].mxu1  ;;  %1103 = vmatmul.mubr.f32.gmra.mrb[228].mxu1 %v356_v50 }
 0x20c   :  { %1107 = vmatprep.mubr.f32.mxu1 %v360_v14  ;;  %v5150_v11 = vpop.f32.mrb[138].mxu0  ;;  %v378_v14 = vld [vmem:[%s5711_s0 + $0xb60] sm:$0xff] }
 0x20d   :  { %2122 = vst.msk [vmem:[%s5713_s3 + $0x1e0] sm:$0xff] %vm2061_vm1, %v1988_v18  ;;  %v1570_v22 = vadd.f32 %v4998_v49, %v840_v19  ;;  %v362_v49 = vld [vmem:[%s5711_s0 + $0xae0] sm:$0xff]  ;;  %v2591_v34 = vpop.f32.mrb[139].mxu0  ;;  %2749 = vmatmul.mubr.f32.gmra.mrb[244].mxu0 %v382_v26  ;;  %v400_v26 = vld [vmem:[%s5711_s0 + $0xc10] sm:$0xff] }
 0x20e   :  { %v844_v25 = vpop.f32.mrb[124].mxu1  ;;  %2751 = vmatprep.mubr.msk.f32.mxu0 %vm3126_vm0, %v3127_v6 }
 0x20f   :  { %v1989_v27 = vmax.f32 %v1570_v22, 0.0  ;;  %v845_v28 = vadd.f32 %v4612_v47, %v844_v25  ;;  %v846_v29 = vpop.f32.mrb[125].mxu1  ;;  %1108 = vmatmul.mubr.f32.gmra.mrb[230].mxu1 %v359_v55 }
 0x210   :  { %1112 = vmatprep.mubr.f32.mxu1 %v363_v23  ;;  %v5169_v21 = vpop.f32.mrb[140].mxu0  ;;  %v381_v23 = vld [vmem:[%s5711_s0 + $0xb78] sm:$0xff] }
 0x211   :  { %2123 = vst.msk [vmem:[%s5713_s3 + $0x1e8] sm:$0xff] %vm2061_vm1, %v1989_v27  ;;  %v1575_v32 = vadd.f32 %v5017_v3, %v845_v28  ;;  %v365_v3 = vld [vmem:[%s5711_s0 + $0xaf8] sm:$0xff]  ;;  %v2594_v43 = vpop.f32.mrb[141].mxu0  ;;  %2752 = vmatmul.mubr.f32.gmra.mrb[246].mxu0 %v385_v36 }
 0x212   :  { %v849_v35 = vpop.f32.mrb[126].mxu1  ;;  %2754 = vmatprep.mubr.msk.f32.mxu0 %vm3126_vm0, %v3127_v6 }
 0x213   :  { %v1990_v37 = vmax.f32 %v1575_v32, 0.0  ;;  %v850_v38 = vadd.f32 %v4612_v47, %v849_v35  ;;  %v851_v39 = vpop.f32.mrb[127].mxu1  ;;  %1113 = vmatmul.mubr.f32.gmra.mrb[232].mxu1 %v362_v49  ;;  %v403_v35 = vld [vmem:[%s5711_s0 + $0xc28] sm:$0xff] }
 0x214   :  { %1117 = vmatprep.mubr.f32.mxu1 %v366_v33  ;;  %v5188_v30 = vpop.f32.mrb[142].mxu0  ;;  %v383_v39 = vld [vmem:[%s5711_s0 + $0xb88] sm:$0xff] }
 0x215   :  { %2124 = vst.msk [vmem:[%s5713_s3 + $0x1f0] sm:$0xff] %vm2061_vm1, %v1990_v37  ;;  %v1580_v42 = vadd.f32 %v5036_v12, %v850_v38  ;;  %v368_v12 = vld [vmem:[%s5711_s0 + $0xb10] sm:$0xff]  ;;  %v2597_v54 = vpop.f32.mrb[143].mxu0  ;;  %2755 = vmatmul.mubr.f32.gmra.mrb[248].mxu0 %v388_v45  ;;  %v5282_v37 = vld [vmem:[%s5712_s2] ss:$0 sm:$0xff] }
 0x216   :  { %v854_v44 = vpop.f32.mrb[128].mxu1  ;;  %2757 = vmatprep.mubr.msk.f32.mxu0 %vm3126_vm0, %v3127_v6  ;;  %v406_v45 = vld [vmem:[%s5711_s0 + $0xc40] sm:$0xff] }
 0x217   :  { %v1991_v46 = vmax.f32 %v1580_v42, 0.0  ;;  %v855_v60 = vadd.f32 %v4612_v47, %v854_v44  ;;  %v856_v48 = vpop.f32.mrb[129].mxu1  ;;  %1118 = vmatmul.mubr.f32.gmra.mrb[234].mxu1 %v365_v3 }
 0x218   :  { %1122 = vmatprep.mubr.f32.mxu1 %v369_v1  ;;  %v5207_v40 = vpop.f32.mrb[144].mxu0  ;;  %v387_v1 = vld [vmem:[%s5711_s0 + $0xba8] sm:$0xff] }
 0x219   :  { %2125 = vst.msk [vmem:[%s5713_s3 + $0x1f8] sm:$0xff] %vm2061_vm1, %v1991_v46  ;;  %v1585_v52 = vadd.f32 %v5055_v0, %v855_v60  ;;  %v371_v0 = vld [vmem:[%s5711_s0 + $0xb28] sm:$0xff]  ;;  %v2600_v4 = vpop.f32.mrb[145].mxu0  ;;  %2758 = vmatmul.mubr.f32.gmra.mrb[250].mxu0 %v391_v57  ;;  %v409_v57 = vld [vmem:[%s5711_s0 + $0xc58] sm:$0xff] }
 0x21a   :  { %v859_v56 = vpop.f32.mrb[130].mxu1  ;;  %2760 = vmatprep.mubr.msk.f32.mxu0 %vm3126_vm0, %v3127_v6 }
 0x21b   :  { %v1992_v58 = vmax.f32 %v1585_v52, 0.0  ;;  %v860_v59 = vadd.f32 %v4612_v47, %v859_v56  ;;  %v861_v61 = vpop.f32.mrb[131].mxu1  ;;  %1123 = vmatmul.mubr.f32.gmra.mrb[236].mxu1 %v368_v12 }
 0x21c   :  { %1127 = vmatprep.mubr.f32.mxu1 %v372_v53  ;;  %v5226_v50 = vpop.f32.mrb[146].mxu0  ;;  %v390_v53 = vld [vmem:[%s5711_s0 + $0xbc0] sm:$0xff] }
 0x21d   :  { %2126 = vst.msk [vmem:[%s5713_s3 + $0x200] sm:$0xff] %vm2061_vm1, %v1992_v58  ;;  %v1590_v63 = vadd.f32 %v5074_v31, %v860_v59  ;;  %v374_v31 = vld [vmem:[%s5711_s0 + $0xb40] sm:$0xff]  ;;  %v2603_v15 = vpop.f32.mrb[147].mxu0  ;;  %2761 = vmatmul.mubr.f32.gmra.mrb[252].mxu0 %v394_v7  ;;  %v412_v7 = vld [vmem:[%s5711_s0 + $0xc70] sm:$0x3] }
 0x21e   :  { %v864_v5 = vpop.f32.mrb[132].mxu1  ;;  %2763 = vmatprep.mubr.msk.f32.mxu0 %vm3126_vm0, %v3127_v6 }
 0x21f   :  { %v1993_v8 = vmax.f32 %v1590_v63, 0.0  ;;  %v865_v9 = vadd.f32 %v4612_v47, %v864_v5  ;;  %v866_v10 = vpop.f32.mrb[133].mxu1  ;;  %1128 = vmatmul.mubr.f32.gmra.mrb[238].mxu1 %v371_v0 }
 0x220   :  { %1132 = vmatprep.mubr.f32.mxu1 %v375_v2  ;;  %v5245_v55 = vpop.f32.mrb[148].mxu0  ;;  %v393_v2 = vld [vmem:[%s5711_s0 + $0xbd8] sm:$0xff] }
 0x221   :  { %2127 = vst.msk [vmem:[%s5713_s3 + $0x208] sm:$0xff] %vm2061_vm1, %v1993_v8  ;;  %v1595_v13 = vadd.f32 %v5093_v41, %v865_v9  ;;  %v377_v41 = vld [vmem:[%s5711_s0 + $0xb58] sm:$0xff]  ;;  %v2606_v24 = vpop.f32.mrb[149].mxu0  ;;  %2764 = vmatmul.mubr.f32.gmra.mrb[254].mxu0 %v397_v17 }
 0x222   :  { %v869_v16 = vpop.f32.mrb[134].mxu1  ;;  %2766 = vmatprep.mubr.msk.f32.mxu0 %vm3126_vm0, %v3127_v6 }
 0x223   :  { %v1994_v18 = vmax.f32 %v1595_v13, 0.0  ;;  %v870_v19 = vadd.f32 %v4612_v47, %v869_v16  ;;  %v871_v20 = vpop.f32.mrb[135].mxu1  ;;  %1133 = vmatmul.mubr.f32.gmra.mrb[240].mxu1 %v374_v31  ;;  %v396_v13 = vld [vmem:[%s5711_s0 + $0xbf0] sm:$0xff] }
 0x224   :  { %1137 = vmatprep.mubr.f32.mxu1 %v378_v14  ;;  %v5264_v49 = vpop.f32.mrb[150].mxu0 }
 0x225   :  { %2128 = vst.msk [vmem:[%s5713_s3 + $0x210] sm:$0xff] %vm2061_vm1, %v1994_v18  ;;  %v1600_v22 = vadd.f32 %v5112_v51, %v870_v19  ;;  %v380_v51 = vld [vmem:[%s5711_s0 + $0xb70] sm:$0xff]  ;;  %v2609_v33 = vpop.f32.mrb[151].mxu0  ;;  %2767 = vmatmul.mubr.f32.gmra.mrb[0].mxu0 %v400_v26  ;;  %v395_v19 = vld [vmem:[%s5711_s0 + $0xbe8] sm:$0xff] }
 0x226   :  { %v874_v25 = vpop.f32.mrb[136].mxu1  ;;  %2769 = vmatprep.mubr.msk.f32.mxu0 %vm3126_vm0, %v3127_v6 }
 0x227   :  { %v1995_v27 = vmax.f32 %v1600_v22, 0.0  ;;  %v875_v28 = vadd.f32 %v4612_v47, %v874_v25  ;;  %v876_v29 = vpop.f32.mrb[137].mxu1  ;;  %1138 = vmatmul.mubr.f32.gmra.mrb[242].mxu1 %v377_v41  ;;  %v384_v47 = vld [vmem:[%s5711_s0 + $0xb90] sm:$0xff]  ;;  %v399_v41 = vld [vmem:[%s5711_s0 + $0xc08] sm:$0xff] }
 0x228   :  { %1142 = vmatprep.mubr.f32.mxu1 %v381_v23  ;;  %v5288_v3 = vpop.f32.mrb[152].mxu0  ;;  %v402_v29 = vld [vmem:[%s5711_s0 + $0xc20] sm:$0xff] }
 0x229   :  { %2129 = vst.msk [vmem:[%s5713_s3 + $0x218] sm:$0xff] %vm2061_vm1, %v1995_v27  ;;  %v1605_v32 = vadd.f32 %v5131_v62, %v875_v28  ;;  %v2612_v43 = vpop.f32.mrb[153].mxu0  ;;  %2770 = vmatmul.mubr.f32.gmra.mrb[2].mxu0 %v403_v35  ;;  %v398_v27 = vld [vmem:[%s5711_s0 + $0xc00] sm:$0xff]  ;;  %v401_v35 = vld [vmem:[%s5711_s0 + $0xc18] sm:$0xff] }
 0x22a   :  { %v879_v34 = vpop.f32.mrb[138].mxu1  ;;  %2772 = vmatprep.mubr.msk.f32.mxu0 %vm3126_vm0, %v3127_v6 }
 0x22b   :  { %v1996_v36 = vmax.f32 %v1605_v32, 0.0  ;;  %v880_v62 = vadd.f32 %v5282_v37, %v879_v34  ;;  %v881_v38 = vpop.f32.mrb[139].mxu1  ;;  %1143 = vmatmul.mubr.f32.gmra.mrb[244].mxu1 %v380_v51 }
 0x22c   :  { %1147 = vmatprep.mubr.f32.mxu1 %v384_v47  ;;  %v5307_v12 = vpop.f32.mrb[154].mxu0 }
 0x22d   :  { %2130 = vst.msk [vmem:[%s5713_s3 + $0x220] sm:$0xff] %vm2061_vm1, %v1996_v36  ;;  %v1610_v42 = vadd.f32 %v5150_v11, %v880_v62  ;;  %v386_v11 = vld [vmem:[%s5711_s0 + $0xba0] sm:$0xff]  ;;  %v2615_v54 = vpop.f32.mrb[155].mxu0  ;;  %2773 = vmatmul.mubr.f32.gmra.mrb[4].mxu0 %v406_v45  ;;  %v405_v62 = vld [vmem:[%s5711_s0 + $0xc38] sm:$0xff] }
 0x22e   :  { %v884_v44 = vpop.f32.mrb[140].mxu1  ;;  %2775 = vmatprep.mubr.msk.f32.mxu0 %vm3126_vm0, %v3127_v6  ;;  %v407_v54 = vld [vmem:[%s5711_s0 + $0xc48] sm:$0xff] }
 0x22f   :  { %v1997_v46 = vmax.f32 %v1610_v42, 0.0  ;;  %v885_v60 = vadd.f32 %v5282_v37, %v884_v44  ;;  %v886_v48 = vpop.f32.mrb[141].mxu1  ;;  %1148 = vmatmul.mubr.f32.gmra.mrb[246].mxu1 %v383_v39  ;;  %v404_v44 = vld [vmem:[%s5711_s0 + $0xc30] sm:$0xff] }
 0x230   :  { %1152 = vmatprep.mubr.f32.mxu1 %v387_v1  ;;  %v5326_v0 = vpop.f32.mrb[156].mxu0 }
 0x231   :  { %2131 = vst.msk [vmem:[%s5713_s3 + $0x228] sm:$0xff] %vm2061_vm1, %v1997_v46  ;;  %v1615_v52 = vadd.f32 %v5169_v21, %v885_v60  ;;  %v389_v21 = vld [vmem:[%s5711_s0 + $0xbb8] sm:$0xff]  ;;  %v2618_v4 = vpop.f32.mrb[157].mxu0  ;;  %2776 = vmatmul.mubr.f32.gmra.mrb[6].mxu0 %v409_v57  ;;  %v408_v46 = vld [vmem:[%s5711_s0 + $0xc50] sm:$0xff]  ;;  %v411_v57 = vld [vmem:[%s5711_s0 + $0xc68] sm:$0x3] }
 0x232   :  { %v889_v56 = vpop.f32.mrb[142].mxu1  ;;  %2778 = vmatprep.mubr.msk.f32.mxu0 %vm3126_vm0, %v3127_v6 }
 0x233   :  { %v1998_v58 = vmax.f32 %v1615_v52, 0.0  ;;  %v890_v59 = vadd.f32 %v5282_v37, %v889_v56  ;;  %v891_v61 = vpop.f32.mrb[143].mxu1  ;;  %1153 = vmatmul.mubr.f32.gmra.mrb[248].mxu1 %v386_v11 }
 0x234   :  { %1157 = vmatprep.mubr.f32.mxu1 %v390_v53  ;;  %v5345_v31 = vpop.f32.mrb[158].mxu0 }
 0x235   :  { %2132 = vst.msk [vmem:[%s5713_s3 + $0x230] sm:$0xff] %vm2061_vm1, %v1998_v58  ;;  %v1620_v63 = vadd.f32 %v5188_v30, %v890_v59  ;;  %v392_v30 = vld [vmem:[%s5711_s0 + $0xbd0] sm:$0xff]  ;;  %v2621_v14 = vpop.f32.mrb[159].mxu0  ;;  %2779 = vmatmul.mubr.f32.gmra.mrb[8].mxu0 %v412_v7 }
 0x236   :  { %v894_v5 = vpop.f32.mrb[144].mxu1 }
 0x237   :  { %v1999_v8 = vmax.f32 %v1620_v63, 0.0  ;;  %v895_v9 = vadd.f32 %v5282_v37, %v894_v5  ;;  %v896_v10 = vpop.f32.mrb[145].mxu1  ;;  %1158 = vmatmul.mubr.f32.gmra.mrb[250].mxu1 %v389_v21 }
 0x238   :  { %1162 = vmatprep.mubr.f32.mxu1 %v393_v2  ;;  %v5359_v20 = vpop.f32.mrb[160].mxu0  ;;  %v410_v2 = vld [vmem:[%s5711_s0 + $0xc60] sm:$0x3] }
 0x239   :  { %2133 = vst.msk [vmem:[%s5713_s3 + $0x238] sm:$0xff] %vm2061_vm1, %v1999_v8  ;;  %v1625_v6 = vadd.f32 %v5207_v40, %v895_v9  ;;  %v2624_v22 = vpop.f32.mrb[161].mxu0 }
 0x23a   :  { %v899_v15 = vpop.f32.mrb[146].mxu1 }
 0x23b   :  { %v2000_v16 = vmax.f32 %v1625_v6, 0.0  ;;  %v900_v17 = vadd.f32 %v5282_v37, %v899_v15  ;;  %v901_v18 = vpop.f32.mrb[147].mxu1  ;;  %1163 = vmatmul.mubr.f32.gmra.mrb[252].mxu1 %v392_v30 }
 0x23c   :  { %1167 = vmatprep.mubr.f32.mxu1 %v396_v13  ;;  %v5373_v28 = vpop.f32.mrb[162].mxu0 }
 0x23d   :  { %2134 = vst.msk [vmem:[%s5713_s3 + $0x240] sm:$0xff] %vm2061_vm1, %v2000_v16  ;;  %v1630_v40 = vadd.f32 %v5226_v50, %v900_v17  ;;  %v2627_v51 = vpop.f32.mrb[163].mxu0 }
 0x23e   :  { %v904_v23 = vpop.f32.mrb[148].mxu1 }
 0x23f   :  { %v2001_v24 = vmax.f32 %v1630_v40, 0.0  ;;  %v905_v25 = vadd.f32 %v5282_v37, %v904_v23  ;;  %v906_v26 = vpop.f32.mrb[149].mxu1  ;;  %1168 = vmatmul.mubr.f32.gmra.mrb[254].mxu1 %v395_v19 }
 0x240   :  { %1172 = vmatprep.mubr.f32.mxu1 %v399_v41  ;;  %v5387_v36 = vpop.f32.mrb[164].mxu0 }
 0x241   :  { %2135 = vst.msk [vmem:[%s5713_s3 + $0x248] sm:$0xff] %vm2061_vm1, %v2001_v24  ;;  %v1635_v50 = vadd.f32 %v5245_v55, %v905_v25  ;;  %v2630_v38 = vpop.f32.mrb[165].mxu0 }
 0x242   :  { %v909_v32 = vpop.f32.mrb[150].mxu1 }
 0x243   :  { %v2002_v47 = vmax.f32 %v1635_v50, 0.0  ;;  %v911_v33 = vpop.f32.mrb[151].mxu1  ;;  %1173 = vmatmul.mubr.f32.gmra.mrb[150].mxu1 %v398_v27  ;;  %v910_v34 = vadd.f32 %v5282_v37, %v909_v32 }
 0x244   :  { %1177 = vmatprep.mubr.f32.mxu1 %v402_v29  ;;  %v5401_v45 = vpop.f32.mrb[166].mxu0 }
 0x245   :  { %2136 = vst.msk [vmem:[%s5713_s3 + $0x250] sm:$0xff] %vm2061_vm1, %v2002_v47  ;;  %v1640_v55 = vadd.f32 %v5264_v49, %v910_v34  ;;  %v2633_v60 = vpop.f32.mrb[167].mxu0 }
 0x246   :  { %v914_v39 = vpop.f32.mrb[152].mxu1 }
 0x247   :  { %v2003_v42 = vmax.f32 %v1640_v55, 0.0  ;;  %v916_v1 = vpop.f32.mrb[153].mxu1  ;;  %1178 = vmatmul.mubr.f32.gmra.mrb[152].mxu1 %v401_v35  ;;  %v915_v43 = vadd.f32 %v5282_v37, %v914_v39 }
 0x248   :  { %1182 = vmatprep.mubr.f32.mxu1 %v405_v62  ;;  %v5415_v56 = vpop.f32.mrb[168].mxu0 }
 0x249   :  { %2137 = vst.msk [vmem:[%s5713_s3 + $0x258] sm:$0xff] %vm2061_vm1, %v2003_v42  ;;  %v1645_v49 = vadd.f32 %v5288_v3, %v915_v43  ;;  %v2636_v58 = vpop.f32.mrb[169].mxu0 }
 0x24a   :  { %v919_v48 = vpop.f32.mrb[154].mxu1 }
 0x24b   :  { %v2004_v11 = vmax.f32 %v1645_v49, 0.0  ;;  %v921_v52 = vpop.f32.mrb[155].mxu1  ;;  %1183 = vmatmul.mubr.f32.gmra.mrb[154].mxu1 %v404_v44  ;;  %v920_v53 = vadd.f32 %v5282_v37, %v919_v48 }
 0x24c   :  { %1187 = vmatprep.mubr.f32.mxu1 %v408_v46  ;;  %v1689_v4 = vpop.f32.mrb[170].mxu0 }
 0x24d   :  { %2138 = vst.msk [vmem:[%s5713_s3 + $0x260] sm:$0xff] %vm2061_vm1, %v2004_v11  ;;  %v1650_v3 = vadd.f32 %v5307_v12, %v920_v53  ;;  %v2639_v5 = vpop.f32.mrb[171].mxu0 }
 0x24e   :  { %v924_v59 = vpop.f32.mrb[156].mxu1 }
 0x24f   :  { %v2005_v61 = vmax.f32 %v1650_v3, 0.0  ;;  %v926_v21 = vpop.f32.mrb[157].mxu1  ;;  %1188 = vmatmul.mubr.f32.gmra.mrb[156].mxu1 %v407_v54  ;;  %v925_v63 = vadd.f32 %v5282_v37, %v924_v59 }
 0x250   :  { %1192 = vmatprep.mubr.f32.mxu1 %v411_v57  ;;  %v1694_v30 = vpop.f32.mrb[172].mxu0 }
 0x251   :  { %2139 = vst.msk [vmem:[%s5713_s3 + $0x268] sm:$0xff] %vm2061_vm1, %v2005_v61  ;;  %v1655_v12 = vadd.f32 %v5326_v0, %v925_v63  ;;  %v2642_v13 = vpop.f32.mrb[173].mxu0 }
 0x252   :  { %v929_v7 = vpop.f32.mrb[158].mxu1 }
 0x253   :  { %v2006_v8 = vmax.f32 %v1655_v12, 0.0  ;;  %v931_v9 = vpop.f32.mrb[159].mxu1  ;;  %1193 = vmatmul.mubr.f32.gmra.mrb[158].mxu1 %v410_v2  ;;  %v930_v10 = vadd.f32 %v5282_v37, %v929_v7 }
 0x254   :  { %v1699_v17 = vpop.f32.mrb[174].mxu0 }
 0x255   :  { %2140 = vst.msk [vmem:[%s5713_s3 + $0x270] sm:$0xff] %vm2061_vm1, %v2006_v8  ;;  %v1660_v6 = vadd.f32 %v5345_v31, %v930_v10  ;;  %v2645_v19 = vpop.f32.mrb[175].mxu0 }
 0x256   :  { %v934_v14 = vpop.f32.mrb[160].mxu1 }
 0x257   :  { %v2007_v15 = vmax.f32 %v1660_v6, 0.0  ;;  %v935_v0 = vadd.f32 %v5282_v37, %v934_v14  ;;  %v936_v16 = vpop.f32.mrb[161].mxu1 }
 0x258   :  { %v1704_v23 = vpop.f32.mrb[176].mxu0 }
 0x259   :  { %2141 = vst.msk [vmem:[%s5713_s3 + $0x278] sm:$0xff] %vm2061_vm1, %v2007_v15  ;;  %v1665_v18 = vadd.f32 %v5359_v20, %v935_v0  ;;  %v2648_v25 = vpop.f32.mrb[177].mxu0 }
 0x25a   :  { %v939_v40 = vpop.f32.mrb[162].mxu1 }
 0x25b   :  { %v2008_v41 = vmax.f32 %v1665_v18, 0.0  ;;  %v940_v22 = vadd.f32 %v5282_v37, %v939_v40  ;;  %v941_v31 = vpop.f32.mrb[163].mxu1 }
 0x25c   :  { %v1709_v29 = vpop.f32.mrb[178].mxu0 }
 0x25d   :  { %2142 = vst.msk [vmem:[%s5713_s3 + $0x280] sm:$0xff] %vm2061_vm1, %v2008_v41  ;;  %v1670_v24 = vadd.f32 %v5373_v28, %v940_v22  ;;  %v2651_v32 = vpop.f32.mrb[179].mxu0 }
 0x25e   :  { %v944_v26 = vpop.f32.mrb[164].mxu1 }
 0x25f   :  { %v2009_v27 = vmax.f32 %v1670_v24, 0.0  ;;  %v945_v50 = vadd.f32 %v5282_v37, %v944_v26  ;;  %v946_v20 = vpop.f32.mrb[165].mxu1 }
 0x260   :  { %v1714_v35 = vpop.f32.mrb[180].mxu0 }
 0x261   :  { %2143 = vst.msk [vmem:[%s5713_s3 + $0x288] sm:$0xff] %vm2061_vm1, %v2009_v27  ;;  %v1675_v51 = vadd.f32 %v5387_v36, %v945_v50  ;;  %v2654_v62 = vpop.f32.mrb[181].mxu0 }
 0x262   :  { %v949_v47 = vpop.f32.mrb[166].mxu1 }
 0x263   :  { %v2010_v33 = vmax.f32 %v1675_v51, 0.0  ;;  %v950_v34 = vadd.f32 %v5282_v37, %v949_v47  ;;  %v951_v28 = vpop.f32.mrb[167].mxu1 }
 0x264   :  { %v1719_v1 = vpop.f32.mrb[182].mxu0 }
 0x265   :  { %2144 = vst.msk [vmem:[%s5713_s3 + $0x290] sm:$0xff] %vm2061_vm1, %v2010_v33  ;;  %v1680_v55 = vadd.f32 %v5401_v45, %v950_v34  ;;  %v2657_v44 = vpop.f32.mrb[183].mxu0 }
 0x266   :  { %v954_v38 = vpop.f32.mrb[168].mxu1 }
 0x267   :  { %v2011_v39 = vmax.f32 %v1680_v55, 0.0  ;;  %v955_v42 = vadd.f32 %v5282_v37, %v954_v38  ;;  %v956_v36 = vpop.f32.mrb[169].mxu1 }
 0x268   :  { %v1724_v48 = vpop.f32.mrb[184].mxu0 }
 0x269   :  { %2145 = vst.msk [vmem:[%s5713_s3 + $0x298] sm:$0xff] %vm2061_vm1, %v2011_v39  ;;  %v1685_v43 = vadd.f32 %v5415_v56, %v955_v42  ;;  %v2660_v52 = vpop.f32.mrb[185].mxu0 }
 0x26a   :  { %v959_v49 = vpop.f32.mrb[170].mxu1 }
 0x26b   :  { %v2012_v46 = vmax.f32 %v1685_v43, 0.0  ;;  %v960_v60 = vadd.f32 %v5282_v37, %v959_v49  ;;  %v961_v45 = vpop.f32.mrb[171].mxu1 }
 0x26c   :  { %v1729_v56 = vpop.f32.mrb[186].mxu0 }
 0x26d   :  { %2146 = vst.msk [vmem:[%s5713_s3 + $0x2a0] sm:$0xff] %vm2061_vm1, %v2012_v46  ;;  %v1690_v11 = vadd.f32 %v1689_v4, %v960_v60  ;;  %v2663_v59 = vpop.f32.mrb[187].mxu0 }
 0x26e   :  { %v964_v53 = vpop.f32.mrb[172].mxu1 }
 0x26f   :  { %v2013_v54 = vmax.f32 %v1690_v11, 0.0  ;;  %v965_v3 = vadd.f32 %v5282_v37, %v964_v53  ;;  %v966_v57 = vpop.f32.mrb[173].mxu1 }
 0x270   :  { %v1734_v4 = vpop.f32.mrb[188].mxu0 }
 0x271   :  { %2147 = vst.msk [vmem:[%s5713_s3 + $0x2a8] sm:$0xff] %vm2061_vm1, %v2013_v54  ;;  %v1695_v58 = vadd.f32 %v1694_v30, %v965_v3  ;;  %v2666_v5 = vpop.f32.mrb[189].mxu0 }
 0x272   :  { %v969_v61 = vpop.f32.mrb[174].mxu1 }
 0x273   :  { %v2014_v21 = vmax.f32 %v1695_v58, 0.0  ;;  %v970_v63 = vadd.f32 %v5282_v37, %v969_v61  ;;  %v971_v2 = vpop.f32.mrb[175].mxu1 }
 0x274   :  { %v1739_v30 = vpop.f32.mrb[190].mxu0 }
 0x275   :  { %2148 = vst.msk [vmem:[%s5713_s3 + $0x2b0] sm:$0xff] %vm2061_vm1, %v2014_v21  ;;  %v1700_v12 = vadd.f32 %v1699_v17, %v970_v63  ;;  %v2669_v13 = vpop.f32.mrb[191].mxu0 }
 0x276   :  { %v974_v7 = vpop.f32.mrb[176].mxu1 }
 0x277   :  { %v2015_v8 = vmax.f32 %v1700_v12, 0.0  ;;  %v975_v9 = vadd.f32 %v5282_v37, %v974_v7  ;;  %v976_v10 = vpop.f32.mrb[177].mxu1 }
 0x278   :  { %v1744_v17 = vpop.f32.mrb[192].mxu0 }
 0x279   :  { %2149 = vst.msk [vmem:[%s5713_s3 + $0x2b8] sm:$0xff] %vm2061_vm1, %v2015_v8  ;;  %v1705_v6 = vadd.f32 %v1704_v23, %v975_v9  ;;  %v2672_v19 = vpop.f32.mrb[193].mxu0 }
 0x27a   :  { %v979_v14 = vpop.f32.mrb[178].mxu1 }
 0x27b   :  { %v2016_v15 = vmax.f32 %v1705_v6, 0.0  ;;  %v980_v0 = vadd.f32 %v5282_v37, %v979_v14  ;;  %v981_v16 = vpop.f32.mrb[179].mxu1 }
 0x27c   :  { %v1749_v23 = vpop.f32.mrb[194].mxu0 }
 0x27d   :  { %2150 = vst.msk [vmem:[%s5713_s3 + $0x2c0] sm:$0xff] %vm2061_vm1, %v2016_v15  ;;  %v1710_v18 = vadd.f32 %v1709_v29, %v980_v0  ;;  %v2675_v25 = vpop.f32.mrb[195].mxu0 }
 0x27e   :  { %v984_v40 = vpop.f32.mrb[180].mxu1 }
 0x27f   :  { %v2017_v41 = vmax.f32 %v1710_v18, 0.0  ;;  %v985_v22 = vadd.f32 %v5282_v37, %v984_v40  ;;  %v986_v31 = vpop.f32.mrb[181].mxu1 }
 0x280   :  { %v1754_v29 = vpop.f32.mrb[196].mxu0 }
 0x281   :  { %2151 = vst.msk [vmem:[%s5713_s3 + $0x2c8] sm:$0xff] %vm2061_vm1, %v2017_v41  ;;  %v1715_v24 = vadd.f32 %v1714_v35, %v985_v22  ;;  %v2678_v32 = vpop.f32.mrb[197].mxu0 }
 0x282   :  { %v989_v26 = vpop.f32.mrb[182].mxu1 }
 0x283   :  { %v2018_v27 = vmax.f32 %v1715_v24, 0.0  ;;  %v990_v50 = vadd.f32 %v5282_v37, %v989_v26  ;;  %v991_v20 = vpop.f32.mrb[183].mxu1 }
 0x284   :  { %v1759_v35 = vpop.f32.mrb[198].mxu0 }
 0x285   :  { %2152 = vst.msk [vmem:[%s5713_s3 + $0x2d0] sm:$0xff] %vm2061_vm1, %v2018_v27  ;;  %v1720_v51 = vadd.f32 %v1719_v1, %v990_v50  ;;  %v2681_v62 = vpop.f32.mrb[199].mxu0 }
 0x286   :  { %v994_v47 = vpop.f32.mrb[184].mxu1 }
 0x287   :  { %v2019_v33 = vmax.f32 %v1720_v51, 0.0  ;;  %v995_v34 = vadd.f32 %v5282_v37, %v994_v47  ;;  %v996_v28 = vpop.f32.mrb[185].mxu1 }
 0x288   :  { %v1764_v1 = vpop.f32.mrb[200].mxu0 }
 0x289   :  { %2153 = vst.msk [vmem:[%s5713_s3 + $0x2d8] sm:$0xff] %vm2061_vm1, %v2019_v33  ;;  %v1725_v55 = vadd.f32 %v1724_v48, %v995_v34  ;;  %v2684_v44 = vpop.f32.mrb[201].mxu0 }
 0x28a   :  { %v999_v38 = vpop.f32.mrb[186].mxu1 }
 0x28b   :  { %v2020_v39 = vmax.f32 %v1725_v55, 0.0  ;;  %v1000_v42 = vadd.f32 %v5282_v37, %v999_v38  ;;  %v1001_v36 = vpop.f32.mrb[187].mxu1 }
 0x28c   :  { %v1769_v48 = vpop.f32.mrb[202].mxu0 }
 0x28d   :  { %2154 = vst.msk [vmem:[%s5713_s3 + $0x2e0] sm:$0xff] %vm2061_vm1, %v2020_v39  ;;  %v1730_v43 = vadd.f32 %v1729_v56, %v1000_v42  ;;  %v2687_v52 = vpop.f32.mrb[203].mxu0 }
 0x28e   :  { %v1004_v49 = vpop.f32.mrb[188].mxu1 }
 0x28f   :  { %v2021_v46 = vmax.f32 %v1730_v43, 0.0  ;;  %v1005_v60 = vadd.f32 %v5282_v37, %v1004_v49  ;;  %v1006_v45 = vpop.f32.mrb[189].mxu1 }
 0x290   :  { %v1774_v56 = vpop.f32.mrb[204].mxu0 }
 0x291   :  { %2155 = vst.msk [vmem:[%s5713_s3 + $0x2e8] sm:$0xff] %vm2061_vm1, %v2021_v46  ;;  %v1735_v11 = vadd.f32 %v1734_v4, %v1005_v60  ;;  %v2690_v59 = vpop.f32.mrb[205].mxu0 }
 0x292   :  { %v1009_v53 = vpop.f32.mrb[190].mxu1 }
 0x293   :  { %v2022_v54 = vmax.f32 %v1735_v11, 0.0  ;;  %v1010_v3 = vadd.f32 %v5282_v37, %v1009_v53  ;;  %v1011_v57 = vpop.f32.mrb[191].mxu1 }
 0x294   :  { %v1779_v4 = vpop.f32.mrb[206].mxu0 }
 0x295   :  { %2156 = vst.msk [vmem:[%s5713_s3 + $0x2f0] sm:$0xff] %vm2061_vm1, %v2022_v54  ;;  %v1740_v58 = vadd.f32 %v1739_v30, %v1010_v3  ;;  %v2693_v5 = vpop.f32.mrb[207].mxu0 }
 0x296   :  { %v1014_v61 = vpop.f32.mrb[192].mxu1 }
 0x297   :  { %v2023_v21 = vmax.f32 %v1740_v58, 0.0  ;;  %v1015_v63 = vadd.f32 %v5282_v37, %v1014_v61  ;;  %v1016_v2 = vpop.f32.mrb[193].mxu1 }
 0x298   :  { %v1784_v30 = vpop.f32.mrb[208].mxu0 }
 0x299   :  { %2157 = vst.msk [vmem:[%s5713_s3 + $0x2f8] sm:$0xff] %vm2061_vm1, %v2023_v21  ;;  %v1745_v12 = vadd.f32 %v1744_v17, %v1015_v63  ;;  %v2696_v13 = vpop.f32.mrb[209].mxu0 }
 0x29a   :  { %v1019_v7 = vpop.f32.mrb[194].mxu1 }
 0x29b   :  { %v2024_v8 = vmax.f32 %v1745_v12, 0.0  ;;  %v1020_v9 = vadd.f32 %v5282_v37, %v1019_v7  ;;  %v1021_v10 = vpop.f32.mrb[195].mxu1 }
 0x29c   :  { %v1789_v17 = vpop.f32.mrb[210].mxu0 }
 0x29d   :  { %2158 = vst.msk [vmem:[%s5713_s3 + $0x300] sm:$0xff] %vm2061_vm1, %v2024_v8  ;;  %v1750_v6 = vadd.f32 %v1749_v23, %v1020_v9  ;;  %v2699_v19 = vpop.f32.mrb[211].mxu0 }
 0x29e   :  { %v1024_v14 = vpop.f32.mrb[196].mxu1 }
 0x29f   :  { %v2025_v15 = vmax.f32 %v1750_v6, 0.0  ;;  %v1025_v0 = vadd.f32 %v5282_v37, %v1024_v14  ;;  %v1026_v16 = vpop.f32.mrb[197].mxu1 }
 0x2a0   :  { %v1794_v23 = vpop.f32.mrb[212].mxu0 }
 0x2a1   :  { %2159 = vst.msk [vmem:[%s5713_s3 + $0x308] sm:$0xff] %vm2061_vm1, %v2025_v15  ;;  %v1755_v18 = vadd.f32 %v1754_v29, %v1025_v0  ;;  %v2702_v25 = vpop.f32.mrb[213].mxu0 }
 0x2a2   :  { %v1029_v40 = vpop.f32.mrb[198].mxu1 }
 0x2a3   :  { %v2026_v41 = vmax.f32 %v1755_v18, 0.0  ;;  %v1030_v22 = vadd.f32 %v5282_v37, %v1029_v40  ;;  %v1031_v31 = vpop.f32.mrb[199].mxu1 }
 0x2a4   :  { %v1799_v29 = vpop.f32.mrb[214].mxu0 }
 0x2a5   :  { %2160 = vst.msk [vmem:[%s5713_s3 + $0x310] sm:$0xff] %vm2061_vm1, %v2026_v41  ;;  %v1760_v24 = vadd.f32 %v1759_v35, %v1030_v22  ;;  %v2705_v32 = vpop.f32.mrb[215].mxu0 }
 0x2a6   :  { %v1034_v26 = vpop.f32.mrb[200].mxu1 }
 0x2a7   :  { %v2027_v27 = vmax.f32 %v1760_v24, 0.0  ;;  %v1035_v50 = vadd.f32 %v5282_v37, %v1034_v26  ;;  %v1036_v20 = vpop.f32.mrb[201].mxu1 }
 0x2a8   :  { %v1804_v35 = vpop.f32.mrb[216].mxu0 }
 0x2a9   :  { %2161 = vst.msk [vmem:[%s5713_s3 + $0x318] sm:$0xff] %vm2061_vm1, %v2027_v27  ;;  %v1765_v51 = vadd.f32 %v1764_v1, %v1035_v50  ;;  %v2708_v62 = vpop.f32.mrb[217].mxu0 }
 0x2aa   :  { %v1039_v47 = vpop.f32.mrb[202].mxu1 }
 0x2ab   :  { %v2028_v33 = vmax.f32 %v1765_v51, 0.0  ;;  %v1040_v34 = vadd.f32 %v5282_v37, %v1039_v47  ;;  %v1041_v28 = vpop.f32.mrb[203].mxu1 }
 0x2ac   :  { %v1809_v1 = vpop.f32.mrb[218].mxu0 }
 0x2ad   :  { %2162 = vst.msk [vmem:[%s5713_s3 + $0x320] sm:$0xff] %vm2061_vm1, %v2028_v33  ;;  %v1770_v55 = vadd.f32 %v1769_v48, %v1040_v34  ;;  %v2711_v44 = vpop.f32.mrb[219].mxu0 }
 0x2ae   :  { %v1044_v38 = vpop.f32.mrb[204].mxu1 }
 0x2af   :  { %v2029_v39 = vmax.f32 %v1770_v55, 0.0  ;;  %v1045_v42 = vadd.f32 %v5282_v37, %v1044_v38  ;;  %v1046_v36 = vpop.f32.mrb[205].mxu1 }
 0x2b0   :  { %v1814_v48 = vpop.f32.mrb[220].mxu0 }
 0x2b1   :  { %2163 = vst.msk [vmem:[%s5713_s3 + $0x328] sm:$0xff] %vm2061_vm1, %v2029_v39  ;;  %v1775_v43 = vadd.f32 %v1774_v56, %v1045_v42  ;;  %v2714_v52 = vpop.f32.mrb[221].mxu0 }
 0x2b2   :  { %v1049_v49 = vpop.f32.mrb[206].mxu1 }
 0x2b3   :  { %v2030_v46 = vmax.f32 %v1775_v43, 0.0  ;;  %v1050_v60 = vadd.f32 %v5282_v37, %v1049_v49  ;;  %v1051_v45 = vpop.f32.mrb[207].mxu1 }
 0x2b4   :  { %v1819_v56 = vpop.f32.mrb[222].mxu0 }
 0x2b5   :  { %2164 = vst.msk [vmem:[%s5713_s3 + $0x330] sm:$0xff] %vm2061_vm1, %v2030_v46  ;;  %v1780_v11 = vadd.f32 %v1779_v4, %v1050_v60  ;;  %v2717_v59 = vpop.f32.mrb[223].mxu0 }
 0x2b6   :  { %v1054_v53 = vpop.f32.mrb[208].mxu1 }
 0x2b7   :  { %v2031_v54 = vmax.f32 %v1780_v11, 0.0  ;;  %v1055_v3 = vadd.f32 %v5282_v37, %v1054_v53  ;;  %v1056_v57 = vpop.f32.mrb[209].mxu1 }
 0x2b8   :  { %v1824_v4 = vpop.f32.mrb[224].mxu0 }
 0x2b9   :  { %2165 = vst.msk [vmem:[%s5713_s3 + $0x338] sm:$0xff] %vm2061_vm1, %v2031_v54  ;;  %v1785_v58 = vadd.f32 %v1784_v30, %v1055_v3  ;;  %v2720_v5 = vpop.f32.mrb[225].mxu0 }
 0x2ba   :  { %v1059_v61 = vpop.f32.mrb[210].mxu1 }
 0x2bb   :  { %v2032_v21 = vmax.f32 %v1785_v58, 0.0  ;;  %v1060_v63 = vadd.f32 %v5282_v37, %v1059_v61  ;;  %v1061_v2 = vpop.f32.mrb[211].mxu1 }
 0x2bc   :  { %v1829_v30 = vpop.f32.mrb[226].mxu0 }
 0x2bd   :  { %2166 = vst.msk [vmem:[%s5713_s3 + $0x340] sm:$0xff] %vm2061_vm1, %v2032_v21  ;;  %v1790_v12 = vadd.f32 %v1789_v17, %v1060_v63  ;;  %v2723_v13 = vpop.f32.mrb[227].mxu0 }
 0x2be   :  { %v1064_v7 = vpop.f32.mrb[212].mxu1 }
 0x2bf   :  { %v2033_v8 = vmax.f32 %v1790_v12, 0.0  ;;  %v1065_v9 = vadd.f32 %v5282_v37, %v1064_v7  ;;  %v1066_v10 = vpop.f32.mrb[213].mxu1 }
 0x2c0   :  { %v1834_v17 = vpop.f32.mrb[228].mxu0 }
 0x2c1   :  { %2167 = vst.msk [vmem:[%s5713_s3 + $0x348] sm:$0xff] %vm2061_vm1, %v2033_v8  ;;  %v1795_v6 = vadd.f32 %v1794_v23, %v1065_v9  ;;  %v2726_v19 = vpop.f32.mrb[229].mxu0 }
 0x2c2   :  { %v1069_v14 = vpop.f32.mrb[214].mxu1 }
 0x2c3   :  { %v2034_v15 = vmax.f32 %v1795_v6, 0.0  ;;  %v1070_v0 = vadd.f32 %v5282_v37, %v1069_v14  ;;  %v1071_v16 = vpop.f32.mrb[215].mxu1 }
 0x2c4   :  { %v1839_v23 = vpop.f32.mrb[230].mxu0 }
 0x2c5   :  { %2168 = vst.msk [vmem:[%s5713_s3 + $0x350] sm:$0xff] %vm2061_vm1, %v2034_v15  ;;  %v1800_v18 = vadd.f32 %v1799_v29, %v1070_v0  ;;  %v2729_v25 = vpop.f32.mrb[231].mxu0 }
 0x2c6   :  { %v1074_v40 = vpop.f32.mrb[216].mxu1 }
 0x2c7   :  { %v2035_v41 = vmax.f32 %v1800_v18, 0.0  ;;  %v1075_v22 = vadd.f32 %v5282_v37, %v1074_v40  ;;  %v1076_v31 = vpop.f32.mrb[217].mxu1 }
 0x2c8   :  { %v1844_v29 = vpop.f32.mrb[232].mxu0 }
 0x2c9   :  { %2169 = vst.msk [vmem:[%s5713_s3 + $0x358] sm:$0xff] %vm2061_vm1, %v2035_v41  ;;  %v1805_v24 = vadd.f32 %v1804_v35, %v1075_v22  ;;  %v2732_v32 = vpop.f32.mrb[233].mxu0 }
 0x2ca   :  { %v1079_v26 = vpop.f32.mrb[218].mxu1 }
 0x2cb   :  { %v2036_v27 = vmax.f32 %v1805_v24, 0.0  ;;  %v1080_v50 = vadd.f32 %v5282_v37, %v1079_v26  ;;  %v1081_v20 = vpop.f32.mrb[219].mxu1 }
 0x2cc   :  { %v1849_v35 = vpop.f32.mrb[234].mxu0 }
 0x2cd   :  { %2170 = vst.msk [vmem:[%s5713_s3 + $0x360] sm:$0xff] %vm2061_vm1, %v2036_v27  ;;  %v1810_v51 = vadd.f32 %v1809_v1, %v1080_v50  ;;  %v2735_v62 = vpop.f32.mrb[235].mxu0 }
 0x2ce   :  { %v1084_v47 = vpop.f32.mrb[220].mxu1 }
 0x2cf   :  { %v2037_v33 = vmax.f32 %v1810_v51, 0.0  ;;  %v1085_v34 = vadd.f32 %v5282_v37, %v1084_v47  ;;  %v1086_v28 = vpop.f32.mrb[221].mxu1 }
 0x2d0   :  { %v1854_v1 = vpop.f32.mrb[236].mxu0 }
 0x2d1   :  { %2171 = vst.msk [vmem:[%s5713_s3 + $0x368] sm:$0xff] %vm2061_vm1, %v2037_v33  ;;  %v1815_v55 = vadd.f32 %v1814_v48, %v1085_v34  ;;  %v2738_v44 = vpop.f32.mrb[237].mxu0 }
 0x2d2   :  { %v1089_v38 = vpop.f32.mrb[222].mxu1 }
 0x2d3   :  { %v2038_v39 = vmax.f32 %v1815_v55, 0.0  ;;  %v1090_v42 = vadd.f32 %v5282_v37, %v1089_v38  ;;  %v1091_v36 = vpop.f32.mrb[223].mxu1 }
 0x2d4   :  { %v1859_v48 = vpop.f32.mrb[238].mxu0 }
 0x2d5   :  { %2172 = vst.msk [vmem:[%s5713_s3 + $0x370] sm:$0xff] %vm2061_vm1, %v2038_v39  ;;  %v1820_v43 = vadd.f32 %v1819_v56, %v1090_v42  ;;  %v2741_v52 = vpop.f32.mrb[239].mxu0 }
 0x2d6   :  { %v1094_v49 = vpop.f32.mrb[224].mxu1 }
 0x2d7   :  { %v2039_v46 = vmax.f32 %v1820_v43, 0.0  ;;  %v1095_v60 = vadd.f32 %v5282_v37, %v1094_v49  ;;  %v1096_v45 = vpop.f32.mrb[225].mxu1 }
 0x2d8   :  { %v1864_v56 = vpop.f32.mrb[240].mxu0 }
 0x2d9   :  { %2173 = vst.msk [vmem:[%s5713_s3 + $0x378] sm:$0xff] %vm2061_vm1, %v2039_v46  ;;  %v1825_v11 = vadd.f32 %v1824_v4, %v1095_v60  ;;  %v2744_v59 = vpop.f32.mrb[241].mxu0 }
 0x2da   :  { %v1099_v53 = vpop.f32.mrb[226].mxu1 }
 0x2db   :  { %v2040_v54 = vmax.f32 %v1825_v11, 0.0  ;;  %v1100_v3 = vadd.f32 %v5282_v37, %v1099_v53  ;;  %v1101_v57 = vpop.f32.mrb[227].mxu1 }
 0x2dc   :  { %v1869_v4 = vpop.f32.mrb[242].mxu0 }
 0x2dd   :  { %2174 = vst.msk [vmem:[%s5713_s3 + $0x380] sm:$0xff] %vm2061_vm1, %v2040_v54  ;;  %v1830_v58 = vadd.f32 %v1829_v30, %v1100_v3  ;;  %v2747_v5 = vpop.f32.mrb[243].mxu0 }
 0x2de   :  { %v1104_v61 = vpop.f32.mrb[228].mxu1 }
 0x2df   :  { %v2041_v21 = vmax.f32 %v1830_v58, 0.0  ;;  %v1105_v63 = vadd.f32 %v5282_v37, %v1104_v61  ;;  %v1106_v2 = vpop.f32.mrb[229].mxu1 }
 0x2e0   :  { %v1874_v30 = vpop.f32.mrb[244].mxu0 }
 0x2e1   :  { %2175 = vst.msk [vmem:[%s5713_s3 + $0x388] sm:$0xff] %vm2061_vm1, %v2041_v21  ;;  %v1835_v12 = vadd.f32 %v1834_v17, %v1105_v63  ;;  %v2750_v13 = vpop.f32.mrb[245].mxu0 }
 0x2e2   :  { %v1109_v7 = vpop.f32.mrb[230].mxu1 }
 0x2e3   :  { %v2042_v8 = vmax.f32 %v1835_v12, 0.0  ;;  %v1110_v9 = vadd.f32 %v5282_v37, %v1109_v7  ;;  %v1111_v10 = vpop.f32.mrb[231].mxu1 }
 0x2e4   :  { %v1879_v17 = vpop.f32.mrb[246].mxu0 }
 0x2e5   :  { %2176 = vst.msk [vmem:[%s5713_s3 + $0x390] sm:$0xff] %vm2061_vm1, %v2042_v8  ;;  %v1840_v6 = vadd.f32 %v1839_v23, %v1110_v9  ;;  %v2753_v19 = vpop.f32.mrb[247].mxu0 }
 0x2e6   :  { %v1114_v14 = vpop.f32.mrb[232].mxu1 }
 0x2e7   :  { %v2043_v15 = vmax.f32 %v1840_v6, 0.0  ;;  %v1115_v0 = vadd.f32 %v5282_v37, %v1114_v14  ;;  %v1116_v16 = vpop.f32.mrb[233].mxu1 }
 0x2e8   :  { %v1884_v23 = vpop.f32.mrb[248].mxu0 }
 0x2e9   :  { %2177 = vst.msk [vmem:[%s5713_s3 + $0x398] sm:$0xff] %vm2061_vm1, %v2043_v15  ;;  %v1845_v18 = vadd.f32 %v1844_v29, %v1115_v0  ;;  %v2756_v25 = vpop.f32.mrb[249].mxu0 }
 0x2ea   :  { %v1119_v40 = vpop.f32.mrb[234].mxu1 }
 0x2eb   :  { %v2044_v41 = vmax.f32 %v1845_v18, 0.0  ;;  %v1120_v22 = vadd.f32 %v5282_v37, %v1119_v40  ;;  %v1121_v31 = vpop.f32.mrb[235].mxu1 }
 0x2ec   :  { %v1889_v29 = vpop.f32.mrb[250].mxu0 }
 0x2ed   :  { %2178 = vst.msk [vmem:[%s5713_s3 + $0x3a0] sm:$0xff] %vm2061_vm1, %v2044_v41  ;;  %v1850_v24 = vadd.f32 %v1849_v35, %v1120_v22  ;;  %v2759_v32 = vpop.f32.mrb[251].mxu0 }
 0x2ee   :  { %v1124_v26 = vpop.f32.mrb[236].mxu1 }
 0x2ef   :  { %v2045_v27 = vmax.f32 %v1850_v24, 0.0  ;;  %v1125_v50 = vadd.f32 %v5282_v37, %v1124_v26  ;;  %v1126_v20 = vpop.f32.mrb[237].mxu1  ;;  %v3124_v26 = vld [vmem:[%s5712_s2] ss:$0 sm:$0xff] }
 0x2f0   :  { %v1894_v35 = vpop.f32.mrb[252].mxu0 }
 0x2f1   :  { %2179 = vst.msk [vmem:[%s5713_s3 + $0x3a8] sm:$0xff] %vm2061_vm1, %v2045_v27  ;;  %v1855_v51 = vadd.f32 %v1854_v1, %v1125_v50  ;;  %v2762_v62 = vpop.f32.mrb[253].mxu0 }
 0x2f2   :  { %v1129_v47 = vpop.f32.mrb[238].mxu1 }
 0x2f3   :  { %v2046_v33 = vmax.f32 %v1855_v51, 0.0  ;;  %v1130_v34 = vadd.f32 %v5282_v37, %v1129_v47  ;;  %v1131_v28 = vpop.f32.mrb[239].mxu1 }
 0x2f4   :  { %v1899_v1 = vpop.f32.mrb[254].mxu0 }
 0x2f5   :  { %2180 = vst.msk [vmem:[%s5713_s3 + $0x3b0] sm:$0xff] %vm2061_vm1, %v2046_v33  ;;  %v1860_v55 = vadd.f32 %v1859_v48, %v1130_v34  ;;  %v2765_v44 = vpop.f32.mrb[255].mxu0 }
 0x2f6   :  { %v1134_v38 = vpop.f32.mrb[240].mxu1 }
 0x2f7   :  { %v2047_v39 = vmax.f32 %v1860_v55, 0.0  ;;  %v1135_v42 = vadd.f32 %v5282_v37, %v1134_v38  ;;  %v1136_v36 = vpop.f32.mrb[241].mxu1 }
 0x2f8   :  { %v1904_v48 = vpop.f32.mrb[0].mxu0 }
 0x2f9   :  { %2181 = vst.msk [vmem:[%s5713_s3 + $0x3b8] sm:$0xff] %vm2061_vm1, %v2047_v39  ;;  %v1865_v43 = vadd.f32 %v1864_v56, %v1135_v42  ;;  %v2768_v52 = vpop.f32.mrb[1].mxu0 }
 0x2fa   :  { %v1139_v49 = vpop.f32.mrb[242].mxu1 }
 0x2fb   :  { %v2048_v46 = vmax.f32 %v1865_v43, 0.0  ;;  %v1140_v60 = vadd.f32 %v5282_v37, %v1139_v49  ;;  %v1141_v45 = vpop.f32.mrb[243].mxu1 }
 0x2fc   :  { %v1909_v56 = vpop.f32.mrb[2].mxu0 }
 0x2fd   :  { %2182 = vst.msk [vmem:[%s5713_s3 + $0x3c0] sm:$0xff] %vm2061_vm1, %v2048_v46  ;;  %v1870_v11 = vadd.f32 %v1869_v4, %v1140_v60  ;;  %v2771_v59 = vpop.f32.mrb[3].mxu0 }
 0x2fe   :  { %v1144_v53 = vpop.f32.mrb[244].mxu1 }
 0x2ff   :  { %v2049_v54 = vmax.f32 %v1870_v11, 0.0  ;;  %v1145_v3 = vadd.f32 %v5282_v37, %v1144_v53  ;;  %v1146_v57 = vpop.f32.mrb[245].mxu1 }
 0x300   :  { %v1914_v4 = vpop.f32.mrb[4].mxu0 }
 0x301   :  { %2183 = vst.msk [vmem:[%s5713_s3 + $0x3c8] sm:$0xff] %vm2061_vm1, %v2049_v54  ;;  %v1875_v58 = vadd.f32 %v1874_v30, %v1145_v3  ;;  %v2774_v5 = vpop.f32.mrb[5].mxu0 }
 0x302   :  { %v1149_v61 = vpop.f32.mrb[246].mxu1 }
 0x303   :  { %v2050_v21 = vmax.f32 %v1875_v58, 0.0  ;;  %v1150_v63 = vadd.f32 %v5282_v37, %v1149_v61  ;;  %v1151_v2 = vpop.f32.mrb[247].mxu1 }
 0x304   :  { %v1919_v30 = vpop.f32.mrb[6].mxu0 }
 0x305   :  { %2184 = vst.msk [vmem:[%s5713_s3 + $0x3d0] sm:$0xff] %vm2061_vm1, %v2050_v21  ;;  %v1880_v12 = vadd.f32 %v1879_v17, %v1150_v63  ;;  %v2777_v13 = vpop.f32.mrb[7].mxu0 }
 0x306   :  { %v1154_v7 = vpop.f32.mrb[248].mxu1 }
 0x307   :  { %v2051_v8 = vmax.f32 %v1880_v12, 0.0  ;;  %v1155_v9 = vadd.f32 %v5282_v37, %v1154_v7  ;;  %v1156_v10 = vpop.f32.mrb[249].mxu1 }
 0x308   :  { %v1924_v17 = vpop.f32.mrb[8].mxu0 }
 0x309   :  { %2185 = vst.msk [vmem:[%s5713_s3 + $0x3d8] sm:$0xff] %vm2061_vm1, %v2051_v8  ;;  %v1885_v6 = vadd.f32 %v1884_v23, %v1155_v9  ;;  %v2780_v19 = vpop.f32.mrb[9].mxu0 }
 0x30a   :  { %v1159_v14 = vpop.f32.mrb[250].mxu1 }
 0x30b   :  { %v2052_v15 = vmax.f32 %v1885_v6, 0.0  ;;  %v1160_v0 = vadd.f32 %v5282_v37, %v1159_v14  ;;  %v1161_v16 = vpop.f32.mrb[251].mxu1 }
 0x30d   :  { %2186 = vst.msk [vmem:[%s5713_s3 + $0x3e0] sm:$0xff] %vm2061_vm1, %v2052_v15  ;;  %v1890_v18 = vadd.f32 %v1889_v29, %v1160_v0 }
 0x30e   :  { %v1164_v40 = vpop.f32.mrb[252].mxu1 }
 0x30f   :  { %v2053_v41 = vmax.f32 %v1890_v18, 0.0  ;;  %v1165_v22 = vadd.f32 %v5282_v37, %v1164_v40  ;;  %v1166_v31 = vpop.f32.mrb[253].mxu1 }
 0x311   :  { %2187 = vst.msk [vmem:[%s5713_s3 + $0x3e8] sm:$0xff] %vm2061_vm1, %v2053_v41  ;;  %v1895_v23 = vadd.f32 %v1894_v35, %v1165_v22 }
 0x312   :  { %v1169_v24 = vpop.f32.mrb[254].mxu1 }
 0x313   :  { %v2054_v25 = vmax.f32 %v1895_v23, 0.0  ;;  %v1170_v27 = vadd.f32 %v3124_v26, %v1169_v24  ;;  %v1171_v50 = vpop.f32.mrb[255].mxu1 }
 0x315   :  { %2188 = vst.msk [vmem:[%s5713_s3 + $0x3f0] sm:$0xff] %vm2061_vm1, %v2054_v25  ;;  %v1900_v37 = vadd.f32 %v1899_v1, %v1170_v27 }
 0x316   :  { %v1174_v20 = vpop.f32.mrb[150].mxu1 }
 0x317   :  { %v2055_v29 = vmax.f32 %v1900_v37, 0.0  ;;  %v1175_v51 = vadd.f32 %v3124_v26, %v1174_v20  ;;  %v1176_v32 = vpop.f32.mrb[151].mxu1 }
 0x319   :  { %2189 = vst.msk [vmem:[%s5713_s3 + $0x3f8] sm:$0xff] %vm2061_vm1, %v2055_v29  ;;  %v1905_v47 = vadd.f32 %v1904_v48, %v1175_v51 }
 0x31a   :  { %v1179_v33 = vpop.f32.mrb[152].mxu1 }
 0x31b   :  { %v2056_v34 = vmax.f32 %v1905_v47, 0.0  ;;  %v1180_v28 = vadd.f32 %v3124_v26, %v1179_v33  ;;  %v1181_v35 = vpop.f32.mrb[153].mxu1 }
 0x31d   :  { %2190 = vst.msk [vmem:[%s5713_s3 + $0x400] sm:$0xff] %vm2061_vm1, %v2056_v34  ;;  %v1910_v55 = vadd.f32 %v1909_v56, %v1180_v28 }
 0x31e   :  { %v1184_v62 = vpop.f32.mrb[154].mxu1 }
 0x31f   :  { %v2057_v38 = vmax.f32 %v1910_v55, 0.0  ;;  %v1185_v39 = vadd.f32 %v3124_v26, %v1184_v62  ;;  %v1186_v42 = vpop.f32.mrb[155].mxu1 }
 0x321   :  { %2191 = vst.msk [vmem:[%s5713_s3 + $0x408] sm:$0xff] %vm2061_vm1, %v2057_v38  ;;  %v1915_v36 = vadd.f32 %v1914_v4, %v1185_v39 }
 0x322   :  { %v1189_v1 = vpop.f32.mrb[156].mxu1 }
 0x323   :  { %v2058_v43 = vmax.f32 %v1915_v36, 0.0  ;;  %v1190_v44 = vadd.f32 %v3124_v26, %v1189_v1  ;;  %v1191_v49 = vpop.f32.mrb[157].mxu1 }
 0x325   :  { %2192 = vst.msk [vmem:[%s5713_s3 + $0x410] sm:$0xff] %vm2061_vm1, %v2058_v43  ;;  %v1920_v46 = vadd.f32 %v1919_v30, %v1190_v44 }
 0x326   :  { %v1194_v60 = vpop.f32.mrb[158].mxu1 }
 0x327   :  { %v2059_v45 = vmax.f32 %v1920_v46, 0.0  ;;  %v1195_v48 = vadd.f32 %v3124_v26, %v1194_v60  ;;  %v1196_v11 = vpop.f32.mrb[159].mxu1 }
 0x329   :  { %2193 = vst.msk [vmem:[%s5713_s3 + $0x418] sm:$0xff] %vm2061_vm1, %v2059_v45  ;;  %v1925_v52 = vadd.f32 %v1924_v17, %v1195_v48 }
 0x32b   :  { %v2060_v53 = vmax.f32 %v1925_v52, 0.0 }
 0x32d   :  { %2195 = vst.msk [vmem:[%s5713_s3 + $0x420] sm:$0x3] %vm2194_vm2, %v2060_v53 }

// kernel: forward.10
= control target key start
LH: loop header
LB: loop body
LE: loop exit
PB: predicated region body
PF: predicated region fallthrough
CT: control target
= control target key end

     0   :  { %vm287_vm0 = vcmask 130048   ;;  %vm798_vm1 = vcmask 123904   ;;  %s2101_s0 = inlined_call_operand.vmem [shape: f32[9,242,16], index: 0, kind: input, shape index: {}]   ;;  %s2102_s1 = inlined_call_operand.vmem [shape: f32[242,16], index: 1, kind: output, shape index: {}]  }
   0x1   :  { %v8_v0 = vld [vmem:[%s2101_s0] sm:$0xff]  ;;  %v39_v1 = vld [vmem:[%s2101_s0 + $0xf8] sm:$0xff]  ;;  %v70_v2 = vld [vmem:[%s2101_s0 + $0x1f0] sm:$0xff] }
   0x2   :  { %v101_v3 = vld [vmem:[%s2101_s0 + $0x2e8] sm:$0xff]  ;;  %v132_v4 = vld [vmem:[%s2101_s0 + $0x3e0] sm:$0xff]  ;;  %v288_v5 = vsel %vm287_vm0, %v8_v0, -inf  ;;  %v289_v6 = vsel %vm287_vm0, %v39_v1, -inf  ;;  %v291_v7 = vsel %vm287_vm0, %v70_v2, -inf  ;;  %v163_v8 = vld [vmem:[%s2101_s0 + $0x4d8] sm:$0xff] }
   0x3   :  { %v194_v9 = vld [vmem:[%s2101_s0 + $0x5d0] sm:$0xff]  ;;  %v225_v10 = vld [vmem:[%s2101_s0 + $0x6c8] sm:$0xff]  ;;  %v290_v11 = vmax.f32 %v288_v5, %v289_v6  ;;  %v293_v12 = vsel %vm287_vm0, %v101_v3, -inf  ;;  %v40_v14 = vld [vmem:[%s2101_s0 + $0x100] sm:$0xff]  ;;  %v295_v22 = vsel %vm287_vm0, %v132_v4, -inf  ;;  %v297_v23 = vsel %vm287_vm0, %v163_v8, -inf }
   0x4   :  { %v9_v13 = vld [vmem:[%s2101_s0 + $0x8] sm:$0xff]  ;;  %v71_v15 = vld [vmem:[%s2101_s0 + $0x1f8] sm:$0xff]  ;;  %v256_v16 = vld [vmem:[%s2101_s0 + $0x7c0] sm:$0xff]  ;;  %v306_v20 = vsel %vm287_vm0, %v40_v14, -inf  ;;  %v299_v29 = vsel %vm287_vm0, %v194_v9, -inf  ;;  %v301_v30 = vsel %vm287_vm0, %v225_v10, -inf }
   0x5   :  { %v292_v17 = vmax.f32 %v290_v11, %v291_v7  ;;  %v102_v18 = vld [vmem:[%s2101_s0 + $0x2f0] sm:$0xff]  ;;  %v305_v19 = vsel %vm287_vm0, %v9_v13, -inf  ;;  %v308_v21 = vsel %vm287_vm0, %v71_v15, -inf  ;;  %v133_v24 = vld [vmem:[%s2101_s0 + $0x3e8] sm:$0xff]  ;;  %v164_v25 = vld [vmem:[%s2101_s0 + $0x4e0] sm:$0xff]  ;;  %v303_v42 = vsel %vm287_vm0, %v256_v16, -inf }
   0x6   :  { %v195_v26 = vld [vmem:[%s2101_s0 + $0x5d8] sm:$0xff]  ;;  %v307_v27 = vmax.f32 %v305_v19, %v306_v20  ;;  %v310_v31 = vsel %vm287_vm0, %v102_v18, -inf  ;;  %v10_v32 = vld [vmem:[%s2101_s0 + $0x10] sm:$0xff]  ;;  %v41_v33 = vld [vmem:[%s2101_s0 + $0x108] sm:$0xff]  ;;  %v312_v44 = vsel %vm287_vm0, %v133_v24, -inf  ;;  %v314_v48 = vsel %vm287_vm0, %v164_v25, -inf }
   0x7   :  { %v294_v28 = vmax.f32 %v292_v17, %v293_v12  ;;  %v72_v34 = vld [vmem:[%s2101_s0 + $0x200] sm:$0xff]  ;;  %v226_v35 = vld [vmem:[%s2101_s0 + $0x6d0] sm:$0xff]  ;;  %v103_v37 = vld [vmem:[%s2101_s0 + $0x2f8] sm:$0xff]  ;;  %v322_v38 = vsel %vm287_vm0, %v10_v32, -inf  ;;  %v323_v39 = vsel %vm287_vm0, %v41_v33, -inf  ;;  %v316_v49 = vsel %vm287_vm0, %v195_v26, -inf }
   0x8   :  { %v309_v36 = vmax.f32 %v307_v27, %v308_v21  ;;  %v325_v40 = vsel %vm287_vm0, %v72_v34, -inf  ;;  %v257_v43 = vld [vmem:[%s2101_s0 + $0x7c8] sm:$0xff]  ;;  %v134_v45 = vld [vmem:[%s2101_s0 + $0x3f0] sm:$0xff]  ;;  %v324_v46 = vmax.f32 %v322_v38, %v323_v39  ;;  %v327_v50 = vsel %vm287_vm0, %v103_v37, -inf  ;;  %v11_v51 = vld [vmem:[%s2101_s0 + $0x18] sm:$0xff] }
   0x9   :  { %v296_v41 = vmax.f32 %v294_v28, %v295_v22  ;;  %v42_v52 = vld [vmem:[%s2101_s0 + $0x110] sm:$0xff]  ;;  %v73_v53 = vld [vmem:[%s2101_s0 + $0x208] sm:$0xff]  ;;  %v318_v55 = vsel %vm287_vm0, %v226_v35, -inf  ;;  %v196_v57 = vld [vmem:[%s2101_s0 + $0x5e0] sm:$0xff]  ;;  %v339_v60 = vsel %vm287_vm0, %v11_v51, -inf  ;;  %v329_v62 = vsel %vm287_vm0, %v134_v45, -inf }
   0xa   :  { %v311_v47 = vmax.f32 %v309_v36, %v310_v31  ;;  %v165_v56 = vld [vmem:[%s2101_s0 + $0x4e8] sm:$0xff]  ;;  %v326_v58 = vmax.f32 %v324_v46, %v325_v40  ;;  %v104_v59 = vld [vmem:[%s2101_s0 + $0x300] sm:$0xff]  ;;  %v135_v63 = vld [vmem:[%s2101_s0 + $0x3f8] sm:$0xff]  ;;  %v340_v0 = vsel %vm287_vm0, %v42_v52, -inf  ;;  %v342_v1 = vsel %vm287_vm0, %v73_v53, -inf }
   0xb   :  { %v298_v54 = vmax.f32 %v296_v41, %v297_v23  ;;  %v320_v3 = vsel %vm287_vm0, %v257_v43, -inf  ;;  %v341_v5 = vmax.f32 %v339_v60, %v340_v0  ;;  %v12_v6 = vld [vmem:[%s2101_s0 + $0x20] sm:$0xff]  ;;  %v43_v7 = vld [vmem:[%s2101_s0 + $0x118] sm:$0xff]  ;;  %v74_v8 = vld [vmem:[%s2101_s0 + $0x210] sm:$0xff]  ;;  %v331_v10 = vsel %vm287_vm0, %v165_v56, -inf }
   0xc   :  { %v313_v61 = vmax.f32 %v311_v47, %v312_v44  ;;  %v328_v4 = vmax.f32 %v326_v58, %v327_v50  ;;  %v333_v11 = vsel %vm287_vm0, %v196_v57, -inf  ;;  %v344_v12 = vsel %vm287_vm0, %v104_v59, -inf  ;;  %v227_v14 = vld [vmem:[%s2101_s0 + $0x6d8] sm:$0xff]  ;;  %v166_v16 = vld [vmem:[%s2101_s0 + $0x4f0] sm:$0xff]  ;;  %v105_v19 = vld [vmem:[%s2101_s0 + $0x308] sm:$0xff] }
   0xd   :  { %v300_v2 = vmax.f32 %v298_v54, %v299_v29  ;;  %v343_v17 = vmax.f32 %v341_v5, %v342_v1  ;;  %v346_v18 = vsel %vm287_vm0, %v135_v63, -inf  ;;  %v258_v21 = vld [vmem:[%s2101_s0 + $0x7d0] sm:$0xff]  ;;  %v356_v22 = vsel %vm287_vm0, %v12_v6, -inf  ;;  %v197_v27 = vld [vmem:[%s2101_s0 + $0x5e8] sm:$0xff]  ;;  %v136_v29 = vld [vmem:[%s2101_s0 + $0x400] sm:$0xff] }
   0xe   :  { %v315_v9 = vmax.f32 %v313_v61, %v314_v48  ;;  %v330_v15 = vmax.f32 %v328_v4, %v329_v62  ;;  %v357_v23 = vsel %vm287_vm0, %v43_v7, -inf  ;;  %v359_v24 = vsel %vm287_vm0, %v74_v8, -inf  ;;  %v13_v31 = vld [vmem:[%s2101_s0 + $0x28] sm:$0xff]  ;;  %v44_v36 = vld [vmem:[%s2101_s0 + $0x120] sm:$0xff]  ;;  %v167_v41 = vld [vmem:[%s2101_s0 + $0x4f8] sm:$0xff] }
   0xf   :  { %v302_v13 = vmax.f32 %v300_v2, %v301_v30  ;;  %v345_v28 = vmax.f32 %v343_v17, %v344_v12  ;;  %v358_v30 = vmax.f32 %v356_v22, %v357_v23  ;;  %v335_v33 = vsel %vm287_vm0, %v227_v14, -inf  ;;  %v228_v39 = vld [vmem:[%s2101_s0 + $0x6e0] sm:$0xff]  ;;  %v75_v43 = vld [vmem:[%s2101_s0 + $0x218] sm:$0xff]  ;;  %v106_v47 = vld [vmem:[%s2101_s0 + $0x310] sm:$0xff] }
  0x10   :  { %v317_v20 = vmax.f32 %v315_v9, %v316_v49  ;;  %v332_v26 = vmax.f32 %v330_v15, %v331_v10  ;;  %v348_v34 = vsel %vm287_vm0, %v166_v16, -inf  ;;  %v361_v35 = vsel %vm287_vm0, %v105_v19, -inf  ;;  %v259_v50 = vld [vmem:[%s2101_s0 + $0x7d8] sm:$0xff]  ;;  %v198_v52 = vld [vmem:[%s2101_s0 + $0x5f0] sm:$0xff]  ;;  %v137_v54 = vld [vmem:[%s2101_s0 + $0x408] sm:$0xff] }
  0x11   :  { %v304_v25 = vmax.f32 %v302_v13, %v303_v42  ;;  %v337_v38 = vsel %vm287_vm0, %v258_v21, -inf  ;;  %v347_v40 = vmax.f32 %v345_v28, %v346_v18  ;;  %v360_v42 = vmax.f32 %v358_v30, %v359_v24  ;;  %v14_v60 = vld [vmem:[%s2101_s0 + $0x30] sm:$0xff]  ;;  %v45_v61 = vld [vmem:[%s2101_s0 + $0x128] sm:$0xff]  ;;  %v168_v6 = vld [vmem:[%s2101_s0 + $0x500] sm:$0xff] }
  0x12   :  { %v319_v32 = vmax.f32 %v317_v20, %v318_v55  ;;  %v334_v37 = vmax.f32 %v332_v26, %v333_v11  ;;  %v350_v45 = vsel %vm287_vm0, %v197_v27, -inf  ;;  %v363_v46 = vsel %vm287_vm0, %v136_v29, -inf  ;;  %v229_v0 = vld [vmem:[%s2101_s0 + $0x6e8] sm:$0xff]  ;;  %v107_v9 = vld [vmem:[%s2101_s0 + $0x318] sm:$0xff]  ;;  %v260_v11 = vld [vmem:[%s2101_s0 + $0x7e0] sm:$0xff] }
  0x13   :  { %816 = vst.msk [vmem:[%s2102_s1] sm:$0xff] %vm287_vm0, %v304_v25  ;;  %v373_v48 = vsel %vm287_vm0, %v13_v31, -inf  ;;  %v349_v51 = vmax.f32 %v347_v40, %v348_v34  ;;  %v362_v53 = vmax.f32 %v360_v42, %v361_v35  ;;  %v374_v55 = vsel %vm287_vm0, %v44_v36, -inf  ;;  %v199_v13 = vld [vmem:[%s2101_s0 + $0x5f8] sm:$0xff]  ;;  %v138_v18 = vld [vmem:[%s2101_s0 + $0x410] sm:$0xff]  ;;  %v77_v27 = vld [vmem:[%s2101_s0 + $0x228] sm:$0xff] }
  0x14   :  { %v321_v44 = vmax.f32 %v319_v32, %v320_v3  ;;  %v336_v49 = vmax.f32 %v334_v37, %v335_v33  ;;  %v352_v56 = vsel %vm287_vm0, %v228_v39, -inf  ;;  %v365_v57 = vsel %vm287_vm0, %v167_v41, -inf  ;;  %v76_v3 = vld [vmem:[%s2101_s0 + $0x220] sm:$0xff]  ;;  %v15_v21 = vld [vmem:[%s2101_s0 + $0x38] sm:$0xff]  ;;  %v46_v22 = vld [vmem:[%s2101_s0 + $0x130] sm:$0xff] }
  0x15   :  { %v375_v58 = vmax.f32 %v373_v48, %v374_v55  ;;  %v376_v59 = vsel %vm287_vm0, %v75_v43, -inf  ;;  %v351_v63 = vmax.f32 %v349_v51, %v350_v45  ;;  %v364_v1 = vmax.f32 %v362_v53, %v363_v46  ;;  %v230_v29 = vld [vmem:[%s2101_s0 + $0x6f0] sm:$0xff]  ;;  %v169_v32 = vld [vmem:[%s2101_s0 + $0x508] sm:$0xff]  ;;  %v108_v34 = vld [vmem:[%s2101_s0 + $0x320] sm:$0xff] }
  0x16   :  { %817 = vst.msk [vmem:[%s2102_s1 + $0x8] sm:$0xff] %vm287_vm0, %v321_v44  ;;  %v338_v62 = vmax.f32 %v336_v49, %v337_v38  ;;  %v378_v2 = vsel %vm287_vm0, %v106_v47, -inf  ;;  %v354_v4 = vsel %vm287_vm0, %v259_v50, -inf  ;;  %v367_v5 = vsel %vm287_vm0, %v198_v52, -inf  ;;  %v261_v36 = vld [vmem:[%s2101_s0 + $0x7e8] sm:$0xff]  ;;  %v200_v37 = vld [vmem:[%s2101_s0 + $0x600] sm:$0xff] }
  0x17   :  { %v377_v7 = vmax.f32 %v375_v58, %v376_v59  ;;  %v380_v8 = vsel %vm287_vm0, %v137_v54, -inf  ;;  %v353_v10 = vmax.f32 %v351_v63, %v352_v56  ;;  %v366_v12 = vmax.f32 %v364_v1, %v365_v57  ;;  %v139_v43 = vld [vmem:[%s2101_s0 + $0x418] sm:$0xff]  ;;  %v16_v46 = vld [vmem:[%s2101_s0 + $0x40] sm:$0xff]  ;;  %v170_v56 = vld [vmem:[%s2101_s0 + $0x510] sm:$0xff] }
  0x18   :  { %818 = vst.msk [vmem:[%s2102_s1 + $0x10] sm:$0xff] %vm287_vm0, %v338_v62  ;;  %v390_v14 = vsel %vm287_vm0, %v14_v60, -inf  ;;  %v391_v15 = vsel %vm287_vm0, %v45_v61, -inf  ;;  %v369_v16 = vsel %vm287_vm0, %v229_v0, -inf  ;;  %v393_v20 = vsel %vm287_vm0, %v76_v3, -inf  ;;  %v47_v47 = vld [vmem:[%s2101_s0 + $0x138] sm:$0xff] }
  0x19   :  { %v379_v17 = vmax.f32 %v377_v7, %v378_v2  ;;  %v392_v19 = vmax.f32 %v390_v14, %v391_v15  ;;  %v355_v23 = vmax.f32 %v353_v10, %v354_v4  ;;  %v368_v24 = vmax.f32 %v366_v12, %v367_v5  ;;  %v231_v50 = vld [vmem:[%s2101_s0 + $0x6f8] sm:$0xff]  ;;  %v78_v58 = vld [vmem:[%s2101_s0 + $0x230] sm:$0xff]  ;;  %v109_v59 = vld [vmem:[%s2101_s0 + $0x328] sm:$0xff] }
  0x1a   :  { %v382_v25 = vsel %vm287_vm0, %v168_v6, -inf  ;;  %v395_v26 = vsel %vm287_vm0, %v107_v9, -inf  ;;  %v371_v28 = vsel %vm287_vm0, %v260_v11, -inf  ;;  %v384_v31 = vsel %vm287_vm0, %v199_v13, -inf  ;;  %v262_v60 = vld [vmem:[%s2101_s0 + $0x7f0] sm:$0xff]  ;;  %v201_v3 = vld [vmem:[%s2101_s0 + $0x608] sm:$0xff] }
  0x1b   :  { %v381_v30 = vmax.f32 %v379_v17, %v380_v8  ;;  %v394_v33 = vmax.f32 %v392_v19, %v393_v20  ;;  %819 = vst.msk [vmem:[%s2102_s1 + $0x18] sm:$0xff] %vm287_vm0, %v355_v23  ;;  %v370_v35 = vmax.f32 %v368_v24, %v369_v16  ;;  %v397_v38 = vsel %vm287_vm0, %v138_v18, -inf  ;;  %v140_v5 = vld [vmem:[%s2101_s0 + $0x420] sm:$0xff]  ;;  %v17_v7 = vld [vmem:[%s2101_s0 + $0x48] sm:$0xff]  ;;  %v171_v17 = vld [vmem:[%s2101_s0 + $0x518] sm:$0xff] }
  0x1c   :  { %v407_v39 = vsel %vm287_vm0, %v15_v21, -inf  ;;  %v408_v40 = vsel %vm287_vm0, %v46_v22, -inf  ;;  %v410_v45 = vsel %vm287_vm0, %v77_v27, -inf  ;;  %v386_v49 = vsel %vm287_vm0, %v230_v29, -inf  ;;  %v48_v12 = vld [vmem:[%s2101_s0 + $0x140] sm:$0xff]  ;;  %v79_v19 = vld [vmem:[%s2101_s0 + $0x238] sm:$0xff] }
  0x1d   :  { %v383_v41 = vmax.f32 %v381_v30, %v382_v25  ;;  %v396_v42 = vmax.f32 %v394_v33, %v395_v26  ;;  %v409_v44 = vmax.f32 %v407_v39, %v408_v40  ;;  %v372_v48 = vmax.f32 %v370_v35, %v371_v28  ;;  %v232_v15 = vld [vmem:[%s2101_s0 + $0x700] sm:$0xff]  ;;  %v110_v23 = vld [vmem:[%s2101_s0 + $0x330] sm:$0xff]  ;;  %v263_v26 = vld [vmem:[%s2101_s0 + $0x7f8] sm:$0xff] }
  0x1e   :  { %v399_v51 = vsel %vm287_vm0, %v169_v32, -inf  ;;  %v412_v52 = vsel %vm287_vm0, %v108_v34, -inf  ;;  %v388_v54 = vsel %vm287_vm0, %v261_v36, -inf  ;;  %v401_v61 = vsel %vm287_vm0, %v200_v37, -inf  ;;  %v202_v28 = vld [vmem:[%s2101_s0 + $0x610] sm:$0xff]  ;;  %v141_v30 = vld [vmem:[%s2101_s0 + $0x428] sm:$0xff] }
  0x1f   :  { %v385_v53 = vmax.f32 %v383_v41, %v384_v31  ;;  %v398_v55 = vmax.f32 %v396_v42, %v397_v38  ;;  %v411_v57 = vmax.f32 %v409_v44, %v410_v45  ;;  %820 = vst.msk [vmem:[%s2102_s1 + $0x20] sm:$0xff] %vm287_vm0, %v372_v48  ;;  %v414_v62 = vsel %vm287_vm0, %v139_v43, -inf  ;;  %v18_v36 = vld [vmem:[%s2101_s0 + $0x50] sm:$0xff]  ;;  %v49_v37 = vld [vmem:[%s2101_s0 + $0x148] sm:$0xff]  ;;  %v80_v43 = vld [vmem:[%s2101_s0 + $0x240] sm:$0xff] }
  0x20   :  { %v424_v63 = vsel %vm287_vm0, %v16_v46, -inf  ;;  %v425_v0 = vsel %vm287_vm0, %v47_v47, -inf  ;;  %v403_v8 = vsel %vm287_vm0, %v231_v50, -inf  ;;  %v416_v9 = vsel %vm287_vm0, %v170_v56, -inf  ;;  %v233_v40 = vld [vmem:[%s2101_s0 + $0x708] sm:$0xff]  ;;  %v172_v46 = vld [vmem:[%s2101_s0 + $0x520] sm:$0xff] }
  0x21   :  { %v387_v1 = vmax.f32 %v385_v53, %v386_v49  ;;  %v400_v2 = vmax.f32 %v398_v55, %v399_v51  ;;  %v413_v4 = vmax.f32 %v411_v57, %v412_v52  ;;  %v426_v6 = vmax.f32 %v424_v63, %v425_v0  ;;  %v111_v49 = vld [vmem:[%s2101_s0 + $0x338] sm:$0xff]  ;;  %v264_v51 = vld [vmem:[%s2101_s0 + $0x800] sm:$0xff] }
  0x22   :  { %v427_v10 = vsel %vm287_vm0, %v78_v58, -inf  ;;  %v429_v11 = vsel %vm287_vm0, %v109_v59, -inf  ;;  %v405_v20 = vsel %vm287_vm0, %v262_v60, -inf  ;;  %v418_v21 = vsel %vm287_vm0, %v201_v3, -inf  ;;  %v203_v53 = vld [vmem:[%s2101_s0 + $0x618] sm:$0xff]  ;;  %v142_v58 = vld [vmem:[%s2101_s0 + $0x430] sm:$0xff] }
  0x23   :  { %v389_v13 = vmax.f32 %v387_v1, %v388_v54  ;;  %v402_v14 = vmax.f32 %v400_v2, %v401_v61  ;;  %v415_v16 = vmax.f32 %v413_v4, %v414_v62  ;;  %v428_v18 = vmax.f32 %v426_v6, %v427_v10  ;;  %v19_v61 = vld [vmem:[%s2101_s0 + $0x58] sm:$0xff]  ;;  %v50_v62 = vld [vmem:[%s2101_s0 + $0x150] sm:$0xff]  ;;  %v81_v3 = vld [vmem:[%s2101_s0 + $0x248] sm:$0xff] }
  0x24   :  { %v431_v22 = vsel %vm287_vm0, %v140_v5, -inf  ;;  %v441_v24 = vsel %vm287_vm0, %v17_v7, -inf  ;;  %v442_v31 = vsel %vm287_vm0, %v48_v12, -inf  ;;  %v420_v32 = vsel %vm287_vm0, %v232_v15, -inf  ;;  %v234_v5 = vld [vmem:[%s2101_s0 + $0x710] sm:$0xff]  ;;  %v112_v10 = vld [vmem:[%s2101_s0 + $0x340] sm:$0xff] }
  0x25   :  { %821 = vst.msk [vmem:[%s2102_s1 + $0x28] sm:$0xff] %vm287_vm0, %v389_v13  ;;  %v404_v25 = vmax.f32 %v402_v14, %v403_v8  ;;  %v417_v27 = vmax.f32 %v415_v16, %v416_v9  ;;  %v430_v29 = vmax.f32 %v428_v18, %v429_v11  ;;  %v433_v33 = vsel %vm287_vm0, %v171_v17, -inf  ;;  %v173_v8 = vld [vmem:[%s2101_s0 + $0x528] sm:$0xff]  ;;  %v204_v13 = vld [vmem:[%s2101_s0 + $0x620] sm:$0xff] }
  0x26   :  { %v443_v34 = vmax.f32 %v441_v24, %v442_v31  ;;  %v444_v35 = vsel %vm287_vm0, %v79_v19, -inf  ;;  %v446_v42 = vsel %vm287_vm0, %v110_v23, -inf  ;;  %v422_v44 = vsel %vm287_vm0, %v263_v26, -inf  ;;  %v265_v12 = vld [vmem:[%s2101_s0 + $0x808] sm:$0xff]  ;;  %v143_v19 = vld [vmem:[%s2101_s0 + $0x438] sm:$0xff] }
  0x27   :  { %v406_v38 = vmax.f32 %v404_v25, %v405_v20  ;;  %v419_v39 = vmax.f32 %v417_v27, %v418_v21  ;;  %v432_v41 = vmax.f32 %v430_v29, %v431_v22  ;;  %v435_v45 = vsel %vm287_vm0, %v202_v28, -inf  ;;  %v20_v22 = vld [vmem:[%s2101_s0 + $0x60] sm:$0xff]  ;;  %v51_v23 = vld [vmem:[%s2101_s0 + $0x158] sm:$0xff] }
  0x28   :  { %v445_v47 = vmax.f32 %v443_v34, %v444_v35  ;;  %v448_v48 = vsel %vm287_vm0, %v141_v30, -inf  ;;  %v458_v54 = vsel %vm287_vm0, %v18_v36, -inf  ;;  %v459_v55 = vsel %vm287_vm0, %v49_v37, -inf  ;;  %v235_v26 = vld [vmem:[%s2101_s0 + $0x718] sm:$0xff]  ;;  %v82_v34 = vld [vmem:[%s2101_s0 + $0x250] sm:$0xff]  ;;  %v113_v35 = vld [vmem:[%s2101_s0 + $0x348] sm:$0xff] }
  0x29   :  { %822 = vst.msk [vmem:[%s2102_s1 + $0x30] sm:$0xff] %vm287_vm0, %v406_v38  ;;  %v421_v50 = vmax.f32 %v419_v39, %v420_v32  ;;  %v434_v52 = vmax.f32 %v432_v41, %v433_v33  ;;  %v437_v56 = vsel %vm287_vm0, %v233_v40, -inf  ;;  %v460_v59 = vmax.f32 %v458_v54, %v459_v55  ;;  %v174_v32 = vld [vmem:[%s2101_s0 + $0x530] sm:$0xff]  ;;  %v236_v55 = vld [vmem:[%s2101_s0 + $0x720] sm:$0xff] }
  0x2a   :  { %v447_v57 = vmax.f32 %v445_v47, %v446_v42  ;;  %v461_v60 = vsel %vm287_vm0, %v80_v43, -inf  ;;  %v450_v1 = vsel %vm287_vm0, %v172_v46, -inf  ;;  %v463_v2 = vsel %vm287_vm0, %v111_v49, -inf  ;;  %v266_v36 = vld [vmem:[%s2101_s0 + $0x810] sm:$0xff]  ;;  %v205_v43 = vld [vmem:[%s2101_s0 + $0x628] sm:$0xff] }
  0x2b   :  { %v423_v63 = vmax.f32 %v421_v50, %v422_v44  ;;  %v436_v0 = vmax.f32 %v434_v52, %v435_v45  ;;  %v439_v4 = vsel %vm287_vm0, %v264_v51, -inf  ;;  %v452_v7 = vsel %vm287_vm0, %v203_v53, -inf  ;;  %v144_v45 = vld [vmem:[%s2101_s0 + $0x440] sm:$0xff]  ;;  %v21_v47 = vld [vmem:[%s2101_s0 + $0x68] sm:$0xff] }
  0x2c   :  { %v449_v6 = vmax.f32 %v447_v57, %v448_v48  ;;  %v462_v9 = vmax.f32 %v460_v59, %v461_v60  ;;  %v465_v14 = vsel %vm287_vm0, %v142_v58, -inf  ;;  %v475_v15 = vsel %vm287_vm0, %v19_v61, -inf  ;;  %v52_v52 = vld [vmem:[%s2101_s0 + $0x160] sm:$0xff]  ;;  %v175_v57 = vld [vmem:[%s2101_s0 + $0x538] sm:$0xff] }
  0x2d   :  { %823 = vst.msk [vmem:[%s2102_s1 + $0x38] sm:$0xff] %vm287_vm0, %v423_v63  ;;  %v438_v11 = vmax.f32 %v436_v0, %v437_v56  ;;  %v476_v16 = vsel %vm287_vm0, %v50_v62, -inf  ;;  %v478_v21 = vsel %vm287_vm0, %v81_v3, -inf  ;;  %v454_v25 = vsel %vm287_vm0, %v234_v5, -inf  ;;  %v83_v59 = vld [vmem:[%s2101_s0 + $0x258] sm:$0xff]  ;;  %v114_v63 = vld [vmem:[%s2101_s0 + $0x350] sm:$0xff] }
  0x2e   :  { %v451_v17 = vmax.f32 %v449_v6, %v450_v1  ;;  %v464_v18 = vmax.f32 %v462_v9, %v463_v2  ;;  %v477_v20 = vmax.f32 %v475_v15, %v476_v16  ;;  %v467_v27 = vsel %vm287_vm0, %v173_v8, -inf  ;;  %v267_v2 = vld [vmem:[%s2101_s0 + $0x818] sm:$0xff]  ;;  %v145_v6 = vld [vmem:[%s2101_s0 + $0x448] sm:$0xff] }
  0x2f   :  { %v440_v24 = vmax.f32 %v438_v11, %v439_v4  ;;  %v480_v28 = vsel %vm287_vm0, %v112_v10, -inf  ;;  %v456_v30 = vsel %vm287_vm0, %v265_v12, -inf  ;;  %v469_v37 = vsel %vm287_vm0, %v204_v13, -inf  ;;  %v206_v4 = vld [vmem:[%s2101_s0 + $0x630] sm:$0xff]  ;;  %v53_v13 = vld [vmem:[%s2101_s0 + $0x168] sm:$0xff] }
  0x30   :  { %v453_v29 = vmax.f32 %v451_v17, %v452_v7  ;;  %v466_v31 = vmax.f32 %v464_v18, %v465_v14  ;;  %v479_v33 = vmax.f32 %v477_v20, %v478_v21  ;;  %v482_v38 = vsel %vm287_vm0, %v143_v19, -inf  ;;  %v22_v12 = vld [vmem:[%s2101_s0 + $0x70] sm:$0xff]  ;;  %v237_v16 = vld [vmem:[%s2101_s0 + $0x728] sm:$0xff]  ;;  %v84_v19 = vld [vmem:[%s2101_s0 + $0x260] sm:$0xff] }
  0x31   :  { %824 = vst.msk [vmem:[%s2102_s1 + $0x40] sm:$0xff] %vm287_vm0, %v440_v24  ;;  %v492_v39 = vsel %vm287_vm0, %v20_v22, -inf  ;;  %v493_v40 = vsel %vm287_vm0, %v51_v23, -inf  ;;  %v471_v48 = vsel %vm287_vm0, %v235_v26, -inf  ;;  %v484_v49 = vsel %vm287_vm0, %v174_v32, -inf  ;;  %v176_v22 = vld [vmem:[%s2101_s0 + $0x540] sm:$0xff] }
  0x32   :  { %v455_v41 = vmax.f32 %v453_v29, %v454_v25  ;;  %v468_v42 = vmax.f32 %v466_v31, %v467_v27  ;;  %v481_v44 = vmax.f32 %v479_v33, %v480_v28  ;;  %v494_v46 = vmax.f32 %v492_v39, %v493_v40  ;;  %v115_v25 = vld [vmem:[%s2101_s0 + $0x358] sm:$0xff]  ;;  %v268_v27 = vld [vmem:[%s2101_s0 + $0x820] sm:$0xff] }
  0x33   :  { %v495_v50 = vsel %vm287_vm0, %v82_v34, -inf  ;;  %v497_v51 = vsel %vm287_vm0, %v113_v35, -inf  ;;  %v473_v60 = vsel %vm287_vm0, %v266_v36, -inf  ;;  %v486_v61 = vsel %vm287_vm0, %v205_v43, -inf  ;;  %v207_v29 = vld [vmem:[%s2101_s0 + $0x638] sm:$0xff]  ;;  %v146_v34 = vld [vmem:[%s2101_s0 + $0x450] sm:$0xff] }
  0x34   :  { %v457_v53 = vmax.f32 %v455_v41, %v456_v30  ;;  %v470_v54 = vmax.f32 %v468_v42, %v469_v37  ;;  %v483_v56 = vmax.f32 %v481_v44, %v482_v38  ;;  %v496_v58 = vmax.f32 %v494_v46, %v495_v50  ;;  %v23_v37 = vld [vmem:[%s2101_s0 + $0x78] sm:$0xff]  ;;  %v54_v38 = vld [vmem:[%s2101_s0 + $0x170] sm:$0xff]  ;;  %v85_v43 = vld [vmem:[%s2101_s0 + $0x268] sm:$0xff] }
  0x35   :  { %v499_v62 = vsel %vm287_vm0, %v144_v45, -inf  ;;  %v509_v0 = vsel %vm287_vm0, %v21_v47, -inf  ;;  %v510_v7 = vsel %vm287_vm0, %v52_v52, -inf  ;;  %v488_v8 = vsel %vm287_vm0, %v236_v55, -inf  ;;  %v238_v45 = vld [vmem:[%s2101_s0 + $0x730] sm:$0xff]  ;;  %v116_v50 = vld [vmem:[%s2101_s0 + $0x360] sm:$0xff] }
  0x36   :  { %825 = vst.msk [vmem:[%s2102_s1 + $0x48] sm:$0xff] %vm287_vm0, %v457_v53  ;;  %v472_v1 = vmax.f32 %v470_v54, %v471_v48  ;;  %v485_v3 = vmax.f32 %v483_v56, %v484_v49  ;;  %v498_v5 = vmax.f32 %v496_v58, %v497_v51  ;;  %v501_v9 = vsel %vm287_vm0, %v175_v57, -inf  ;;  %v177_v48 = vld [vmem:[%s2101_s0 + $0x548] sm:$0xff]  ;;  %v208_v53 = vld [vmem:[%s2101_s0 + $0x640] sm:$0xff] }
  0x37   :  { %v511_v10 = vmax.f32 %v509_v0, %v510_v7  ;;  %v512_v11 = vsel %vm287_vm0, %v83_v59, -inf  ;;  %v514_v18 = vsel %vm287_vm0, %v114_v63, -inf  ;;  %v490_v20 = vsel %vm287_vm0, %v267_v2, -inf  ;;  %v269_v52 = vld [vmem:[%s2101_s0 + $0x828] sm:$0xff]  ;;  %v147_v59 = vld [vmem:[%s2101_s0 + $0x458] sm:$0xff] }
  0x38   :  { %v474_v14 = vmax.f32 %v472_v1, %v473_v60  ;;  %v487_v15 = vmax.f32 %v485_v3, %v486_v61  ;;  %v500_v17 = vmax.f32 %v498_v5, %v499_v62  ;;  %v503_v21 = vsel %vm287_vm0, %v206_v4, -inf  ;;  %v24_v62 = vld [vmem:[%s2101_s0 + $0x80] sm:$0xff]  ;;  %v55_v63 = vld [vmem:[%s2101_s0 + $0x178] sm:$0xff] }
  0x39   :  { %v513_v23 = vmax.f32 %v511_v10, %v512_v11  ;;  %v516_v24 = vsel %vm287_vm0, %v145_v6, -inf  ;;  %v526_v30 = vsel %vm287_vm0, %v22_v12, -inf  ;;  %v527_v31 = vsel %vm287_vm0, %v53_v13, -inf  ;;  %v239_v2 = vld [vmem:[%s2101_s0 + $0x738] sm:$0xff]  ;;  %v86_v10 = vld [vmem:[%s2101_s0 + $0x270] sm:$0xff]  ;;  %v117_v11 = vld [vmem:[%s2101_s0 + $0x368] sm:$0xff] }
  0x3a   :  { %826 = vst.msk [vmem:[%s2102_s1 + $0x50] sm:$0xff] %vm287_vm0, %v474_v14  ;;  %v489_v26 = vmax.f32 %v487_v15, %v488_v8  ;;  %v502_v28 = vmax.f32 %v500_v17, %v501_v9  ;;  %v505_v32 = vsel %vm287_vm0, %v237_v16, -inf  ;;  %v528_v35 = vmax.f32 %v526_v30, %v527_v31  ;;  %v178_v8 = vld [vmem:[%s2101_s0 + $0x550] sm:$0xff]  ;;  %v240_v31 = vld [vmem:[%s2101_s0 + $0x740] sm:$0xff] }
  0x3b   :  { %v515_v33 = vmax.f32 %v513_v23, %v514_v18  ;;  %v529_v36 = vsel %vm287_vm0, %v84_v19, -inf  ;;  %v518_v41 = vsel %vm287_vm0, %v176_v22, -inf  ;;  %v531_v42 = vsel %vm287_vm0, %v115_v25, -inf  ;;  %v270_v12 = vld [vmem:[%s2101_s0 + $0x830] sm:$0xff]  ;;  %v209_v19 = vld [vmem:[%s2101_s0 + $0x648] sm:$0xff] }
  0x3c   :  { %v491_v39 = vmax.f32 %v489_v26, %v490_v20  ;;  %v504_v40 = vmax.f32 %v502_v28, %v503_v21  ;;  %v507_v44 = vsel %vm287_vm0, %v268_v27, -inf  ;;  %v520_v47 = vsel %vm287_vm0, %v207_v29, -inf  ;;  %v148_v21 = vld [vmem:[%s2101_s0 + $0x460] sm:$0xff]  ;;  %v25_v23 = vld [vmem:[%s2101_s0 + $0x88] sm:$0xff] }
  0x3d   :  { %v517_v46 = vmax.f32 %v515_v33, %v516_v24  ;;  %v530_v49 = vmax.f32 %v528_v35, %v529_v36  ;;  %v533_v54 = vsel %vm287_vm0, %v146_v34, -inf  ;;  %v543_v55 = vsel %vm287_vm0, %v23_v37, -inf  ;;  %v56_v28 = vld [vmem:[%s2101_s0 + $0x180] sm:$0xff]  ;;  %v179_v33 = vld [vmem:[%s2101_s0 + $0x558] sm:$0xff] }
  0x3e   :  { %827 = vst.msk [vmem:[%s2102_s1 + $0x58] sm:$0xff] %vm287_vm0, %v491_v39  ;;  %v506_v51 = vmax.f32 %v504_v40, %v505_v32  ;;  %v544_v56 = vsel %vm287_vm0, %v54_v38, -inf  ;;  %v546_v61 = vsel %vm287_vm0, %v85_v43, -inf  ;;  %v522_v1 = vsel %vm287_vm0, %v238_v45, -inf  ;;  %v87_v35 = vld [vmem:[%s2101_s0 + $0x278] sm:$0xff]  ;;  %v118_v39 = vld [vmem:[%s2101_s0 + $0x370] sm:$0xff] }
  0x3f   :  { %v519_v57 = vmax.f32 %v517_v46, %v518_v41  ;;  %v532_v58 = vmax.f32 %v530_v49, %v531_v42  ;;  %v545_v60 = vmax.f32 %v543_v55, %v544_v56  ;;  %v535_v3 = vsel %vm287_vm0, %v177_v48, -inf  ;;  %v271_v42 = vld [vmem:[%s2101_s0 + $0x838] sm:$0xff]  ;;  %v149_v46 = vld [vmem:[%s2101_s0 + $0x468] sm:$0xff] }
  0x40   :  { %v508_v0 = vmax.f32 %v506_v51, %v507_v44  ;;  %v548_v4 = vsel %vm287_vm0, %v116_v50, -inf  ;;  %v524_v6 = vsel %vm287_vm0, %v269_v52, -inf  ;;  %v537_v13 = vsel %vm287_vm0, %v208_v53, -inf  ;;  %v210_v44 = vld [vmem:[%s2101_s0 + $0x650] sm:$0xff]  ;;  %v57_v53 = vld [vmem:[%s2101_s0 + $0x188] sm:$0xff] }
  0x41   :  { %v521_v5 = vmax.f32 %v519_v57, %v520_v47  ;;  %v534_v7 = vmax.f32 %v532_v58, %v533_v54  ;;  %v547_v9 = vmax.f32 %v545_v60, %v546_v61  ;;  %v550_v14 = vsel %vm287_vm0, %v147_v59, -inf  ;;  %v26_v52 = vld [vmem:[%s2101_s0 + $0x90] sm:$0xff]  ;;  %v241_v56 = vld [vmem:[%s2101_s0 + $0x748] sm:$0xff]  ;;  %v88_v59 = vld [vmem:[%s2101_s0 + $0x280] sm:$0xff] }
  0x42   :  { %828 = vst.msk [vmem:[%s2102_s1 + $0x60] sm:$0xff] %vm287_vm0, %v508_v0  ;;  %v560_v15 = vsel %vm287_vm0, %v24_v62, -inf  ;;  %v561_v16 = vsel %vm287_vm0, %v55_v63, -inf  ;;  %v539_v24 = vsel %vm287_vm0, %v239_v2, -inf  ;;  %v552_v25 = vsel %vm287_vm0, %v178_v8, -inf  ;;  %v180_v62 = vld [vmem:[%s2101_s0 + $0x560] sm:$0xff] }
  0x43   :  { %v523_v17 = vmax.f32 %v521_v5, %v522_v1  ;;  %v536_v18 = vmax.f32 %v534_v7, %v535_v3  ;;  %v549_v20 = vmax.f32 %v547_v9, %v548_v4  ;;  %v562_v22 = vmax.f32 %v560_v15, %v561_v16  ;;  %v119_v1 = vld [vmem:[%s2101_s0 + $0x378] sm:$0xff]  ;;  %v272_v3 = vld [vmem:[%s2101_s0 + $0x840] sm:$0xff] }
  0x44   :  { %v563_v26 = vsel %vm287_vm0, %v86_v10, -inf  ;;  %v565_v27 = vsel %vm287_vm0, %v117_v11, -inf  ;;  %v541_v36 = vsel %vm287_vm0, %v270_v12, -inf  ;;  %v554_v37 = vsel %vm287_vm0, %v209_v19, -inf  ;;  %v211_v5 = vld [vmem:[%s2101_s0 + $0x658] sm:$0xff]  ;;  %v150_v10 = vld [vmem:[%s2101_s0 + $0x470] sm:$0xff] }
  0x45   :  { %v525_v29 = vmax.f32 %v523_v17, %v524_v6  ;;  %v538_v30 = vmax.f32 %v536_v18, %v537_v13  ;;  %v551_v32 = vmax.f32 %v549_v20, %v550_v14  ;;  %v564_v34 = vmax.f32 %v562_v22, %v563_v26  ;;  %v27_v13 = vld [vmem:[%s2101_s0 + $0x98] sm:$0xff]  ;;  %v58_v14 = vld [vmem:[%s2101_s0 + $0x190] sm:$0xff]  ;;  %v89_v19 = vld [vmem:[%s2101_s0 + $0x288] sm:$0xff] }
  0x46   :  { %v567_v38 = vsel %vm287_vm0, %v148_v21, -inf  ;;  %v577_v40 = vsel %vm287_vm0, %v25_v23, -inf  ;;  %v578_v47 = vsel %vm287_vm0, %v56_v28, -inf  ;;  %v556_v48 = vsel %vm287_vm0, %v240_v31, -inf  ;;  %v242_v21 = vld [vmem:[%s2101_s0 + $0x750] sm:$0xff]  ;;  %v120_v26 = vld [vmem:[%s2101_s0 + $0x380] sm:$0xff] }
  0x47   :  { %829 = vst.msk [vmem:[%s2102_s1 + $0x68] sm:$0xff] %vm287_vm0, %v525_v29  ;;  %v540_v41 = vmax.f32 %v538_v30, %v539_v24  ;;  %v553_v43 = vmax.f32 %v551_v32, %v552_v25  ;;  %v566_v45 = vmax.f32 %v564_v34, %v565_v27  ;;  %v569_v49 = vsel %vm287_vm0, %v179_v33, -inf  ;;  %v181_v24 = vld [vmem:[%s2101_s0 + $0x568] sm:$0xff]  ;;  %v212_v29 = vld [vmem:[%s2101_s0 + $0x660] sm:$0xff] }
  0x48   :  { %v579_v50 = vmax.f32 %v577_v40, %v578_v47  ;;  %v580_v51 = vsel %vm287_vm0, %v87_v35, -inf  ;;  %v582_v58 = vsel %vm287_vm0, %v118_v39, -inf  ;;  %v558_v60 = vsel %vm287_vm0, %v271_v42, -inf  ;;  %v273_v28 = vld [vmem:[%s2101_s0 + $0x848] sm:$0xff]  ;;  %v151_v35 = vld [vmem:[%s2101_s0 + $0x478] sm:$0xff] }
  0x49   :  { %v542_v54 = vmax.f32 %v540_v41, %v541_v36  ;;  %v555_v55 = vmax.f32 %v553_v43, %v554_v37  ;;  %v568_v57 = vmax.f32 %v566_v45, %v567_v38  ;;  %v571_v61 = vsel %vm287_vm0, %v210_v44, -inf  ;;  %v28_v38 = vld [vmem:[%s2101_s0 + $0xa0] sm:$0xff]  ;;  %v59_v39 = vld [vmem:[%s2101_s0 + $0x198] sm:$0xff] }
  0x4a   :  { %v581_v63 = vmax.f32 %v579_v50, %v580_v51  ;;  %v584_v0 = vsel %vm287_vm0, %v149_v46, -inf  ;;  %v594_v6 = vsel %vm287_vm0, %v26_v52, -inf  ;;  %v595_v7 = vsel %vm287_vm0, %v57_v53, -inf  ;;  %v243_v42 = vld [vmem:[%s2101_s0 + $0x758] sm:$0xff]  ;;  %v90_v50 = vld [vmem:[%s2101_s0 + $0x290] sm:$0xff]  ;;  %v121_v51 = vld [vmem:[%s2101_s0 + $0x388] sm:$0xff] }
  0x4b   :  { %830 = vst.msk [vmem:[%s2102_s1 + $0x70] sm:$0xff] %vm287_vm0, %v542_v54  ;;  %v557_v2 = vmax.f32 %v555_v55, %v556_v48  ;;  %v570_v4 = vmax.f32 %v568_v57, %v569_v49  ;;  %v573_v8 = vsel %vm287_vm0, %v241_v56, -inf  ;;  %v596_v11 = vmax.f32 %v594_v6, %v595_v7  ;;  %v182_v48 = vld [vmem:[%s2101_s0 + $0x570] sm:$0xff]  ;;  %v244_v7 = vld [vmem:[%s2101_s0 + $0x760] sm:$0xff] }
  0x4c   :  { %v583_v9 = vmax.f32 %v581_v63, %v582_v58  ;;  %v597_v12 = vsel %vm287_vm0, %v88_v59, -inf  ;;  %v586_v17 = vsel %vm287_vm0, %v180_v62, -inf  ;;  %v599_v18 = vsel %vm287_vm0, %v119_v1, -inf  ;;  %v274_v52 = vld [vmem:[%s2101_s0 + $0x850] sm:$0xff]  ;;  %v213_v59 = vld [vmem:[%s2101_s0 + $0x668] sm:$0xff] }
  0x4d   :  { %v559_v15 = vmax.f32 %v557_v2, %v558_v60  ;;  %v572_v16 = vmax.f32 %v570_v4, %v571_v61  ;;  %v575_v20 = vsel %vm287_vm0, %v272_v3, -inf  ;;  %v588_v23 = vsel %vm287_vm0, %v211_v5, -inf  ;;  %v152_v61 = vld [vmem:[%s2101_s0 + $0x480] sm:$0xff]  ;;  %v29_v63 = vld [vmem:[%s2101_s0 + $0xa8] sm:$0xff] }
  0x4e   :  { %v585_v22 = vmax.f32 %v583_v9, %v584_v0  ;;  %v598_v25 = vmax.f32 %v596_v11, %v597_v12  ;;  %v601_v30 = vsel %vm287_vm0, %v150_v10, -inf  ;;  %v611_v31 = vsel %vm287_vm0, %v27_v13, -inf  ;;  %v60_v4 = vld [vmem:[%s2101_s0 + $0x1a0] sm:$0xff]  ;;  %v183_v9 = vld [vmem:[%s2101_s0 + $0x578] sm:$0xff] }
  0x4f   :  { %831 = vst.msk [vmem:[%s2102_s1 + $0x78] sm:$0xff] %vm287_vm0, %v559_v15  ;;  %v574_v27 = vmax.f32 %v572_v16, %v573_v8  ;;  %v612_v32 = vsel %vm287_vm0, %v58_v14, -inf  ;;  %v614_v37 = vsel %vm287_vm0, %v89_v19, -inf  ;;  %v590_v41 = vsel %vm287_vm0, %v242_v21, -inf  ;;  %v91_v11 = vld [vmem:[%s2101_s0 + $0x298] sm:$0xff]  ;;  %v122_v15 = vld [vmem:[%s2101_s0 + $0x390] sm:$0xff] }
  0x50   :  { %v587_v33 = vmax.f32 %v585_v22, %v586_v17  ;;  %v600_v34 = vmax.f32 %v598_v25, %v599_v18  ;;  %v613_v36 = vmax.f32 %v611_v31, %v612_v32  ;;  %v603_v43 = vsel %vm287_vm0, %v181_v24, -inf  ;;  %v275_v18 = vld [vmem:[%s2101_s0 + $0x858] sm:$0xff]  ;;  %v153_v22 = vld [vmem:[%s2101_s0 + $0x488] sm:$0xff] }
  0x51   :  { %v576_v40 = vmax.f32 %v574_v27, %v575_v20  ;;  %v616_v44 = vsel %vm287_vm0, %v120_v26, -inf  ;;  %v592_v46 = vsel %vm287_vm0, %v273_v28, -inf  ;;  %v605_v53 = vsel %vm287_vm0, %v212_v29, -inf  ;;  %v214_v20 = vld [vmem:[%s2101_s0 + $0x670] sm:$0xff]  ;;  %v61_v29 = vld [vmem:[%s2101_s0 + $0x1a8] sm:$0xff] }
  0x52   :  { %v589_v45 = vmax.f32 %v587_v33, %v588_v23  ;;  %v602_v47 = vmax.f32 %v600_v34, %v601_v30  ;;  %v615_v49 = vmax.f32 %v613_v36, %v614_v37  ;;  %v618_v54 = vsel %vm287_vm0, %v151_v35, -inf  ;;  %v30_v28 = vld [vmem:[%s2101_s0 + $0xb0] sm:$0xff]  ;;  %v245_v32 = vld [vmem:[%s2101_s0 + $0x768] sm:$0xff]  ;;  %v92_v35 = vld [vmem:[%s2101_s0 + $0x2a0] sm:$0xff] }
  0x53   :  { %832 = vst.msk [vmem:[%s2102_s1 + $0x80] sm:$0xff] %vm287_vm0, %v576_v40  ;;  %v628_v55 = vsel %vm287_vm0, %v28_v38, -inf  ;;  %v629_v56 = vsel %vm287_vm0, %v59_v39, -inf  ;;  %v607_v0 = vsel %vm287_vm0, %v243_v42, -inf  ;;  %v620_v1 = vsel %vm287_vm0, %v182_v48, -inf  ;;  %v184_v38 = vld [vmem:[%s2101_s0 + $0x580] sm:$0xff] }
  0x54   :  { %v591_v57 = vmax.f32 %v589_v45, %v590_v41  ;;  %v604_v58 = vmax.f32 %v602_v47, %v603_v43  ;;  %v617_v60 = vmax.f32 %v615_v49, %v616_v44  ;;  %v630_v62 = vmax.f32 %v628_v55, %v629_v56  ;;  %v123_v41 = vld [vmem:[%s2101_s0 + $0x398] sm:$0xff]  ;;  %v276_v43 = vld [vmem:[%s2101_s0 + $0x860] sm:$0xff] }
  0x55   :  { %v631_v2 = vsel %vm287_vm0, %v90_v50, -inf  ;;  %v633_v3 = vsel %vm287_vm0, %v121_v51, -inf  ;;  %v609_v12 = vsel %vm287_vm0, %v274_v52, -inf  ;;  %v622_v13 = vsel %vm287_vm0, %v213_v59, -inf  ;;  %v215_v45 = vld [vmem:[%s2101_s0 + $0x678] sm:$0xff]  ;;  %v154_v50 = vld [vmem:[%s2101_s0 + $0x490] sm:$0xff] }
  0x56   :  { %v593_v5 = vmax.f32 %v591_v57, %v592_v46  ;;  %v606_v6 = vmax.f32 %v604_v58, %v605_v53  ;;  %v619_v8 = vmax.f32 %v617_v60, %v618_v54  ;;  %v632_v10 = vmax.f32 %v630_v62, %v631_v2  ;;  %v31_v53 = vld [vmem:[%s2101_s0 + $0xb8] sm:$0xff]  ;;  %v62_v54 = vld [vmem:[%s2101_s0 + $0x1b0] sm:$0xff]  ;;  %v93_v59 = vld [vmem:[%s2101_s0 + $0x2a8] sm:$0xff] }
  0x57   :  { %v635_v14 = vsel %vm287_vm0, %v152_v61, -inf  ;;  %v645_v16 = vsel %vm287_vm0, %v29_v63, -inf  ;;  %v646_v23 = vsel %vm287_vm0, %v60_v4, -inf  ;;  %v624_v24 = vsel %vm287_vm0, %v244_v7, -inf  ;;  %v246_v61 = vld [vmem:[%s2101_s0 + $0x770] sm:$0xff]  ;;  %v124_v2 = vld [vmem:[%s2101_s0 + $0x3a0] sm:$0xff] }
  0x58   :  { %833 = vst.msk [vmem:[%s2102_s1 + $0x88] sm:$0xff] %vm287_vm0, %v593_v5  ;;  %v608_v17 = vmax.f32 %v606_v6, %v607_v0  ;;  %v621_v19 = vmax.f32 %v619_v8, %v620_v1  ;;  %v634_v21 = vmax.f32 %v632_v10, %v633_v3  ;;  %v637_v25 = vsel %vm287_vm0, %v183_v9, -inf  ;;  %v185_v0 = vld [vmem:[%s2101_s0 + $0x588] sm:$0xff]  ;;  %v216_v5 = vld [vmem:[%s2101_s0 + $0x680] sm:$0xff] }
  0x59   :  { %v647_v26 = vmax.f32 %v645_v16, %v646_v23  ;;  %v648_v27 = vsel %vm287_vm0, %v91_v11, -inf  ;;  %v650_v34 = vsel %vm287_vm0, %v122_v15, -inf  ;;  %v626_v36 = vsel %vm287_vm0, %v275_v18, -inf  ;;  %v277_v4 = vld [vmem:[%s2101_s0 + $0x868] sm:$0xff]  ;;  %v155_v11 = vld [vmem:[%s2101_s0 + $0x498] sm:$0xff] }
  0x5a   :  { %v610_v30 = vmax.f32 %v608_v17, %v609_v12  ;;  %v623_v31 = vmax.f32 %v621_v19, %v622_v13  ;;  %v636_v33 = vmax.f32 %v634_v21, %v635_v14  ;;  %v639_v37 = vsel %vm287_vm0, %v214_v20, -inf  ;;  %v32_v14 = vld [vmem:[%s2101_s0 + $0xc0] sm:$0xff]  ;;  %v63_v15 = vld [vmem:[%s2101_s0 + $0x1b8] sm:$0xff] }
  0x5b   :  { %v649_v39 = vmax.f32 %v647_v26, %v648_v27  ;;  %v652_v40 = vsel %vm287_vm0, %v153_v22, -inf  ;;  %v662_v46 = vsel %vm287_vm0, %v30_v28, -inf  ;;  %v663_v47 = vsel %vm287_vm0, %v61_v29, -inf  ;;  %v247_v18 = vld [vmem:[%s2101_s0 + $0x778] sm:$0xff]  ;;  %v94_v26 = vld [vmem:[%s2101_s0 + $0x2b0] sm:$0xff]  ;;  %v125_v27 = vld [vmem:[%s2101_s0 + $0x3a8] sm:$0xff] }
  0x5c   :  { %834 = vst.msk [vmem:[%s2102_s1 + $0x90] sm:$0xff] %vm287_vm0, %v610_v30  ;;  %v625_v42 = vmax.f32 %v623_v31, %v624_v24  ;;  %v638_v44 = vmax.f32 %v636_v33, %v637_v25  ;;  %v641_v48 = vsel %vm287_vm0, %v245_v32, -inf  ;;  %v664_v51 = vmax.f32 %v662_v46, %v663_v47  ;;  %v186_v24 = vld [vmem:[%s2101_s0 + $0x590] sm:$0xff]  ;;  %v248_v47 = vld [vmem:[%s2101_s0 + $0x780] sm:$0xff] }
  0x5d   :  { %v651_v49 = vmax.f32 %v649_v39, %v650_v34  ;;  %v665_v52 = vsel %vm287_vm0, %v92_v35, -inf  ;;  %v654_v57 = vsel %vm287_vm0, %v184_v38, -inf  ;;  %v667_v58 = vsel %vm287_vm0, %v123_v41, -inf  ;;  %v278_v28 = vld [vmem:[%s2101_s0 + $0x870] sm:$0xff]  ;;  %v217_v35 = vld [vmem:[%s2101_s0 + $0x688] sm:$0xff] }
  0x5e   :  { %v627_v55 = vmax.f32 %v625_v42, %v626_v36  ;;  %v640_v56 = vmax.f32 %v638_v44, %v639_v37  ;;  %v643_v60 = vsel %vm287_vm0, %v276_v43, -inf  ;;  %v656_v63 = vsel %vm287_vm0, %v215_v45, -inf  ;;  %v156_v37 = vld [vmem:[%s2101_s0 + $0x4a0] sm:$0xff]  ;;  %v33_v39 = vld [vmem:[%s2101_s0 + $0xc8] sm:$0xff] }
  0x5f   :  { %v653_v62 = vmax.f32 %v651_v49, %v652_v40  ;;  %v666_v1 = vmax.f32 %v664_v51, %v665_v52  ;;  %v669_v6 = vsel %vm287_vm0, %v154_v50, -inf  ;;  %v679_v7 = vsel %vm287_vm0, %v31_v53, -inf  ;;  %v64_v44 = vld [vmem:[%s2101_s0 + $0x1c0] sm:$0xff]  ;;  %v187_v49 = vld [vmem:[%s2101_s0 + $0x598] sm:$0xff] }
  0x60   :  { %835 = vst.msk [vmem:[%s2102_s1 + $0x98] sm:$0xff] %vm287_vm0, %v627_v55  ;;  %v642_v3 = vmax.f32 %v640_v56, %v641_v48  ;;  %v680_v8 = vsel %vm287_vm0, %v62_v54, -inf  ;;  %v682_v13 = vsel %vm287_vm0, %v93_v59, -inf  ;;  %v658_v17 = vsel %vm287_vm0, %v246_v61, -inf  ;;  %v95_v51 = vld [vmem:[%s2101_s0 + $0x2b8] sm:$0xff]  ;;  %v126_v55 = vld [vmem:[%s2101_s0 + $0x3b0] sm:$0xff] }
  0x61   :  { %v655_v9 = vmax.f32 %v653_v62, %v654_v57  ;;  %v668_v10 = vmax.f32 %v666_v1, %v667_v58  ;;  %v681_v12 = vmax.f32 %v679_v7, %v680_v8  ;;  %v671_v19 = vsel %vm287_vm0, %v185_v0, -inf  ;;  %v279_v58 = vld [vmem:[%s2101_s0 + $0x878] sm:$0xff]  ;;  %v157_v62 = vld [vmem:[%s2101_s0 + $0x4a8] sm:$0xff] }
  0x62   :  { %v644_v16 = vmax.f32 %v642_v3, %v643_v60  ;;  %v684_v20 = vsel %vm287_vm0, %v124_v2, -inf  ;;  %v660_v22 = vsel %vm287_vm0, %v277_v4, -inf  ;;  %v673_v29 = vsel %vm287_vm0, %v216_v5, -inf  ;;  %v218_v60 = vld [vmem:[%s2101_s0 + $0x690] sm:$0xff]  ;;  %v65_v5 = vld [vmem:[%s2101_s0 + $0x1c8] sm:$0xff] }
  0x63   :  { %v657_v21 = vmax.f32 %v655_v9, %v656_v63  ;;  %v670_v23 = vmax.f32 %v668_v10, %v669_v6  ;;  %v683_v25 = vmax.f32 %v681_v12, %v682_v13  ;;  %v686_v30 = vsel %vm287_vm0, %v155_v11, -inf  ;;  %v34_v4 = vld [vmem:[%s2101_s0 + $0xd0] sm:$0xff]  ;;  %v249_v8 = vld [vmem:[%s2101_s0 + $0x788] sm:$0xff]  ;;  %v96_v11 = vld [vmem:[%s2101_s0 + $0x2c0] sm:$0xff] }
  0x64   :  { %836 = vst.msk [vmem:[%s2102_s1 + $0xa0] sm:$0xff] %vm287_vm0, %v644_v16  ;;  %v696_v31 = vsel %vm287_vm0, %v32_v14, -inf  ;;  %v697_v32 = vsel %vm287_vm0, %v63_v15, -inf  ;;  %v675_v40 = vsel %vm287_vm0, %v247_v18, -inf  ;;  %v688_v41 = vsel %vm287_vm0, %v186_v24, -inf  ;;  %v188_v14 = vld [vmem:[%s2101_s0 + $0x5a0] sm:$0xff] }
  0x65   :  { %v659_v33 = vmax.f32 %v657_v21, %v658_v17  ;;  %v672_v34 = vmax.f32 %v670_v23, %v671_v19  ;;  %v685_v36 = vmax.f32 %v683_v25, %v684_v20  ;;  %v698_v38 = vmax.f32 %v696_v31, %v697_v32  ;;  %v127_v17 = vld [vmem:[%s2101_s0 + $0x3b8] sm:$0xff]  ;;  %v280_v19 = vld [vmem:[%s2101_s0 + $0x880] sm:$0xff] }
  0x66   :  { %v699_v42 = vsel %vm287_vm0, %v94_v26, -inf  ;;  %v701_v43 = vsel %vm287_vm0, %v125_v27, -inf  ;;  %v677_v52 = vsel %vm287_vm0, %v278_v28, -inf  ;;  %v690_v53 = vsel %vm287_vm0, %v217_v35, -inf  ;;  %v219_v21 = vld [vmem:[%s2101_s0 + $0x698] sm:$0xff]  ;;  %v158_v26 = vld [vmem:[%s2101_s0 + $0x4b0] sm:$0xff] }
  0x67   :  { %v661_v45 = vmax.f32 %v659_v33, %v660_v22  ;;  %v674_v46 = vmax.f32 %v672_v34, %v673_v29  ;;  %v687_v48 = vmax.f32 %v685_v36, %v686_v30  ;;  %v700_v50 = vmax.f32 %v698_v38, %v699_v42  ;;  %v35_v29 = vld [vmem:[%s2101_s0 + $0xd8] sm:$0xff]  ;;  %v66_v30 = vld [vmem:[%s2101_s0 + $0x1d0] sm:$0xff]  ;;  %v97_v35 = vld [vmem:[%s2101_s0 + $0x2c8] sm:$0xff] }
  0x68   :  { %v703_v54 = vsel %vm287_vm0, %v156_v37, -inf  ;;  %v713_v56 = vsel %vm287_vm0, %v33_v39, -inf  ;;  %v714_v63 = vsel %vm287_vm0, %v64_v44, -inf  ;;  %v692_v0 = vsel %vm287_vm0, %v248_v47, -inf  ;;  %v250_v37 = vld [vmem:[%s2101_s0 + $0x790] sm:$0xff]  ;;  %v128_v42 = vld [vmem:[%s2101_s0 + $0x3c0] sm:$0xff] }
  0x69   :  { %837 = vst.msk [vmem:[%s2102_s1 + $0xa8] sm:$0xff] %vm287_vm0, %v661_v45  ;;  %v676_v57 = vmax.f32 %v674_v46, %v675_v40  ;;  %v689_v59 = vmax.f32 %v687_v48, %v688_v41  ;;  %v702_v61 = vmax.f32 %v700_v50, %v701_v43  ;;  %v705_v1 = vsel %vm287_vm0, %v187_v49, -inf  ;;  %v189_v40 = vld [vmem:[%s2101_s0 + $0x5a8] sm:$0xff]  ;;  %v220_v45 = vld [vmem:[%s2101_s0 + $0x6a0] sm:$0xff] }
  0x6a   :  { %v715_v2 = vmax.f32 %v713_v56, %v714_v63  ;;  %v716_v3 = vsel %vm287_vm0, %v95_v51, -inf  ;;  %v718_v10 = vsel %vm287_vm0, %v126_v55, -inf  ;;  %v694_v12 = vsel %vm287_vm0, %v279_v58, -inf  ;;  %v281_v44 = vld [vmem:[%s2101_s0 + $0x888] sm:$0xff]  ;;  %v159_v51 = vld [vmem:[%s2101_s0 + $0x4b8] sm:$0xff] }
  0x6b   :  { %v678_v6 = vmax.f32 %v676_v57, %v677_v52  ;;  %v691_v7 = vmax.f32 %v689_v59, %v690_v53  ;;  %v704_v9 = vmax.f32 %v702_v61, %v703_v54  ;;  %v707_v13 = vsel %vm287_vm0, %v218_v60, -inf  ;;  %v36_v54 = vld [vmem:[%s2101_s0 + $0xe0] sm:$0xff]  ;;  %v67_v55 = vld [vmem:[%s2101_s0 + $0x1d8] sm:$0xff] }
  0x6c   :  { %v717_v15 = vmax.f32 %v715_v2, %v716_v3  ;;  %v720_v16 = vsel %vm287_vm0, %v157_v62, -inf  ;;  %v730_v22 = vsel %vm287_vm0, %v34_v4, -inf  ;;  %v731_v23 = vsel %vm287_vm0, %v65_v5, -inf  ;;  %v251_v58 = vld [vmem:[%s2101_s0 + $0x798] sm:$0xff]  ;;  %v98_v2 = vld [vmem:[%s2101_s0 + $0x2d0] sm:$0xff]  ;;  %v129_v3 = vld [vmem:[%s2101_s0 + $0x3c8] sm:$0xff] }
  0x6d   :  { %838 = vst.msk [vmem:[%s2102_s1 + $0xb0] sm:$0xff] %vm287_vm0, %v678_v6  ;;  %v693_v18 = vmax.f32 %v691_v7, %v692_v0  ;;  %v706_v20 = vmax.f32 %v704_v9, %v705_v1  ;;  %v709_v24 = vsel %vm287_vm0, %v249_v8, -inf  ;;  %v732_v27 = vmax.f32 %v730_v22, %v731_v23  ;;  %v190_v0 = vld [vmem:[%s2101_s0 + $0x5b0] sm:$0xff]  ;;  %v252_v23 = vld [vmem:[%s2101_s0 + $0x7a0] sm:$0xff] }
  0x6e   :  { %v719_v25 = vmax.f32 %v717_v15, %v718_v10  ;;  %v733_v28 = vsel %vm287_vm0, %v96_v11, -inf  ;;  %v722_v33 = vsel %vm287_vm0, %v188_v14, -inf  ;;  %v735_v34 = vsel %vm287_vm0, %v127_v17, -inf  ;;  %v282_v4 = vld [vmem:[%s2101_s0 + $0x890] sm:$0xff]  ;;  %v221_v11 = vld [vmem:[%s2101_s0 + $0x6a8] sm:$0xff] }
  0x6f   :  { %v695_v31 = vmax.f32 %v693_v18, %v694_v12  ;;  %v708_v32 = vmax.f32 %v706_v20, %v707_v13  ;;  %v711_v36 = vsel %vm287_vm0, %v280_v19, -inf  ;;  %v724_v39 = vsel %vm287_vm0, %v219_v21, -inf  ;;  %v160_v13 = vld [vmem:[%s2101_s0 + $0x4c0] sm:$0xff]  ;;  %v37_v15 = vld [vmem:[%s2101_s0 + $0xe8] sm:$0xff] }
  0x70   :  { %v721_v38 = vmax.f32 %v719_v25, %v720_v16  ;;  %v734_v41 = vmax.f32 %v732_v27, %v733_v28  ;;  %v737_v46 = vsel %vm287_vm0, %v158_v26, -inf  ;;  %v747_v47 = vsel %vm287_vm0, %v35_v29, -inf  ;;  %v68_v20 = vld [vmem:[%s2101_s0 + $0x1e0] sm:$0xff]  ;;  %v191_v25 = vld [vmem:[%s2101_s0 + $0x5b8] sm:$0xff] }
  0x71   :  { %839 = vst.msk [vmem:[%s2102_s1 + $0xb8] sm:$0xff] %vm287_vm0, %v695_v31  ;;  %v710_v43 = vmax.f32 %v708_v32, %v709_v24  ;;  %v748_v48 = vsel %vm287_vm0, %v66_v30, -inf  ;;  %v750_v53 = vsel %vm287_vm0, %v97_v35, -inf  ;;  %v726_v57 = vsel %vm287_vm0, %v250_v37, -inf  ;;  %v99_v27 = vld [vmem:[%s2101_s0 + $0x2d8] sm:$0xff]  ;;  %v130_v32 = vld [vmem:[%s2101_s0 + $0x3d0] sm:$0xff] }
  0x72   :  { %v723_v49 = vmax.f32 %v721_v38, %v722_v33  ;;  %v736_v50 = vmax.f32 %v734_v41, %v735_v34  ;;  %v749_v52 = vmax.f32 %v747_v47, %v748_v48  ;;  %v739_v59 = vsel %vm287_vm0, %v189_v40, -inf  ;;  %v283_v29 = vld [vmem:[%s2101_s0 + $0x898] sm:$0xff]  ;;  %v161_v38 = vld [vmem:[%s2101_s0 + $0x4c8] sm:$0xff]  ;;  %v38_v40 = vld [vmem:[%s2101_s0 + $0xf0] sm:$0x3] }
  0x73   :  { %v712_v56 = vmax.f32 %v710_v43, %v711_v36  ;;  %v752_v60 = vsel %vm287_vm0, %v128_v42, -inf  ;;  %v728_v62 = vsel %vm287_vm0, %v281_v44, -inf  ;;  %v741_v5 = vsel %vm287_vm0, %v220_v45, -inf  ;;  %v222_v36 = vld [vmem:[%s2101_s0 + $0x6b0] sm:$0xff]  ;;  %v69_v45 = vld [vmem:[%s2101_s0 + $0x1e8] sm:$0x3] }
  0x74   :  { %v725_v61 = vmax.f32 %v723_v49, %v724_v39  ;;  %v738_v63 = vmax.f32 %v736_v50, %v737_v46  ;;  %v751_v1 = vmax.f32 %v749_v52, %v750_v53  ;;  %v754_v6 = vsel %vm287_vm0, %v159_v51, -inf  ;;  %v253_v48 = vld [vmem:[%s2101_s0 + $0x7a8] sm:$0xff]  ;;  %v100_v51 = vld [vmem:[%s2101_s0 + $0x2e0] sm:$0x3] }
  0x75   :  { %840 = vst.msk [vmem:[%s2102_s1 + $0xc0] sm:$0xff] %vm287_vm0, %v712_v56  ;;  %v764_v7 = vsel %vm287_vm0, %v36_v54, -inf  ;;  %v765_v8 = vsel %vm287_vm0, %v67_v55, -inf  ;;  %v743_v16 = vsel %vm287_vm0, %v251_v58, -inf  ;;  %v756_v17 = vsel %vm287_vm0, %v190_v0, -inf  ;;  %v192_v54 = vld [vmem:[%s2101_s0 + $0x5c0] sm:$0xff] }
  0x76   :  { %v727_v9 = vmax.f32 %v725_v61, %v726_v57  ;;  %v740_v10 = vmax.f32 %v738_v63, %v739_v59  ;;  %v753_v12 = vmax.f32 %v751_v1, %v752_v60  ;;  %v766_v14 = vmax.f32 %v764_v7, %v765_v8  ;;  %v131_v57 = vld [vmem:[%s2101_s0 + $0x3d8] sm:$0x3]  ;;  %v284_v59 = vld [vmem:[%s2101_s0 + $0x8a0] sm:$0xff] }
  0x77   :  { %v767_v18 = vsel %vm287_vm0, %v98_v2, -inf  ;;  %v769_v19 = vsel %vm287_vm0, %v129_v3, -inf  ;;  %v745_v28 = vsel %vm287_vm0, %v282_v4, -inf  ;;  %v758_v30 = vsel %vm287_vm0, %v221_v11, -inf  ;;  %v223_v0 = vld [vmem:[%s2101_s0 + $0x6b8] sm:$0xff] }
  0x78   :  { %v729_v21 = vmax.f32 %v727_v9, %v728_v62  ;;  %v742_v22 = vmax.f32 %v740_v10, %v741_v5  ;;  %v755_v24 = vmax.f32 %v753_v12, %v754_v6  ;;  %v768_v26 = vmax.f32 %v766_v14, %v767_v18  ;;  %v162_v2 = vld [vmem:[%s2101_s0 + $0x4d0] sm:$0x3]  ;;  %v193_v12 = vld [vmem:[%s2101_s0 + $0x5c8] sm:$0x3] }
  0x79   :  { %v771_v31 = vsel %vm287_vm0, %v160_v13, -inf  ;;  %v781_v33 = vsel %vm287_vm0, %v37_v15, -inf  ;;  %v782_v39 = vsel %vm287_vm0, %v68_v20, -inf  ;;  %v760_v41 = vsel %vm287_vm0, %v252_v23, -inf  ;;  %v254_v10 = vld [vmem:[%s2101_s0 + $0x7b0] sm:$0xff] }
  0x7a   :  { %841 = vst.msk [vmem:[%s2102_s1 + $0xc8] sm:$0xff] %vm287_vm0, %v729_v21  ;;  %v744_v34 = vmax.f32 %v742_v22, %v743_v16  ;;  %v757_v35 = vmax.f32 %v755_v24, %v756_v17  ;;  %v770_v37 = vmax.f32 %v768_v26, %v769_v19  ;;  %v773_v42 = vsel %vm287_vm0, %v191_v25, -inf  ;;  %v285_v17 = vld [vmem:[%s2101_s0 + $0x8a8] sm:$0xff]  ;;  %v224_v19 = vld [vmem:[%s2101_s0 + $0x6c0] sm:$0x3] }
  0x7b   :  { %v783_v43 = vmax.f32 %v781_v33, %v782_v39  ;;  %v784_v44 = vsel %vm287_vm0, %v99_v27, -inf  ;;  %v786_v50 = vsel %vm287_vm0, %v130_v32, -inf  ;;  %v762_v52 = vsel %vm287_vm0, %v283_v29, -inf  ;;  %v255_v25 = vld [vmem:[%s2101_s0 + $0x7b8] sm:$0x3] }
  0x7c   :  { %v746_v46 = vmax.f32 %v744_v34, %v745_v28  ;;  %v759_v47 = vmax.f32 %v757_v35, %v758_v30  ;;  %v772_v49 = vmax.f32 %v770_v37, %v771_v31  ;;  %v775_v53 = vsel %vm287_vm0, %v222_v36, -inf  ;;  %v286_v30 = vld [vmem:[%s2101_s0 + $0x8b0] sm:$0x3] }
  0x7d   :  { %v785_v55 = vmax.f32 %v783_v43, %v784_v44  ;;  %v788_v56 = vsel %vm287_vm0, %v161_v38, -inf  ;;  %v799_v61 = vsel %vm798_vm1, %v38_v40, -inf  ;;  %v800_v62 = vsel %vm798_vm1, %v69_v45, -inf }
  0x7e   :  { %842 = vst.msk [vmem:[%s2102_s1 + $0xd0] sm:$0xff] %vm287_vm0, %v746_v46  ;;  %v761_v58 = vmax.f32 %v759_v47, %v760_v41  ;;  %v774_v60 = vmax.f32 %v772_v49, %v773_v42  ;;  %v777_v63 = vsel %vm287_vm0, %v253_v48, -inf  ;;  %v801_v3 = vmax.f32 %v799_v61, %v800_v62 }
  0x7f   :  { %v787_v1 = vmax.f32 %v785_v55, %v786_v50  ;;  %v802_v4 = vsel %vm798_vm1, %v100_v51, -inf  ;;  %v790_v7 = vsel %vm287_vm0, %v192_v54, -inf  ;;  %v804_v8 = vsel %vm798_vm1, %v131_v57, -inf }
  0x80   :  { %v763_v5 = vmax.f32 %v761_v58, %v762_v52  ;;  %v776_v6 = vmax.f32 %v774_v60, %v775_v53  ;;  %v779_v9 = vsel %vm287_vm0, %v284_v59, -inf  ;;  %v803_v13 = vmax.f32 %v801_v3, %v802_v4 }
  0x81   :  { %v789_v11 = vmax.f32 %v787_v1, %v788_v56  ;;  %v792_v15 = vsel %vm287_vm0, %v223_v0, -inf  ;;  %v806_v16 = vsel %vm798_vm1, %v162_v2, -inf  ;;  %v794_v22 = vsel %vm287_vm0, %v254_v10, -inf }
  0x82   :  { %843 = vst.msk [vmem:[%s2102_s1 + $0xd8] sm:$0xff] %vm287_vm0, %v763_v5  ;;  %v778_v14 = vmax.f32 %v776_v6, %v777_v63  ;;  %v805_v20 = vmax.f32 %v803_v13, %v804_v8  ;;  %v808_v23 = vsel %vm798_vm1, %v193_v12, -inf  ;;  %v796_v27 = vsel %vm287_vm0, %v285_v17, -inf }
  0x83   :  { %v791_v18 = vmax.f32 %v789_v11, %v790_v7  ;;  %v810_v28 = vsel %vm798_vm1, %v224_v19, -inf  ;;  %v812_v32 = vsel %vm798_vm1, %v255_v25, -inf  ;;  %v814_v35 = vsel %vm798_vm1, %v286_v30, -inf }
  0x84   :  { %v780_v21 = vmax.f32 %v778_v14, %v779_v9  ;;  %v807_v26 = vmax.f32 %v805_v20, %v806_v16 }
  0x85   :  { %v793_v24 = vmax.f32 %v791_v18, %v792_v15 }
  0x86   :  { %844 = vst.msk [vmem:[%s2102_s1 + $0xe0] sm:$0xff] %vm287_vm0, %v780_v21  ;;  %v809_v31 = vmax.f32 %v807_v26, %v808_v23 }
  0x87   :  { %v795_v29 = vmax.f32 %v793_v24, %v794_v22 }
  0x88   :  { %v811_v34 = vmax.f32 %v809_v31, %v810_v28 }
  0x89   :  { %v797_v33 = vmax.f32 %v795_v29, %v796_v27 }
  0x8a   :  { %v813_v36 = vmax.f32 %v811_v34, %v812_v32 }
  0x8b   :  { %845 = vst.msk [vmem:[%s2102_s1 + $0xe8] sm:$0xff] %vm287_vm0, %v797_v33 }
  0x8c   :  { %v815_v37 = vmax.f32 %v813_v36, %v814_v35 }
  0x8e   :  { %846 = vst.msk [vmem:[%s2102_s1 + $0xf0] sm:$0x3] %vm798_vm1, %v815_v37 }

// kernel: forward.11
= control target key start
LH: loop header
LB: loop body
LE: loop exit
PB: predicated region body
PF: predicated region fallthrough
CT: control target
= control target key end

     0   :  { %v877_v0 = vmov 0.0|0.0   ;;  %vm680_vm0 = vcmask 261120   ;;  %vm711_vm1 = vcmask 254976   ;;  %s1653_s1 = inlined_call_operand.vmem [shape: f32[512,32], index: 1, kind: input, shape index: {}]   ;;  %s1654_s0 = inlined_call_operand.vmem [shape: f32[242,512], index: 0, kind: input, shape index: {}]   ;;  %s1655_s2 = inlined_call_operand.vmem [shape: f32[1,32], index: 2, kind: input, shape index: {}]   ;;  %s1656_s3 = inlined_call_operand.vmem [shape: f32[242,32], index: 3, kind: output, shape index: {}]  }
   0x1   :  { %718 = vmatprep.subr.bf16.mxu1 %v877_v0  ;;  %v138_v1 = vld [vmem:[%s1653_s1] sm:$0xff]  ;;  %v139_v2 = vld [vmem:[%s1653_s1 + $0x8] sm:$0xff]  ;;  %766 = vmatprep.subr.bf16.mxu0 %v877_v0  ;;  %v140_v6 = vld [vmem:[%s1653_s1 + $0x10] sm:$0xff] }
   0x2   :  { %v170_v3 = vld [vmem:[%s1653_s1 + $0x100] sm:$0xff]  ;;  %v719_v4 = vpack.c.bf16 %v139_v2, %v138_v1  ;;  %v171_v5 = vld [vmem:[%s1653_s1 + $0x108] sm:$0xff]  ;;  %v141_v7 = vld [vmem:[%s1653_s1 + $0x18] sm:$0xff] }
   0x3   :  { %v767_v8 = vpack.c.bf16 %v171_v5, %v170_v3  ;;  %v172_v9 = vld [vmem:[%s1653_s1 + $0x110] sm:$0xff]  ;;  %v173_v10 = vld [vmem:[%s1653_s1 + $0x118] sm:$0xff]  ;;  %v722_v11 = vpack.c.bf16 %v141_v7, %v140_v6  ;;  %v142_v13 = vld [vmem:[%s1653_s1 + $0x20] sm:$0xff] }
   0x4   :  { %720 = vmatpush1.bf16.msra.mxu1 %v719_v4  ;;  %v770_v12 = vpack.c.bf16 %v173_v10, %v172_v9  ;;  %v143_v14 = vld [vmem:[%s1653_s1 + $0x28] sm:$0xff]  ;;  %v174_v15 = vld [vmem:[%s1653_s1 + $0x120] sm:$0xff]  ;;  %v144_v19 = vld [vmem:[%s1653_s1 + $0x30] sm:$0xff] }
   0x5   :  { %768 = vmatpush1.bf16.msra.mxu0 %v767_v8  ;;  %721 = vmatprep.subr.bf16.mxu1 %v877_v0  ;;  %v175_v16 = vld [vmem:[%s1653_s1 + $0x128] sm:$0xff]  ;;  %v725_v17 = vpack.c.bf16 %v143_v14, %v142_v13  ;;  %v145_v20 = vld [vmem:[%s1653_s1 + $0x38] sm:$0xff]  ;;  %v176_v21 = vld [vmem:[%s1653_s1 + $0x130] sm:$0xff] }
   0x6   :  { %769 = vmatprep.subr.bf16.mxu0 %v877_v0  ;;  %v773_v18 = vpack.c.bf16 %v175_v16, %v174_v15  ;;  %v177_v22 = vld [vmem:[%s1653_s1 + $0x138] sm:$0xff]  ;;  %v728_v23 = vpack.c.bf16 %v145_v20, %v144_v19  ;;  %v146_v25 = vld [vmem:[%s1653_s1 + $0x40] sm:$0xff]  ;;  %v147_v26 = vld [vmem:[%s1653_s1 + $0x48] sm:$0xff] }
   0x7   :  { %v776_v24 = vpack.c.bf16 %v177_v22, %v176_v21  ;;  %v178_v27 = vld [vmem:[%s1653_s1 + $0x140] sm:$0xff]  ;;  %v179_v28 = vld [vmem:[%s1653_s1 + $0x148] sm:$0xff]  ;;  %v731_v29 = vpack.c.bf16 %v147_v26, %v146_v25  ;;  %v148_v31 = vld [vmem:[%s1653_s1 + $0x50] sm:$0xff] }
   0x8   :  { %723 = vmatpush1.bf16.msra.mxu1 %v722_v11  ;;  %v779_v30 = vpack.c.bf16 %v179_v28, %v178_v27  ;;  %v149_v32 = vld [vmem:[%s1653_s1 + $0x58] sm:$0xff]  ;;  %v180_v33 = vld [vmem:[%s1653_s1 + $0x150] sm:$0xff]  ;;  %v150_v37 = vld [vmem:[%s1653_s1 + $0x60] sm:$0xff] }
   0x9   :  { %771 = vmatpush1.bf16.msra.mxu0 %v770_v12  ;;  %724 = vmatprep.subr.bf16.mxu1 %v877_v0  ;;  %v181_v34 = vld [vmem:[%s1653_s1 + $0x158] sm:$0xff]  ;;  %v734_v35 = vpack.c.bf16 %v149_v32, %v148_v31  ;;  %v151_v38 = vld [vmem:[%s1653_s1 + $0x68] sm:$0xff]  ;;  %v182_v39 = vld [vmem:[%s1653_s1 + $0x160] sm:$0xff] }
   0xa   :  { %772 = vmatprep.subr.bf16.mxu0 %v877_v0  ;;  %v782_v36 = vpack.c.bf16 %v181_v34, %v180_v33  ;;  %v183_v40 = vld [vmem:[%s1653_s1 + $0x168] sm:$0xff]  ;;  %v17_v42 = vld [vmem:[%s1654_s0 + $0x18] sm:$0xff]  ;;  %v737_v43 = vpack.c.bf16 %v151_v38, %v150_v37  ;;  %v152_v45 = vld [vmem:[%s1653_s1 + $0x70] sm:$0xff] }
   0xb   :  { %v15_v41 = vld [vmem:[%s1654_s0 + $0x8] sm:$0xff]  ;;  %493 = vmatprep.mubr.f32.mxu0 %v17_v42  ;;  %v785_v44 = vpack.c.bf16 %v183_v40, %v182_v39  ;;  %v153_v46 = vld [vmem:[%s1653_s1 + $0x78] sm:$0xff]  ;;  %v184_v47 = vld [vmem:[%s1653_s1 + $0x170] sm:$0xff] }
   0xc   :  { %726 = vmatpush1.bf16.msra.mxu1 %v725_v17  ;;  %273 = vmatprep.mubr.f32.mxu1 %v15_v41  ;;  %v185_v48 = vld [vmem:[%s1653_s1 + $0x178] sm:$0xff]  ;;  %v740_v49 = vpack.c.bf16 %v153_v46, %v152_v45  ;;  %v154_v51 = vld [vmem:[%s1653_s1 + $0x80] sm:$0xff]  ;;  %v155_v52 = vld [vmem:[%s1653_s1 + $0x88] sm:$0xff] }
   0xd   :  { %774 = vmatpush1.bf16.msra.mxu0 %v773_v18  ;;  %727 = vmatprep.subr.bf16.mxu1 %v877_v0  ;;  %v788_v50 = vpack.c.bf16 %v185_v48, %v184_v47  ;;  %v186_v53 = vld [vmem:[%s1653_s1 + $0x180] sm:$0xff]  ;;  %v187_v54 = vld [vmem:[%s1653_s1 + $0x188] sm:$0xff]  ;;  %v743_v55 = vpack.c.bf16 %v155_v52, %v154_v51  ;;  %v156_v57 = vld [vmem:[%s1653_s1 + $0x90] sm:$0xff] }
   0xe   :  { %775 = vmatprep.subr.bf16.mxu0 %v877_v0  ;;  %v791_v56 = vpack.c.bf16 %v187_v54, %v186_v53  ;;  %v157_v58 = vld [vmem:[%s1653_s1 + $0x98] sm:$0xff]  ;;  %v188_v59 = vld [vmem:[%s1653_s1 + $0x190] sm:$0xff]  ;;  %v158_v63 = vld [vmem:[%s1653_s1 + $0xa0] sm:$0xff] }
   0xf   :  { %v189_v60 = vld [vmem:[%s1653_s1 + $0x198] sm:$0xff]  ;;  %v746_v61 = vpack.c.bf16 %v157_v58, %v156_v57  ;;  %v159_v1 = vld [vmem:[%s1653_s1 + $0xa8] sm:$0xff]  ;;  %v190_v2 = vld [vmem:[%s1653_s1 + $0x1a0] sm:$0xff] }
  0x10   :  { %729 = vmatpush1.bf16.msra.mxu1 %v728_v23  ;;  %v794_v62 = vpack.c.bf16 %v189_v60, %v188_v59  ;;  %v191_v3 = vld [vmem:[%s1653_s1 + $0x1a8] sm:$0xff]  ;;  %v749_v4 = vpack.c.bf16 %v159_v1, %v158_v63  ;;  %v160_v6 = vld [vmem:[%s1653_s1 + $0xb0] sm:$0xff]  ;;  %v161_v7 = vld [vmem:[%s1653_s1 + $0xb8] sm:$0xff] }
  0x11   :  { %777 = vmatpush1.bf16.msra.mxu0 %v776_v24  ;;  %730 = vmatprep.subr.bf16.mxu1 %v877_v0  ;;  %v797_v5 = vpack.c.bf16 %v191_v3, %v190_v2  ;;  %v192_v8 = vld [vmem:[%s1653_s1 + $0x1b0] sm:$0xff]  ;;  %v193_v9 = vld [vmem:[%s1653_s1 + $0x1b8] sm:$0xff]  ;;  %v752_v10 = vpack.c.bf16 %v161_v7, %v160_v6  ;;  %v162_v12 = vld [vmem:[%s1653_s1 + $0xc0] sm:$0xff] }
  0x12   :  { %778 = vmatprep.subr.bf16.mxu0 %v877_v0  ;;  %v800_v11 = vpack.c.bf16 %v193_v9, %v192_v8  ;;  %v163_v13 = vld [vmem:[%s1653_s1 + $0xc8] sm:$0xff]  ;;  %v194_v14 = vld [vmem:[%s1653_s1 + $0x1c0] sm:$0xff]  ;;  %v164_v18 = vld [vmem:[%s1653_s1 + $0xd0] sm:$0xff] }
  0x13   :  { %v195_v15 = vld [vmem:[%s1653_s1 + $0x1c8] sm:$0xff]  ;;  %v755_v16 = vpack.c.bf16 %v163_v13, %v162_v12  ;;  %v165_v19 = vld [vmem:[%s1653_s1 + $0xd8] sm:$0xff]  ;;  %v196_v20 = vld [vmem:[%s1653_s1 + $0x1d0] sm:$0xff] }
  0x14   :  { %732 = vmatpush1.bf16.msra.mxu1 %v731_v29  ;;  %v803_v17 = vpack.c.bf16 %v195_v15, %v194_v14  ;;  %v197_v21 = vld [vmem:[%s1653_s1 + $0x1d8] sm:$0xff]  ;;  %v758_v22 = vpack.c.bf16 %v165_v19, %v164_v18  ;;  %v166_v24 = vld [vmem:[%s1653_s1 + $0xe0] sm:$0xff]  ;;  %v167_v25 = vld [vmem:[%s1653_s1 + $0xe8] sm:$0xff] }
  0x15   :  { %780 = vmatpush1.bf16.msra.mxu0 %v779_v30  ;;  %733 = vmatprep.subr.bf16.mxu1 %v877_v0  ;;  %v806_v23 = vpack.c.bf16 %v197_v21, %v196_v20  ;;  %v198_v26 = vld [vmem:[%s1653_s1 + $0x1e0] sm:$0xff]  ;;  %v199_v27 = vld [vmem:[%s1653_s1 + $0x1e8] sm:$0xff]  ;;  %v761_v28 = vpack.c.bf16 %v167_v25, %v166_v24  ;;  %v168_v30 = vld [vmem:[%s1653_s1 + $0xf0] sm:$0xff] }
  0x16   :  { %781 = vmatprep.subr.bf16.mxu0 %v877_v0  ;;  %v809_v29 = vpack.c.bf16 %v199_v27, %v198_v26  ;;  %v169_v31 = vld [vmem:[%s1653_s1 + $0xf8] sm:$0xff]  ;;  %v200_v32 = vld [vmem:[%s1653_s1 + $0x1f0] sm:$0xff]  ;;  %v19_v38 = vld [vmem:[%s1654_s0 + $0x28] sm:$0xff] }
  0x17   :  { %v201_v33 = vld [vmem:[%s1653_s1 + $0x1f8] sm:$0xff]  ;;  %v764_v34 = vpack.c.bf16 %v169_v31, %v168_v30  ;;  %v16_v37 = vld [vmem:[%s1654_s0 + $0x10] sm:$0xff]  ;;  %v23_v41 = vld [vmem:[%s1654_s0 + $0x48] sm:$0xff] }
  0x18   :  { %735 = vmatpush1.bf16.msra.mxu1 %v734_v35  ;;  %v812_v35 = vpack.c.bf16 %v201_v33, %v200_v32  ;;  %v21_v39 = vld [vmem:[%s1654_s0 + $0x38] sm:$0xff]  ;;  %v20_v40 = vld [vmem:[%s1654_s0 + $0x30] sm:$0xff]  ;;  %v27_v45 = vld [vmem:[%s1654_s0 + $0x68] sm:$0xff] }
  0x19   :  { %783 = vmatpush1.bf16.msra.mxu0 %v782_v36  ;;  %736 = vmatprep.subr.bf16.mxu1 %v877_v0  ;;  %v14_v36 = vld [vmem:[%s1654_s0] sm:$0xff]  ;;  %v25_v42 = vld [vmem:[%s1654_s0 + $0x58] sm:$0xff]  ;;  %v28_v48 = vld [vmem:[%s1654_s0 + $0x70] sm:$0xff] }
  0x1a   :  { %784 = vmatprep.subr.bf16.mxu0 %v877_v0  ;;  %v29_v46 = vld [vmem:[%s1654_s0 + $0x78] sm:$0xff]  ;;  %v26_v47 = vld [vmem:[%s1654_s0 + $0x60] sm:$0xff]  ;;  %v32_v52 = vld [vmem:[%s1654_s0 + $0x90] sm:$0xff] }
  0x1b   :  { %v30_v51 = vld [vmem:[%s1654_s0 + $0x80] sm:$0xff]  ;;  %v35_v53 = vld [vmem:[%s1654_s0 + $0xa8] sm:$0xff]  ;;  %v37_v54 = vld [vmem:[%s1654_s0 + $0xb8] sm:$0xff] }
  0x1c   :  { %738 = vmatpush1.bf16.msra.mxu1 %v737_v43  ;;  %v22_v43 = vld [vmem:[%s1654_s0 + $0x40] sm:$0xff]  ;;  %v39_v57 = vld [vmem:[%s1654_s0 + $0xc8] sm:$0xff]  ;;  %v41_v58 = vld [vmem:[%s1654_s0 + $0xd8] sm:$0xff] }
  0x1d   :  { %786 = vmatpush1.bf16.msra.mxu0 %v785_v44  ;;  %739 = vmatprep.subr.bf16.mxu1 %v877_v0  ;;  %v24_v44 = vld [vmem:[%s1654_s0 + $0x50] sm:$0xff]  ;;  %v38_v59 = vld [vmem:[%s1654_s0 + $0xc0] sm:$0xff]  ;;  %v47_v2 = vld [vmem:[%s1654_s0 + $0x108] sm:$0xff] }
  0x1e   :  { %787 = vmatprep.subr.bf16.mxu0 %v877_v0  ;;  %v40_v60 = vld [vmem:[%s1654_s0 + $0xd0] sm:$0xff]  ;;  %v42_v63 = vld [vmem:[%s1654_s0 + $0xe0] sm:$0xff]  ;;  %v49_v3 = vld [vmem:[%s1654_s0 + $0x118] sm:$0xff] }
  0x1f   :  { %v44_v1 = vld [vmem:[%s1654_s0 + $0xf0] sm:$0xff]  ;;  %v51_v6 = vld [vmem:[%s1654_s0 + $0x128] sm:$0xff]  ;;  %v53_v7 = vld [vmem:[%s1654_s0 + $0x138] sm:$0xff] }
  0x20   :  { %741 = vmatpush1.bf16.msra.mxu1 %v740_v49  ;;  %v31_v49 = vld [vmem:[%s1654_s0 + $0x88] sm:$0xff]  ;;  %v50_v8 = vld [vmem:[%s1654_s0 + $0x120] sm:$0xff]  ;;  %v52_v9 = vld [vmem:[%s1654_s0 + $0x130] sm:$0xff] }
  0x21   :  { %789 = vmatpush1.bf16.msra.mxu0 %v788_v50  ;;  %742 = vmatprep.subr.bf16.mxu1 %v877_v0  ;;  %v33_v50 = vld [vmem:[%s1654_s0 + $0x98] sm:$0xff]  ;;  %v54_v12 = vld [vmem:[%s1654_s0 + $0x140] sm:$0xff]  ;;  %v56_v13 = vld [vmem:[%s1654_s0 + $0x150] sm:$0xff] }
  0x22   :  { %790 = vmatprep.subr.bf16.mxu0 %v877_v0  ;;  %v59_v14 = vld [vmem:[%s1654_s0 + $0x168] sm:$0xff]  ;;  %v61_v15 = vld [vmem:[%s1654_s0 + $0x178] sm:$0xff]  ;;  %v62_v20 = vld [vmem:[%s1654_s0 + $0x180] sm:$0xff] }
  0x23   :  { %v63_v18 = vld [vmem:[%s1654_s0 + $0x188] sm:$0xff]  ;;  %v65_v19 = vld [vmem:[%s1654_s0 + $0x198] sm:$0xff]  ;;  %v64_v21 = vld [vmem:[%s1654_s0 + $0x190] sm:$0xff] }
  0x24   :  { %744 = vmatpush1.bf16.msra.mxu1 %v743_v55  ;;  %v34_v55 = vld [vmem:[%s1654_s0 + $0xa0] sm:$0xff]  ;;  %v68_v25 = vld [vmem:[%s1654_s0 + $0x1b0] sm:$0xff]  ;;  %v71_v26 = vld [vmem:[%s1654_s0 + $0x1c8] sm:$0xff] }
  0x25   :  { %792 = vmatpush1.bf16.msra.mxu0 %v791_v56  ;;  %745 = vmatprep.subr.bf16.mxu1 %v877_v0  ;;  %v36_v56 = vld [vmem:[%s1654_s0 + $0xb0] sm:$0xff]  ;;  %v66_v24 = vld [vmem:[%s1654_s0 + $0x1a0] sm:$0xff]  ;;  %v73_v27 = vld [vmem:[%s1654_s0 + $0x1d8] sm:$0xff] }
  0x26   :  { %793 = vmatprep.subr.bf16.mxu0 %v877_v0  ;;  %v75_v30 = vld [vmem:[%s1654_s0 + $0x1e8] sm:$0xff]  ;;  %v77_v31 = vld [vmem:[%s1654_s0 + $0x1f8] sm:$0xff]  ;;  %v74_v32 = vld [vmem:[%s1654_s0 + $0x1e0] sm:$0xff] }
  0x27   :  { %v76_v33 = vld [vmem:[%s1654_s0 + $0x1f0] sm:$0xff] }
  0x28   :  { %747 = vmatpush1.bf16.msra.mxu1 %v746_v61  ;;  %v43_v61 = vld [vmem:[%s1654_s0 + $0xe8] sm:$0xff] }
  0x29   :  { %795 = vmatpush1.bf16.msra.mxu0 %v794_v62  ;;  %748 = vmatprep.subr.bf16.mxu1 %v877_v0  ;;  %v45_v62 = vld [vmem:[%s1654_s0 + $0xf8] sm:$0xff] }
  0x2a   :  { %796 = vmatprep.subr.bf16.mxu0 %v877_v0 }
  0x2c   :  { %750 = vmatpush1.bf16.msra.mxu1 %v749_v4  ;;  %v46_v4 = vld [vmem:[%s1654_s0 + $0x100] sm:$0xff] }
  0x2d   :  { %798 = vmatpush1.bf16.msra.mxu0 %v797_v5  ;;  %751 = vmatprep.subr.bf16.mxu1 %v877_v0  ;;  %v48_v5 = vld [vmem:[%s1654_s0 + $0x110] sm:$0xff] }
  0x2e   :  { %799 = vmatprep.subr.bf16.mxu0 %v877_v0 }
  0x30   :  { %753 = vmatpush1.bf16.msra.mxu1 %v752_v10  ;;  %v55_v10 = vld [vmem:[%s1654_s0 + $0x148] sm:$0xff] }
  0x31   :  { %801 = vmatpush1.bf16.msra.mxu0 %v800_v11  ;;  %754 = vmatprep.subr.bf16.mxu1 %v877_v0  ;;  %v57_v11 = vld [vmem:[%s1654_s0 + $0x158] sm:$0xff] }
  0x32   :  { %802 = vmatprep.subr.bf16.mxu0 %v877_v0 }
  0x34   :  { %756 = vmatpush1.bf16.msra.mxu1 %v755_v16  ;;  %v58_v16 = vld [vmem:[%s1654_s0 + $0x160] sm:$0xff] }
  0x35   :  { %804 = vmatpush1.bf16.msra.mxu0 %v803_v17  ;;  %757 = vmatprep.subr.bf16.mxu1 %v877_v0  ;;  %v60_v17 = vld [vmem:[%s1654_s0 + $0x170] sm:$0xff] }
  0x36   :  { %805 = vmatprep.subr.bf16.mxu0 %v877_v0 }
  0x38   :  { %759 = vmatpush1.bf16.msra.mxu1 %v758_v22  ;;  %v67_v22 = vld [vmem:[%s1654_s0 + $0x1a8] sm:$0xff] }
  0x39   :  { %807 = vmatpush1.bf16.msra.mxu0 %v806_v23  ;;  %760 = vmatprep.subr.bf16.mxu1 %v877_v0  ;;  %v69_v23 = vld [vmem:[%s1654_s0 + $0x1b8] sm:$0xff] }
  0x3a   :  { %808 = vmatprep.subr.bf16.mxu0 %v877_v0 }
  0x3c   :  { %762 = vmatpush1.bf16.msra.mxu1 %v761_v28  ;;  %v70_v28 = vld [vmem:[%s1654_s0 + $0x1c0] sm:$0xff] }
  0x3d   :  { %810 = vmatpush1.bf16.msra.mxu0 %v809_v29  ;;  %763 = vmatprep.subr.bf16.mxu1 %v877_v0  ;;  %v72_v29 = vld [vmem:[%s1654_s0 + $0x1d0] sm:$0xff] }
  0x3e   :  { %811 = vmatprep.subr.bf16.mxu0 %v877_v0  ;;  %v18_v0 = vld [vmem:[%s1654_s0 + $0x20] sm:$0xff] }
  0x40   :  { %765 = vmatpush1.bf16.msra.mxu1 %v764_v34  ;;  %v79_v34 = vld [vmem:[%s1654_s0 + $0x208] sm:$0xff] }
  0x41   :  { %813 = vmatpush1.bf16.msra.mxu0 %v812_v35  ;;  %v81_v35 = vld [vmem:[%s1654_s0 + $0x218] sm:$0xff] }
  0x43   :  { %274 = vmatmul.mubr.f32.vlgmr.msra.gmra.mrb[0].mxu1 %v14_v36  ;;  %v78_v36 = vld [vmem:[%s1654_s0 + $0x200] sm:$0xff] }
  0x44   :  { %494 = vmatmul.mubr.f32.vlgmr.msra.gmra.mrb[0].mxu0 %v16_v37  ;;  %278 = vmatprep.mubr.f32.mxu1 %v19_v38  ;;  %v80_v37 = vld [vmem:[%s1654_s0 + $0x210] sm:$0xff]  ;;  %v83_v38 = vld [vmem:[%s1654_s0 + $0x228] sm:$0xff] }
  0x45   :  { %498 = vmatprep.mubr.f32.mxu0 %v21_v39  ;;  %v85_v39 = vld [vmem:[%s1654_s0 + $0x238] sm:$0xff] }
  0x47   :  { %279 = vmatmul.mubr.f32.gmra.mrb[2].mxu1 %v18_v0  ;;  %v82_v0 = vld [vmem:[%s1654_s0 + $0x220] sm:$0xff] }
  0x48   :  { %499 = vmatmul.mubr.f32.gmra.mrb[2].mxu0 %v20_v40  ;;  %283 = vmatprep.mubr.f32.mxu1 %v23_v41  ;;  %v84_v40 = vld [vmem:[%s1654_s0 + $0x230] sm:$0xff]  ;;  %v87_v41 = vld [vmem:[%s1654_s0 + $0x248] sm:$0xff] }
  0x49   :  { %503 = vmatprep.mubr.f32.mxu0 %v25_v42  ;;  %v89_v42 = vld [vmem:[%s1654_s0 + $0x258] sm:$0xff] }
  0x4b   :  { %284 = vmatmul.mubr.f32.gmra.mrb[4].mxu1 %v22_v43  ;;  %v86_v43 = vld [vmem:[%s1654_s0 + $0x240] sm:$0xff] }
  0x4c   :  { %504 = vmatmul.mubr.f32.gmra.mrb[4].mxu0 %v24_v44  ;;  %288 = vmatprep.mubr.f32.mxu1 %v27_v45  ;;  %v88_v44 = vld [vmem:[%s1654_s0 + $0x250] sm:$0xff]  ;;  %v91_v45 = vld [vmem:[%s1654_s0 + $0x268] sm:$0xff] }
  0x4d   :  { %508 = vmatprep.mubr.f32.mxu0 %v29_v46  ;;  %v93_v46 = vld [vmem:[%s1654_s0 + $0x278] sm:$0xff] }
  0x4f   :  { %289 = vmatmul.mubr.f32.gmra.mrb[6].mxu1 %v26_v47  ;;  %v90_v47 = vld [vmem:[%s1654_s0 + $0x260] sm:$0xff] }
  0x50   :  { %509 = vmatmul.mubr.f32.gmra.mrb[6].mxu0 %v28_v48  ;;  %293 = vmatprep.mubr.f32.mxu1 %v31_v49  ;;  %v92_v48 = vld [vmem:[%s1654_s0 + $0x270] sm:$0xff]  ;;  %v95_v49 = vld [vmem:[%s1654_s0 + $0x288] sm:$0xff] }
  0x51   :  { %513 = vmatprep.mubr.f32.mxu0 %v33_v50  ;;  %v97_v50 = vld [vmem:[%s1654_s0 + $0x298] sm:$0xff] }
  0x53   :  { %294 = vmatmul.mubr.f32.gmra.mrb[8].mxu1 %v30_v51  ;;  %v94_v51 = vld [vmem:[%s1654_s0 + $0x280] sm:$0xff] }
  0x54   :  { %514 = vmatmul.mubr.f32.gmra.mrb[8].mxu0 %v32_v52  ;;  %298 = vmatprep.mubr.f32.mxu1 %v35_v53  ;;  %v96_v52 = vld [vmem:[%s1654_s0 + $0x290] sm:$0xff]  ;;  %v99_v53 = vld [vmem:[%s1654_s0 + $0x2a8] sm:$0xff] }
  0x55   :  { %518 = vmatprep.mubr.f32.mxu0 %v37_v54  ;;  %v101_v54 = vld [vmem:[%s1654_s0 + $0x2b8] sm:$0xff] }
  0x57   :  { %299 = vmatmul.mubr.f32.gmra.mrb[10].mxu1 %v34_v55  ;;  %v98_v55 = vld [vmem:[%s1654_s0 + $0x2a0] sm:$0xff] }
  0x58   :  { %519 = vmatmul.mubr.f32.gmra.mrb[10].mxu0 %v36_v56  ;;  %303 = vmatprep.mubr.f32.mxu1 %v39_v57  ;;  %v100_v56 = vld [vmem:[%s1654_s0 + $0x2b0] sm:$0xff]  ;;  %v103_v57 = vld [vmem:[%s1654_s0 + $0x2c8] sm:$0xff] }
  0x59   :  { %523 = vmatprep.mubr.f32.mxu0 %v41_v58  ;;  %v105_v58 = vld [vmem:[%s1654_s0 + $0x2d8] sm:$0xff] }
  0x5b   :  { %304 = vmatmul.mubr.f32.gmra.mrb[12].mxu1 %v38_v59  ;;  %v102_v59 = vld [vmem:[%s1654_s0 + $0x2c0] sm:$0xff] }
  0x5c   :  { %524 = vmatmul.mubr.f32.gmra.mrb[12].mxu0 %v40_v60  ;;  %308 = vmatprep.mubr.f32.mxu1 %v43_v61  ;;  %v104_v60 = vld [vmem:[%s1654_s0 + $0x2d0] sm:$0xff]  ;;  %v107_v61 = vld [vmem:[%s1654_s0 + $0x2e8] sm:$0xff] }
  0x5d   :  { %528 = vmatprep.mubr.f32.mxu0 %v45_v62  ;;  %v109_v62 = vld [vmem:[%s1654_s0 + $0x2f8] sm:$0xff] }
  0x5f   :  { %309 = vmatmul.mubr.f32.gmra.mrb[14].mxu1 %v42_v63  ;;  %v106_v63 = vld [vmem:[%s1654_s0 + $0x2e0] sm:$0xff] }
  0x60   :  { %529 = vmatmul.mubr.f32.gmra.mrb[14].mxu0 %v44_v1  ;;  %313 = vmatprep.mubr.f32.mxu1 %v47_v2  ;;  %v108_v1 = vld [vmem:[%s1654_s0 + $0x2f0] sm:$0xff]  ;;  %v111_v2 = vld [vmem:[%s1654_s0 + $0x308] sm:$0xff] }
  0x61   :  { %533 = vmatprep.mubr.f32.mxu0 %v49_v3  ;;  %v113_v3 = vld [vmem:[%s1654_s0 + $0x318] sm:$0xff] }
  0x63   :  { %314 = vmatmul.mubr.f32.gmra.mrb[16].mxu1 %v46_v4  ;;  %v110_v4 = vld [vmem:[%s1654_s0 + $0x300] sm:$0xff] }
  0x64   :  { %534 = vmatmul.mubr.f32.gmra.mrb[16].mxu0 %v48_v5  ;;  %318 = vmatprep.mubr.f32.mxu1 %v51_v6  ;;  %v112_v5 = vld [vmem:[%s1654_s0 + $0x310] sm:$0xff]  ;;  %v115_v6 = vld [vmem:[%s1654_s0 + $0x328] sm:$0xff] }
  0x65   :  { %538 = vmatprep.mubr.f32.mxu0 %v53_v7  ;;  %v117_v7 = vld [vmem:[%s1654_s0 + $0x338] sm:$0xff] }
  0x67   :  { %319 = vmatmul.mubr.f32.gmra.mrb[18].mxu1 %v50_v8  ;;  %v114_v8 = vld [vmem:[%s1654_s0 + $0x320] sm:$0xff] }
  0x68   :  { %539 = vmatmul.mubr.f32.gmra.mrb[18].mxu0 %v52_v9  ;;  %323 = vmatprep.mubr.f32.mxu1 %v55_v10  ;;  %v116_v9 = vld [vmem:[%s1654_s0 + $0x330] sm:$0xff]  ;;  %v119_v10 = vld [vmem:[%s1654_s0 + $0x348] sm:$0xff] }
  0x69   :  { %543 = vmatprep.mubr.f32.mxu0 %v57_v11  ;;  %v121_v11 = vld [vmem:[%s1654_s0 + $0x358] sm:$0xff] }
  0x6b   :  { %324 = vmatmul.mubr.f32.gmra.mrb[20].mxu1 %v54_v12  ;;  %v118_v12 = vld [vmem:[%s1654_s0 + $0x340] sm:$0xff] }
  0x6c   :  { %544 = vmatmul.mubr.f32.gmra.mrb[20].mxu0 %v56_v13  ;;  %328 = vmatprep.mubr.f32.mxu1 %v59_v14  ;;  %v120_v13 = vld [vmem:[%s1654_s0 + $0x350] sm:$0xff]  ;;  %v123_v14 = vld [vmem:[%s1654_s0 + $0x368] sm:$0xff] }
  0x6d   :  { %548 = vmatprep.mubr.f32.mxu0 %v61_v15  ;;  %v125_v15 = vld [vmem:[%s1654_s0 + $0x378] sm:$0xff] }
  0x6f   :  { %329 = vmatmul.mubr.f32.gmra.mrb[22].mxu1 %v58_v16  ;;  %v122_v16 = vld [vmem:[%s1654_s0 + $0x360] sm:$0xff] }
  0x70   :  { %549 = vmatmul.mubr.f32.gmra.mrb[22].mxu0 %v60_v17  ;;  %333 = vmatprep.mubr.f32.mxu1 %v63_v18  ;;  %v124_v17 = vld [vmem:[%s1654_s0 + $0x370] sm:$0xff]  ;;  %v127_v18 = vld [vmem:[%s1654_s0 + $0x388] sm:$0xff] }
  0x71   :  { %553 = vmatprep.mubr.f32.mxu0 %v65_v19  ;;  %v129_v19 = vld [vmem:[%s1654_s0 + $0x398] sm:$0xff] }
  0x73   :  { %334 = vmatmul.mubr.f32.gmra.mrb[24].mxu1 %v62_v20  ;;  %v126_v20 = vld [vmem:[%s1654_s0 + $0x380] sm:$0xff] }
  0x74   :  { %554 = vmatmul.mubr.f32.gmra.mrb[24].mxu0 %v64_v21  ;;  %338 = vmatprep.mubr.f32.mxu1 %v67_v22  ;;  %v128_v21 = vld [vmem:[%s1654_s0 + $0x390] sm:$0xff]  ;;  %v131_v22 = vld [vmem:[%s1654_s0 + $0x3a8] sm:$0xff] }
  0x75   :  { %558 = vmatprep.mubr.f32.mxu0 %v69_v23  ;;  %v133_v23 = vld [vmem:[%s1654_s0 + $0x3b8] sm:$0xff] }
  0x77   :  { %339 = vmatmul.mubr.f32.gmra.mrb[26].mxu1 %v66_v24  ;;  %v130_v24 = vld [vmem:[%s1654_s0 + $0x3a0] sm:$0xff] }
  0x78   :  { %559 = vmatmul.mubr.f32.gmra.mrb[26].mxu0 %v68_v25  ;;  %343 = vmatprep.mubr.f32.mxu1 %v71_v26  ;;  %v132_v25 = vld [vmem:[%s1654_s0 + $0x3b0] sm:$0xff]  ;;  %v135_v26 = vld [vmem:[%s1654_s0 + $0x3c8] sm:$0x3] }
  0x79   :  { %563 = vmatprep.mubr.f32.mxu0 %v73_v27  ;;  %v137_v27 = vld [vmem:[%s1654_s0 + $0x3d8] sm:$0x3] }
  0x7b   :  { %344 = vmatmul.mubr.f32.gmra.mrb[28].mxu1 %v70_v28  ;;  %v134_v28 = vld [vmem:[%s1654_s0 + $0x3c0] sm:$0x3] }
  0x7c   :  { %564 = vmatmul.mubr.f32.gmra.mrb[28].mxu0 %v72_v29  ;;  %348 = vmatprep.mubr.f32.mxu1 %v75_v30  ;;  %v136_v29 = vld [vmem:[%s1654_s0 + $0x3d0] sm:$0x3]  ;;  %v1497_v30 = vld [vmem:[%s1655_s2] ss:$0 sm:$0xff] }
  0x7d   :  { %568 = vmatprep.mubr.f32.mxu0 %v77_v31 }
  0x7f   :  { %349 = vmatmul.mubr.f32.gmra.mrb[30].mxu1 %v74_v32 }
  0x80   :  { %569 = vmatmul.mubr.f32.gmra.mrb[30].mxu0 %v76_v33  ;;  %353 = vmatprep.mubr.f32.mxu1 %v79_v34 }
  0x81   :  { %573 = vmatprep.mubr.f32.mxu0 %v81_v35 }
  0x83   :  { %354 = vmatmul.mubr.f32.gmra.mrb[32].mxu1 %v78_v36 }
  0x84   :  { %574 = vmatmul.mubr.f32.gmra.mrb[32].mxu0 %v80_v37  ;;  %358 = vmatprep.mubr.f32.mxu1 %v83_v38 }
  0x85   :  { %578 = vmatprep.mubr.f32.mxu0 %v85_v39 }
  0x87   :  { %359 = vmatmul.mubr.f32.gmra.mrb[34].mxu1 %v82_v0 }
  0x88   :  { %579 = vmatmul.mubr.f32.gmra.mrb[34].mxu0 %v84_v40  ;;  %363 = vmatprep.mubr.f32.mxu1 %v87_v41 }
  0x89   :  { %583 = vmatprep.mubr.f32.mxu0 %v89_v42 }
  0x8b   :  { %364 = vmatmul.mubr.f32.gmra.mrb[36].mxu1 %v86_v43 }
  0x8c   :  { %584 = vmatmul.mubr.f32.gmra.mrb[36].mxu0 %v88_v44  ;;  %368 = vmatprep.mubr.f32.mxu1 %v91_v45 }
  0x8d   :  { %588 = vmatprep.mubr.f32.mxu0 %v93_v46 }
  0x8f   :  { %369 = vmatmul.mubr.f32.gmra.mrb[38].mxu1 %v90_v47 }
  0x90   :  { %589 = vmatmul.mubr.f32.gmra.mrb[38].mxu0 %v92_v48  ;;  %373 = vmatprep.mubr.f32.mxu1 %v95_v49 }
  0x91   :  { %593 = vmatprep.mubr.f32.mxu0 %v97_v50 }
  0x93   :  { %374 = vmatmul.mubr.f32.gmra.mrb[40].mxu1 %v94_v51 }
  0x94   :  { %594 = vmatmul.mubr.f32.gmra.mrb[40].mxu0 %v96_v52  ;;  %378 = vmatprep.mubr.f32.mxu1 %v99_v53 }
  0x95   :  { %598 = vmatprep.mubr.f32.mxu0 %v101_v54 }
  0x97   :  { %379 = vmatmul.mubr.f32.gmra.mrb[42].mxu1 %v98_v55 }
  0x98   :  { %599 = vmatmul.mubr.f32.gmra.mrb[42].mxu0 %v100_v56  ;;  %383 = vmatprep.mubr.f32.mxu1 %v103_v57 }
  0x99   :  { %603 = vmatprep.mubr.f32.mxu0 %v105_v58 }
  0x9b   :  { %384 = vmatmul.mubr.f32.gmra.mrb[44].mxu1 %v102_v59 }
  0x9c   :  { %604 = vmatmul.mubr.f32.gmra.mrb[44].mxu0 %v104_v60  ;;  %388 = vmatprep.mubr.f32.mxu1 %v107_v61 }
  0x9d   :  { %608 = vmatprep.mubr.f32.mxu0 %v109_v62 }
  0x9f   :  { %389 = vmatmul.mubr.f32.gmra.mrb[46].mxu1 %v106_v63 }
  0xa0   :  { %609 = vmatmul.mubr.f32.gmra.mrb[46].mxu0 %v108_v1  ;;  %393 = vmatprep.mubr.f32.mxu1 %v111_v2 }
  0xa1   :  { %613 = vmatprep.mubr.f32.mxu0 %v113_v3 }
  0xa3   :  { %394 = vmatmul.mubr.f32.gmra.mrb[48].mxu1 %v110_v4 }
  0xa4   :  { %614 = vmatmul.mubr.f32.gmra.mrb[48].mxu0 %v112_v5  ;;  %398 = vmatprep.mubr.f32.mxu1 %v115_v6 }
  0xa5   :  { %618 = vmatprep.mubr.f32.mxu0 %v117_v7 }
  0xa7   :  { %399 = vmatmul.mubr.f32.gmra.mrb[50].mxu1 %v114_v8 }
  0xa8   :  { %619 = vmatmul.mubr.f32.gmra.mrb[50].mxu0 %v116_v9  ;;  %403 = vmatprep.mubr.f32.mxu1 %v119_v10 }
  0xa9   :  { %623 = vmatprep.mubr.f32.mxu0 %v121_v11 }
  0xab   :  { %404 = vmatmul.mubr.f32.gmra.mrb[52].mxu1 %v118_v12 }
  0xac   :  { %624 = vmatmul.mubr.f32.gmra.mrb[52].mxu0 %v120_v13  ;;  %408 = vmatprep.mubr.f32.mxu1 %v123_v14 }
  0xad   :  { %628 = vmatprep.mubr.f32.mxu0 %v125_v15 }
  0xaf   :  { %409 = vmatmul.mubr.f32.gmra.mrb[54].mxu1 %v122_v16 }
  0xb0   :  { %629 = vmatmul.mubr.f32.gmra.mrb[54].mxu0 %v124_v17  ;;  %413 = vmatprep.mubr.f32.mxu1 %v127_v18 }
  0xb1   :  { %633 = vmatprep.mubr.f32.mxu0 %v129_v19 }
  0xb3   :  { %414 = vmatmul.mubr.f32.gmra.mrb[56].mxu1 %v126_v20 }
  0xb4   :  { %634 = vmatmul.mubr.f32.gmra.mrb[56].mxu0 %v128_v21  ;;  %418 = vmatprep.mubr.f32.mxu1 %v131_v22 }
  0xb5   :  { %638 = vmatprep.mubr.f32.mxu0 %v133_v23 }
  0xb7   :  { %419 = vmatmul.mubr.f32.gmra.mrb[58].mxu1 %v130_v24 }
  0xb8   :  { %639 = vmatmul.mubr.f32.gmra.mrb[58].mxu0 %v132_v25  ;;  %423 = vmatprep.mubr.f32.mxu1 %v135_v26 }
  0xb9   :  { %643 = vmatprep.mubr.f32.mxu0 %v137_v27 }
  0xbb   :  { %424 = vmatmul.mubr.f32.gmra.mrb[60].mxu1 %v134_v28 }
  0xbc   :  { %644 = vmatmul.mubr.f32.gmra.mrb[60].mxu0 %v136_v29 }
 0x116   :  { %v275_v31 = vpop.f32.mrb[0].mxu1 }
 0x117   :  { %v276_v32 = vadd.f32 %v1497_v30, %v275_v31  ;;  %v277_v33 = vpop.f32.mrb[1].mxu1  ;;  %v495_v34 = vpop.f32.mrb[0].mxu0 }
 0x118   :  { %v497_v35 = vpop.f32.mrb[1].mxu0 }
 0x119   :  { %v496_v36 = vadd.f32 %v495_v34, %v276_v32 }
 0x11a   :  { %v280_v37 = vpop.f32.mrb[2].mxu1 }
 0x11b   :  { %v649_v38 = vmax.f32 %v496_v36, 0.0  ;;  %v281_v39 = vadd.f32 %v1497_v30, %v280_v37  ;;  %v282_v0 = vpop.f32.mrb[3].mxu1  ;;  %v500_v40 = vpop.f32.mrb[2].mxu0 }
 0x11c   :  { %v502_v41 = vpop.f32.mrb[3].mxu0 }
 0x11d   :  { %681 = vst.msk [vmem:[%s1656_s3] sm:$0xff] %vm680_vm0, %v649_v38  ;;  %v501_v42 = vadd.f32 %v500_v40, %v281_v39 }
 0x11e   :  { %v285_v43 = vpop.f32.mrb[4].mxu1 }
 0x11f   :  { %v650_v44 = vmax.f32 %v501_v42, 0.0  ;;  %v286_v45 = vadd.f32 %v1497_v30, %v285_v43  ;;  %v287_v46 = vpop.f32.mrb[5].mxu1  ;;  %v505_v47 = vpop.f32.mrb[4].mxu0 }
 0x120   :  { %v507_v48 = vpop.f32.mrb[5].mxu0 }
 0x121   :  { %682 = vst.msk [vmem:[%s1656_s3 + $0x8] sm:$0xff] %vm680_vm0, %v650_v44  ;;  %v506_v49 = vadd.f32 %v505_v47, %v286_v45 }
 0x122   :  { %v290_v50 = vpop.f32.mrb[6].mxu1 }
 0x123   :  { %v651_v51 = vmax.f32 %v506_v49, 0.0  ;;  %v291_v52 = vadd.f32 %v1497_v30, %v290_v50  ;;  %v292_v53 = vpop.f32.mrb[7].mxu1  ;;  %v510_v54 = vpop.f32.mrb[6].mxu0 }
 0x124   :  { %v512_v55 = vpop.f32.mrb[7].mxu0 }
 0x125   :  { %683 = vst.msk [vmem:[%s1656_s3 + $0x10] sm:$0xff] %vm680_vm0, %v651_v51  ;;  %v511_v56 = vadd.f32 %v510_v54, %v291_v52 }
 0x126   :  { %v295_v57 = vpop.f32.mrb[8].mxu1 }
 0x127   :  { %v652_v58 = vmax.f32 %v511_v56, 0.0  ;;  %v296_v59 = vadd.f32 %v1497_v30, %v295_v57  ;;  %v297_v60 = vpop.f32.mrb[9].mxu1  ;;  %v515_v61 = vpop.f32.mrb[8].mxu0 }
 0x128   :  { %v517_v62 = vpop.f32.mrb[9].mxu0 }
 0x129   :  { %684 = vst.msk [vmem:[%s1656_s3 + $0x18] sm:$0xff] %vm680_vm0, %v652_v58  ;;  %v516_v63 = vadd.f32 %v515_v61, %v296_v59 }
 0x12a   :  { %v300_v1 = vpop.f32.mrb[10].mxu1 }
 0x12b   :  { %v653_v2 = vmax.f32 %v516_v63, 0.0  ;;  %v301_v3 = vadd.f32 %v1497_v30, %v300_v1  ;;  %v302_v4 = vpop.f32.mrb[11].mxu1  ;;  %v520_v5 = vpop.f32.mrb[10].mxu0 }
 0x12c   :  { %v522_v6 = vpop.f32.mrb[11].mxu0 }
 0x12d   :  { %685 = vst.msk [vmem:[%s1656_s3 + $0x20] sm:$0xff] %vm680_vm0, %v653_v2  ;;  %v521_v7 = vadd.f32 %v520_v5, %v301_v3 }
 0x12e   :  { %v305_v8 = vpop.f32.mrb[12].mxu1 }
 0x12f   :  { %v654_v9 = vmax.f32 %v521_v7, 0.0  ;;  %v306_v10 = vadd.f32 %v1497_v30, %v305_v8  ;;  %v307_v11 = vpop.f32.mrb[13].mxu1  ;;  %v525_v12 = vpop.f32.mrb[12].mxu0 }
 0x130   :  { %v527_v13 = vpop.f32.mrb[13].mxu0 }
 0x131   :  { %686 = vst.msk [vmem:[%s1656_s3 + $0x28] sm:$0xff] %vm680_vm0, %v654_v9  ;;  %v526_v14 = vadd.f32 %v525_v12, %v306_v10 }
 0x132   :  { %v310_v15 = vpop.f32.mrb[14].mxu1 }
 0x133   :  { %v655_v16 = vmax.f32 %v526_v14, 0.0  ;;  %v311_v17 = vadd.f32 %v1497_v30, %v310_v15  ;;  %v312_v18 = vpop.f32.mrb[15].mxu1  ;;  %v530_v19 = vpop.f32.mrb[14].mxu0 }
 0x134   :  { %v532_v20 = vpop.f32.mrb[15].mxu0 }
 0x135   :  { %687 = vst.msk [vmem:[%s1656_s3 + $0x30] sm:$0xff] %vm680_vm0, %v655_v16  ;;  %v531_v21 = vadd.f32 %v530_v19, %v311_v17 }
 0x136   :  { %v315_v22 = vpop.f32.mrb[16].mxu1 }
 0x137   :  { %v656_v23 = vmax.f32 %v531_v21, 0.0  ;;  %v316_v24 = vadd.f32 %v1497_v30, %v315_v22  ;;  %v317_v25 = vpop.f32.mrb[17].mxu1  ;;  %v535_v26 = vpop.f32.mrb[16].mxu0 }
 0x138   :  { %v537_v27 = vpop.f32.mrb[17].mxu0 }
 0x139   :  { %688 = vst.msk [vmem:[%s1656_s3 + $0x38] sm:$0xff] %vm680_vm0, %v656_v23  ;;  %v536_v28 = vadd.f32 %v535_v26, %v316_v24 }
 0x13a   :  { %v320_v29 = vpop.f32.mrb[18].mxu1 }
 0x13b   :  { %v657_v31 = vmax.f32 %v536_v28, 0.0  ;;  %v321_v32 = vadd.f32 %v1497_v30, %v320_v29  ;;  %v322_v33 = vpop.f32.mrb[19].mxu1  ;;  %v540_v34 = vpop.f32.mrb[18].mxu0 }
 0x13c   :  { %v542_v35 = vpop.f32.mrb[19].mxu0 }
 0x13d   :  { %689 = vst.msk [vmem:[%s1656_s3 + $0x40] sm:$0xff] %vm680_vm0, %v657_v31  ;;  %v541_v36 = vadd.f32 %v540_v34, %v321_v32 }
 0x13e   :  { %v325_v37 = vpop.f32.mrb[20].mxu1 }
 0x13f   :  { %v658_v38 = vmax.f32 %v541_v36, 0.0  ;;  %v326_v39 = vadd.f32 %v1497_v30, %v325_v37  ;;  %v327_v0 = vpop.f32.mrb[21].mxu1  ;;  %v545_v40 = vpop.f32.mrb[20].mxu0 }
 0x140   :  { %v547_v41 = vpop.f32.mrb[21].mxu0 }
 0x141   :  { %690 = vst.msk [vmem:[%s1656_s3 + $0x48] sm:$0xff] %vm680_vm0, %v658_v38  ;;  %v546_v42 = vadd.f32 %v545_v40, %v326_v39 }
 0x142   :  { %v330_v43 = vpop.f32.mrb[22].mxu1 }
 0x143   :  { %v659_v44 = vmax.f32 %v546_v42, 0.0  ;;  %v331_v45 = vadd.f32 %v1497_v30, %v330_v43  ;;  %v332_v46 = vpop.f32.mrb[23].mxu1  ;;  %v550_v47 = vpop.f32.mrb[22].mxu0 }
 0x144   :  { %v552_v48 = vpop.f32.mrb[23].mxu0 }
 0x145   :  { %691 = vst.msk [vmem:[%s1656_s3 + $0x50] sm:$0xff] %vm680_vm0, %v659_v44  ;;  %v551_v49 = vadd.f32 %v550_v47, %v331_v45 }
 0x146   :  { %v335_v50 = vpop.f32.mrb[24].mxu1 }
 0x147   :  { %v660_v51 = vmax.f32 %v551_v49, 0.0  ;;  %v336_v52 = vadd.f32 %v1497_v30, %v335_v50  ;;  %v337_v53 = vpop.f32.mrb[25].mxu1  ;;  %v555_v54 = vpop.f32.mrb[24].mxu0 }
 0x148   :  { %v557_v55 = vpop.f32.mrb[25].mxu0 }
 0x149   :  { %692 = vst.msk [vmem:[%s1656_s3 + $0x58] sm:$0xff] %vm680_vm0, %v660_v51  ;;  %v556_v56 = vadd.f32 %v555_v54, %v336_v52 }
 0x14a   :  { %v340_v57 = vpop.f32.mrb[26].mxu1 }
 0x14b   :  { %v661_v58 = vmax.f32 %v556_v56, 0.0  ;;  %v341_v59 = vadd.f32 %v1497_v30, %v340_v57  ;;  %v342_v60 = vpop.f32.mrb[27].mxu1  ;;  %v560_v61 = vpop.f32.mrb[26].mxu0 }
 0x14c   :  { %v562_v62 = vpop.f32.mrb[27].mxu0 }
 0x14d   :  { %693 = vst.msk [vmem:[%s1656_s3 + $0x60] sm:$0xff] %vm680_vm0, %v661_v58  ;;  %v561_v63 = vadd.f32 %v560_v61, %v341_v59 }
 0x14e   :  { %v345_v1 = vpop.f32.mrb[28].mxu1 }
 0x14f   :  { %v662_v2 = vmax.f32 %v561_v63, 0.0  ;;  %v346_v3 = vadd.f32 %v1497_v30, %v345_v1  ;;  %v347_v4 = vpop.f32.mrb[29].mxu1  ;;  %v565_v5 = vpop.f32.mrb[28].mxu0 }
 0x150   :  { %v567_v6 = vpop.f32.mrb[29].mxu0 }
 0x151   :  { %694 = vst.msk [vmem:[%s1656_s3 + $0x68] sm:$0xff] %vm680_vm0, %v662_v2  ;;  %v566_v7 = vadd.f32 %v565_v5, %v346_v3 }
 0x152   :  { %v350_v8 = vpop.f32.mrb[30].mxu1 }
 0x153   :  { %v663_v9 = vmax.f32 %v566_v7, 0.0  ;;  %v351_v10 = vadd.f32 %v1497_v30, %v350_v8  ;;  %v352_v11 = vpop.f32.mrb[31].mxu1  ;;  %v570_v12 = vpop.f32.mrb[30].mxu0 }
 0x154   :  { %v572_v13 = vpop.f32.mrb[31].mxu0 }
 0x155   :  { %695 = vst.msk [vmem:[%s1656_s3 + $0x70] sm:$0xff] %vm680_vm0, %v663_v9  ;;  %v571_v14 = vadd.f32 %v570_v12, %v351_v10 }
 0x156   :  { %v355_v15 = vpop.f32.mrb[32].mxu1 }
 0x157   :  { %v664_v16 = vmax.f32 %v571_v14, 0.0  ;;  %v356_v17 = vadd.f32 %v1497_v30, %v355_v15  ;;  %v357_v18 = vpop.f32.mrb[33].mxu1  ;;  %v575_v19 = vpop.f32.mrb[32].mxu0 }
 0x158   :  { %v577_v20 = vpop.f32.mrb[33].mxu0 }
 0x159   :  { %696 = vst.msk [vmem:[%s1656_s3 + $0x78] sm:$0xff] %vm680_vm0, %v664_v16  ;;  %v576_v21 = vadd.f32 %v575_v19, %v356_v17 }
 0x15a   :  { %v360_v22 = vpop.f32.mrb[34].mxu1 }
 0x15b   :  { %v665_v23 = vmax.f32 %v576_v21, 0.0  ;;  %v361_v24 = vadd.f32 %v1497_v30, %v360_v22  ;;  %v362_v25 = vpop.f32.mrb[35].mxu1  ;;  %v580_v26 = vpop.f32.mrb[34].mxu0 }
 0x15c   :  { %v582_v27 = vpop.f32.mrb[35].mxu0 }
 0x15d   :  { %697 = vst.msk [vmem:[%s1656_s3 + $0x80] sm:$0xff] %vm680_vm0, %v665_v23  ;;  %v581_v28 = vadd.f32 %v580_v26, %v361_v24 }
 0x15e   :  { %v365_v29 = vpop.f32.mrb[36].mxu1 }
 0x15f   :  { %v666_v31 = vmax.f32 %v581_v28, 0.0  ;;  %v366_v32 = vadd.f32 %v1497_v30, %v365_v29  ;;  %v367_v33 = vpop.f32.mrb[37].mxu1  ;;  %v585_v34 = vpop.f32.mrb[36].mxu0 }
 0x160   :  { %v587_v35 = vpop.f32.mrb[37].mxu0 }
 0x161   :  { %698 = vst.msk [vmem:[%s1656_s3 + $0x88] sm:$0xff] %vm680_vm0, %v666_v31  ;;  %v586_v36 = vadd.f32 %v585_v34, %v366_v32 }
 0x162   :  { %v370_v37 = vpop.f32.mrb[38].mxu1 }
 0x163   :  { %v667_v38 = vmax.f32 %v586_v36, 0.0  ;;  %v371_v39 = vadd.f32 %v1497_v30, %v370_v37  ;;  %v372_v0 = vpop.f32.mrb[39].mxu1  ;;  %v590_v40 = vpop.f32.mrb[38].mxu0 }
 0x164   :  { %v592_v41 = vpop.f32.mrb[39].mxu0 }
 0x165   :  { %699 = vst.msk [vmem:[%s1656_s3 + $0x90] sm:$0xff] %vm680_vm0, %v667_v38  ;;  %v591_v42 = vadd.f32 %v590_v40, %v371_v39 }
 0x166   :  { %v375_v43 = vpop.f32.mrb[40].mxu1 }
 0x167   :  { %v668_v44 = vmax.f32 %v591_v42, 0.0  ;;  %v376_v45 = vadd.f32 %v1497_v30, %v375_v43  ;;  %v377_v46 = vpop.f32.mrb[41].mxu1  ;;  %v595_v47 = vpop.f32.mrb[40].mxu0 }
 0x168   :  { %v597_v48 = vpop.f32.mrb[41].mxu0 }
 0x169   :  { %700 = vst.msk [vmem:[%s1656_s3 + $0x98] sm:$0xff] %vm680_vm0, %v668_v44  ;;  %v596_v49 = vadd.f32 %v595_v47, %v376_v45 }
 0x16a   :  { %v380_v50 = vpop.f32.mrb[42].mxu1 }
 0x16b   :  { %v669_v51 = vmax.f32 %v596_v49, 0.0  ;;  %v381_v52 = vadd.f32 %v1497_v30, %v380_v50  ;;  %v382_v53 = vpop.f32.mrb[43].mxu1  ;;  %v600_v54 = vpop.f32.mrb[42].mxu0 }
 0x16c   :  { %v602_v55 = vpop.f32.mrb[43].mxu0 }
 0x16d   :  { %701 = vst.msk [vmem:[%s1656_s3 + $0xa0] sm:$0xff] %vm680_vm0, %v669_v51  ;;  %v601_v56 = vadd.f32 %v600_v54, %v381_v52 }
 0x16e   :  { %v385_v57 = vpop.f32.mrb[44].mxu1 }
 0x16f   :  { %v670_v58 = vmax.f32 %v601_v56, 0.0  ;;  %v386_v59 = vadd.f32 %v1497_v30, %v385_v57  ;;  %v387_v60 = vpop.f32.mrb[45].mxu1  ;;  %v605_v61 = vpop.f32.mrb[44].mxu0 }
 0x170   :  { %v607_v62 = vpop.f32.mrb[45].mxu0 }
 0x171   :  { %702 = vst.msk [vmem:[%s1656_s3 + $0xa8] sm:$0xff] %vm680_vm0, %v670_v58  ;;  %v606_v63 = vadd.f32 %v605_v61, %v386_v59 }
 0x172   :  { %v390_v1 = vpop.f32.mrb[46].mxu1 }
 0x173   :  { %v671_v2 = vmax.f32 %v606_v63, 0.0  ;;  %v391_v3 = vadd.f32 %v1497_v30, %v390_v1  ;;  %v392_v4 = vpop.f32.mrb[47].mxu1  ;;  %v610_v5 = vpop.f32.mrb[46].mxu0 }
 0x174   :  { %v612_v6 = vpop.f32.mrb[47].mxu0 }
 0x175   :  { %703 = vst.msk [vmem:[%s1656_s3 + $0xb0] sm:$0xff] %vm680_vm0, %v671_v2  ;;  %v611_v7 = vadd.f32 %v610_v5, %v391_v3 }
 0x176   :  { %v395_v8 = vpop.f32.mrb[48].mxu1 }
 0x177   :  { %v672_v9 = vmax.f32 %v611_v7, 0.0  ;;  %v396_v10 = vadd.f32 %v1497_v30, %v395_v8  ;;  %v397_v11 = vpop.f32.mrb[49].mxu1  ;;  %v615_v12 = vpop.f32.mrb[48].mxu0 }
 0x178   :  { %v617_v13 = vpop.f32.mrb[49].mxu0 }
 0x179   :  { %704 = vst.msk [vmem:[%s1656_s3 + $0xb8] sm:$0xff] %vm680_vm0, %v672_v9  ;;  %v616_v14 = vadd.f32 %v615_v12, %v396_v10 }
 0x17a   :  { %v400_v15 = vpop.f32.mrb[50].mxu1 }
 0x17b   :  { %v673_v16 = vmax.f32 %v616_v14, 0.0  ;;  %v401_v17 = vadd.f32 %v1497_v30, %v400_v15  ;;  %v402_v18 = vpop.f32.mrb[51].mxu1  ;;  %v620_v19 = vpop.f32.mrb[50].mxu0 }
 0x17c   :  { %v622_v20 = vpop.f32.mrb[51].mxu0 }
 0x17d   :  { %705 = vst.msk [vmem:[%s1656_s3 + $0xc0] sm:$0xff] %vm680_vm0, %v673_v16  ;;  %v621_v21 = vadd.f32 %v620_v19, %v401_v17 }
 0x17e   :  { %v405_v22 = vpop.f32.mrb[52].mxu1 }
 0x17f   :  { %v674_v23 = vmax.f32 %v621_v21, 0.0  ;;  %v406_v24 = vadd.f32 %v1497_v30, %v405_v22  ;;  %v407_v25 = vpop.f32.mrb[53].mxu1  ;;  %v625_v26 = vpop.f32.mrb[52].mxu0 }
 0x180   :  { %v627_v27 = vpop.f32.mrb[53].mxu0 }
 0x181   :  { %706 = vst.msk [vmem:[%s1656_s3 + $0xc8] sm:$0xff] %vm680_vm0, %v674_v23  ;;  %v626_v28 = vadd.f32 %v625_v26, %v406_v24 }
 0x182   :  { %v410_v29 = vpop.f32.mrb[54].mxu1 }
 0x183   :  { %v675_v31 = vmax.f32 %v626_v28, 0.0  ;;  %v411_v32 = vadd.f32 %v1497_v30, %v410_v29  ;;  %v412_v33 = vpop.f32.mrb[55].mxu1  ;;  %v630_v34 = vpop.f32.mrb[54].mxu0 }
 0x184   :  { %v632_v35 = vpop.f32.mrb[55].mxu0 }
 0x185   :  { %707 = vst.msk [vmem:[%s1656_s3 + $0xd0] sm:$0xff] %vm680_vm0, %v675_v31  ;;  %v631_v36 = vadd.f32 %v630_v34, %v411_v32 }
 0x186   :  { %v415_v37 = vpop.f32.mrb[56].mxu1 }
 0x187   :  { %v676_v38 = vmax.f32 %v631_v36, 0.0  ;;  %v416_v39 = vadd.f32 %v1497_v30, %v415_v37  ;;  %v417_v0 = vpop.f32.mrb[57].mxu1  ;;  %v635_v40 = vpop.f32.mrb[56].mxu0 }
 0x188   :  { %v637_v41 = vpop.f32.mrb[57].mxu0 }
 0x189   :  { %708 = vst.msk [vmem:[%s1656_s3 + $0xd8] sm:$0xff] %vm680_vm0, %v676_v38  ;;  %v636_v42 = vadd.f32 %v635_v40, %v416_v39 }
 0x18a   :  { %v420_v43 = vpop.f32.mrb[58].mxu1 }
 0x18b   :  { %v677_v44 = vmax.f32 %v636_v42, 0.0  ;;  %v421_v45 = vadd.f32 %v1497_v30, %v420_v43  ;;  %v422_v46 = vpop.f32.mrb[59].mxu1  ;;  %v640_v47 = vpop.f32.mrb[58].mxu0 }
 0x18c   :  { %v642_v48 = vpop.f32.mrb[59].mxu0 }
 0x18d   :  { %709 = vst.msk [vmem:[%s1656_s3 + $0xe0] sm:$0xff] %vm680_vm0, %v677_v44  ;;  %v641_v49 = vadd.f32 %v640_v47, %v421_v45 }
 0x18e   :  { %v425_v50 = vpop.f32.mrb[60].mxu1 }
 0x18f   :  { %v678_v51 = vmax.f32 %v641_v49, 0.0  ;;  %v426_v52 = vadd.f32 %v1497_v30, %v425_v50  ;;  %v427_v53 = vpop.f32.mrb[61].mxu1  ;;  %v645_v54 = vpop.f32.mrb[60].mxu0 }
 0x190   :  { %v647_v55 = vpop.f32.mrb[61].mxu0 }
 0x191   :  { %710 = vst.msk [vmem:[%s1656_s3 + $0xe8] sm:$0xff] %vm680_vm0, %v678_v51  ;;  %v646_v56 = vadd.f32 %v645_v54, %v426_v52 }
 0x193   :  { %v679_v57 = vmax.f32 %v646_v56, 0.0 }
 0x195   :  { %712 = vst.msk [vmem:[%s1656_s3 + $0xf0] sm:$0x3] %vm711_vm1, %v679_v57 }

// kernel: forward.12
= control target key start
LH: loop header
LB: loop body
LE: loop exit
PB: predicated region body
PF: predicated region fallthrough
CT: control target
= control target key end

     0   :  { %vm71_vm0 = vcmask 261120   ;;  %vm174_vm1 = vcmask 254976   ;;  %s496_s0 = inlined_call_operand.vmem [shape: f32[9,50,32], index: 0, kind: input, shape index: {}]   ;;  %s497_s1 = inlined_call_operand.vmem [shape: f32[50,32], index: 1, kind: output, shape index: {}]  }
   0x1   :  { %v8_v0 = vld [vmem:[%s496_s0] sm:$0xff]  ;;  %v15_v1 = vld [vmem:[%s496_s0 + $0x38] sm:$0xff]  ;;  %v22_v2 = vld [vmem:[%s496_s0 + $0x70] sm:$0xff] }
   0x2   :  { %v29_v3 = vld [vmem:[%s496_s0 + $0xa8] sm:$0xff]  ;;  %v36_v4 = vld [vmem:[%s496_s0 + $0xe0] sm:$0xff]  ;;  %v43_v5 = vld [vmem:[%s496_s0 + $0x118] sm:$0xff]  ;;  %v72_v6 = vsel %vm71_vm0, %v8_v0, -inf  ;;  %v73_v7 = vsel %vm71_vm0, %v15_v1, -inf  ;;  %v75_v8 = vsel %vm71_vm0, %v22_v2, -inf }
   0x3   :  { %v50_v9 = vld [vmem:[%s496_s0 + $0x150] sm:$0xff]  ;;  %v57_v10 = vld [vmem:[%s496_s0 + $0x188] sm:$0xff]  ;;  %v64_v11 = vld [vmem:[%s496_s0 + $0x1c0] sm:$0xff]  ;;  %v74_v12 = vmax.f32 %v72_v6, %v73_v7  ;;  %v77_v13 = vsel %vm71_vm0, %v29_v3, -inf  ;;  %v79_v23 = vsel %vm71_vm0, %v36_v4, -inf  ;;  %v81_v24 = vsel %vm71_vm0, %v43_v5, -inf }
   0x4   :  { %v9_v14 = vld [vmem:[%s496_s0 + $0x8] sm:$0xff]  ;;  %v16_v15 = vld [vmem:[%s496_s0 + $0x40] sm:$0xff]  ;;  %v23_v16 = vld [vmem:[%s496_s0 + $0x78] sm:$0xff]  ;;  %v83_v25 = vsel %vm71_vm0, %v50_v9, -inf  ;;  %v275_v31 = vsel %vm71_vm0, %v57_v10, -inf  ;;  %v87_v32 = vsel %vm71_vm0, %v64_v11, -inf }
   0x5   :  { %v76_v17 = vmax.f32 %v74_v12, %v75_v8  ;;  %v30_v18 = vld [vmem:[%s496_s0 + $0xb0] sm:$0xff]  ;;  %v37_v19 = vld [vmem:[%s496_s0 + $0xe8] sm:$0xff]  ;;  %v89_v20 = vsel %vm71_vm0, %v9_v14, -inf  ;;  %v90_v21 = vsel %vm71_vm0, %v16_v15, -inf  ;;  %v92_v22 = vsel %vm71_vm0, %v23_v16, -inf  ;;  %v44_v26 = vld [vmem:[%s496_s0 + $0x120] sm:$0xff] }
   0x6   :  { %v51_v27 = vld [vmem:[%s496_s0 + $0x158] sm:$0xff]  ;;  %v58_v28 = vld [vmem:[%s496_s0 + $0x190] sm:$0xff]  ;;  %v91_v29 = vmax.f32 %v89_v20, %v90_v21  ;;  %v94_v33 = vsel %vm71_vm0, %v30_v18, -inf  ;;  %v17_v35 = vld [vmem:[%s496_s0 + $0x48] sm:$0xff]  ;;  %v96_v44 = vsel %vm71_vm0, %v37_v19, -inf  ;;  %v98_v45 = vsel %vm71_vm0, %v44_v26, -inf }
   0x7   :  { %v78_v30 = vmax.f32 %v76_v17, %v77_v13  ;;  %v10_v34 = vld [vmem:[%s496_s0 + $0x10] sm:$0xff]  ;;  %v24_v36 = vld [vmem:[%s496_s0 + $0x80] sm:$0xff]  ;;  %v65_v37 = vld [vmem:[%s496_s0 + $0x1c8] sm:$0xff]  ;;  %v107_v41 = vsel %vm71_vm0, %v17_v35, -inf  ;;  %v100_v50 = vsel %vm71_vm0, %v51_v27, -inf  ;;  %v102_v51 = vsel %vm71_vm0, %v58_v28, -inf }
   0x8   :  { %v93_v38 = vmax.f32 %v91_v29, %v92_v22  ;;  %v31_v39 = vld [vmem:[%s496_s0 + $0xb8] sm:$0xff]  ;;  %v106_v40 = vsel %vm71_vm0, %v10_v34, -inf  ;;  %v109_v42 = vsel %vm71_vm0, %v24_v36, -inf  ;;  %v38_v46 = vld [vmem:[%s496_s0 + $0xf0] sm:$0xff]  ;;  %v45_v47 = vld [vmem:[%s496_s0 + $0x128] sm:$0xff]  ;;  %v104_v57 = vsel %vm71_vm0, %v65_v37, -inf }
   0x9   :  { %v80_v43 = vmax.f32 %v78_v30, %v79_v23  ;;  %v108_v48 = vmax.f32 %v106_v40, %v107_v41  ;;  %v111_v52 = vsel %vm71_vm0, %v31_v39, -inf  ;;  %v11_v53 = vld [vmem:[%s496_s0 + $0x18] sm:$0xff]  ;;  %v18_v54 = vld [vmem:[%s496_s0 + $0x50] sm:$0xff]  ;;  %v25_v55 = vld [vmem:[%s496_s0 + $0x88] sm:$0xff]  ;;  %v113_v0 = vsel %vm71_vm0, %v38_v46, -inf }
   0xa   :  { %v95_v49 = vmax.f32 %v93_v38, %v94_v33  ;;  %v52_v58 = vld [vmem:[%s496_s0 + $0x160] sm:$0xff]  ;;  %v59_v59 = vld [vmem:[%s496_s0 + $0x198] sm:$0xff]  ;;  %v123_v62 = vsel %vm71_vm0, %v11_v53, -inf  ;;  %v124_v2 = vsel %vm71_vm0, %v18_v54, -inf  ;;  %v126_v3 = vsel %vm71_vm0, %v25_v55, -inf  ;;  %v26_v10 = vld [vmem:[%s496_s0 + $0x90] sm:$0xff] }
   0xb   :  { %v82_v56 = vmax.f32 %v80_v43, %v81_v24  ;;  %v110_v60 = vmax.f32 %v108_v48, %v109_v42  ;;  %v32_v61 = vld [vmem:[%s496_s0 + $0xc0] sm:$0xff]  ;;  %v39_v1 = vld [vmem:[%s496_s0 + $0xf8] sm:$0xff]  ;;  %v115_v6 = vsel %vm71_vm0, %v45_v47, -inf  ;;  %v125_v7 = vmax.f32 %v123_v62, %v124_v2  ;;  %v66_v16 = vld [vmem:[%s496_s0 + $0x1d0] sm:$0xff] }
   0xc   :  { %v97_v63 = vmax.f32 %v95_v49, %v96_v44  ;;  %v12_v8 = vld [vmem:[%s496_s0 + $0x20] sm:$0xff]  ;;  %v19_v9 = vld [vmem:[%s496_s0 + $0x58] sm:$0xff]  ;;  %v117_v12 = vsel %vm71_vm0, %v52_v58, -inf  ;;  %v119_v13 = vsel %vm71_vm0, %v59_v59, -inf  ;;  %v128_v14 = vsel %vm71_vm0, %v32_v61, -inf  ;;  %v46_v18 = vld [vmem:[%s496_s0 + $0x130] sm:$0xff] }
   0xd   :  { %v84_v4 = vmax.f32 %v82_v56, %v83_v25  ;;  %v112_v5 = vmax.f32 %v110_v60, %v111_v52  ;;  %v127_v19 = vmax.f32 %v125_v7, %v126_v3  ;;  %v130_v20 = vsel %vm71_vm0, %v39_v1, -inf  ;;  %v33_v21 = vld [vmem:[%s496_s0 + $0xc8] sm:$0xff]  ;;  %v60_v29 = vld [vmem:[%s496_s0 + $0x1a0] sm:$0xff]  ;;  %v47_v42 = vld [vmem:[%s496_s0 + $0x138] sm:$0xff] }
   0xe   :  { %v99_v11 = vmax.f32 %v97_v63, %v98_v45  ;;  %v53_v23 = vld [vmem:[%s496_s0 + $0x168] sm:$0xff]  ;;  %v140_v24 = vsel %vm71_vm0, %v12_v8, -inf  ;;  %v141_v25 = vsel %vm71_vm0, %v19_v9, -inf  ;;  %v143_v26 = vsel %vm71_vm0, %v26_v10, -inf  ;;  %v20_v38 = vld [vmem:[%s496_s0 + $0x60] sm:$0xff]  ;;  %v27_v44 = vld [vmem:[%s496_s0 + $0x98] sm:$0xff] }
   0xf   :  { %v86_v15 = vmax.f32 %v84_v4, %v275_v31  ;;  %v114_v17 = vmax.f32 %v112_v5, %v113_v0  ;;  %v129_v30 = vmax.f32 %v127_v19, %v128_v14  ;;  %v40_v31 = vld [vmem:[%s496_s0 + $0x100] sm:$0xff]  ;;  %v142_v33 = vmax.f32 %v140_v24, %v141_v25  ;;  %v13_v34 = vld [vmem:[%s496_s0 + $0x28] sm:$0xff]  ;;  %v34_v48 = vld [vmem:[%s496_s0 + $0xd0] sm:$0xff] }
  0x10   :  { %v101_v22 = vmax.f32 %v99_v11, %v100_v50  ;;  %v121_v36 = vsel %vm71_vm0, %v66_v16, -inf  ;;  %v145_v37 = vsel %vm71_vm0, %v33_v21, -inf  ;;  %v134_v41 = vsel %vm71_vm0, %v53_v23, -inf  ;;  %v54_v53 = vld [vmem:[%s496_s0 + $0x170] sm:$0xff]  ;;  %v41_v55 = vld [vmem:[%s496_s0 + $0x108] sm:$0xff]  ;;  %v68_v11 = vld [vmem:[%s496_s0 + $0x1e0] sm:$0xff] }
  0x11   :  { %v88_v27 = vmax.f32 %v86_v15, %v87_v32  ;;  %v116_v28 = vmax.f32 %v114_v17, %v115_v6  ;;  %v132_v32 = vsel %vm71_vm0, %v46_v18, -inf  ;;  %v131_v40 = vmax.f32 %v129_v30, %v130_v20  ;;  %v14_v60 = vld [vmem:[%s496_s0 + $0x30] sm:$0x3]  ;;  %v21_v61 = vld [vmem:[%s496_s0 + $0x68] sm:$0x3]  ;;  %v48_v6 = vld [vmem:[%s496_s0 + $0x140] sm:$0xff] }
  0x12   :  { %v103_v35 = vmax.f32 %v101_v22, %v102_v51  ;;  %v144_v43 = vmax.f32 %v142_v33, %v143_v26  ;;  %v136_v46 = vsel %vm71_vm0, %v60_v29, -inf  ;;  %v147_v47 = vsel %vm71_vm0, %v40_v31, -inf  ;;  %v67_v51 = vld [vmem:[%s496_s0 + $0x1d8] sm:$0xff]  ;;  %v61_v0 = vld [vmem:[%s496_s0 + $0x1a8] sm:$0xff]  ;;  %v28_v3 = vld [vmem:[%s496_s0 + $0xa0] sm:$0x3] }
  0x13   :  { %192 = vst.msk [vmem:[%s497_s1] sm:$0xff] %vm71_vm0, %v88_v27  ;;  %v118_v39 = vmax.f32 %v116_v28, %v117_v12  ;;  %v157_v49 = vsel %vm71_vm0, %v13_v34, -inf  ;;  %v133_v52 = vmax.f32 %v131_v40, %v132_v32  ;;  %v158_v56 = vsel %vm71_vm0, %v20_v38, -inf  ;;  %v35_v9 = vld [vmem:[%s496_s0 + $0xd8] sm:$0x3]  ;;  %v62_v26 = vld [vmem:[%s496_s0 + $0x1b0] sm:$0xff] }
  0x14   :  { %v105_v45 = vmax.f32 %v103_v35, %v104_v57  ;;  %v146_v54 = vmax.f32 %v144_v43, %v145_v37  ;;  %v149_v57 = vsel %vm71_vm0, %v47_v42, -inf  ;;  %v159_v58 = vmax.f32 %v157_v49, %v158_v56  ;;  %v55_v16 = vld [vmem:[%s496_s0 + $0x178] sm:$0xff]  ;;  %v42_v18 = vld [vmem:[%s496_s0 + $0x110] sm:$0x3]  ;;  %v49_v28 = vld [vmem:[%s496_s0 + $0x148] sm:$0x3] }
  0x15   :  { %v120_v50 = vmax.f32 %v118_v39, %v119_v13  ;;  %v160_v59 = vsel %vm71_vm0, %v27_v44, -inf  ;;  %v135_v63 = vmax.f32 %v133_v52, %v134_v41  ;;  %v162_v2 = vsel %vm71_vm0, %v34_v48, -inf  ;;  %v69_v34 = vld [vmem:[%s496_s0 + $0x1e8] sm:$0xff]  ;;  %v63_v41 = vld [vmem:[%s496_s0 + $0x1b8] sm:$0x3] }
  0x16   :  { %193 = vst.msk [vmem:[%s497_s1 + $0x8] sm:$0xff] %vm71_vm0, %v105_v45  ;;  %v148_v1 = vmax.f32 %v146_v54, %v147_v47  ;;  %v138_v4 = vsel %vm71_vm0, %v67_v51, -inf  ;;  %v151_v5 = vsel %vm71_vm0, %v54_v53, -inf  ;;  %v161_v7 = vmax.f32 %v159_v58, %v160_v59 }
  0x17   :  { %v122_v62 = vmax.f32 %v120_v50, %v121_v36  ;;  %v164_v8 = vsel %vm71_vm0, %v41_v55, -inf  ;;  %v137_v10 = vmax.f32 %v135_v63, %v136_v46  ;;  %v175_v13 = vsel %vm174_vm1, %v14_v60, -inf  ;;  %v56_v36 = vld [vmem:[%s496_s0 + $0x180] sm:$0x3]  ;;  %v70_v46 = vld [vmem:[%s496_s0 + $0x1f0] sm:$0x3] }
  0x18   :  { %v150_v12 = vmax.f32 %v148_v1, %v149_v57  ;;  %v176_v14 = vsel %vm174_vm1, %v21_v61, -inf  ;;  %v153_v15 = vsel %vm71_vm0, %v61_v0, -inf  ;;  %v163_v17 = vmax.f32 %v161_v7, %v162_v2 }
  0x19   :  { %194 = vst.msk [vmem:[%s497_s1 + $0x10] sm:$0xff] %vm71_vm0, %v122_v62  ;;  %v177_v19 = vmax.f32 %v175_v13, %v176_v14  ;;  %v178_v20 = vsel %vm174_vm1, %v28_v3, -inf  ;;  %v139_v21 = vmax.f32 %v137_v10, %v138_v4  ;;  %v166_v23 = vsel %vm71_vm0, %v48_v6, -inf }
  0x1a   :  { %v152_v22 = vmax.f32 %v150_v12, %v151_v5  ;;  %v180_v24 = vsel %vm174_vm1, %v35_v9, -inf  ;;  %v155_v25 = vsel %vm71_vm0, %v68_v11, -inf  ;;  %v165_v27 = vmax.f32 %v163_v17, %v164_v8 }
  0x1b   :  { %v179_v29 = vmax.f32 %v177_v19, %v178_v20  ;;  %195 = vst.msk [vmem:[%s497_s1 + $0x18] sm:$0xff] %vm71_vm0, %v139_v21  ;;  %v168_v31 = vsel %vm71_vm0, %v55_v16, -inf  ;;  %v182_v33 = vsel %vm174_vm1, %v42_v18, -inf  ;;  %v170_v38 = vsel %vm71_vm0, %v62_v26, -inf }
  0x1c   :  { %v154_v30 = vmax.f32 %v152_v22, %v153_v15  ;;  %v167_v35 = vmax.f32 %v165_v27, %v166_v23  ;;  %v184_v39 = vsel %vm174_vm1, %v49_v28, -inf  ;;  %v172_v43 = vsel %vm71_vm0, %v69_v34, -inf }
  0x1d   :  { %v181_v32 = vmax.f32 %v179_v29, %v180_v24  ;;  %v186_v44 = vsel %vm174_vm1, %v56_v36, -inf  ;;  %v188_v48 = vsel %vm174_vm1, %v63_v41, -inf  ;;  %v190_v51 = vsel %vm174_vm1, %v70_v46, -inf }
  0x1e   :  { %v156_v37 = vmax.f32 %v154_v30, %v155_v25  ;;  %v169_v40 = vmax.f32 %v167_v35, %v168_v31 }
  0x1f   :  { %v183_v42 = vmax.f32 %v181_v32, %v182_v33 }
  0x20   :  { %196 = vst.msk [vmem:[%s497_s1 + $0x20] sm:$0xff] %vm71_vm0, %v156_v37  ;;  %v171_v45 = vmax.f32 %v169_v40, %v170_v38 }
  0x21   :  { %v185_v47 = vmax.f32 %v183_v42, %v184_v39 }
  0x22   :  { %v173_v49 = vmax.f32 %v171_v45, %v172_v43 }
  0x23   :  { %v187_v50 = vmax.f32 %v185_v47, %v186_v44 }
  0x24   :  { %197 = vst.msk [vmem:[%s497_s1 + $0x28] sm:$0xff] %vm71_vm0, %v173_v49 }
  0x25   :  { %v189_v52 = vmax.f32 %v187_v50, %v188_v48 }
  0x27   :  { %v191_v53 = vmax.f32 %v189_v52, %v190_v51 }
  0x29   :  { %198 = vst.msk [vmem:[%s497_s1 + $0x30] sm:$0x3] %vm174_vm1, %v191_v53 }

// kernel: forward.13
= control target key start
LH: loop header
LB: loop body
LE: loop exit
PB: predicated region body
PF: predicated region fallthrough
CT: control target
= control target key end

     0   :  { %v499_v3 = vmov 0.0|0.0   ;;  %vm500_vm0 = vmmov 0   ;;  %v501_v4 = vmov 0.0   ;;  %vm297_vm1 = vcmask 523264   ;;  %s781_s1 = inlined_call_operand.vmem [shape: f32[384,64], index: 1, kind: input, shape index: {}]   ;;  %s782_s0 = inlined_call_operand.vmem [shape: f32[50,384], index: 0, kind: input, shape index: {}]   ;;  %s783_s2 = inlined_call_operand.vmem [shape: f32[1,64], index: 2, kind: input, shape index: {}]   ;;  %s784_s3 = inlined_call_operand.vmem [shape: f32[50,64], index: 3, kind: output, shape index: {}]  }
   0x1   :  { %v51_v0 = vld [vmem:[%s781_s1 + $0x80] sm:$0xff]  ;;  %v52_v1 = vld [vmem:[%s781_s1 + $0x88] sm:$0xff]  ;;  %472 = vmatprep.subr.bf16.mxu1 %v499_v3  ;;  %419 = vmatprep.mubr.msk.f32.mxu1 %vm500_vm0, %v501_v4  ;;  %v53_v7 = vld [vmem:[%s781_s1 + $0x90] sm:$0xff]  ;;  %vm304_vm2 = vcmask 517120  }
   0x2   :  { %v35_v2 = vld [vmem:[%s781_s1] sm:$0xff]  ;;  %v440_v5 = vpack.c.bf16 %v52_v1, %v51_v0  ;;  %v36_v6 = vld [vmem:[%s781_s1 + $0x8] sm:$0xff]  ;;  %v54_v8 = vld [vmem:[%s781_s1 + $0x98] sm:$0xff] }
   0x3   :  { %v442_v9 = vpack.c.bf16 %v36_v6, %v35_v2  ;;  %v444_v10 = vpack.c.bf16 %v54_v8, %v53_v7  ;;  %v37_v11 = vld [vmem:[%s781_s1 + $0x10] sm:$0xff]  ;;  %v38_v12 = vld [vmem:[%s781_s1 + $0x18] sm:$0xff]  ;;  %v67_v13 = vld [vmem:[%s781_s1 + $0x100] sm:$0xff] }
   0x4   :  { %441 = vmatprep.subr.bf16.mxu0 %v440_v5  ;;  %v68_v14 = vld [vmem:[%s781_s1 + $0x108] sm:$0xff]  ;;  %v55_v15 = vld [vmem:[%s781_s1 + $0xa0] sm:$0xff]  ;;  %v446_v17 = vpack.c.bf16 %v38_v12, %v37_v11  ;;  %v69_v19 = vld [vmem:[%s781_s1 + $0x110] sm:$0xff] }
   0x5   :  { %v56_v16 = vld [vmem:[%s781_s1 + $0xa8] sm:$0xff]  ;;  %443 = vmatpush3.bf16.msra.mxu0 %v442_v9  ;;  %v473_v18 = vpack.c.bf16 %v68_v14, %v67_v13  ;;  %v39_v21 = vld [vmem:[%s781_s1 + $0x20] sm:$0xff]  ;;  %v70_v23 = vld [vmem:[%s781_s1 + $0x118] sm:$0xff] }
   0x6   :  { %445 = vmatprep.subr.bf16.mxu0 %v444_v10  ;;  %v448_v20 = vpack.c.bf16 %v56_v16, %v55_v15  ;;  %v40_v22 = vld [vmem:[%s781_s1 + $0x28] sm:$0xff]  ;;  %v476_v24 = vpack.c.bf16 %v70_v23, %v69_v19  ;;  %v57_v25 = vld [vmem:[%s781_s1 + $0xb0] sm:$0xff]  ;;  %v58_v26 = vld [vmem:[%s781_s1 + $0xb8] sm:$0xff] }
   0x7   :  { %474 = vmatpush3.bf16.msra.mxu1 %v473_v18  ;;  %v71_v27 = vld [vmem:[%s781_s1 + $0x120] sm:$0xff]  ;;  %v72_v28 = vld [vmem:[%s781_s1 + $0x128] sm:$0xff]  ;;  %v450_v29 = vpack.c.bf16 %v40_v22, %v39_v21  ;;  %v452_v30 = vpack.c.bf16 %v58_v26, %v57_v25  ;;  %v41_v31 = vld [vmem:[%s781_s1 + $0x30] sm:$0xff] }
   0x8   :  { %475 = vmatprep.subr.bf16.mxu1 %v499_v3  ;;  %v42_v32 = vld [vmem:[%s781_s1 + $0x38] sm:$0xff]  ;;  %v479_v33 = vpack.c.bf16 %v72_v28, %v71_v27  ;;  %v59_v34 = vld [vmem:[%s781_s1 + $0xc0] sm:$0xff]  ;;  %v60_v35 = vld [vmem:[%s781_s1 + $0xc8] sm:$0xff] }
   0x9   :  { %447 = vmatpush3.bf16.msra.mxu0 %v446_v17  ;;  %v73_v36 = vld [vmem:[%s781_s1 + $0x130] sm:$0xff]  ;;  %v74_v37 = vld [vmem:[%s781_s1 + $0x138] sm:$0xff]  ;;  %v454_v38 = vpack.c.bf16 %v42_v32, %v41_v31  ;;  %v456_v39 = vpack.c.bf16 %v60_v35, %v59_v34  ;;  %v43_v40 = vld [vmem:[%s781_s1 + $0x40] sm:$0xff] }
   0xa   :  { %449 = vmatprep.subr.bf16.mxu0 %v448_v20  ;;  %v44_v41 = vld [vmem:[%s781_s1 + $0x48] sm:$0xff]  ;;  %v482_v42 = vpack.c.bf16 %v74_v37, %v73_v36  ;;  %v61_v43 = vld [vmem:[%s781_s1 + $0xd0] sm:$0xff]  ;;  %v62_v44 = vld [vmem:[%s781_s1 + $0xd8] sm:$0xff] }
   0xb   :  { %477 = vmatpush3.bf16.msra.mxu1 %v476_v24  ;;  %v75_v45 = vld [vmem:[%s781_s1 + $0x140] sm:$0xff]  ;;  %v76_v46 = vld [vmem:[%s781_s1 + $0x148] sm:$0xff]  ;;  %v458_v48 = vpack.c.bf16 %v44_v41, %v43_v40  ;;  %v460_v49 = vpack.c.bf16 %v62_v44, %v61_v43  ;;  %v45_v50 = vld [vmem:[%s781_s1 + $0x50] sm:$0xff] }
   0xc   :  { %478 = vmatprep.subr.bf16.mxu1 %v499_v3  ;;  %v15_v47 = vld [vmem:[%s782_s0 + $0x8] sm:$0xff]  ;;  %v46_v51 = vld [vmem:[%s781_s1 + $0x58] sm:$0xff]  ;;  %v485_v52 = vpack.c.bf16 %v76_v46, %v75_v45  ;;  %v63_v53 = vld [vmem:[%s781_s1 + $0xe0] sm:$0xff] }
   0xd   :  { %451 = vmatpush3.bf16.msra.mxu0 %v450_v29  ;;  %154 = vmatprep.mubr.f32.mxu0 %v15_v47  ;;  %v64_v54 = vld [vmem:[%s781_s1 + $0xe8] sm:$0xff]  ;;  %v77_v55 = vld [vmem:[%s781_s1 + $0x150] sm:$0xff]  ;;  %v78_v56 = vld [vmem:[%s781_s1 + $0x158] sm:$0xff]  ;;  %v462_v57 = vpack.c.bf16 %v46_v51, %v45_v50 }
   0xe   :  { %453 = vmatprep.subr.bf16.mxu0 %v452_v30  ;;  %v464_v58 = vpack.c.bf16 %v64_v54, %v63_v53  ;;  %v47_v59 = vld [vmem:[%s781_s1 + $0x60] sm:$0xff]  ;;  %v48_v60 = vld [vmem:[%s781_s1 + $0x68] sm:$0xff]  ;;  %v488_v61 = vpack.c.bf16 %v78_v56, %v77_v55  ;;  %v65_v62 = vld [vmem:[%s781_s1 + $0xf0] sm:$0xff] }
   0xf   :  { %480 = vmatpush3.bf16.msra.mxu1 %v479_v33  ;;  %v66_v63 = vld [vmem:[%s781_s1 + $0xf8] sm:$0xff]  ;;  %v79_v0 = vld [vmem:[%s781_s1 + $0x160] sm:$0xff]  ;;  %v80_v1 = vld [vmem:[%s781_s1 + $0x168] sm:$0xff]  ;;  %v466_v2 = vpack.c.bf16 %v48_v60, %v47_v59 }
  0x10   :  { %481 = vmatprep.subr.bf16.mxu1 %v499_v3  ;;  %v468_v5 = vpack.c.bf16 %v66_v63, %v65_v62  ;;  %v49_v6 = vld [vmem:[%s781_s1 + $0x70] sm:$0xff]  ;;  %v50_v7 = vld [vmem:[%s781_s1 + $0x78] sm:$0xff]  ;;  %v491_v8 = vpack.c.bf16 %v80_v1, %v79_v0  ;;  %v14_v13 = vld [vmem:[%s782_s0] sm:$0xff] }
  0x11   :  { %455 = vmatpush3.bf16.msra.mxu0 %v454_v38  ;;  %v81_v9 = vld [vmem:[%s781_s1 + $0x170] sm:$0xff]  ;;  %v82_v10 = vld [vmem:[%s781_s1 + $0x178] sm:$0xff]  ;;  %v470_v11 = vpack.c.bf16 %v50_v7, %v49_v6  ;;  %v18_v14 = vld [vmem:[%s782_s0 + $0x20] sm:$0xff] }
  0x12   :  { %457 = vmatprep.subr.bf16.mxu0 %v456_v39  ;;  %v494_v12 = vpack.c.bf16 %v82_v10, %v81_v9  ;;  %v16_v15 = vld [vmem:[%s782_s0 + $0x10] sm:$0xff]  ;;  %v21_v16 = vld [vmem:[%s782_s0 + $0x38] sm:$0xff]  ;;  %v19_v17 = vld [vmem:[%s782_s0 + $0x28] sm:$0xff] }
  0x13   :  { %483 = vmatpush3.bf16.msra.mxu1 %v482_v42  ;;  %v20_v18 = vld [vmem:[%s782_s0 + $0x30] sm:$0xff]  ;;  %v22_v20 = vld [vmem:[%s782_s0 + $0x40] sm:$0xff]  ;;  %v23_v21 = vld [vmem:[%s782_s0 + $0x48] sm:$0xff] }
  0x14   :  { %484 = vmatprep.subr.bf16.mxu1 %v499_v3  ;;  %v24_v19 = vld [vmem:[%s782_s0 + $0x50] sm:$0xff]  ;;  %v27_v22 = vld [vmem:[%s782_s0 + $0x68] sm:$0xff]  ;;  %v25_v23 = vld [vmem:[%s782_s0 + $0x58] sm:$0xff] }
  0x15   :  { %459 = vmatpush3.bf16.msra.mxu0 %v458_v48  ;;  %v26_v24 = vld [vmem:[%s782_s0 + $0x60] sm:$0xff]  ;;  %v28_v26 = vld [vmem:[%s782_s0 + $0x70] sm:$0xff]  ;;  %v29_v27 = vld [vmem:[%s782_s0 + $0x78] sm:$0xff] }
  0x16   :  { %461 = vmatprep.subr.bf16.mxu0 %v460_v49  ;;  %v30_v25 = vld [vmem:[%s782_s0 + $0x80] sm:$0xff]  ;;  %v33_v28 = vld [vmem:[%s782_s0 + $0x98] sm:$0x3]  ;;  %v31_v29 = vld [vmem:[%s782_s0 + $0x88] sm:$0xff] }
  0x17   :  { %486 = vmatpush3.bf16.msra.mxu1 %v485_v52  ;;  %v32_v30 = vld [vmem:[%s782_s0 + $0x90] sm:$0x3]  ;;  %v34_v31 = vld [vmem:[%s782_s0 + $0xa0] sm:$0x3] }
  0x18   :  { %487 = vmatprep.subr.bf16.mxu1 %v499_v3  ;;  %v310_v34 = vld [vmem:[%s783_s2] ss:$0 sm:$0xff] }
  0x19   :  { %463 = vmatpush3.bf16.msra.mxu0 %v462_v57 }
  0x1a   :  { %465 = vmatprep.subr.bf16.mxu0 %v464_v58 }
  0x1b   :  { %489 = vmatpush3.bf16.msra.mxu1 %v488_v61 }
  0x1c   :  { %490 = vmatprep.subr.bf16.mxu1 %v499_v3 }
  0x1d   :  { %467 = vmatpush3.bf16.msra.mxu0 %v466_v2 }
  0x1e   :  { %469 = vmatprep.subr.bf16.mxu0 %v468_v5 }
  0x1f   :  { %492 = vmatpush3.bf16.msra.mxu1 %v491_v8 }
  0x20   :  { %493 = vmatprep.subr.bf16.mxu1 %v499_v3  ;;  %v17_v3 = vld [vmem:[%s782_s0 + $0x18] sm:$0xff] }
  0x21   :  { %471 = vmatpush3.bf16.msra.mxu0 %v470_v11 }
  0x23   :  { %495 = vmatpush3.bf16.msra.mxu1 %v494_v12 }
  0x24   :  { %155 = vmatmul.mubr.f32.vlgmr.msra.gmra.mrb[0].mxu0 %v14_v13 }
  0x25   :  { %159 = vmatprep.mubr.f32.mxu0 %v18_v14 }
  0x26   :  { %420 = vmatmul.mubr.f32.vlgmr.msra.gmra.mrb[0].mxu1 %v16_v15 }
  0x27   :  { %422 = vmatprep.mubr.msk.f32.mxu1 %vm500_vm0, %v501_v4 }
  0x28   :  { %160 = vmatmul.mubr.f32.gmra.mrb[2].mxu0 %v17_v3 }
  0x29   :  { %164 = vmatprep.mubr.f32.mxu0 %v21_v16 }
  0x2a   :  { %423 = vmatmul.mubr.f32.gmra.mrb[2].mxu1 %v19_v17 }
  0x2b   :  { %425 = vmatprep.mubr.msk.f32.mxu1 %vm500_vm0, %v501_v4 }
  0x2c   :  { %165 = vmatmul.mubr.f32.gmra.mrb[4].mxu0 %v20_v18 }
  0x2d   :  { %169 = vmatprep.mubr.f32.mxu0 %v24_v19 }
  0x2e   :  { %426 = vmatmul.mubr.f32.gmra.mrb[4].mxu1 %v22_v20 }
  0x2f   :  { %428 = vmatprep.mubr.msk.f32.mxu1 %vm500_vm0, %v501_v4 }
  0x30   :  { %170 = vmatmul.mubr.f32.gmra.mrb[6].mxu0 %v23_v21 }
  0x31   :  { %174 = vmatprep.mubr.f32.mxu0 %v27_v22 }
  0x32   :  { %429 = vmatmul.mubr.f32.gmra.mrb[6].mxu1 %v25_v23 }
  0x33   :  { %431 = vmatprep.mubr.msk.f32.mxu1 %vm500_vm0, %v501_v4 }
  0x34   :  { %175 = vmatmul.mubr.f32.gmra.mrb[8].mxu0 %v26_v24 }
  0x35   :  { %179 = vmatprep.mubr.f32.mxu0 %v30_v25 }
  0x36   :  { %432 = vmatmul.mubr.f32.gmra.mrb[8].mxu1 %v28_v26 }
  0x37   :  { %434 = vmatprep.mubr.msk.f32.mxu1 %vm500_vm0, %v501_v4 }
  0x38   :  { %180 = vmatmul.mubr.f32.gmra.mrb[10].mxu0 %v29_v27 }
  0x39   :  { %184 = vmatprep.mubr.f32.mxu0 %v33_v28 }
  0x3a   :  { %435 = vmatmul.mubr.f32.gmra.mrb[10].mxu1 %v31_v29 }
  0x3b   :  { %437 = vmatprep.mubr.msk.f32.mxu1 %vm500_vm0, %v501_v4 }
  0x3c   :  { %185 = vmatmul.mubr.f32.gmra.mrb[12].mxu0 %v32_v30 }
  0x3e   :  { %438 = vmatmul.mubr.f32.gmra.mrb[12].mxu1 %v34_v31 }
  0xf7   :  { %v343_v32 = vpop.f32.mrb[0].mxu0 }
  0xf8   :  { %v344_v33 = vpop.f32.mrb[1].mxu0 }
  0xf9   :  { %v345_v35 = vadd.f32 %v344_v33, %v343_v32  ;;  %v256_v36 = vpop.f32.mrb[0].mxu1 }
  0xfa   :  { %v421_v37 = vpop.f32.mrb[1].mxu1 }
  0xfb   :  { %v346_v38 = vpop.f32.mrb[2].mxu0  ;;  %v157_v39 = vadd.f32 %v345_v35, %v310_v34 }
  0xfc   :  { %v347_v40 = vpop.f32.mrb[3].mxu0 }
  0xfd   :  { %v257_v41 = vadd.f32 %v256_v36, %v157_v39  ;;  %v348_v4 = vadd.f32 %v347_v40, %v346_v38  ;;  %v261_v42 = vpop.f32.mrb[2].mxu1 }
  0xfe   :  { %v424_v43 = vpop.f32.mrb[3].mxu1 }
  0xff   :  { %v290_v44 = vmax.f32 %v257_v41, 0.0  ;;  %v349_v45 = vpop.f32.mrb[4].mxu0  ;;  %v162_v46 = vadd.f32 %v348_v4, %v310_v34 }
 0x100   :  { %v350_v47 = vpop.f32.mrb[5].mxu0 }
 0x101   :  { %298 = vst.msk [vmem:[%s784_s3] sm:$0xff] %vm297_vm1, %v290_v44  ;;  %v262_v48 = vadd.f32 %v261_v42, %v162_v46  ;;  %v351_v49 = vadd.f32 %v350_v47, %v349_v45  ;;  %v266_v50 = vpop.f32.mrb[4].mxu1 }
 0x102   :  { %v427_v51 = vpop.f32.mrb[5].mxu1 }
 0x103   :  { %v291_v52 = vmax.f32 %v262_v48, 0.0  ;;  %v352_v53 = vpop.f32.mrb[6].mxu0  ;;  %v167_v54 = vadd.f32 %v351_v49, %v310_v34 }
 0x104   :  { %v353_v55 = vpop.f32.mrb[7].mxu0 }
 0x105   :  { %299 = vst.msk [vmem:[%s784_s3 + $0x8] sm:$0xff] %vm297_vm1, %v291_v52  ;;  %v267_v56 = vadd.f32 %v266_v50, %v167_v54  ;;  %v354_v57 = vadd.f32 %v353_v55, %v352_v53  ;;  %v271_v58 = vpop.f32.mrb[6].mxu1 }
 0x106   :  { %v430_v59 = vpop.f32.mrb[7].mxu1 }
 0x107   :  { %v292_v60 = vmax.f32 %v267_v56, 0.0  ;;  %v355_v61 = vpop.f32.mrb[8].mxu0  ;;  %v172_v62 = vadd.f32 %v354_v57, %v310_v34 }
 0x108   :  { %v356_v63 = vpop.f32.mrb[9].mxu0 }
 0x109   :  { %300 = vst.msk [vmem:[%s784_s3 + $0x10] sm:$0xff] %vm297_vm1, %v292_v60  ;;  %v272_v0 = vadd.f32 %v271_v58, %v172_v62  ;;  %v357_v1 = vadd.f32 %v356_v63, %v355_v61  ;;  %v276_v2 = vpop.f32.mrb[8].mxu1 }
 0x10a   :  { %v433_v5 = vpop.f32.mrb[9].mxu1 }
 0x10b   :  { %v293_v6 = vmax.f32 %v272_v0, 0.0  ;;  %v358_v7 = vpop.f32.mrb[10].mxu0  ;;  %v177_v8 = vadd.f32 %v357_v1, %v310_v34 }
 0x10c   :  { %v359_v9 = vpop.f32.mrb[11].mxu0 }
 0x10d   :  { %301 = vst.msk [vmem:[%s784_s3 + $0x18] sm:$0xff] %vm297_vm1, %v293_v6  ;;  %v277_v10 = vadd.f32 %v276_v2, %v177_v8  ;;  %v360_v11 = vadd.f32 %v359_v9, %v358_v7  ;;  %v281_v12 = vpop.f32.mrb[10].mxu1 }
 0x10e   :  { %v436_v13 = vpop.f32.mrb[11].mxu1 }
 0x10f   :  { %v294_v14 = vmax.f32 %v277_v10, 0.0  ;;  %v361_v15 = vpop.f32.mrb[12].mxu0  ;;  %v182_v3 = vadd.f32 %v360_v11, %v310_v34 }
 0x110   :  { %v362_v16 = vpop.f32.mrb[13].mxu0 }
 0x111   :  { %302 = vst.msk [vmem:[%s784_s3 + $0x20] sm:$0xff] %vm297_vm1, %v294_v14  ;;  %v282_v17 = vadd.f32 %v281_v12, %v182_v3  ;;  %v363_v18 = vadd.f32 %v362_v16, %v361_v15  ;;  %v286_v19 = vpop.f32.mrb[12].mxu1 }
 0x112   :  { %v439_v20 = vpop.f32.mrb[13].mxu1 }
 0x113   :  { %v295_v21 = vmax.f32 %v282_v17, 0.0  ;;  %v187_v22 = vadd.f32 %v363_v18, %v310_v34 }
 0x115   :  { %303 = vst.msk [vmem:[%s784_s3 + $0x28] sm:$0xff] %vm297_vm1, %v295_v21  ;;  %v287_v23 = vadd.f32 %v286_v19, %v187_v22 }
 0x117   :  { %v296_v24 = vmax.f32 %v287_v23, 0.0 }
 0x119   :  { %305 = vst.msk [vmem:[%s784_s3 + $0x30] sm:$0x3] %vm304_vm2, %v296_v24 }

// kernel: forward.14
= control target key start
LH: loop header
LB: loop body
LE: loop exit
PB: predicated region body
PF: predicated region fallthrough
CT: control target
= control target key end

     0   :  { %vm747_vm0 = vmmov 0   ;;  %vm443_vm1 = vcmask 523264   ;;  %vm450_vm2 = vcmask 517120   ;;  %s1167_s1 = inlined_call_operand.vmem [shape: f32[640,64], index: 1, kind: input, shape index: {}]   ;;  %s1168_s0 = inlined_call_operand.vmem [shape: f32[50,640], index: 0, kind: input, shape index: {}]   ;;  %s1169_s2 = inlined_call_operand.vmem [shape: f32[1,64], index: 2, kind: input, shape index: {}]   ;;  %s1170_s3 = inlined_call_operand.vmem [shape: f32[50,64], index: 3, kind: output, shape index: {}]  }
   0x1   :  { %v65_v0 = vld [vmem:[%s1167_s1 + $0x80] sm:$0xff]  ;;  %v66_v1 = vld [vmem:[%s1167_s1 + $0x88] sm:$0xff]  ;;  %v67_v11 = vld [vmem:[%s1167_s1 + $0x90] sm:$0xff] }
   0x2   :  { %v97_v2 = vld [vmem:[%s1167_s1 + $0x180] sm:$0xff]  ;;  %v639_v3 = vpack.c.bf16 %v66_v1, %v65_v0  ;;  %v98_v4 = vld [vmem:[%s1167_s1 + $0x188] sm:$0xff]  ;;  %v68_v13 = vld [vmem:[%s1167_s1 + $0x98] sm:$0xff] }
   0x3   :  { %v49_v5 = vld [vmem:[%s1167_s1] sm:$0xff]  ;;  %v50_v6 = vld [vmem:[%s1167_s1 + $0x8] sm:$0xff]  ;;  %v671_v7 = vpack.c.bf16 %v98_v4, %v97_v2  ;;  %v99_v14 = vld [vmem:[%s1167_s1 + $0x190] sm:$0xff]  ;;  %v643_v16 = vpack.c.bf16 %v68_v13, %v67_v11 }
   0x4   :  { %v641_v8 = vpack.c.bf16 %v50_v6, %v49_v5  ;;  %v81_v9 = vld [vmem:[%s1167_s1 + $0x100] sm:$0xff]  ;;  %v82_v10 = vld [vmem:[%s1167_s1 + $0x108] sm:$0xff]  ;;  %640 = vmatprep.subr.bf16.mxu0 %v639_v3  ;;  %v100_v15 = vld [vmem:[%s1167_s1 + $0x198] sm:$0xff] }
   0x5   :  { %v673_v12 = vpack.c.bf16 %v82_v10, %v81_v9  ;;  %672 = vmatprep.subr.bf16.mxu1 %v671_v7  ;;  %v675_v17 = vpack.c.bf16 %v100_v15, %v99_v14  ;;  %v51_v18 = vld [vmem:[%s1167_s1 + $0x10] sm:$0xff]  ;;  %v52_v19 = vld [vmem:[%s1167_s1 + $0x18] sm:$0xff]  ;;  %v69_v23 = vld [vmem:[%s1167_s1 + $0xa0] sm:$0xff] }
   0x6   :  { %642 = vmatpush3.bf16.msra.mxu0 %v641_v8  ;;  %v83_v20 = vld [vmem:[%s1167_s1 + $0x110] sm:$0xff]  ;;  %v645_v21 = vpack.c.bf16 %v52_v19, %v51_v18  ;;  %v84_v22 = vld [vmem:[%s1167_s1 + $0x118] sm:$0xff]  ;;  %v70_v24 = vld [vmem:[%s1167_s1 + $0xa8] sm:$0xff] }
   0x7   :  { %674 = vmatpush3.bf16.msra.mxu1 %v673_v12  ;;  %644 = vmatprep.subr.bf16.mxu0 %v643_v16  ;;  %v677_v25 = vpack.c.bf16 %v84_v22, %v83_v20  ;;  %v647_v26 = vpack.c.bf16 %v70_v24, %v69_v23  ;;  %v101_v27 = vld [vmem:[%s1167_s1 + $0x1a0] sm:$0xff]  ;;  %v102_v28 = vld [vmem:[%s1167_s1 + $0x1a8] sm:$0xff]  ;;  %v71_v35 = vld [vmem:[%s1167_s1 + $0xb0] sm:$0xff] }
   0x8   :  { %676 = vmatprep.subr.bf16.mxu1 %v675_v17  ;;  %v53_v29 = vld [vmem:[%s1167_s1 + $0x20] sm:$0xff]  ;;  %v679_v30 = vpack.c.bf16 %v102_v28, %v101_v27  ;;  %v54_v31 = vld [vmem:[%s1167_s1 + $0x28] sm:$0xff]  ;;  %v72_v36 = vld [vmem:[%s1167_s1 + $0xb8] sm:$0xff] }
   0x9   :  { %v85_v32 = vld [vmem:[%s1167_s1 + $0x120] sm:$0xff]  ;;  %v86_v33 = vld [vmem:[%s1167_s1 + $0x128] sm:$0xff]  ;;  %v649_v34 = vpack.c.bf16 %v54_v31, %v53_v29  ;;  %v103_v37 = vld [vmem:[%s1167_s1 + $0x1b0] sm:$0xff]  ;;  %v651_v39 = vpack.c.bf16 %v72_v36, %v71_v35 }
   0xa   :  { %646 = vmatpush3.bf16.msra.mxu0 %v645_v21  ;;  %v681_v38 = vpack.c.bf16 %v86_v33, %v85_v32  ;;  %v104_v40 = vld [vmem:[%s1167_s1 + $0x1b8] sm:$0xff]  ;;  %v55_v41 = vld [vmem:[%s1167_s1 + $0x30] sm:$0xff]  ;;  %v73_v46 = vld [vmem:[%s1167_s1 + $0xc0] sm:$0xff] }
   0xb   :  { %678 = vmatpush3.bf16.msra.mxu1 %v677_v25  ;;  %648 = vmatprep.subr.bf16.mxu0 %v647_v26  ;;  %v56_v42 = vld [vmem:[%s1167_s1 + $0x38] sm:$0xff]  ;;  %v683_v43 = vpack.c.bf16 %v104_v40, %v103_v37  ;;  %v87_v44 = vld [vmem:[%s1167_s1 + $0x130] sm:$0xff]  ;;  %v74_v47 = vld [vmem:[%s1167_s1 + $0xc8] sm:$0xff] }
   0xc   :  { %680 = vmatprep.subr.bf16.mxu1 %v679_v30  ;;  %v88_v45 = vld [vmem:[%s1167_s1 + $0x138] sm:$0xff]  ;;  %v105_v48 = vld [vmem:[%s1167_s1 + $0x1c0] sm:$0xff]  ;;  %v106_v49 = vld [vmem:[%s1167_s1 + $0x1c8] sm:$0xff]  ;;  %v653_v50 = vpack.c.bf16 %v56_v42, %v55_v41  ;;  %v655_v52 = vpack.c.bf16 %v74_v47, %v73_v46 }
   0xd   :  { %v685_v51 = vpack.c.bf16 %v88_v45, %v87_v44  ;;  %v57_v53 = vld [vmem:[%s1167_s1 + $0x40] sm:$0xff]  ;;  %v58_v54 = vld [vmem:[%s1167_s1 + $0x48] sm:$0xff]  ;;  %v687_v56 = vpack.c.bf16 %v106_v49, %v105_v48  ;;  %v75_v58 = vld [vmem:[%s1167_s1 + $0xd0] sm:$0xff] }
   0xe   :  { %650 = vmatpush3.bf16.msra.mxu0 %v649_v34  ;;  %v89_v55 = vld [vmem:[%s1167_s1 + $0x140] sm:$0xff]  ;;  %v90_v57 = vld [vmem:[%s1167_s1 + $0x148] sm:$0xff]  ;;  %v76_v59 = vld [vmem:[%s1167_s1 + $0xd8] sm:$0xff]  ;;  %v657_v62 = vpack.c.bf16 %v58_v54, %v57_v53 }
   0xf   :  { %682 = vmatpush3.bf16.msra.mxu1 %v681_v38  ;;  %652 = vmatprep.subr.bf16.mxu0 %v651_v39  ;;  %v107_v60 = vld [vmem:[%s1167_s1 + $0x1d0] sm:$0xff]  ;;  %v108_v61 = vld [vmem:[%s1167_s1 + $0x1d8] sm:$0xff]  ;;  %v689_v63 = vpack.c.bf16 %v90_v57, %v89_v55  ;;  %v659_v0 = vpack.c.bf16 %v76_v59, %v75_v58  ;;  %v77_v6 = vld [vmem:[%s1167_s1 + $0xe0] sm:$0xff]  ;;  %v746_v38 = vmov 0.0|0.0  }
  0x10   :  { %684 = vmatprep.subr.bf16.mxu1 %v683_v43  ;;  %v59_v1 = vld [vmem:[%s1167_s1 + $0x50] sm:$0xff]  ;;  %v60_v2 = vld [vmem:[%s1167_s1 + $0x58] sm:$0xff]  ;;  %v691_v4 = vpack.c.bf16 %v108_v61, %v107_v60  ;;  %v78_v7 = vld [vmem:[%s1167_s1 + $0xe8] sm:$0xff] }
  0x11   :  { %v91_v3 = vld [vmem:[%s1167_s1 + $0x150] sm:$0xff]  ;;  %v92_v5 = vld [vmem:[%s1167_s1 + $0x158] sm:$0xff]  ;;  %v109_v8 = vld [vmem:[%s1167_s1 + $0x1e0] sm:$0xff]  ;;  %v661_v10 = vpack.c.bf16 %v60_v2, %v59_v1  ;;  %v663_v14 = vpack.c.bf16 %v78_v7, %v77_v6 }
  0x12   :  { %654 = vmatpush3.bf16.msra.mxu0 %v653_v50  ;;  %v110_v9 = vld [vmem:[%s1167_s1 + $0x1e8] sm:$0xff]  ;;  %v61_v11 = vld [vmem:[%s1167_s1 + $0x60] sm:$0xff]  ;;  %v693_v13 = vpack.c.bf16 %v92_v5, %v91_v3  ;;  %v79_v19 = vld [vmem:[%s1167_s1 + $0xf0] sm:$0xff] }
  0x13   :  { %686 = vmatpush3.bf16.msra.mxu1 %v685_v51  ;;  %656 = vmatprep.subr.bf16.mxu0 %v655_v52  ;;  %v62_v12 = vld [vmem:[%s1167_s1 + $0x68] sm:$0xff]  ;;  %v93_v15 = vld [vmem:[%s1167_s1 + $0x160] sm:$0xff]  ;;  %v695_v18 = vpack.c.bf16 %v110_v9, %v109_v8  ;;  %v80_v20 = vld [vmem:[%s1167_s1 + $0xf8] sm:$0xff] }
  0x14   :  { %688 = vmatprep.subr.bf16.mxu1 %v687_v56  ;;  %v94_v16 = vld [vmem:[%s1167_s1 + $0x168] sm:$0xff]  ;;  %v17_v21 = vld [vmem:[%s1168_s0 + $0x18] sm:$0xff]  ;;  %v111_v22 = vld [vmem:[%s1167_s1 + $0x1f0] sm:$0xff]  ;;  %v665_v24 = vpack.c.bf16 %v62_v12, %v61_v11  ;;  %v667_v26 = vpack.c.bf16 %v80_v20, %v79_v19 }
  0x15   :  { %v15_v17 = vld [vmem:[%s1168_s0 + $0x8] sm:$0xff]  ;;  %v112_v23 = vld [vmem:[%s1167_s1 + $0x1f8] sm:$0xff]  ;;  %300 = vmatprep.mubr.f32.mxu1 %v17_v21  ;;  %v697_v25 = vpack.c.bf16 %v94_v16, %v93_v15  ;;  %v63_v27 = vld [vmem:[%s1167_s1 + $0x70] sm:$0xff]  ;;  %v748_v21 = vmov 0.0  }
  0x16   :  { %658 = vmatpush3.bf16.msra.mxu0 %v657_v62  ;;  %200 = vmatprep.mubr.f32.mxu0 %v15_v17  ;;  %v64_v28 = vld [vmem:[%s1167_s1 + $0x78] sm:$0xff]  ;;  %v699_v29 = vpack.c.bf16 %v112_v23, %v111_v22  ;;  %v95_v30 = vld [vmem:[%s1167_s1 + $0x170] sm:$0xff]  ;;  %v113_v34 = vld [vmem:[%s1167_s1 + $0x200] sm:$0xff] }
  0x17   :  { %690 = vmatpush3.bf16.msra.mxu1 %v689_v63  ;;  %660 = vmatprep.subr.bf16.mxu0 %v659_v0  ;;  %v96_v31 = vld [vmem:[%s1167_s1 + $0x178] sm:$0xff]  ;;  %v669_v32 = vpack.c.bf16 %v64_v28, %v63_v27  ;;  %v114_v35 = vld [vmem:[%s1167_s1 + $0x208] sm:$0xff]  ;;  %v14_v36 = vld [vmem:[%s1168_s0] sm:$0xff] }
  0x18   :  { %692 = vmatprep.subr.bf16.mxu1 %v691_v4  ;;  %v701_v33 = vpack.c.bf16 %v96_v31, %v95_v30  ;;  %v704_v37 = vpack.c.bf16 %v114_v35, %v113_v34  ;;  %v16_v39 = vld [vmem:[%s1168_s0 + $0x10] sm:$0xff]  ;;  %v116_v41 = vld [vmem:[%s1167_s1 + $0x218] sm:$0xff]  ;;  %v19_v44 = vld [vmem:[%s1168_s0 + $0x28] sm:$0xff] }
  0x19   :  { %v115_v40 = vld [vmem:[%s1167_s1 + $0x210] sm:$0xff]  ;;  %v22_v45 = vld [vmem:[%s1168_s0 + $0x40] sm:$0xff]  ;;  %v21_v46 = vld [vmem:[%s1168_s0 + $0x38] sm:$0xff] }
  0x1a   :  { %662 = vmatpush3.bf16.msra.mxu0 %v661_v10  ;;  %v20_v42 = vld [vmem:[%s1168_s0 + $0x30] sm:$0xff]  ;;  %v707_v43 = vpack.c.bf16 %v116_v41, %v115_v40  ;;  %v117_v47 = vld [vmem:[%s1167_s1 + $0x220] sm:$0xff]  ;;  %v118_v48 = vld [vmem:[%s1167_s1 + $0x228] sm:$0xff] }
  0x1b   :  { %694 = vmatpush3.bf16.msra.mxu1 %v693_v13  ;;  %664 = vmatprep.subr.bf16.mxu0 %v663_v14  ;;  %v25_v49 = vld [vmem:[%s1168_s0 + $0x58] sm:$0xff]  ;;  %v710_v50 = vpack.c.bf16 %v118_v48, %v117_v47  ;;  %v24_v51 = vld [vmem:[%s1168_s0 + $0x50] sm:$0xff]  ;;  %v27_v52 = vld [vmem:[%s1168_s0 + $0x68] sm:$0xff] }
  0x1c   :  { %696 = vmatprep.subr.bf16.mxu1 %v695_v18  ;;  %v26_v53 = vld [vmem:[%s1168_s0 + $0x60] sm:$0xff]  ;;  %v119_v54 = vld [vmem:[%s1167_s1 + $0x230] sm:$0xff]  ;;  %v120_v55 = vld [vmem:[%s1167_s1 + $0x238] sm:$0xff] }
  0x1d   :  { %v30_v56 = vld [vmem:[%s1168_s0 + $0x80] sm:$0xff]  ;;  %v713_v57 = vpack.c.bf16 %v120_v55, %v119_v54  ;;  %v29_v58 = vld [vmem:[%s1168_s0 + $0x78] sm:$0xff]  ;;  %v32_v59 = vld [vmem:[%s1168_s0 + $0x90] sm:$0xff] }
  0x1e   :  { %666 = vmatpush3.bf16.msra.mxu0 %v665_v24  ;;  %v31_v60 = vld [vmem:[%s1168_s0 + $0x88] sm:$0xff]  ;;  %v121_v61 = vld [vmem:[%s1167_s1 + $0x240] sm:$0xff]  ;;  %v37_v2 = vld [vmem:[%s1168_s0 + $0xb8] sm:$0xff] }
  0x1f   :  { %698 = vmatpush3.bf16.msra.mxu1 %v697_v25  ;;  %668 = vmatprep.subr.bf16.mxu0 %v667_v26  ;;  %v122_v62 = vld [vmem:[%s1167_s1 + $0x248] sm:$0xff]  ;;  %v34_v1 = vld [vmem:[%s1168_s0 + $0xa0] sm:$0xff]  ;;  %v36_v3 = vld [vmem:[%s1168_s0 + $0xb0] sm:$0xff] }
  0x20   :  { %700 = vmatprep.subr.bf16.mxu1 %v699_v29  ;;  %v35_v63 = vld [vmem:[%s1168_s0 + $0xa8] sm:$0xff]  ;;  %v716_v0 = vpack.c.bf16 %v122_v62, %v121_v61  ;;  %v123_v4 = vld [vmem:[%s1167_s1 + $0x250] sm:$0xff]  ;;  %v124_v5 = vld [vmem:[%s1167_s1 + $0x258] sm:$0xff] }
  0x21   :  { %v40_v6 = vld [vmem:[%s1168_s0 + $0xd0] sm:$0xff]  ;;  %v719_v7 = vpack.c.bf16 %v124_v5, %v123_v4  ;;  %v39_v8 = vld [vmem:[%s1168_s0 + $0xc8] sm:$0xff]  ;;  %v42_v9 = vld [vmem:[%s1168_s0 + $0xe0] sm:$0xff] }
  0x22   :  { %670 = vmatpush3.bf16.msra.mxu0 %v669_v32  ;;  %v41_v10 = vld [vmem:[%s1168_s0 + $0xd8] sm:$0xff]  ;;  %v125_v11 = vld [vmem:[%s1167_s1 + $0x260] sm:$0xff]  ;;  %v126_v12 = vld [vmem:[%s1167_s1 + $0x268] sm:$0xff] }
  0x23   :  { %702 = vmatpush3.bf16.msra.mxu1 %v701_v33  ;;  %703 = vmatprep.subr.bf16.mxu0 %v746_v38  ;;  %v45_v13 = vld [vmem:[%s1168_s0 + $0xf8] sm:$0x3]  ;;  %v722_v14 = vpack.c.bf16 %v126_v12, %v125_v11  ;;  %v44_v15 = vld [vmem:[%s1168_s0 + $0xf0] sm:$0x3]  ;;  %v47_v16 = vld [vmem:[%s1168_s0 + $0x108] sm:$0x3] }
  0x24   :  { %727 = vmatprep.subr.bf16.mxu1 %v746_v38  ;;  %v46_v17 = vld [vmem:[%s1168_s0 + $0x100] sm:$0x3]  ;;  %v127_v18 = vld [vmem:[%s1167_s1 + $0x270] sm:$0xff]  ;;  %v128_v19 = vld [vmem:[%s1167_s1 + $0x278] sm:$0xff] }
  0x25   :  { %201 = vmatmul.mubr.f32.vlgmr.msra.gmra.mrb[0].mxu0 %v14_v36  ;;  %v725_v20 = vpack.c.bf16 %v128_v19, %v127_v18  ;;  %v18_v22 = vld [vmem:[%s1168_s0 + $0x20] sm:$0xff]  ;;  %v23_v24 = vld [vmem:[%s1168_s0 + $0x48] sm:$0xff]  ;;  %v28_v26 = vld [vmem:[%s1168_s0 + $0x70] sm:$0xff] }
  0x26   :  { %301 = vmatmul.mubr.f32.vlgmr.msra.gmra.mrb[0].mxu1 %v16_v39  ;;  %705 = vmatpush3.bf16.msra.mxu0 %v704_v37  ;;  %v38_v23 = vld [vmem:[%s1168_s0 + $0xc0] sm:$0xff]  ;;  %v43_v25 = vld [vmem:[%s1168_s0 + $0xe8] sm:$0xff]  ;;  %v48_v27 = vld [vmem:[%s1168_s0 + $0x110] sm:$0x3] }
  0x27   :  { %735 = vmatpush3.bf16.msra.mxu1 %v704_v37  ;;  %706 = vmatprep.subr.bf16.mxu0 %v746_v38  ;;  %v33_v28 = vld [vmem:[%s1168_s0 + $0x98] sm:$0xff]  ;;  %v456_v30 = vld [vmem:[%s1169_s2] ss:$0 sm:$0xff] }
  0x28   :  { %728 = vmatprep.subr.bf16.mxu1 %v746_v38  ;;  %205 = vmatprep.mubr.f32.mxu0 %v20_v42 }
  0x29   :  { %206 = vmatmul.mubr.f32.gmra.mrb[2].mxu0 %v19_v44  ;;  %305 = vmatprep.mubr.f32.mxu1 %v22_v45 }
  0x2a   :  { %708 = vmatpush3.bf16.msra.mxu0 %v707_v43  ;;  %306 = vmatmul.mubr.f32.gmra.mrb[2].mxu1 %v21_v46 }
  0x2b   :  { %736 = vmatpush3.bf16.msra.mxu1 %v707_v43  ;;  %709 = vmatprep.subr.bf16.mxu0 %v746_v38 }
  0x2c   :  { %729 = vmatprep.subr.bf16.mxu1 %v746_v38  ;;  %210 = vmatprep.mubr.f32.mxu0 %v25_v49 }
  0x2d   :  { %211 = vmatmul.mubr.f32.gmra.mrb[4].mxu0 %v24_v51  ;;  %310 = vmatprep.mubr.f32.mxu1 %v27_v52 }
  0x2e   :  { %711 = vmatpush3.bf16.msra.mxu0 %v710_v50  ;;  %311 = vmatmul.mubr.f32.gmra.mrb[4].mxu1 %v26_v53 }
  0x2f   :  { %737 = vmatpush3.bf16.msra.mxu1 %v710_v50  ;;  %712 = vmatprep.subr.bf16.mxu0 %v746_v38 }
  0x30   :  { %730 = vmatprep.subr.bf16.mxu1 %v746_v38  ;;  %215 = vmatprep.mubr.f32.mxu0 %v30_v56 }
  0x31   :  { %216 = vmatmul.mubr.f32.gmra.mrb[6].mxu0 %v29_v58  ;;  %315 = vmatprep.mubr.f32.mxu1 %v32_v59 }
  0x32   :  { %714 = vmatpush3.bf16.msra.mxu0 %v713_v57  ;;  %316 = vmatmul.mubr.f32.gmra.mrb[6].mxu1 %v31_v60 }
  0x33   :  { %738 = vmatpush3.bf16.msra.mxu1 %v713_v57  ;;  %715 = vmatprep.subr.bf16.mxu0 %v746_v38 }
  0x34   :  { %731 = vmatprep.subr.bf16.mxu1 %v746_v38  ;;  %220 = vmatprep.mubr.f32.mxu0 %v35_v63 }
  0x35   :  { %221 = vmatmul.mubr.f32.gmra.mrb[8].mxu0 %v34_v1  ;;  %320 = vmatprep.mubr.f32.mxu1 %v37_v2 }
  0x36   :  { %717 = vmatpush3.bf16.msra.mxu0 %v716_v0  ;;  %321 = vmatmul.mubr.f32.gmra.mrb[8].mxu1 %v36_v3 }
  0x37   :  { %739 = vmatpush3.bf16.msra.mxu1 %v716_v0  ;;  %718 = vmatprep.subr.bf16.mxu0 %v746_v38 }
  0x38   :  { %732 = vmatprep.subr.bf16.mxu1 %v746_v38  ;;  %225 = vmatprep.mubr.f32.mxu0 %v40_v6 }
  0x39   :  { %226 = vmatmul.mubr.f32.gmra.mrb[10].mxu0 %v39_v8  ;;  %325 = vmatprep.mubr.f32.mxu1 %v42_v9 }
  0x3a   :  { %720 = vmatpush3.bf16.msra.mxu0 %v719_v7  ;;  %326 = vmatmul.mubr.f32.gmra.mrb[10].mxu1 %v41_v10 }
  0x3b   :  { %740 = vmatpush3.bf16.msra.mxu1 %v719_v7  ;;  %721 = vmatprep.subr.bf16.mxu0 %v746_v38 }
  0x3c   :  { %733 = vmatprep.subr.bf16.mxu1 %v746_v38  ;;  %230 = vmatprep.mubr.f32.mxu0 %v45_v13 }
  0x3d   :  { %231 = vmatmul.mubr.f32.gmra.mrb[12].mxu0 %v44_v15  ;;  %330 = vmatprep.mubr.f32.mxu1 %v47_v16 }
  0x3e   :  { %723 = vmatpush3.bf16.msra.mxu0 %v722_v14  ;;  %331 = vmatmul.mubr.f32.gmra.mrb[12].mxu1 %v46_v17 }
  0x3f   :  { %741 = vmatpush3.bf16.msra.mxu1 %v722_v14  ;;  %724 = vmatprep.subr.bf16.mxu0 %v746_v38 }
  0x40   :  { %734 = vmatprep.subr.bf16.mxu1 %v746_v38  ;;  %618 = vmatprep.mubr.msk.f32.mxu0 %vm747_vm0, %v748_v21 }
  0x41   :  { %630 = vmatprep.mubr.msk.f32.mxu1 %vm747_vm0, %v748_v21 }
  0x42   :  { %726 = vmatpush3.bf16.msra.mxu0 %v725_v20 }
  0x43   :  { %742 = vmatpush3.bf16.msra.mxu1 %v725_v20 }
  0x45   :  { %619 = vmatmul.mubr.f32.vlgmr.msra.gmra.mrb[14].mxu0 %v18_v22 }
  0x46   :  { %631 = vmatmul.mubr.f32.vlgmr.msra.gmra.mrb[14].mxu1 %v38_v23  ;;  %621 = vmatprep.mubr.msk.f32.mxu0 %vm747_vm0, %v748_v21 }
  0x47   :  { %633 = vmatprep.mubr.msk.f32.mxu1 %vm747_vm0, %v748_v21 }
  0x49   :  { %622 = vmatmul.mubr.f32.gmra.mrb[16].mxu0 %v23_v24 }
  0x4a   :  { %634 = vmatmul.mubr.f32.gmra.mrb[16].mxu1 %v43_v25  ;;  %624 = vmatprep.mubr.msk.f32.mxu0 %vm747_vm0, %v748_v21 }
  0x4b   :  { %636 = vmatprep.mubr.msk.f32.mxu1 %vm747_vm0, %v748_v21 }
  0x4d   :  { %625 = vmatmul.mubr.f32.gmra.mrb[18].mxu0 %v28_v26 }
  0x4e   :  { %637 = vmatmul.mubr.f32.gmra.mrb[18].mxu1 %v48_v27  ;;  %627 = vmatprep.mubr.msk.f32.mxu0 %vm747_vm0, %v748_v21 }
  0x51   :  { %628 = vmatmul.mubr.f32.gmra.mrb[20].mxu0 %v33_v28 }
  0xf8   :  { %v489_v29 = vpop.f32.mrb[0].mxu0 }
  0xf9   :  { %v490_v31 = vpop.f32.mrb[1].mxu0  ;;  %v542_v32 = vpop.f32.mrb[0].mxu1 }
  0xfa   :  { %v491_v33 = vadd.f32 %v490_v31, %v489_v29  ;;  %v543_v34 = vpop.f32.mrb[1].mxu1 }
  0xfb   :  { %v544_v35 = vadd.f32 %v543_v34, %v542_v32 }
  0xfc   :  { %v203_v36 = vadd.f32 %v491_v33, %v456_v30  ;;  %v492_v37 = vpop.f32.mrb[2].mxu0 }
  0xfd   :  { %v493_v38 = vpop.f32.mrb[3].mxu0  ;;  %v545_v39 = vpop.f32.mrb[2].mxu1 }
  0xfe   :  { %v494_v40 = vadd.f32 %v493_v38, %v492_v37  ;;  %v546_v41 = vpop.f32.mrb[3].mxu1  ;;  %v303_v42 = vadd.f32 %v544_v35, %v203_v36 }
  0xff   :  { %v547_v43 = vadd.f32 %v546_v41, %v545_v39 }
 0x100   :  { %v208_v44 = vadd.f32 %v494_v40, %v456_v30  ;;  %v495_v45 = vpop.f32.mrb[4].mxu0 }
 0x101   :  { %v496_v46 = vpop.f32.mrb[5].mxu0  ;;  %v548_v47 = vpop.f32.mrb[4].mxu1 }
 0x102   :  { %v497_v48 = vadd.f32 %v496_v46, %v495_v45  ;;  %v549_v49 = vpop.f32.mrb[5].mxu1  ;;  %v308_v50 = vadd.f32 %v547_v43, %v208_v44 }
 0x103   :  { %v550_v51 = vadd.f32 %v549_v49, %v548_v47 }
 0x104   :  { %v213_v52 = vadd.f32 %v497_v48, %v456_v30  ;;  %v498_v53 = vpop.f32.mrb[6].mxu0 }
 0x105   :  { %v499_v54 = vpop.f32.mrb[7].mxu0  ;;  %v551_v55 = vpop.f32.mrb[6].mxu1 }
 0x106   :  { %v500_v56 = vadd.f32 %v499_v54, %v498_v53  ;;  %v552_v57 = vpop.f32.mrb[7].mxu1  ;;  %v313_v58 = vadd.f32 %v550_v51, %v213_v52 }
 0x107   :  { %v553_v59 = vadd.f32 %v552_v57, %v551_v55 }
 0x108   :  { %v218_v60 = vadd.f32 %v500_v56, %v456_v30  ;;  %v501_v61 = vpop.f32.mrb[8].mxu0 }
 0x109   :  { %v502_v62 = vpop.f32.mrb[9].mxu0  ;;  %v554_v63 = vpop.f32.mrb[8].mxu1 }
 0x10a   :  { %v503_v0 = vadd.f32 %v502_v62, %v501_v61  ;;  %v555_v1 = vpop.f32.mrb[9].mxu1  ;;  %v318_v2 = vadd.f32 %v553_v59, %v218_v60 }
 0x10b   :  { %v556_v3 = vadd.f32 %v555_v1, %v554_v63 }
 0x10c   :  { %v223_v4 = vadd.f32 %v503_v0, %v456_v30  ;;  %v504_v5 = vpop.f32.mrb[10].mxu0 }
 0x10d   :  { %v505_v6 = vpop.f32.mrb[11].mxu0  ;;  %v557_v7 = vpop.f32.mrb[10].mxu1 }
 0x10e   :  { %v506_v8 = vadd.f32 %v505_v6, %v504_v5  ;;  %v558_v9 = vpop.f32.mrb[11].mxu1  ;;  %v323_v10 = vadd.f32 %v556_v3, %v223_v4 }
 0x10f   :  { %v559_v11 = vadd.f32 %v558_v9, %v557_v7 }
 0x110   :  { %v228_v12 = vadd.f32 %v506_v8, %v456_v30  ;;  %v507_v13 = vpop.f32.mrb[12].mxu0 }
 0x111   :  { %v508_v14 = vpop.f32.mrb[13].mxu0  ;;  %v560_v15 = vpop.f32.mrb[12].mxu1 }
 0x112   :  { %v509_v16 = vadd.f32 %v508_v14, %v507_v13  ;;  %v561_v17 = vpop.f32.mrb[13].mxu1  ;;  %v328_v18 = vadd.f32 %v559_v11, %v228_v12 }
 0x113   :  { %v562_v19 = vadd.f32 %v561_v17, %v560_v15 }
 0x114   :  { %v233_v20 = vadd.f32 %v509_v16, %v456_v30 }
 0x116   :  { %v333_v21 = vadd.f32 %v562_v19, %v233_v20 }
 0x118   :  { %v402_v22 = vpop.f32.mrb[14].mxu0 }
 0x119   :  { %v403_v23 = vadd.f32 %v402_v22, %v303_v42  ;;  %v422_v24 = vpop.f32.mrb[14].mxu1  ;;  %v620_v25 = vpop.f32.mrb[15].mxu0 }
 0x11a   :  { %v423_v26 = vadd.f32 %v422_v24, %v323_v10  ;;  %v632_v27 = vpop.f32.mrb[15].mxu1 }
 0x11b   :  { %v436_v28 = vmax.f32 %v403_v23, 0.0 }
 0x11c   :  { %v440_v29 = vmax.f32 %v423_v26, 0.0  ;;  %v407_v31 = vpop.f32.mrb[16].mxu0 }
 0x11d   :  { %444 = vst.msk [vmem:[%s1170_s3] sm:$0xff] %vm443_vm1, %v436_v28  ;;  %v408_v32 = vadd.f32 %v407_v31, %v308_v50  ;;  %v427_v33 = vpop.f32.mrb[16].mxu1  ;;  %v623_v34 = vpop.f32.mrb[17].mxu0 }
 0x11e   :  { %448 = vst.msk [vmem:[%s1170_s3 + $0x20] sm:$0xff] %vm443_vm1, %v440_v29  ;;  %v428_v30 = vadd.f32 %v427_v33, %v328_v18  ;;  %v635_v35 = vpop.f32.mrb[17].mxu1 }
 0x11f   :  { %v437_v36 = vmax.f32 %v408_v32, 0.0 }
 0x120   :  { %v441_v37 = vmax.f32 %v428_v30, 0.0  ;;  %v412_v38 = vpop.f32.mrb[18].mxu0 }
 0x121   :  { %445 = vst.msk [vmem:[%s1170_s3 + $0x8] sm:$0xff] %vm443_vm1, %v437_v36  ;;  %v413_v39 = vadd.f32 %v412_v38, %v313_v58  ;;  %v432_v40 = vpop.f32.mrb[18].mxu1  ;;  %v626_v41 = vpop.f32.mrb[19].mxu0 }
 0x122   :  { %449 = vst.msk [vmem:[%s1170_s3 + $0x28] sm:$0xff] %vm443_vm1, %v441_v37  ;;  %v433_v42 = vadd.f32 %v432_v40, %v333_v21  ;;  %v638_v43 = vpop.f32.mrb[19].mxu1 }
 0x123   :  { %v438_v44 = vmax.f32 %v413_v39, 0.0 }
 0x124   :  { %v442_v45 = vmax.f32 %v433_v42, 0.0  ;;  %v417_v46 = vpop.f32.mrb[20].mxu0 }
 0x125   :  { %446 = vst.msk [vmem:[%s1170_s3 + $0x10] sm:$0xff] %vm443_vm1, %v438_v44  ;;  %v418_v47 = vadd.f32 %v417_v46, %v318_v2  ;;  %v629_v48 = vpop.f32.mrb[21].mxu0 }
 0x126   :  { %451 = vst.msk [vmem:[%s1170_s3 + $0x30] sm:$0x3] %vm450_vm2, %v442_v45 }
 0x127   :  { %v439_v49 = vmax.f32 %v418_v47, 0.0 }
 0x129   :  { %447 = vst.msk [vmem:[%s1170_s3 + $0x18] sm:$0xff] %vm443_vm1, %v439_v49 }

// kernel: forward.16
= control target key start
LH: loop header
LB: loop body
LE: loop exit
PB: predicated region body
PF: predicated region fallthrough
CT: control target
= control target key end

     0   :  { %vm17_vm0 = vcmask 523264   ;;  %s90_s0 = inlined_call_operand.vmem [shape: f32[9,8,64], index: 0, kind: input, shape index: {}]   ;;  %s91_s1 = inlined_call_operand.vmem [shape: f32[8,64], index: 1, kind: output, shape index: {}]  }
   0x1   :  { %v8_v0 = vld [vmem:[%s90_s0] sm:$0xff]  ;;  %v9_v1 = vld [vmem:[%s90_s0 + $0x8] sm:$0xff]  ;;  %v10_v2 = vld [vmem:[%s90_s0 + $0x10] sm:$0xff] }
   0x2   :  { %v11_v3 = vld [vmem:[%s90_s0 + $0x18] sm:$0xff]  ;;  %v12_v4 = vld [vmem:[%s90_s0 + $0x20] sm:$0xff]  ;;  %v13_v5 = vld [vmem:[%s90_s0 + $0x28] sm:$0xff]  ;;  %v18_v6 = vsel %vm17_vm0, %v8_v0, -inf  ;;  %v19_v7 = vsel %vm17_vm0, %v9_v1, -inf  ;;  %v20_v8 = vsel %vm17_vm0, %v10_v2, -inf }
   0x3   :  { %v14_v9 = vld [vmem:[%s90_s0 + $0x30] sm:$0xff]  ;;  %v15_v10 = vld [vmem:[%s90_s0 + $0x38] sm:$0xff]  ;;  %v16_v11 = vld [vmem:[%s90_s0 + $0x40] sm:$0xff]  ;;  %v21_v12 = vsel %vm17_vm0, %v11_v3, -inf  ;;  %v22_v13 = vsel %vm17_vm0, %v12_v4, -inf  ;;  %v24_v14 = vsel %vm17_vm0, %v13_v5, -inf }
   0x4   :  { %v23_v15 = vmax.f32 %v18_v6, %v22_v13  ;;  %v25_v16 = vmax.f32 %v19_v7, %v24_v14  ;;  %v26_v17 = vsel %vm17_vm0, %v14_v9, -inf  ;;  %v28_v18 = vsel %vm17_vm0, %v15_v10, -inf }
   0x5   :  { %v27_v19 = vmax.f32 %v20_v8, %v26_v17  ;;  %v29_v20 = vmax.f32 %v21_v12, %v28_v18  ;;  %v30_v21 = vsel %vm17_vm0, %v16_v11, -inf }
   0x6   :  { %v31_v22 = vmax.f32 %v23_v15, %v30_v21 }
   0x7   :  { %v33_v23 = vmax.f32 %v27_v19, %v29_v20 }
   0x8   :  { %v32_v24 = vmax.f32 %v31_v22, %v25_v16 }
   0xa   :  { %v34_v25 = vmax.f32 %v32_v24, %v33_v23 }
   0xc   :  { %35 = vst.msk [vmem:[%s91_s1] sm:$0xff] %vm17_vm0, %v34_v25 }

// kernel: forward.17
= control target key start
LH: loop header
LB: loop body
LE: loop exit
PB: predicated region body
PF: predicated region fallthrough
CT: control target
= control target key end

     0   :  { %s866_s0 = inlined_call_operand.vmem [shape: f32[8,640], index: 0, kind: input, shape index: {}]   ;;  %s867_s1 = inlined_call_operand.vmem [shape: f32[640,32], index: 1, kind: input, shape index: {}]   ;;  %s868_s2 = inlined_call_operand.vmem [shape: f32[1,32], index: 2, kind: input, shape index: {}]   ;;  %s869_s3 = inlined_call_operand.hbm [shape: f32[8,32], index: 3, kind: output, shape index: {}]  }
   0x1   :  { %v36_v0 = vld [vmem:[%s867_s1 + $0x80] sm:$0xff]  ;;  %v37_v1 = vld [vmem:[%s867_s1 + $0x88] sm:$0xff]  ;;  %v38_v11 = vld [vmem:[%s867_s1 + $0x90] sm:$0xff] }
   0x2   :  { %v20_v2 = vld [vmem:[%s867_s1] sm:$0xff]  ;;  %v456_v3 = vpack.c.bf16 %v37_v1, %v36_v0  ;;  %v21_v4 = vld [vmem:[%s867_s1 + $0x8] sm:$0xff]  ;;  %v39_v13 = vld [vmem:[%s867_s1 + $0x98] sm:$0xff] }
   0x3   :  { %v68_v5 = vld [vmem:[%s867_s1 + $0x180] sm:$0xff]  ;;  %v69_v6 = vld [vmem:[%s867_s1 + $0x188] sm:$0xff]  ;;  %v458_v7 = vpack.c.bf16 %v21_v4, %v20_v2  ;;  %v22_v14 = vld [vmem:[%s867_s1 + $0x10] sm:$0xff]  ;;  %v460_v16 = vpack.c.bf16 %v39_v13, %v38_v11 }
   0x4   :  { %v488_v8 = vpack.c.bf16 %v69_v6, %v68_v5  ;;  %v52_v9 = vld [vmem:[%s867_s1 + $0x100] sm:$0xff]  ;;  %v53_v10 = vld [vmem:[%s867_s1 + $0x108] sm:$0xff]  ;;  %457 = vmatprep.subr.bf16.mxu0 %v456_v3  ;;  %v23_v15 = vld [vmem:[%s867_s1 + $0x18] sm:$0xff] }
   0x5   :  { %v490_v12 = vpack.c.bf16 %v53_v10, %v52_v9  ;;  %459 = vmatpush3.bf16.msra.mxu0 %v458_v7  ;;  %v462_v17 = vpack.c.bf16 %v23_v15, %v22_v14  ;;  %v70_v18 = vld [vmem:[%s867_s1 + $0x190] sm:$0xff]  ;;  %v71_v19 = vld [vmem:[%s867_s1 + $0x198] sm:$0xff]  ;;  %v40_v23 = vld [vmem:[%s867_s1 + $0xa0] sm:$0xff] }
   0x6   :  { %489 = vmatprep.subr.bf16.mxu1 %v488_v8  ;;  %v54_v20 = vld [vmem:[%s867_s1 + $0x110] sm:$0xff]  ;;  %v492_v21 = vpack.c.bf16 %v71_v19, %v70_v18  ;;  %v55_v22 = vld [vmem:[%s867_s1 + $0x118] sm:$0xff]  ;;  %v41_v24 = vld [vmem:[%s867_s1 + $0xa8] sm:$0xff]  ;;  %461 = vmatprep.subr.bf16.mxu0 %v460_v16 }
   0x7   :  { %491 = vmatpush3.bf16.msra.mxu1 %v490_v12  ;;  %v494_v25 = vpack.c.bf16 %v55_v22, %v54_v20  ;;  %v464_v26 = vpack.c.bf16 %v41_v24, %v40_v23  ;;  %v24_v27 = vld [vmem:[%s867_s1 + $0x20] sm:$0xff]  ;;  %v25_v28 = vld [vmem:[%s867_s1 + $0x28] sm:$0xff]  ;;  %v42_v35 = vld [vmem:[%s867_s1 + $0xb0] sm:$0xff] }
   0x8   :  { %v72_v29 = vld [vmem:[%s867_s1 + $0x1a0] sm:$0xff]  ;;  %493 = vmatprep.subr.bf16.mxu1 %v492_v21  ;;  %v73_v30 = vld [vmem:[%s867_s1 + $0x1a8] sm:$0xff]  ;;  %v466_v33 = vpack.c.bf16 %v25_v28, %v24_v27  ;;  %v43_v36 = vld [vmem:[%s867_s1 + $0xb8] sm:$0xff] }
   0x9   :  { %v56_v31 = vld [vmem:[%s867_s1 + $0x120] sm:$0xff]  ;;  %v57_v32 = vld [vmem:[%s867_s1 + $0x128] sm:$0xff]  ;;  %463 = vmatpush3.bf16.msra.mxu0 %v462_v17  ;;  %v496_v34 = vpack.c.bf16 %v73_v30, %v72_v29  ;;  %v26_v37 = vld [vmem:[%s867_s1 + $0x30] sm:$0xff]  ;;  %v468_v39 = vpack.c.bf16 %v43_v36, %v42_v35 }
   0xa   :  { %465 = vmatprep.subr.bf16.mxu0 %v464_v26  ;;  %v498_v38 = vpack.c.bf16 %v57_v32, %v56_v31  ;;  %v27_v40 = vld [vmem:[%s867_s1 + $0x38] sm:$0xff]  ;;  %v74_v41 = vld [vmem:[%s867_s1 + $0x1b0] sm:$0xff]  ;;  %v44_v46 = vld [vmem:[%s867_s1 + $0xc0] sm:$0xff] }
   0xb   :  { %495 = vmatpush3.bf16.msra.mxu1 %v494_v25  ;;  %v75_v42 = vld [vmem:[%s867_s1 + $0x1b8] sm:$0xff]  ;;  %v58_v44 = vld [vmem:[%s867_s1 + $0x130] sm:$0xff]  ;;  %v45_v47 = vld [vmem:[%s867_s1 + $0xc8] sm:$0xff]  ;;  %v470_v48 = vpack.c.bf16 %v27_v40, %v26_v37 }
   0xc   :  { %497 = vmatprep.subr.bf16.mxu1 %v496_v34  ;;  %v500_v43 = vpack.c.bf16 %v75_v42, %v74_v41  ;;  %v59_v45 = vld [vmem:[%s867_s1 + $0x138] sm:$0xff]  ;;  %v76_v49 = vld [vmem:[%s867_s1 + $0x1c0] sm:$0xff]  ;;  %v77_v50 = vld [vmem:[%s867_s1 + $0x1c8] sm:$0xff]  ;;  %v472_v52 = vpack.c.bf16 %v45_v47, %v44_v46 }
   0xd   :  { %467 = vmatpush3.bf16.msra.mxu0 %v466_v33  ;;  %v502_v51 = vpack.c.bf16 %v59_v45, %v58_v44  ;;  %v28_v53 = vld [vmem:[%s867_s1 + $0x40] sm:$0xff]  ;;  %v29_v54 = vld [vmem:[%s867_s1 + $0x48] sm:$0xff]  ;;  %v504_v56 = vpack.c.bf16 %v77_v50, %v76_v49  ;;  %v46_v58 = vld [vmem:[%s867_s1 + $0xd0] sm:$0xff] }
   0xe   :  { %469 = vmatprep.subr.bf16.mxu0 %v468_v39  ;;  %v60_v55 = vld [vmem:[%s867_s1 + $0x140] sm:$0xff]  ;;  %v61_v57 = vld [vmem:[%s867_s1 + $0x148] sm:$0xff]  ;;  %v47_v59 = vld [vmem:[%s867_s1 + $0xd8] sm:$0xff]  ;;  %v474_v62 = vpack.c.bf16 %v29_v54, %v28_v53 }
   0xf   :  { %499 = vmatpush3.bf16.msra.mxu1 %v498_v38  ;;  %v78_v60 = vld [vmem:[%s867_s1 + $0x1d0] sm:$0xff]  ;;  %v79_v61 = vld [vmem:[%s867_s1 + $0x1d8] sm:$0xff]  ;;  %v506_v63 = vpack.c.bf16 %v61_v57, %v60_v55  ;;  %v476_v0 = vpack.c.bf16 %v47_v59, %v46_v58  ;;  %v48_v6 = vld [vmem:[%s867_s1 + $0xe0] sm:$0xff] }
  0x10   :  { %501 = vmatprep.subr.bf16.mxu1 %v500_v43  ;;  %v30_v1 = vld [vmem:[%s867_s1 + $0x50] sm:$0xff]  ;;  %v31_v2 = vld [vmem:[%s867_s1 + $0x58] sm:$0xff]  ;;  %v508_v4 = vpack.c.bf16 %v79_v61, %v78_v60  ;;  %v49_v7 = vld [vmem:[%s867_s1 + $0xe8] sm:$0xff] }
  0x11   :  { %471 = vmatpush3.bf16.msra.mxu0 %v470_v48  ;;  %v62_v3 = vld [vmem:[%s867_s1 + $0x150] sm:$0xff]  ;;  %v63_v5 = vld [vmem:[%s867_s1 + $0x158] sm:$0xff]  ;;  %v80_v8 = vld [vmem:[%s867_s1 + $0x1e0] sm:$0xff]  ;;  %v478_v10 = vpack.c.bf16 %v31_v2, %v30_v1  ;;  %v480_v14 = vpack.c.bf16 %v49_v7, %v48_v6 }
  0x12   :  { %473 = vmatprep.subr.bf16.mxu0 %v472_v52  ;;  %v81_v9 = vld [vmem:[%s867_s1 + $0x1e8] sm:$0xff]  ;;  %v32_v11 = vld [vmem:[%s867_s1 + $0x60] sm:$0xff]  ;;  %v510_v13 = vpack.c.bf16 %v63_v5, %v62_v3  ;;  %v50_v19 = vld [vmem:[%s867_s1 + $0xf0] sm:$0xff] }
  0x13   :  { %503 = vmatpush3.bf16.msra.mxu1 %v502_v51  ;;  %v16_v12 = vld [vmem:[%s866_s0 + $0x8] sm:$0xff]  ;;  %v64_v16 = vld [vmem:[%s867_s1 + $0x160] sm:$0xff]  ;;  %v512_v18 = vpack.c.bf16 %v81_v9, %v80_v8  ;;  %v51_v20 = vld [vmem:[%s867_s1 + $0xf8] sm:$0xff] }
  0x14   :  { %505 = vmatprep.subr.bf16.mxu1 %v504_v56  ;;  %v33_v15 = vld [vmem:[%s867_s1 + $0x68] sm:$0xff]  ;;  %171 = vmatprep.mubr.f32.mxu0 %v16_v12  ;;  %v18_v21 = vld [vmem:[%s866_s0 + $0x18] sm:$0xff]  ;;  %v82_v22 = vld [vmem:[%s867_s1 + $0x1f0] sm:$0xff]  ;;  %v484_v26 = vpack.c.bf16 %v51_v20, %v50_v19 }
  0x15   :  { %475 = vmatpush3.bf16.msra.mxu0 %v474_v62  ;;  %v65_v17 = vld [vmem:[%s867_s1 + $0x168] sm:$0xff]  ;;  %v83_v23 = vld [vmem:[%s867_s1 + $0x1f8] sm:$0xff]  ;;  %241 = vmatprep.mubr.f32.mxu1 %v18_v21  ;;  %v482_v24 = vpack.c.bf16 %v33_v15, %v32_v11  ;;  %v34_v27 = vld [vmem:[%s867_s1 + $0x70] sm:$0xff] }
  0x16   :  { %477 = vmatprep.subr.bf16.mxu0 %v476_v0  ;;  %v514_v25 = vpack.c.bf16 %v65_v17, %v64_v16  ;;  %v35_v28 = vld [vmem:[%s867_s1 + $0x78] sm:$0xff]  ;;  %v516_v29 = vpack.c.bf16 %v83_v23, %v82_v22  ;;  %v66_v30 = vld [vmem:[%s867_s1 + $0x170] sm:$0xff] }
  0x17   :  { %507 = vmatpush3.bf16.msra.mxu1 %v506_v63  ;;  %v67_v31 = vld [vmem:[%s867_s1 + $0x178] sm:$0xff]  ;;  %v486_v32 = vpack.c.bf16 %v35_v28, %v34_v27 }
  0x18   :  { %509 = vmatprep.subr.bf16.mxu1 %v508_v4 }
  0x19   :  { %479 = vmatpush3.bf16.msra.mxu0 %v478_v10 }
  0x1a   :  { %481 = vmatprep.subr.bf16.mxu0 %v480_v14 }
  0x1b   :  { %511 = vmatpush3.bf16.msra.mxu1 %v510_v13 }
  0x1c   :  { %513 = vmatprep.subr.bf16.mxu1 %v512_v18 }
  0x1d   :  { %483 = vmatpush3.bf16.msra.mxu0 %v482_v24 }
  0x1e   :  { %8 = vsyncpa [#allocation3], 0  ;;  %485 = vmatprep.subr.bf16.mxu0 %v484_v26  ;;  %v518_v33 = vpack.c.bf16 %v67_v31, %v66_v30  ;;  %v84_v34 = vld [vmem:[%s867_s1 + $0x200] sm:$0xff]  ;;  %v85_v35 = vld [vmem:[%s867_s1 + $0x208] sm:$0xff]  ;;  %v572_v38 = vmov 0.0|0.0   ;;  %vm573_vm0 = vmmov 0  }
  0x1f   :  { %515 = vmatpush3.bf16.msra.mxu1 %v514_v25  ;;  %v15_v36 = vld [vmem:[%s866_s0] sm:$0xff]  ;;  %v521_v37 = vpack.c.bf16 %v85_v35, %v84_v34  ;;  %v17_v39 = vld [vmem:[%s866_s0 + $0x10] sm:$0xff]  ;;  %v87_v41 = vld [vmem:[%s867_s1 + $0x218] sm:$0xff]  ;;  %v574_v45 = vmov 0.0   ;;  %vm317_vm1 = vcmask 261120  }
  0x20   :  { %517 = vmatprep.subr.bf16.mxu1 %v516_v29  ;;  %v86_v40 = vld [vmem:[%s867_s1 + $0x210] sm:$0xff]  ;;  %v88_v43 = vld [vmem:[%s867_s1 + $0x220] sm:$0xff]  ;;  %v89_v44 = vld [vmem:[%s867_s1 + $0x228] sm:$0xff] }
  0x21   :  { %487 = vmatpush3.bf16.msra.mxu0 %v486_v32  ;;  %v524_v42 = vpack.c.bf16 %v87_v41, %v86_v40  ;;  %v527_v46 = vpack.c.bf16 %v89_v44, %v88_v43  ;;  %v90_v47 = vld [vmem:[%s867_s1 + $0x230] sm:$0xff]  ;;  %v91_v48 = vld [vmem:[%s867_s1 + $0x238] sm:$0xff]  ;;  %v92_v50 = vld [vmem:[%s867_s1 + $0x240] sm:$0xff] }
  0x22   :  { %520 = vmatprep.subr.bf16.mxu0 %v572_v38  ;;  %v530_v49 = vpack.c.bf16 %v91_v48, %v90_v47  ;;  %v93_v51 = vld [vmem:[%s867_s1 + $0x248] sm:$0xff]  ;;  %v94_v53 = vld [vmem:[%s867_s1 + $0x250] sm:$0xff]  ;;  %v95_v54 = vld [vmem:[%s867_s1 + $0x258] sm:$0xff] }
  0x23   :  { %519 = vmatpush3.bf16.msra.mxu1 %v518_v33  ;;  %v533_v52 = vpack.c.bf16 %v93_v51, %v92_v50  ;;  %v536_v55 = vpack.c.bf16 %v95_v54, %v94_v53  ;;  %v96_v56 = vld [vmem:[%s867_s1 + $0x260] sm:$0xff]  ;;  %v97_v57 = vld [vmem:[%s867_s1 + $0x268] sm:$0xff]  ;;  %v98_v59 = vld [vmem:[%s867_s1 + $0x270] sm:$0xff] }
  0x24   :  { %172 = vmatmul.mubr.f32.vlgmr.msra.gmra.mrb[0].mxu0 %v15_v36  ;;  %v539_v58 = vpack.c.bf16 %v97_v57, %v96_v56  ;;  %v99_v60 = vld [vmem:[%s867_s1 + $0x278] sm:$0xff]  ;;  %v19_v62 = vld [vmem:[%s866_s0 + $0x20] sm:$0xff]  ;;  %s575_s1 = smov [#allocation2]  }
  0x25   :  { %522 = vmatpush3.bf16.msra.mxu0 %v521_v37  ;;  %453 = vmatprep.mubr.msk.f32.mxu0 %vm573_vm0, %v574_v45  ;;  %v542_v61 = vpack.c.bf16 %v99_v60, %v98_v59  ;;  %v333_v0 = vld [vmem:[%s868_s2] ss:$0 sm:$0xff]  ;;  %s325_s22 = sshll.u32 %s575_s1, 4  ;;  %s326_s22 = int_to_ptr.vmem [resolvable:$true] %s325_s22 }
  0x26   :  { %242 = vmatmul.mubr.f32.vlgmr.msra.gmra.mrb[0].mxu1 %v17_v39  ;;  %523 = vmatprep.subr.bf16.mxu0 %v572_v38  ;;  %s548_s0 = scalar_lea.vmem %s326_s22, 128  ;;  %p553_p1 = scmp.lt.s32.totalorder %s326_s22, %s326_s22 }
  0x27   :  { %p549_p0 = scmp.ne.s32.totalorder %s326_s22, %s548_s0  ;;  %p554_p2 = scmp.lt.s32.totalorder %s548_s0, %s548_s0 }
  0x29   :  { %525 = vmatpush3.bf16.msra.mxu0 %v524_v42  ;;  %p555_p3 = por %p554_p2, %p553_p1 }
  0x2a   :  { %526 = vmatprep.subr.bf16.mxu0 %v572_v38 }
  0x2b   :  { %p556_p4 = pnand %p555_p3, %p549_p0 }
  0x2d   :  { %528 = vmatpush3.bf16.msra.mxu0 %v527_v46 }
  0x2e   :  { %529 = vmatprep.subr.bf16.mxu0 %v572_v38 }
  0x31   :  { %531 = vmatpush3.bf16.msra.mxu0 %v530_v49 }
  0x32   :  { %532 = vmatprep.subr.bf16.mxu0 %v572_v38 }
  0x35   :  { %534 = vmatpush3.bf16.msra.mxu0 %v533_v52 }
  0x36   :  { %535 = vmatprep.subr.bf16.mxu0 %v572_v38 }
  0x39   :  { %537 = vmatpush3.bf16.msra.mxu0 %v536_v55 }
  0x3a   :  { %538 = vmatprep.subr.bf16.mxu0 %v572_v38 }
  0x3d   :  { %540 = vmatpush3.bf16.msra.mxu0 %v539_v58 }
  0x3e   :  { %541 = vmatprep.subr.bf16.mxu0 %v572_v38 }
  0x41   :  { %543 = vmatpush3.bf16.msra.mxu0 %v542_v61 }
  0x44   :  { %454 = vmatmul.mubr.f32.vlgmr.msra.gmra.mrb[2].mxu0 %v19_v62 }
  0xf7   :  { %v366_v63 = vpop.f32.mrb[0].mxu0 }
  0xf8   :  { %v367_v1 = vpop.f32.mrb[1].mxu0 }
  0xf9   :  { %v401_v2 = vpop.f32.mrb[0].mxu1  ;;  %v368_v3 = vadd.f32 %v367_v1, %v366_v63 }
  0xfa   :  { %v402_v4 = vpop.f32.mrb[1].mxu1 }
  0xfb   :  { %v403_v5 = vadd.f32 %v402_v4, %v401_v2  ;;  %v174_v6 = vadd.f32 %v368_v3, %v333_v0 }
  0xfd   :  { %v244_v7 = vadd.f32 %v403_v5, %v174_v6 }
 0x117   :  { %v313_v8 = vpop.f32.mrb[2].mxu0 }
 0x118   :  { %v314_v9 = vadd.f32 %v313_v8, %v244_v7  ;;  %v455_v10 = vpop.f32.mrb[3].mxu0 }
 0x11a   :  { %318 = vst.msk [vmem:[#allocation2] sm:$0xff] %vm317_vm1, %v314_v9 }
 0x11b   :  { %559 = shalt.err (!%p556_p4)
}
 0x11c   :  { %s560_s24 = scalar_lea.hbm %s869_s3, 128 }
 0x11d   :  { %p561_p5 = scmp.ne.s32.totalorder %s869_s3, %s560_s24  ;;  %p564_p6 = scmp.lt.u32.totalorder %s560_s24, %s869_s3 }
 0x11f   :  { %p566_p7 = pnand %p564_p6, %p561_p5 }
 0x121   :  { %569 = shalt.err (!%p566_p7)
}
 0x122   :  { %328 = dma.vmem_to_hbm [thread:$0]  %s326_s22, 128, %s869_s3, [#allocation3]  }
 0x123   :  { %570 = dma.done.wait [#allocation3], 128  }
 0x124   :  { %571 = vsyncadd [#allocation3], 4294967168 }
 0x125   :  { %332 = vsyncpa [#allocation3], 1 }

</bundles_post_ra>
